<compile_context>
chip_gen: v6e
topology: v6e:2x2x1
jax: 0.10.0
libtpu: 0.0.40
codegen_flags: <defaults>
</compile_context>

<pallas_src>
import functools
import math

import jax
import jax.numpy as jnp
import numpy as np
from jax import lax
from jax.experimental import pallas as pl
from jax.experimental.pallas import tpu as pltpu


# ------------------------------ fused kernel -------------------------------- #
def _series_attn1_kernel(x_ref, w_in_ref, b_in_ref, w_out_ref, b_out_ref,
                         o_ref, qkv_sc, s_sc, oh_sc, *,
                         num_heads, head_dim, topk):
    hp = lax.Precision.HIGHEST
    f32 = jnp.float32
    qkv_dim = num_heads * head_dim
    n = x_ref.shape[0]

    x = x_ref[...].astype(f32)            # (N, E)
    w_in = w_in_ref[...].astype(f32)      # (3Q, E)  PyTorch layout, no transpose
    b_in = b_in_ref[...].astype(f32)      # (1, 3Q)
    w_out = w_out_ref[...].astype(f32)    # (E, Q)   PyTorch layout, no transpose
    b_out = b_out_ref[...].astype(f32)    # (1, E)

    # 1) in-projection: x @ w_in.T + b_in -> VMEM scratch; per-head Q/K/V are
    #    then static Ref-window loads (no value-level lane shuffles).
    qkv_sc[...] = lax.dot_general(x, w_in, (((1,), (1,)), ((), ())),
                                  preferred_element_type=f32, precision=hp) + b_in

    scale = f32(1.0 / math.sqrt(head_dim))
    neg_inf = f32(-jnp.inf)

    # 2) per-head scores q_h @ k_h^T, stacked along sublanes into s_sc (H*N, N).
    for h in range(num_heads):
        lo = h * head_dim
        hi = lo + head_dim
        q_h = qkv_sc[:, lo:hi] * scale                       # (N, D)
        k_h = qkv_sc[:, qkv_dim + lo:qkv_dim + hi]           # (N, D)
        s_sc[h * n:(h + 1) * n, :] = lax.dot_general(
            q_h, k_h, (((1,), (1,)), ((), ())),
            preferred_element_type=f32, precision=hp)        # (N, N)

    # 3) top-k threshold via iterative max extraction, ONE unrolled loop over
    #    the head-stacked scores (topk rounds instead of topk*num_heads), and
    #    no mask update after the last extraction.  The iteration-0 max doubles
    #    as the softmax row max (filtering never removes the row maximum).
    # TODO(synk): exact torch.topk tie handling (keep exactly k entries) is not
    # reproduced; all values tied with the threshold are kept (measure-zero for
    # continuous float inputs).
    work = s_sc[...]                                         # (H*N, N)
    row_max = jnp.max(work, axis=-1, keepdims=True)          # (H*N, 1)
    thresh = row_max
    for _ in range(topk - 1):
        work = jnp.where(work >= thresh, neg_inf, work)
        thresh = jnp.max(work, axis=-1, keepdims=True)

    # 4) filtered softmax numerator + row sums for ALL heads at once.
    s = s_sc[...]
    p = jnp.where(s >= thresh, jnp.exp(s - row_max), f32(0.0))   # (H*N, N)
    inv = pl.reciprocal(jnp.sum(p, axis=-1, keepdims=True))      # (H*N, 1), exact

    # 5) per-head attn @ V with 1/denom folded into the small (N, D) head
    #    output, written into its static lane slot of the (N, Q) scratch.
    for h in range(num_heads):
        lo = h * head_dim
        hi = lo + head_dim
        p_h = p[h * n:(h + 1) * n, :]                        # (N, N) sublane slice
        v_h = qkv_sc[:, 2 * qkv_dim + lo:2 * qkv_dim + hi]   # (N, D)
        oh_sc[:, lo:hi] = jnp.dot(p_h, v_h, preferred_element_type=f32,
                                  precision=hp) * inv[h * n:(h + 1) * n, :]

    # 6) single out-projection dot: (N, Q) @ w_out.T + bias.
    out = lax.dot_general(oh_sc[...], w_out, (((1,), (1,)), ((), ())),
                          preferred_element_type=f32, precision=hp) + b_out
    o_ref[...] = out.astype(o_ref.dtype)


# ------------------------------ full forward -------------------------------- #
def series_attn1_forward(x, params, *, num_heads, topk):
    squeeze = x.ndim == 2
    if squeeze:
        x = x[None]                      # (1, N, E): the module's bsz == 1 case
    bsz, n, embed_dim = x.shape
    w_in = params["in_proj_weight"]      # (3Q, E)
    b_in = params["in_proj_bias"]        # (3Q,)
    w_out = params["out_proj_weight"]    # (E, Q)
    b_out = params["out_proj_bias"]      # (E,)
    qkv_dim = w_in.shape[0] // 3
    head_dim = qkv_dim // num_heads
    assert topk <= n, "topk must not exceed the sequence length"

    kern = functools.partial(_series_attn1_kernel, num_heads=num_heads,
                             head_dim=head_dim, topk=topk)
    b_in2 = b_in.reshape(1, -1)
    b_out2 = b_out.reshape(1, -1)

    out = pl.pallas_call(
        kern,
        out_shape=jax.ShapeDtypeStruct((bsz, n, embed_dim), x.dtype),
        grid=(bsz,),
        in_specs=[
            pl.BlockSpec((None, n, embed_dim), lambda b: (b, 0, 0)),
            pl.BlockSpec(w_in.shape, lambda b: (0, 0)),
            pl.BlockSpec(b_in2.shape, lambda b: (0, 0)),
            pl.BlockSpec(w_out.shape, lambda b: (0, 0)),
            pl.BlockSpec(b_out2.shape, lambda b: (0, 0)),
        ],
        out_specs=pl.BlockSpec((None, n, embed_dim), lambda b: (b, 0, 0)),
        scratch_shapes=[
            pltpu.VMEM((n, 3 * qkv_dim), jnp.float32),        # qkv
            pltpu.VMEM((num_heads * n, n), jnp.float32),      # stacked scores
            pltpu.VMEM((n, qkv_dim), jnp.float32),            # per-head outputs
        ],
        compiler_params=pltpu.CompilerParams(
            dimension_semantics=("parallel",)),
    )(x, w_in, b_in2, w_out, b_out2)
    return out[0] if squeeze else out


# --------------------------- parameter initialization ----------------------- #
def init_params(key, embed_dim, qkv_dim):
    k1, k2 = jax.random.split(key)
    # xavier_uniform_ for in_proj_weight (fan_in = embed_dim, fan_out = 3*qkv_dim)
    bound_in = math.sqrt(6.0 / (embed_dim + 3 * qkv_dim))
    in_proj_weight = jax.random.uniform(
        k1, (3 * qkv_dim, embed_dim), jnp.float32, -bound_in, bound_in
    )
    in_proj_bias = jnp.zeros((3 * qkv_dim,), jnp.float32)
    # nn.Linear default init for out_proj.weight -> U(-1/sqrt(fan_in), 1/sqrt(fan_in))
    bound_out = 1.0 / math.sqrt(qkv_dim)
    out_proj_weight = jax.random.uniform(
        k2, (embed_dim, qkv_dim), jnp.float32, -bound_out, bound_out
    )
    out_proj_bias = jnp.zeros((embed_dim,), jnp.float32)
    return {
        "in_proj_weight": in_proj_weight,
        "in_proj_bias": in_proj_bias,
        "out_proj_weight": out_proj_weight,
        "out_proj_bias": out_proj_bias,
    }


# ------------------------------ pure-JAX reference --------------------------- #
def reference_forward(x, params, num_heads, topk):
    n, _ = x.shape
    hp = lax.Precision.HIGHEST
    qkv = (
        jnp.dot(x, params["in_proj_weight"].T, precision=hp) + params["in_proj_bias"]
    )
    q, k, v = jnp.split(qkv, 3, axis=-1)
    qkv_dim = q.shape[-1]
    d = qkv_dim // num_heads
    q = q.reshape(n, num_heads, d).transpose(1, 0, 2) / math.sqrt(d)
    k = k.reshape(n, num_heads, d).transpose(1, 0, 2)
    v = v.reshape(n, num_heads, d).transpose(1, 0, 2)
    s = jnp.einsum("hnd,hmd->hnm", q, k, precision=hp)
    vals = lax.top_k(s, topk)[0]
    thresh = vals[..., -1:]
    s = jnp.where(s >= thresh, s, -jnp.inf)
    attn = jax.nn.softmax(s, axis=-1)
    o = jnp.einsum("hnm,hmd->hnd", attn, v, precision=hp)
    o = o.transpose(1, 0, 2).reshape(n, qkv_dim)
    return jnp.dot(o, params["out_proj_weight"].T, precision=hp) + params["out_proj_bias"]


# ----------------------------------- main ------------------------------------ #
if __name__ == "__main__":
    # Small shapes consistent with the module: B=2 independent sequences,
    # seq N=64, embed_dim=32, qkv_dim=24 (num_heads=3, head_dim=8), topk=8.
    B, N, EMBED_DIM, QKV_DIM, NUM_HEADS, TOPK = 2, 64, 32, 24, 3, 8

    key = jax.random.PRNGKey(0)
    kx, kp = jax.random.split(key)
    x = jax.random.normal(kx, (B, N, EMBED_DIM), dtype=jnp.float32)
    params = init_params(kp, EMBED_DIM, QKV_DIM)

    fwd = jax.jit(
        functools.partial(series_attn1_forward, num_heads=NUM_HEADS, topk=TOPK)
    )
    out = jax.block_until_ready(fwd(x, params))
    assert out.shape == (B, N, EMBED_DIM)

    ref = jax.block_until_ready(
        jax.vmap(lambda xb: reference_forward(xb, params, NUM_HEADS, TOPK))(x)
    )
    np.testing.assert_allclose(np.asarray(out), np.asarray(ref), rtol=1e-4, atol=1e-4)

    # Also validate the single-sequence (module-equivalent, bsz == 1) 2-D path.
    out1 = jax.block_until_ready(fwd(x[0], params))
    np.testing.assert_allclose(np.asarray(out1), np.asarray(ref[0]),
                               rtol=1e-4, atol=1e-4)

    print("KERNEL_OK")
</pallas_src>

<mosaic_0001>
module attributes {stable_mosaic.version = 11 : i64} {
  func.func @_series_attn1_kernel(%arg0: i32, %arg1: memref<1x64x32xf32, #tpu.memory_space<vmem>>, %arg2: memref<72x32xf32, #tpu.memory_space<vmem>>, %arg3: memref<1x72xf32, #tpu.memory_space<vmem>>, %arg4: memref<32x24xf32, #tpu.memory_space<vmem>>, %arg5: memref<1x32xf32, #tpu.memory_space<vmem>>, %arg6: memref<1x64x32xf32, #tpu.memory_space<vmem>>, %arg7: memref<64x72xf32, #tpu.memory_space<vmem>>, %arg8: memref<192x64xf32, #tpu.memory_space<vmem>>, %arg9: memref<64x24xf32, #tpu.memory_space<vmem>>) attributes {dimension_semantics = [#tpu.dimension_semantics<parallel>], iteration_bounds = array<i64: 2>, scalar_prefetch = 0 : i64, scratch_operands = 3 : i64, tpu.core_type = #tpu.core_type<tc>, window_params = [{transform_indices = @transform_0, window_bounds = array<i64: 1, 64, 32>}, {pipeline_mode = #tpu.pipeline_mode<synchronous>, transform_indices = @transform_1, window_bounds = array<i64: 72, 32>}, {pipeline_mode = #tpu.pipeline_mode<synchronous>, transform_indices = @transform_2, window_bounds = array<i64: 1, 72>}, {pipeline_mode = #tpu.pipeline_mode<synchronous>, transform_indices = @transform_3, window_bounds = array<i64: 32, 24>}, {pipeline_mode = #tpu.pipeline_mode<synchronous>, transform_indices = @transform_4, window_bounds = array<i64: 1, 32>}, {transform_indices = @transform_5, window_bounds = array<i64: 1, 64, 32>}]} {
    %c0 = arith.constant 0 : index
    %c0_0 = arith.constant 0 : index
    %c0_1 = arith.constant 0 : index
    %0 = vector.load %arg1[%c0, %c0_0, %c0_1] : memref<1x64x32xf32, #tpu.memory_space<vmem>>, vector<1x64x32xf32>
    %1 = vector.shape_cast %0 : vector<1x64x32xf32> to vector<64x32xf32>
    %c0_2 = arith.constant 0 : index
    %c0_3 = arith.constant 0 : index
    %2 = vector.load %arg2[%c0_2, %c0_3] : memref<72x32xf32, #tpu.memory_space<vmem>>, vector<72x32xf32>
    %c0_4 = arith.constant 0 : index
    %c0_5 = arith.constant 0 : index
    %3 = vector.load %arg3[%c0_4, %c0_5] : memref<1x72xf32, #tpu.memory_space<vmem>>, vector<1x72xf32>
    %c0_6 = arith.constant 0 : index
    %c0_7 = arith.constant 0 : index
    %4 = vector.load %arg4[%c0_6, %c0_7] : memref<32x24xf32, #tpu.memory_space<vmem>>, vector<32x24xf32>
    %c0_8 = arith.constant 0 : index
    %c0_9 = arith.constant 0 : index
    %5 = vector.load %arg5[%c0_8, %c0_9] : memref<1x32xf32, #tpu.memory_space<vmem>>, vector<1x32xf32>
    %cst = arith.constant dense<0.000000e+00> : vector<64x72xf32>
    %6 = tpu.matmul %1, %2, %cst {dimension_numbers = #tpu.dot_dimension_numbers<[1], [1], [0], [0], [0, 0, 1, 0], [], []>, precision = #tpu.contract_precision<fp32>} : vector<64x32xf32>, vector<72x32xf32>, vector<64x72xf32> -> vector<64x72xf32>
    %7 = vector.broadcast %3 : vector<1x72xf32> to vector<64x72xf32>
    %8 = arith.addf %6, %7 : vector<64x72xf32>
    %c0_10 = arith.constant 0 : index
    %c0_11 = arith.constant 0 : index
    %9 = vector.load %arg7[%c0_10, %c0_11] : memref<64x72xf32, #tpu.memory_space<vmem>>, vector<64x72xf32>
    tpu.vector_store %arg7[%c0_10, %c0_11], %8 {strides = array<i32>} : memref<64x72xf32, #tpu.memory_space<vmem>>, vector<64x72xf32>,
    %c0_12 = arith.constant 0 : index
    %c0_13 = arith.constant 0 : index
    %10 = vector.load %arg7[%c0_12, %c0_13] : memref<64x72xf32, #tpu.memory_space<vmem>>, vector<64x8xf32>
    %cst_14 = arith.constant 0.353553385 : f32
    %11 = vector.broadcast %cst_14 : f32 to vector<64x8xf32>
    %12 = arith.mulf %10, %11 : vector<64x8xf32>
    %c0_15 = arith.constant 0 : index
    %c24 = arith.constant 24 : index
    %13 = vector.load %arg7[%c0_15, %c24] : memref<64x72xf32, #tpu.memory_space<vmem>>, vector<64x8xf32>
    %cst_16 = arith.constant dense<0.000000e+00> : vector<64x64xf32>
    %14 = tpu.matmul %12, %13, %cst_16 {dimension_numbers = #tpu.dot_dimension_numbers<[1], [1], [0], [0], [0, 0, 1, 0], [], []>, precision = #tpu.contract_precision<fp32>} : vector<64x8xf32>, vector<64x8xf32>, vector<64x64xf32> -> vector<64x64xf32>
    %c0_17 = arith.constant 0 : index
    %c0_18 = arith.constant 0 : index
    %15 = vector.load %arg8[%c0_17, %c0_18] : memref<192x64xf32, #tpu.memory_space<vmem>>, vector<64x64xf32>
    tpu.vector_store %arg8[%c0_17, %c0_18], %14 {strides = array<i32>} : memref<192x64xf32, #tpu.memory_space<vmem>>, vector<64x64xf32>,
    %c0_19 = arith.constant 0 : index
    %c8 = arith.constant 8 : index
    %16 = vector.load %arg7[%c0_19, %c8] : memref<64x72xf32, #tpu.memory_space<vmem>>, vector<64x8xf32>
    %cst_20 = arith.constant 0.353553385 : f32
    %17 = vector.broadcast %cst_20 : f32 to vector<64x8xf32>
    %18 = arith.mulf %16, %17 : vector<64x8xf32>
    %c0_21 = arith.constant 0 : index
    %c32 = arith.constant 32 : index
    %19 = vector.load %arg7[%c0_21, %c32] : memref<64x72xf32, #tpu.memory_space<vmem>>, vector<64x8xf32>
    %cst_22 = arith.constant dense<0.000000e+00> : vector<64x64xf32>
    %20 = tpu.matmul %18, %19, %cst_22 {dimension_numbers = #tpu.dot_dimension_numbers<[1], [1], [0], [0], [0, 0, 1, 0], [], []>, precision = #tpu.contract_precision<fp32>} : vector<64x8xf32>, vector<64x8xf32>, vector<64x64xf32> -> vector<64x64xf32>
    %c64 = arith.constant 64 : index
    %c0_23 = arith.constant 0 : index
    %21 = vector.load %arg8[%c64, %c0_23] : memref<192x64xf32, #tpu.memory_space<vmem>>, vector<64x64xf32>
    tpu.vector_store %arg8[%c64, %c0_23], %20 {strides = array<i32>} : memref<192x64xf32, #tpu.memory_space<vmem>>, vector<64x64xf32>,
    %c0_24 = arith.constant 0 : index
    %c16 = arith.constant 16 : index
    %22 = vector.load %arg7[%c0_24, %c16] : memref<64x72xf32, #tpu.memory_space<vmem>>, vector<64x8xf32>
    %cst_25 = arith.constant 0.353553385 : f32
    %23 = vector.broadcast %cst_25 : f32 to vector<64x8xf32>
    %24 = arith.mulf %22, %23 : vector<64x8xf32>
    %c0_26 = arith.constant 0 : index
    %c40 = arith.constant 40 : index
    %25 = vector.load %arg7[%c0_26, %c40] : memref<64x72xf32, #tpu.memory_space<vmem>>, vector<64x8xf32>
    %cst_27 = arith.constant dense<0.000000e+00> : vector<64x64xf32>
    %26 = tpu.matmul %24, %25, %cst_27 {dimension_numbers = #tpu.dot_dimension_numbers<[1], [1], [0], [0], [0, 0, 1, 0], [], []>, precision = #tpu.contract_precision<fp32>} : vector<64x8xf32>, vector<64x8xf32>, vector<64x64xf32> -> vector<64x64xf32>
    %c128 = arith.constant 128 : index
    %c0_28 = arith.constant 0 : index
    %27 = vector.load %arg8[%c128, %c0_28] : memref<192x64xf32, #tpu.memory_space<vmem>>, vector<64x64xf32>
    tpu.vector_store %arg8[%c128, %c0_28], %26 {strides = array<i32>} : memref<192x64xf32, #tpu.memory_space<vmem>>, vector<64x64xf32>,
    %c0_29 = arith.constant 0 : index
    %c0_30 = arith.constant 0 : index
    %28 = vector.load %arg8[%c0_29, %c0_30] : memref<192x64xf32, #tpu.memory_space<vmem>>, vector<192x64xf32>
    %cst_31 = arith.constant dense<0xFF800000> : vector<192xf32>
    %29 = vector.multi_reduction <maximumf>, %28, %cst_31 [1] : vector<192x64xf32> to vector<192xf32>
    %30 = vector.shape_cast %29 : vector<192xf32> to vector<192x1xf32>
    %31 = vector.broadcast %30 : vector<192x1xf32> to vector<192x64xf32>
    %32 = arith.cmpf oge, %28, %31 : vector<192x64xf32>
    %cst_32 = arith.constant 0xFF800000 : f32
    %33 = vector.broadcast %cst_32 : f32 to vector<192x64xf32>
    %34 = arith.select %32, %33, %28 : vector<192x64xi1>, vector<192x64xf32>
    %cst_33 = arith.constant dense<0xFF800000> : vector<192xf32>
    %35 = vector.multi_reduction <maximumf>, %34, %cst_33 [1] : vector<192x64xf32> to vector<192xf32>
    %36 = vector.shape_cast %35 : vector<192xf32> to vector<192x1xf32>
    %37 = vector.broadcast %36 : vector<192x1xf32> to vector<192x64xf32>
    %38 = arith.cmpf oge, %34, %37 : vector<192x64xf32>
    %cst_34 = arith.constant 0xFF800000 : f32
    %39 = vector.broadcast %cst_34 : f32 to vector<192x64xf32>
    %40 = arith.select %38, %39, %34 : vector<192x64xi1>, vector<192x64xf32>
    %cst_35 = arith.constant dense<0xFF800000> : vector<192xf32>
    %41 = vector.multi_reduction <maximumf>, %40, %cst_35 [1] : vector<192x64xf32> to vector<192xf32>
    %42 = vector.shape_cast %41 : vector<192xf32> to vector<192x1xf32>
    %43 = vector.broadcast %42 : vector<192x1xf32> to vector<192x64xf32>
    %44 = arith.cmpf oge, %40, %43 : vector<192x64xf32>
    %cst_36 = arith.constant 0xFF800000 : f32
    %45 = vector.broadcast %cst_36 : f32 to vector<192x64xf32>
    %46 = arith.select %44, %45, %40 : vector<192x64xi1>, vector<192x64xf32>
    %cst_37 = arith.constant dense<0xFF800000> : vector<192xf32>
    %47 = vector.multi_reduction <maximumf>, %46, %cst_37 [1] : vector<192x64xf32> to vector<192xf32>
    %48 = vector.shape_cast %47 : vector<192xf32> to vector<192x1xf32>
    %49 = vector.broadcast %48 : vector<192x1xf32> to vector<192x64xf32>
    %50 = arith.cmpf oge, %46, %49 : vector<192x64xf32>
    %cst_38 = arith.constant 0xFF800000 : f32
    %51 = vector.broadcast %cst_38 : f32 to vector<192x64xf32>
    %52 = arith.select %50, %51, %46 : vector<192x64xi1>, vector<192x64xf32>
    %cst_39 = arith.constant dense<0xFF800000> : vector<192xf32>
    %53 = vector.multi_reduction <maximumf>, %52, %cst_39 [1] : vector<192x64xf32> to vector<192xf32>
    %54 = vector.shape_cast %53 : vector<192xf32> to vector<192x1xf32>
    %55 = vector.broadcast %54 : vector<192x1xf32> to vector<192x64xf32>
    %56 = arith.cmpf oge, %52, %55 : vector<192x64xf32>
    %cst_40 = arith.constant 0xFF800000 : f32
    %57 = vector.broadcast %cst_40 : f32 to vector<192x64xf32>
    %58 = arith.select %56, %57, %52 : vector<192x64xi1>, vector<192x64xf32>
    %cst_41 = arith.constant dense<0xFF800000> : vector<192xf32>
    %59 = vector.multi_reduction <maximumf>, %58, %cst_41 [1] : vector<192x64xf32> to vector<192xf32>
    %60 = vector.shape_cast %59 : vector<192xf32> to vector<192x1xf32>
    %61 = vector.broadcast %60 : vector<192x1xf32> to vector<192x64xf32>
    %62 = arith.cmpf oge, %58, %61 : vector<192x64xf32>
    %cst_42 = arith.constant 0xFF800000 : f32
    %63 = vector.broadcast %cst_42 : f32 to vector<192x64xf32>
    %64 = arith.select %62, %63, %58 : vector<192x64xi1>, vector<192x64xf32>
    %cst_43 = arith.constant dense<0xFF800000> : vector<192xf32>
    %65 = vector.multi_reduction <maximumf>, %64, %cst_43 [1] : vector<192x64xf32> to vector<192xf32>
    %66 = vector.shape_cast %65 : vector<192xf32> to vector<192x1xf32>
    %67 = vector.broadcast %66 : vector<192x1xf32> to vector<192x64xf32>
    %68 = arith.cmpf oge, %64, %67 : vector<192x64xf32>
    %cst_44 = arith.constant 0xFF800000 : f32
    %69 = vector.broadcast %cst_44 : f32 to vector<192x64xf32>
    %70 = arith.select %68, %69, %64 : vector<192x64xi1>, vector<192x64xf32>
    %cst_45 = arith.constant dense<0xFF800000> : vector<192xf32>
    %71 = vector.multi_reduction <maximumf>, %70, %cst_45 [1] : vector<192x64xf32> to vector<192xf32>
    %72 = vector.shape_cast %71 : vector<192xf32> to vector<192x1xf32>
    %c0_46 = arith.constant 0 : index
    %c0_47 = arith.constant 0 : index
    %73 = vector.load %arg8[%c0_46, %c0_47] : memref<192x64xf32, #tpu.memory_space<vmem>>, vector<192x64xf32>
    %74 = vector.broadcast %72 : vector<192x1xf32> to vector<192x64xf32>
    %75 = arith.cmpf oge, %73, %74 : vector<192x64xf32>
    %76 = vector.broadcast %30 : vector<192x1xf32> to vector<192x64xf32>
    %77 = arith.subf %73, %76 : vector<192x64xf32>
    %78 = math.exp %77 : vector<192x64xf32>
    %cst_48 = arith.constant 0.000000e+00 : f32
    %79 = vector.broadcast %cst_48 : f32 to vector<192x64xf32>
    %80 = arith.select %75, %78, %79 : vector<192x64xi1>, vector<192x64xf32>
    %cst_49 = arith.constant dense<0.000000e+00> : vector<192xf32>
    %81 = vector.multi_reduction <add>, %80, %cst_49 [1] : vector<192x64xf32> to vector<192xf32>
    %82 = vector.shape_cast %81 : vector<192xf32> to vector<192x1xf32>
    %83 = tpu.reciprocal %82 : vector<192x1xf32> -> vector<192x1xf32>
    %84 = vector.extract_strided_slice %80 {offsets = [0, 0], sizes = [64, 64], strides = [1, 1]} : vector<192x64xf32> to vector<64x64xf32>
    %c0_50 = arith.constant 0 : index
    %c48 = arith.constant 48 : index
    %85 = vector.load %arg7[%c0_50, %c48] : memref<64x72xf32, #tpu.memory_space<vmem>>, vector<64x8xf32>
    %cst_51 = arith.constant dense<0.000000e+00> : vector<64x8xf32>
    %86 = tpu.matmul %84, %85, %cst_51 {dimension_numbers = #tpu.dot_dimension_numbers<[1], [0], [0], [1], [0, 0, 1, 1], [], []>, precision = #tpu.contract_precision<fp32>} : vector<64x64xf32>, vector<64x8xf32>, vector<64x8xf32> -> vector<64x8xf32>
    %87 = vector.extract_strided_slice %83 {offsets = [0, 0], sizes = [64, 1], strides = [1, 1]} : vector<192x1xf32> to vector<64x1xf32>
    %88 = vector.broadcast %87 : vector<64x1xf32> to vector<64x8xf32>
    %89 = arith.mulf %86, %88 : vector<64x8xf32>
    %c0_52 = arith.constant 0 : index
    %c0_53 = arith.constant 0 : index
    %90 = vector.load %arg9[%c0_52, %c0_53] : memref<64x24xf32, #tpu.memory_space<vmem>>, vector<64x8xf32>
    tpu.vector_store %arg9[%c0_52, %c0_53], %89 {strides = array<i32>} : memref<64x24xf32, #tpu.memory_space<vmem>>, vector<64x8xf32>,
    %91 = vector.extract_strided_slice %80 {offsets = [64, 0], sizes = [64, 64], strides = [1, 1]} : vector<192x64xf32> to vector<64x64xf32>
    %c0_54 = arith.constant 0 : index
    %c56 = arith.constant 56 : index
    %92 = vector.load %arg7[%c0_54, %c56] : memref<64x72xf32, #tpu.memory_space<vmem>>, vector<64x8xf32>
    %cst_55 = arith.constant dense<0.000000e+00> : vector<64x8xf32>
    %93 = tpu.matmul %91, %92, %cst_55 {dimension_numbers = #tpu.dot_dimension_numbers<[1], [0], [0], [1], [0, 0, 1, 1], [], []>, precision = #tpu.contract_precision<fp32>} : vector<64x64xf32>, vector<64x8xf32>, vector<64x8xf32> -> vector<64x8xf32>
    %94 = vector.extract_strided_slice %83 {offsets = [64, 0], sizes = [64, 1], strides = [1, 1]} : vector<192x1xf32> to vector<64x1xf32>
    %95 = vector.broadcast %94 : vector<64x1xf32> to vector<64x8xf32>
    %96 = arith.mulf %93, %95 : vector<64x8xf32>
    %c0_56 = arith.constant 0 : index
    %c8_57 = arith.constant 8 : index
    %97 = vector.load %arg9[%c0_56, %c8_57] : memref<64x24xf32, #tpu.memory_space<vmem>>, vector<64x8xf32>
    tpu.vector_store %arg9[%c0_56, %c8_57], %96 {strides = array<i32>} : memref<64x24xf32, #tpu.memory_space<vmem>>, vector<64x8xf32>,
    %98 = vector.extract_strided_slice %80 {offsets = [128, 0], sizes = [64, 64], strides = [1, 1]} : vector<192x64xf32> to vector<64x64xf32>
    %c0_58 = arith.constant 0 : index
    %c64_59 = arith.constant 64 : index
    %99 = vector.load %arg7[%c0_58, %c64_59] : memref<64x72xf32, #tpu.memory_space<vmem>>, vector<64x8xf32>
    %cst_60 = arith.constant dense<0.000000e+00> : vector<64x8xf32>
    %100 = tpu.matmul %98, %99, %cst_60 {dimension_numbers = #tpu.dot_dimension_numbers<[1], [0], [0], [1], [0, 0, 1, 1], [], []>, precision = #tpu.contract_precision<fp32>} : vector<64x64xf32>, vector<64x8xf32>, vector<64x8xf32> -> vector<64x8xf32>
    %101 = vector.extract_strided_slice %83 {offsets = [128, 0], sizes = [64, 1], strides = [1, 1]} : vector<192x1xf32> to vector<64x1xf32>
    %102 = vector.broadcast %101 : vector<64x1xf32> to vector<64x8xf32>
    %103 = arith.mulf %100, %102 : vector<64x8xf32>
    %c0_61 = arith.constant 0 : index
    %c16_62 = arith.constant 16 : index
    %104 = vector.load %arg9[%c0_61, %c16_62] : memref<64x24xf32, #tpu.memory_space<vmem>>, vector<64x8xf32>
    tpu.vector_store %arg9[%c0_61, %c16_62], %103 {strides = array<i32>} : memref<64x24xf32, #tpu.memory_space<vmem>>, vector<64x8xf32>,
    %c0_63 = arith.constant 0 : index
    %c0_64 = arith.constant 0 : index
    %105 = vector.load %arg9[%c0_63, %c0_64] : memref<64x24xf32, #tpu.memory_space<vmem>>, vector<64x24xf32>
    %cst_65 = arith.constant dense<0.000000e+00> : vector<64x32xf32>
    %106 = tpu.matmul %105, %4, %cst_65 {dimension_numbers = #tpu.dot_dimension_numbers<[1], [1], [0], [0], [0, 0, 1, 0], [], []>, precision = #tpu.contract_precision<fp32>} : vector<64x24xf32>, vector<32x24xf32>, vector<64x32xf32> -> vector<64x32xf32>
    %107 = vector.broadcast %5 : vector<1x32xf32> to vector<64x32xf32>
    %108 = arith.addf %106, %107 : vector<64x32xf32>
    %c0_66 = arith.constant 0 : index
    %c0_67 = arith.constant 0 : index
    %c0_68 = arith.constant 0 : index
    %109 = vector.load %arg6[%c0_66, %c0_67, %c0_68] : memref<1x64x32xf32, #tpu.memory_space<vmem>>, vector<1x64x32xf32>
    %110 = vector.shape_cast %109 : vector<1x64x32xf32> to vector<64x32xf32>
    %111 = vector.shape_cast %108 : vector<64x32xf32> to vector<1x64x32xf32>
    tpu.vector_store %arg6[%c0_66, %c0_67, %c0_68], %111 {strides = array<i32>} : memref<1x64x32xf32, #tpu.memory_space<vmem>>, vector<1x64x32xf32>,
    return
  }
  func.func @transform_0(%arg0: i32) -> (i32, i32, i32) {
    %c0_i32 = arith.constant 0 : i32
    %c0_i32_0 = arith.constant 0 : i32
    %c0_i32_1 = arith.constant 0 : i32
    return %arg0, %c0_i32, %c0_i32_0 : i32, i32, i32
  }
  func.func @transform_1(%arg0: i32) -> (i32, i32) {
    %c0_i32 = arith.constant 0 : i32
    %c0_i32_0 = arith.constant 0 : i32
    %c0_i32_1 = arith.constant 0 : i32
    return %c0_i32, %c0_i32_0 : i32, i32
  }
  func.func @transform_2(%arg0: i32) -> (i32, i32) {
    %c0_i32 = arith.constant 0 : i32
    %c0_i32_0 = arith.constant 0 : i32
    %c0_i32_1 = arith.constant 0 : i32
    return %c0_i32, %c0_i32_0 : i32, i32
  }
  func.func @transform_3(%arg0: i32) -> (i32, i32) {
    %c0_i32 = arith.constant 0 : i32
    %c0_i32_0 = arith.constant 0 : i32
    %c0_i32_1 = arith.constant 0 : i32
    return %c0_i32, %c0_i32_0 : i32, i32
  }
  func.func @transform_4(%arg0: i32) -> (i32, i32) {
    %c0_i32 = arith.constant 0 : i32
    %c0_i32_0 = arith.constant 0 : i32
    %c0_i32_1 = arith.constant 0 : i32
    return %c0_i32, %c0_i32_0 : i32, i32
  }
  func.func @transform_5(%arg0: i32) -> (i32, i32, i32) {
    %c0_i32 = arith.constant 0 : i32
    %c0_i32_0 = arith.constant 0 : i32
    %c0_i32_1 = arith.constant 0 : i32
    return %arg0, %c0_i32, %c0_i32_0 : i32, i32, i32
  }
}

</mosaic_0001>

<bundles_post_ra>
// kernel: series_attn1_forward.1
= control target key start
LH: loop header
LB: loop body
LE: loop exit
PB: predicated region body
PF: predicated region fallthrough
CT: control target
= control target key end

     0   :  { %s11110_s18 = smov 0   ;;  %s15289_s0 = inlined_call_operand.vmem [shape: f32[2,64,32], index: 0, kind: input, shape index: {}]   ;;  %s15290_s1 = inlined_call_operand.vmem [shape: f32[72,32], index: 1, kind: input, shape index: {}]   ;;  %s15291_s2 = inlined_call_operand.vmem [shape: f32[1,72], index: 2, kind: input, shape index: {}]   ;;  %s15292_s3 = inlined_call_operand.vmem [shape: f32[32,24], index: 3, kind: input, shape index: {}]   ;;  %s15293_s4 = inlined_call_operand.vmem [shape: f32[1,32], index: 4, kind: input, shape index: {}]   ;;  %s15294_s5 = inlined_call_operand.vmem [shape: f32[2,64,32], index: 5, kind: output, shape index: {}]  }
   0x1 LB: > { %s8850_s19 = sadd.s32 4294967295, %s11068_s18   ;;  %p8854_p0 = scmp.ge.s32.totalorder %s11068_s18, 1  ;;  %s11068_s18 = sphi %s11110_s18, %s15_s18  }
   0x2   : > { %p187_p1 = scmp.lt.s32.totalorder %s11068_s18, 3 }
   0x4   : > { %p188_p2 = pnand %p8854_p0, %p187_p1 }
   0x6   : > { %191 = sbr.rel (%p188_p2) target bundleno = 2818 (0xb02), region = 40 }
   0xb   : > { %v241_v0 = vld [vmem:[%s15290_s1 + $0x40] sm:$0xff]  ;;  %vm254_vm0 = vcmask 261120   ;;  %v240_v1 = vld [vmem:[%s15290_s1 + $0x38] sm:$0xff]  ;;  %v239_v2 = vld [vmem:[%s15290_s1 + $0x30] sm:$0xff]  ;;  %p215_p3 = scmp.lt.s32.totalorder %s8850_s19, 1  ;;  %vm1157_vm1 = vcmask 588800  }
   0xc   : > { %v304_v3 = vsel %vm254_vm0, %v241_v0, 0  ;;  %v301_v4 = vsel %vm254_vm0, %v240_v1, 0  ;;  %v298_v5 = vsel %vm254_vm0, %v239_v2, 0  ;;  %v238_v6 = vld [vmem:[%s15290_s1 + $0x28] sm:$0xff]  ;;  %v237_v7 = vld [vmem:[%s15290_s1 + $0x20] sm:$0xff]  ;;  %v236_v12 = vld [vmem:[%s15290_s1 + $0x18] sm:$0xff] }
   0xd   : > { %v11136_v8 = vand.u32 4294901760, %v304_v3  ;;  %v11138_v9 = vand.u32 4294901760, %v301_v4  ;;  %v11140_v10 = vand.u32 4294901760, %v298_v5  ;;  %v295_v11 = vsel %vm254_vm0, %v238_v6, 0  ;;  %s15491_s19 = smov (!%p215_p3, %s8850_s19), 1  ;;  %v235_v24 = vld [vmem:[%s15290_s1 + $0x10] sm:$0xff] }
   0xe   : > { %v11146_v13 = vand.u32 4294901760, %v295_v11  ;;  %v292_v14 = vsel %vm254_vm0, %v237_v7, 0  ;;  %v289_v19 = vsel %vm254_vm0, %v236_v12, 0  ;;  %s8863_s7 = sshll.u32 %s15491_s19, 6  ;;  %v286_v29 = vsel %vm254_vm0, %v235_v24, 0  ;;  %v234_v35 = vld [vmem:[%s15290_s1 + $0x8] sm:$0xff] }
   0xf   : > { %9615 = vmatprep.subr.mxu0 %v11136_v8  ;;  %v11153_v15 = vsub.f32 %v304_v3, %v11136_v8  ;;  %v11156_v16 = vsub.f32 %v301_v4, %v11138_v9  ;;  %v11159_v17 = vsub.f32 %v298_v5, %v11140_v10  ;;  %v11162_v18 = vand.u32 4294901760, %v292_v14  ;;  %s11187_s12 = scalar_lea.vmem %s15289_s0, %s8863_s7  ;;  %v233_v44 = vld [vmem:[%s15290_s1] sm:$0xff]  ;;  %s11070_s21 = smov 104  }
  0x10   : > { %9616 = vmatpush3.xpose.msra.mxu0 %v11136_v8  ;;  %v11177_v23 = vsub.f32 %v295_v11, %v11146_v13  ;;  %v225_v27 = vld [vmem:[%s11187_s12] sm:$0xff]  ;;  %v11195_v28 = vand.u32 4294901760, %v289_v19  ;;  %v11214_v38 = vand.u32 4294901760, %v286_v29  ;;  %v283_v39 = vsel %vm254_vm0, %v234_v35, 0  ;;  %v226_v46 = vld [vmem:[%s11187_s12 + $0x8] sm:$0xff]  ;;  %v227_v52 = vld [vmem:[%s11187_s12 + $0x10] sm:$0xff] }
  0x11   : > { %9617 = vmatprep.subr.mxu0 %v11138_v9  ;;  %v11168_v20 = vand.u32 4294901760, %v11153_v15  ;;  %v11171_v21 = vand.u32 4294901760, %v11156_v16  ;;  %v11174_v22 = vand.u32 4294901760, %v11159_v17  ;;  %v11199_v30 = vsub.f32 %v292_v14, %v11162_v18  ;;  %v228_v57 = vld [vmem:[%s11187_s12 + $0x18] sm:$0xff]  ;;  %v229_v63 = vld [vmem:[%s11187_s12 + $0x20] sm:$0xff]  ;;  %v230_v4 = vld [vmem:[%s11187_s12 + $0x28] sm:$0xff] }
  0x12   : > { %v11205_v34 = vand.u32 4294901760, %v11177_v23  ;;  %v256_v36 = vsel %vm254_vm0, %v225_v27, 0  ;;  %v11218_v40 = vsub.f32 %v289_v19, %v11195_v28  ;;  %v11236_v48 = vand.u32 4294901760, %v283_v39  ;;  %v231_v14 = vld [vmem:[%s11187_s12 + $0x30] sm:$0xff]  ;;  %v232_v27 = vld [vmem:[%s11187_s12 + $0x38] sm:$0xff]  ;;  %s11071_s22 = smov 96  }
  0x13   : > { %v478_v25 = vsub.f32 %v11153_v15, %v11168_v20  ;;  %v485_v26 = vsub.f32 %v11156_v16, %v11171_v21  ;;  %v492_v33 = vsub.f32 %v11159_v17, %v11174_v22  ;;  %v11211_v37 = vand.u32 4294901760, %v256_v36  ;;  %s11072_s23 = smov 120   ;;  %s11073_s24 = smov 88  }
  0x14   : > { %9618 = vmatpush3.xpose.msra.mxu0 %v11138_v9  ;;  %v499_v42 = vsub.f32 %v11177_v23, %v11205_v34  ;;  %v11224_v43 = vand.u32 4294901760, %v11199_v30  ;;  %v11239_v49 = vand.u32 4294901760, %v11218_v40  ;;  %v280_v50 = vsel %vm254_vm0, %v233_v44, 0  ;;  %s11074_s25 = smov 112   ;;  %s11075_s26 = smov 80  }
  0x15   : > { %9619 = vmatprep.subr.mxu0 %v11140_v10  ;;  %v479_v31 = vand.u32 4294901760, %v478_v25  ;;  %v486_v32 = vand.u32 4294901760, %v485_v26  ;;  %v493_v41 = vand.u32 4294901760, %v492_v33  ;;  %v11230_v45 = vsub.f32 %v256_v36, %v11211_v37  ;;  %9663 = vmatprep.mubr.f32.mxu1 %v11211_v37  ;;  %s11076_s27 = smov 72   ;;  %s11077_s28 = smov 64  }
  0x16   : > { %v259_v51 = vsel %vm254_vm0, %v226_v46, 0  ;;  %v500_v53 = vand.u32 4294901760, %v499_v42  ;;  %v506_v54 = vsub.f32 %v11199_v30, %v11224_v43  ;;  %v11248_v55 = vsub.f32 %v286_v29, %v11214_v38  ;;  %s11078_s29 = smov 8   ;;  %s11079_s14 = smov 16  }
  0x17   : > { %9645 = vmatprep.subr.mxu1 %v479_v31  ;;  %v382_v47 = vand.u32 4294901760, %v11230_v45  ;;  %v11254_v59 = vand.u32 4294901760, %v259_v51  ;;  %v262_v60 = vsel %vm254_vm0, %v227_v52, 0  ;;  %v11258_v61 = vand.u32 4294901760, %v280_v50 }
  0x18   : > { %9620 = vmatpush3.xpose.msra.mxu0 %v11140_v10  ;;  %9646 = vmatpush3.xpose.msra.mxu1 %v479_v31  ;;  %v265_v62 = vsel %vm254_vm0, %v228_v57, 0  ;;  %v507_v0 = vand.u32 4294901760, %v506_v54  ;;  %v513_v1 = vsub.f32 %v11218_v40, %v11239_v49  ;;  %v11266_v2 = vand.u32 4294901760, %v11248_v55 }
  0x19   : > { %9621 = vmatprep.subr.mxu0 %v11146_v13  ;;  %9647 = vmatprep.subr.mxu1 %v486_v32  ;;  %v383_v56 = vsub.f32 %v11230_v45, %v382_v47  ;;  %v11269_v3 = vsub.f32 %v283_v39, %v11236_v48  ;;  %v11272_v5 = vand.u32 4294901760, %v262_v60  ;;  %v11275_v6 = vsub.f32 %v259_v51, %v11254_v59 }
  0x1a   : > { %v11277_v7 = vand.u32 4294901760, %v265_v62  ;;  %v268_v11 = vsel %vm254_vm0, %v229_v63, 0  ;;  %v271_v12 = vsel %vm254_vm0, %v230_v4, 0  ;;  %v514_v19 = vand.u32 4294901760, %v513_v1 }
  0x1b   : > { %v384_v58 = vand.u32 4294901760, %v383_v56  ;;  %v520_v24 = vsub.f32 %v11248_v55, %v11266_v2  ;;  %v11287_v25 = vand.u32 4294901760, %v11269_v3  ;;  %v11290_v26 = vsub.f32 %v280_v50, %v11258_v61 }
  0x1c   : > { %9622 = vmatpush3.xpose.msra.mxu0 %v11146_v13  ;;  %9648 = vmatpush3.xpose.msra.mxu1 %v486_v32  ;;  %v11294_v29 = vsub.f32 %v262_v60, %v11272_v5  ;;  %v11296_v31 = vand.u32 4294901760, %v268_v11  ;;  %v392_v32 = vand.u32 4294901760, %v11275_v6  ;;  %v11300_v33 = vsub.f32 %v265_v62, %v11277_v7 }
  0x1d   : > { %9623 = vmatprep.subr.mxu0 %v11162_v18  ;;  %9649 = vmatprep.subr.mxu1 %v493_v41  ;;  %v11302_v35 = vand.u32 4294901760, %v271_v12  ;;  %v274_v36 = vsel %vm254_vm0, %v231_v14, 0  ;;  %v277_v39 = vsel %vm254_vm0, %v232_v27, 0  ;;  %v527_v42 = vsub.f32 %v11269_v3, %v11287_v25 }
  0x1e   : > { %9633 = vmatprep.mubr.f32.mxu0 %v384_v58  ;;  %v11311_v44 = vand.u32 4294901760, %v11290_v26  ;;  %v402_v46 = vand.u32 4294901760, %v11294_v29  ;;  %v11315_v50 = vsub.f32 %v268_v11, %v11296_v31  ;;  %v11317_v51 = vand.u32 4294901760, %v274_v36 }
  0x1f   : > { %v393_v52 = vsub.f32 %v11275_v6, %v392_v32  ;;  %v11324_v54 = vsub.f32 %v271_v12, %v11302_v35  ;;  %v11326_v56 = vand.u32 4294901760, %v277_v39  ;;  %v528_v57 = vand.u32 4294901760, %v527_v42 }
  0x20   : > { %9624 = vmatpush3.xpose.msra.mxu0 %v11162_v18  ;;  %9650 = vmatpush3.xpose.msra.mxu1 %v493_v41  ;;  %v521_v41 = vand.u32 4294901760, %v520_v24  ;;  %v534_v58 = vsub.f32 %v11290_v26, %v11311_v44  ;;  %v403_v60 = vsub.f32 %v11294_v29, %v402_v46  ;;  %v422_v62 = vand.u32 4294901760, %v11315_v50 }
  0x21   : > { %9625 = vmatprep.subr.mxu0 %v11195_v28  ;;  %9651 = vmatprep.subr.mxu1 %v500_v53  ;;  %v11337_v63 = vsub.f32 %v274_v36, %v11317_v51  ;;  %v432_v4 = vand.u32 4294901760, %v11324_v54  ;;  %v11344_v11 = vsub.f32 %v277_v39, %v11326_v56  ;;  %vm1206_vm2 = vcmask 64512  }
  0x22   : > { %v535_v12 = vand.u32 4294901760, %v534_v58  ;;  %v404_v14 = vand.u32 4294901760, %v403_v60  ;;  %vm2085_vm3 = vcmask 523264  }
  0x23   : > { %v442_v24 = vand.u32 4294901760, %v11337_v63  ;;  %v433_v36 = vsub.f32 %v11324_v54, %v432_v4  ;;  %v452_v39 = vand.u32 4294901760, %v11344_v11 }
  0x24   : > { %9626 = vmatpush3.xpose.msra.mxu0 %v11195_v28  ;;  %9652 = vmatpush3.xpose.msra.mxu1 %v500_v53  ;;  %v412_v53 = vand.u32 4294901760, %v11300_v33 }
  0x25   : > { %9627 = vmatprep.subr.mxu0 %v11214_v38  ;;  %9653 = vmatprep.subr.mxu1 %v507_v0  ;;  %v443_v42 = vsub.f32 %v11337_v63, %v442_v24  ;;  %v453_v58 = vsub.f32 %v11344_v11, %v452_v39 }
  0x26   : > { %v413_v1 = vsub.f32 %v11300_v33, %v412_v53 }
  0x28   : > { %9628 = vmatpush3.xpose.msra.mxu0 %v11214_v38  ;;  %9654 = vmatpush3.xpose.msra.mxu1 %v507_v0  ;;  %v394_v0 = vand.u32 4294901760, %v393_v52  ;;  %v414_v27 = vand.u32 4294901760, %v413_v1  ;;  %v434_v52 = vand.u32 4294901760, %v433_v36 }
  0x29   : > { %9629 = vmatprep.subr.mxu0 %v11236_v48  ;;  %9655 = vmatprep.subr.mxu1 %v514_v19 }
  0x2c   : > { %9630 = vmatpush3.xpose.msra.mxu0 %v11236_v48  ;;  %9656 = vmatpush3.xpose.msra.mxu1 %v514_v19  ;;  %v423_v19 = vsub.f32 %v11315_v50, %v422_v62 }
  0x2d   : > { %9631 = vmatprep.subr.mxu0 %v11258_v61  ;;  %9657 = vmatprep.subr.mxu1 %v521_v41 }
  0x30   : > { %9632 = vmatpush3.xpose.msra.mxu0 %v11258_v61  ;;  %9658 = vmatpush3.xpose.msra.mxu1 %v521_v41  ;;  %v424_v41 = vand.u32 4294901760, %v423_v19 }
  0x31   : > { %9659 = vmatprep.subr.mxu1 %v528_v57  ;;  %9675 = vmatprep.subr.mxu0 %v11153_v15 }
  0x33   : > { %9634 = vmatmul.mubr.f32.vlgmr.msra.gmra.mxu0 %v394_v0 }
  0x34   : > { %9660 = vmatpush3.xpose.msra.mxu1 %v528_v57  ;;  %9676 = vmatpush3.xpose.msra.mxu0 %v11153_v15  ;;  %v444_v15 = vand.u32 4294901760, %v443_v42  ;;  %v454_v57 = vand.u32 4294901760, %v453_v58 }
  0x35   : > { %9661 = vmatprep.subr.mxu1 %v535_v12  ;;  %9677 = vmatprep.subr.mxu0 %v11156_v16 }
  0x36   : > { %9636 = vmatprep.mubr.f32.mxu0 %v404_v14 }
  0x37   : > { %9637 = vmatmul.mubr.f32.gmra.mxu0 %v414_v27 }
  0x38   : > { %9662 = vmatpush3.xpose.msra.mxu1 %v535_v12  ;;  %9678 = vmatpush3.xpose.msra.mxu0 %v11156_v16 }
  0x39   : > { %9679 = vmatprep.subr.mxu0 %v11159_v17  ;;  %9705 = vmatprep.subr.mxu1 %v11136_v8 }
  0x3a   : > { %9639 = vmatprep.mubr.f32.mxu0 %v424_v41 }
  0x3b   : > { %9664 = vmatmul.mubr.f32.vlgmr.msra.gmra.mxu1 %v11254_v59  ;;  %9640 = vmatmul.mubr.f32.gmra.mxu0 %v434_v52 }
  0x3c   : > { %9680 = vmatpush3.xpose.msra.mxu0 %v11159_v17  ;;  %9706 = vmatpush3.xpose.msra.mxu1 %v11136_v8 }
  0x3d   : > { %9681 = vmatprep.subr.mxu0 %v11177_v23  ;;  %9707 = vmatprep.subr.mxu1 %v11138_v9 }
  0x3e   : > { %9666 = vmatprep.mubr.f32.mxu1 %v11272_v5  ;;  %9642 = vmatprep.mubr.f32.mxu0 %v444_v15 }
  0x3f   : > { %9667 = vmatmul.mubr.f32.gmra.mxu1 %v11277_v7  ;;  %9643 = vmatmul.mubr.f32.gmra.mxu0 %v454_v57 }
  0x40   : > { %9682 = vmatpush3.xpose.msra.mxu0 %v11177_v23  ;;  %9708 = vmatpush3.xpose.msra.mxu1 %v11138_v9 }
  0x41   : > { %9683 = vmatprep.subr.mxu0 %v11199_v30  ;;  %9709 = vmatprep.subr.mxu1 %v11140_v10 }
  0x42   : > { %9669 = vmatprep.mubr.f32.mxu1 %v11296_v31  ;;  %9693 = vmatprep.mubr.f32.mxu0 %v11230_v45 }
  0x43   : > { %9670 = vmatmul.mubr.f32.gmra.mxu1 %v11302_v35 }
  0x44   : > { %9684 = vmatpush3.xpose.msra.mxu0 %v11199_v30  ;;  %9710 = vmatpush3.xpose.msra.mxu1 %v11140_v10 }
  0x45   : > { %9685 = vmatprep.subr.mxu0 %v11218_v40  ;;  %9711 = vmatprep.subr.mxu1 %v11146_v13 }
  0x46   : > { %9672 = vmatprep.mubr.f32.mxu1 %v11317_v51 }
  0x47   : > { %9673 = vmatmul.mubr.f32.gmra.mxu1 %v11326_v56 }
  0x48   : > { %9686 = vmatpush3.xpose.msra.mxu0 %v11218_v40  ;;  %9712 = vmatpush3.xpose.msra.mxu1 %v11146_v13 }
  0x49   : > { %9687 = vmatprep.subr.mxu0 %v11248_v55  ;;  %9713 = vmatprep.subr.mxu1 %v11162_v18 }
  0x4a   : > { %9723 = vmatprep.mubr.f32.mxu1 %v382_v47 }
  0x4c   : > { %9688 = vmatpush3.xpose.msra.mxu0 %v11248_v55  ;;  %9714 = vmatpush3.xpose.msra.mxu1 %v11162_v18 }
  0x4d   : > { %9689 = vmatprep.subr.mxu0 %v11269_v3  ;;  %9715 = vmatprep.subr.mxu1 %v11195_v28 }
  0x50   : > { %9690 = vmatpush3.xpose.msra.mxu0 %v11269_v3  ;;  %9716 = vmatpush3.xpose.msra.mxu1 %v11195_v28  ;;  %v8859_v3 = vld [vmem:[%s15291_s2] ss:$0 sm:$0xff] }
  0x51   : > { %9691 = vmatprep.subr.mxu0 %v11290_v26  ;;  %9717 = vmatprep.subr.mxu1 %v11214_v38 }
  0x54   : > { %9692 = vmatpush3.xpose.msra.mxu0 %v11290_v26  ;;  %9718 = vmatpush3.xpose.msra.mxu1 %v11214_v38 }
  0x55   : > { %9719 = vmatprep.subr.mxu1 %v11236_v48  ;;  %9735 = vmatprep.subr.mxu0 %v11168_v20 }
  0x57   : > { %9694 = vmatmul.mubr.f32.vlgmr.msra.gmra.mxu0 %v11275_v6 }
  0x58   : > { %9720 = vmatpush3.xpose.msra.mxu1 %v11236_v48  ;;  %9736 = vmatpush3.xpose.msra.mxu0 %v11168_v20 }
  0x59   : > { %9696 = vmatprep.mubr.f32.mxu0 %v11294_v29  ;;  %9721 = vmatprep.subr.mxu1 %v11258_v61 }
  0x5a   : > { %9737 = vmatprep.subr.mxu0 %v11171_v21 }
  0x5b   : > { %9697 = vmatmul.mubr.f32.gmra.mxu0 %v11300_v33 }
  0x5c   : > { %9722 = vmatpush3.xpose.msra.mxu1 %v11258_v61  ;;  %9738 = vmatpush3.xpose.msra.mxu0 %v11171_v21 }
  0x5d   : > { %9699 = vmatprep.mubr.f32.mxu0 %v11315_v50  ;;  %9739 = vmatprep.subr.mxu0 %v11174_v22 }
  0x5e   : > { %9765 = vmatprep.subr.mxu1 %v11136_v8 }
  0x5f   : > { %9700 = vmatmul.mubr.f32.gmra.mxu0 %v11324_v54  ;;  %9724 = vmatmul.mubr.f32.vlgmr.msra.gmra.mxu1 %v392_v32 }
  0x60   : > { %9740 = vmatpush3.xpose.msra.mxu0 %v11174_v22  ;;  %9766 = vmatpush3.xpose.msra.mxu1 %v11136_v8 }
  0x61   : > { %9702 = vmatprep.mubr.f32.mxu0 %v11337_v63  ;;  %9726 = vmatprep.mubr.f32.mxu1 %v402_v46 }
  0x62   : > { %9741 = vmatprep.subr.mxu0 %v11205_v34  ;;  %9767 = vmatprep.subr.mxu1 %v11138_v9 }
  0x63   : > { %9703 = vmatmul.mubr.f32.gmra.mxu0 %v11344_v11  ;;  %9727 = vmatmul.mubr.f32.gmra.mxu1 %v412_v53 }
  0x64   : > { %9742 = vmatpush3.xpose.msra.mxu0 %v11205_v34  ;;  %9768 = vmatpush3.xpose.msra.mxu1 %v11138_v9 }
  0x65   : > { %9729 = vmatprep.mubr.f32.mxu1 %v422_v62  ;;  %9743 = vmatprep.subr.mxu0 %v11224_v43 }
  0x66   : > { %9769 = vmatprep.subr.mxu1 %v11140_v10  ;;  %9753 = vmatprep.mubr.f32.mxu0 %v11211_v37 }
  0x67   : > { %9730 = vmatmul.mubr.f32.gmra.mxu1 %v432_v4 }
  0x68   : > { %9744 = vmatpush3.xpose.msra.mxu0 %v11224_v43  ;;  %9770 = vmatpush3.xpose.msra.mxu1 %v11140_v10 }
  0x69   : > { %9732 = vmatprep.mubr.f32.mxu1 %v442_v24  ;;  %9745 = vmatprep.subr.mxu0 %v11239_v49 }
  0x6a   : > { %9771 = vmatprep.subr.mxu1 %v11146_v13 }
  0x6b   : > { %9733 = vmatmul.mubr.f32.gmra.mxu1 %v452_v39 }
  0x6c   : > { %9746 = vmatpush3.xpose.msra.mxu0 %v11239_v49  ;;  %9772 = vmatpush3.xpose.msra.mxu1 %v11146_v13 }
  0x6d   : > { %9747 = vmatprep.subr.mxu0 %v11266_v2  ;;  %9773 = vmatprep.subr.mxu1 %v11162_v18 }
  0x6e   : > { %9783 = vmatprep.mubr.f32.mxu1 %v11211_v37 }
  0x70   : > { %9748 = vmatpush3.xpose.msra.mxu0 %v11266_v2  ;;  %9774 = vmatpush3.xpose.msra.mxu1 %v11162_v18 }
  0x71   : > { %9749 = vmatprep.subr.mxu0 %v11287_v25  ;;  %9775 = vmatprep.subr.mxu1 %v11195_v28 }
  0x74   : > { %9750 = vmatpush3.xpose.msra.mxu0 %v11287_v25  ;;  %9776 = vmatpush3.xpose.msra.mxu1 %v11195_v28 }
  0x75   : > { %9751 = vmatprep.subr.mxu0 %v11311_v44  ;;  %9777 = vmatprep.subr.mxu1 %v11214_v38 }
  0x78   : > { %9752 = vmatpush3.xpose.msra.mxu0 %v11311_v44  ;;  %9778 = vmatpush3.xpose.msra.mxu1 %v11214_v38 }
  0x79   : > { %9779 = vmatprep.subr.mxu1 %v11236_v48 }
  0x7b   : > { %9754 = vmatmul.mubr.f32.vlgmr.msra.gmra.mxu0 %v11254_v59 }
  0x7c   : > { %9780 = vmatpush3.xpose.msra.mxu1 %v11236_v48  ;;  %9756 = vmatprep.mubr.f32.mxu0 %v11272_v5 }
  0x7d   : > { %9781 = vmatprep.subr.mxu1 %v11258_v61 }
  0x7f   : > { %9757 = vmatmul.mubr.f32.gmra.mxu0 %v11277_v7 }
  0x80   : > { %9782 = vmatpush3.xpose.msra.mxu1 %v11258_v61  ;;  %9759 = vmatprep.mubr.f32.mxu0 %v11296_v31 }
  0x83   : > { %9760 = vmatmul.mubr.f32.gmra.mxu0 %v11302_v35  ;;  %9784 = vmatmul.mubr.f32.vlgmr.msra.gmra.mxu1 %v11254_v59 }
  0x84   : > { %9762 = vmatprep.mubr.f32.mxu0 %v11317_v51  ;;  %9786 = vmatprep.mubr.f32.mxu1 %v11272_v5 }
  0x87   : > { %9763 = vmatmul.mubr.f32.gmra.mxu0 %v11326_v56  ;;  %9787 = vmatmul.mubr.f32.gmra.mxu1 %v11277_v7 }
  0x88   : > { %9789 = vmatprep.mubr.f32.mxu1 %v11296_v31 }
  0x8b   : > { %9790 = vmatmul.mubr.f32.gmra.mxu1 %v11302_v35 }
  0x8c   : > { %9792 = vmatprep.mubr.f32.mxu1 %v11317_v51 }
  0x8f   : > { %9793 = vmatmul.mubr.f32.gmra.mxu1 %v11326_v56 }
  0xf3   : > { %v9635_v8 = vpop.f32.mrf.mxu0 }
  0xf4   : > { %v397_v7 = vadd.f32 %v9635_v8, %v8859_v3 }
  0xf5   : > { %v386_v9 = vpop.f32.mrf.mxu0 }
  0xf6   : > { %v387_v29 = vadd.f32 %v8859_v3, %v386_v9 }
  0xf7   : > { %v9638_v10 = vpop.f32.mrf.mxu0 }
  0xf8   : > { %v417_v33 = vadd.f32 %v9638_v10, %v8859_v3 }
  0xf9   : > { %v406_v16 = vpop.f32.mrf.mxu0 }
  0xfa   : > { %v407_v50 = vadd.f32 %v8859_v3, %v406_v16 }
  0xfb   : > { %v9665_v13 = vpop.f32.mrf.mxu1  ;;  %v9641_v18 = vpop.f32.mrf.mxu0 }
  0xfc   : > { %v579_v32 = vadd.f32 %v9665_v13, %v397_v7  ;;  %v437_v53 = vadd.f32 %v9641_v18, %v8859_v3 }
  0xfd   : > { %v572_v17 = vpop.f32.mrf.mxu1  ;;  %v426_v21 = vpop.f32.mrf.mxu0 }
  0xfe   : > { %v573_v46 = vadd.f32 %v572_v17, %v387_v29  ;;  %v427_v63 = vadd.f32 %v8859_v3, %v426_v21 }
  0xff   : > { %v9668_v20 = vpop.f32.mrf.mxu1  ;;  %v9644_v23 = vpop.f32.mrf.mxu0 }
 0x100   : > { %v591_v56 = vadd.f32 %v9668_v20, %v417_v33  ;;  %v457_v19 = vadd.f32 %v9644_v23, %v8859_v3 }
 0x101   : > { %v584_v22 = vpop.f32.mrf.mxu1  ;;  %v446_v30 = vpop.f32.mrf.mxu0 }
 0x102   : > { %v585_v4 = vadd.f32 %v584_v22, %v407_v50  ;;  %v447_v58 = vadd.f32 %v8859_v3, %v446_v30 }
 0x103   : > { %v9671_v28 = vpop.f32.mrf.mxu1 }
 0x104   : > { %v603_v24 = vadd.f32 %v9671_v28, %v437_v53 }
 0x105   : > { %v596_v34 = vpop.f32.mrf.mxu1 }
 0x106   : > { %v597_v15 = vadd.f32 %v596_v34, %v427_v63 }
 0x107   : > { %v9674_v38 = vpop.f32.mrf.mxu1 }
 0x108   : > { %v615_v17 = vadd.f32 %v9674_v38, %v457_v19 }
 0x109   : > { %v608_v43 = vpop.f32.mrf.mxu1 }
 0x10a   : > { %v609_v28 = vadd.f32 %v608_v43, %v447_v58 }
 0x117   : > { %v9695_v37 = vpop.f32.mrf.mxu0 }
 0x118   : > { %v712_v51 = vadd.f32 %v9695_v37, %v579_v32 }
 0x119   : > { %v704_v40 = vpop.f32.mrf.mxu0 }
 0x11a   : > { %v705_v60 = vadd.f32 %v704_v40, %v573_v46 }
 0x11b   : > { %v9698_v45 = vpop.f32.mrf.mxu0 }
 0x11c   : > { %v726_v11 = vadd.f32 %v9698_v45, %v591_v56 }
 0x11d   : > { %v718_v48 = vpop.f32.mrf.mxu0 }
 0x11e   : > { %v719_v39 = vadd.f32 %v718_v48, %v585_v4 }
 0x11f   : > { %v9725_v47 = vpop.f32.mrf.mxu1  ;;  %v9701_v55 = vpop.f32.mrf.mxu0 }
 0x120   : > { %v844_v62 = vadd.f32 %v9725_v47, %v712_v51  ;;  %v740_v9 = vadd.f32 %v9701_v55, %v603_v24 }
 0x121   : > { %v835_v49 = vpop.f32.mrf.mxu1  ;;  %v732_v61 = vpop.f32.mrf.mxu0 }
 0x122   : > { %v836_v12 = vadd.f32 %v835_v49, %v705_v60  ;;  %v733_v20 = vadd.f32 %v732_v61, %v597_v15 }
 0x123   : > { %v9728_v59 = vpop.f32.mrf.mxu1  ;;  %v9704_v5 = vpop.f32.mrf.mxu0 }
 0x124   : > { %v860_v41 = vadd.f32 %v9728_v59, %v726_v11  ;;  %v754_v34 = vadd.f32 %v9704_v5, %v615_v17 }
 0x125   : > { %v851_v2 = vpop.f32.mrf.mxu1  ;;  %v746_v25 = vpop.f32.mrf.mxu0 }
 0x126   : > { %v852_v10 = vadd.f32 %v851_v2, %v719_v39  ;;  %v747_v49 = vadd.f32 %v746_v25, %v609_v28 }
 0x127   : > { %v9731_v6 = vpop.f32.mrf.mxu1 }
 0x128   : > { %v876_v21 = vadd.f32 %v9731_v6, %v740_v9 }
 0x129   : > { %v867_v26 = vpop.f32.mrf.mxu1 }
 0x12a   : > { %v868_v40 = vadd.f32 %v867_v26, %v733_v20 }
 0x12b   : > { %v9734_v35 = vpop.f32.mrf.mxu1 }
 0x12c   : > { %v892_v55 = vadd.f32 %v9734_v35, %v754_v34 }
 0x12d   : > { %v883_v0 = vpop.f32.mrf.mxu1 }
 0x12e   : > { %v884_v3 = vadd.f32 %v883_v0, %v747_v49 }
 0x13b   : > { %v9755_v31 = vpop.f32.mrf.mxu0 }
 0x13c   : > { %v996_v14 = vadd.f32 %v9755_v31, %v844_v62 }
 0x13d   : > { %v989_v44 = vpop.f32.mrf.mxu0 }
 0x13e   : > { %v990_v42 = vadd.f32 %v989_v44, %v836_v12 }
 0x13f   : > { %v9758_v54 = vpop.f32.mrf.mxu0 }
 0x140   : > { %v1008_v13 = vadd.f32 %v9758_v54, %v860_v41 }
 0x141   : > { %v1001_v1 = vpop.f32.mrf.mxu0 }
 0x142   : > { %v1002_v22 = vadd.f32 %v1001_v1, %v852_v10 }
 0x143   : > { %v9761_v27 = vpop.f32.mrf.mxu0  ;;  %v9785_v36 = vpop.f32.mrf.mxu1 }
 0x144   : > { %v1118_v52 = vadd.f32 %v9785_v36, %v996_v14  ;;  %v1020_v45 = vadd.f32 %v9761_v27, %v876_v21 }
 0x145   : > { %v1013_v57 = vpop.f32.mrf.mxu0  ;;  %v1111_v8 = vpop.f32.mrf.mxu1 }
 0x146   : > { %1159 = vst.msk [vmem:[#allocation2 + $0x8] sm:$0xff] %vm1157_vm1, %v1118_v52  ;;  %v1112_v16 = vadd.f32 %v1111_v8, %v990_v42  ;;  %v1014_v38 = vadd.f32 %v1013_v57, %v868_v40 }
 0x147   : > { %v9788_v18 = vpop.f32.mrf.mxu1  ;;  %v9764_v37 = vpop.f32.mrf.mxu0 }
 0x148   : > { %1158 = vst.msk [vmem:[#allocation2] sm:$0xff] %vm1157_vm1, %v1112_v16  ;;  %v1130_v23 = vadd.f32 %v9788_v18, %v1008_v13  ;;  %v1032_v6 = vadd.f32 %v9764_v37, %v892_v55 }
 0x149   : > { %v1123_v30 = vpop.f32.mrf.mxu1  ;;  %v1025_v61 = vpop.f32.mrf.mxu0 }
 0x14a   : > { %1161 = vst.msk [vmem:[#allocation2 + $0x18] sm:$0xff] %vm1157_vm1, %v1130_v23  ;;  %v1124_v47 = vadd.f32 %v1123_v30, %v1002_v22  ;;  %v1026_v26 = vadd.f32 %v1025_v61, %v884_v3 }
 0x14b   : > { %v9791_v48 = vpop.f32.mrf.mxu1 }
 0x14c   : > { %1160 = vst.msk [vmem:[#allocation2 + $0x10] sm:$0xff] %vm1157_vm1, %v1124_v47  ;;  %v1142_v59 = vadd.f32 %v9791_v48, %v1020_v45 }
 0x14d   : > { %v1135_v2 = vpop.f32.mrf.mxu1  ;;  %v1167_v0 = vld [vmem:[#allocation2 + $0x8] sm:$0xff] }
 0x14e   : > { %1163 = vst.msk [vmem:[#allocation2 + $0x28] sm:$0xff] %vm1157_vm1, %v1142_v59  ;;  %v1136_v43 = vadd.f32 %v1135_v2, %v1014_v38  ;;  %v11518_v1 = vmul.f32 0.35355338, %v1167_v0 }
 0x14f   : > { %v9794_v5 = vpop.f32.mrf.mxu1  ;;  %v11488_v7 = vld [vmem:[#allocation2] sm:$0xff] }
 0x150   : > { %1162 = vst.msk [vmem:[#allocation2 + $0x20] sm:$0xff] %vm1157_vm1, %v1136_v43  ;;  %v1154_v29 = vadd.f32 %v9794_v5, %v1032_v6  ;;  %v11492_v25 = vmul.f32 0.35355338, %v11488_v7  ;;  %v1211_v43 = vsel %vm1206_vm2, %v11518_v1, 0 }
 0x151   : > { %v1147_v31 = vpop.f32.mrf.mxu1  ;;  %v1169_v63 = vld [vmem:[#allocation2 + $0x18] sm:$0xff] }
 0x152   : > { %1165 = vst.msk [vmem:[#allocation2 + $0x38] sm:$0xff] %vm1157_vm1, %v1154_v29  ;;  %v1148_v32 = vadd.f32 %v1147_v31, %v1026_v26  ;;  %v1208_v33 = vsel %vm1206_vm2, %v11492_v25, 0  ;;  %v11521_v4 = vmul.f32 0.35355338, %v1169_v63 }
 0x153   : > { %v11497_v35 = vand.u32 4294901760, %v1208_v33  ;;  %v1168_v62 = vld [vmem:[#allocation2 + $0x10] sm:$0xff] }
 0x154   : > { %1164 = vst.msk [vmem:[#allocation2 + $0x30] sm:$0xff] %vm1157_vm1, %v1148_v32  ;;  %v11528_v12 = vmul.f32 0.35355338, %v1168_v62  ;;  %v11633_v32 = vand.u32 4294901760, %v1211_v43 }
 0x155   : > { %9839 = vmatprep.mubr.f32.mxu1 %v11497_v35  ;;  %v11501_v44 = vld [vmem:[#allocation2 + $0x28] sm:$0xff]  ;;  %v11504_v46 = vsub.f32 %v1208_v33, %v11497_v35 }
 0x156   : > { %1200 = vrot.lane.b32.xlu1 %v11501_v44, %s11070_s21  ;;  %v11526_v11 = vmul.f32 0.35355338, %v11501_v44  ;;  %v1214_v6 = vsel %vm1206_vm2, %v11528_v12, 0 }
 0x157   : > { %v1322_v50 = vand.u32 4294901760, %v11504_v46  ;;  %v1170_v53 = vld [vmem:[#allocation2 + $0x20] sm:$0xff] }
 0x158   : > { %v11535_v19 = vmul.f32 0.35355338, %v1170_v53 }
 0x159   : > { %v11508_v51 = vld [vmem:[#allocation2 + $0x38] sm:$0xff]  ;;  %v1323_v54 = vsub.f32 %v11504_v46, %v1322_v50 }
 0x15a   : > { %1204 = vrot.lane.b32.xlu0 %v11508_v51, %s11070_s21  ;;  %1198 = vrot.lane.b32.xlu1 %v1170_v53, %s11070_s21  ;;  %v11533_v14 = vmul.f32 0.35355338, %v11508_v51  ;;  %v1220_v33 = vsel %vm1206_vm2, %v11535_v19, 0 }
 0x15b   : > { %v1324_v56 = vand.u32 4294901760, %v1323_v54  ;;  %v1172_v60 = vld [vmem:[#allocation2 + $0x30] sm:$0xff] }
 0x15c   : > { %v11539_v24 = vmul.f32 0.35355338, %v1172_v60 }
 0x15d   : > { %9811 = vmatprep.mubr.f32.mxu0 %v1324_v56 }
 0x15e   : > { %1202 = vrot.lane.b32.xlu0 %v1172_v60, %s11070_s21  ;;  %1194 = vrot.lane.b32.xlu1 %v1168_v62, %s11070_s21 }
 0x162   : > { %1196 = vrot.lane.b32.xlu0 %v1169_v63, %s11070_s21  ;;  %1190 = vrot.lane.b32.xlu1 %v11488_v7, %s11070_s21 }
 0x166   : > { %1192 = vrot.lane.b32.xlu0 %v1167_v0, %s11070_s21  ;;  %2154 = vrot.lane.b32.xlu1 %v1172_v60, %s11071_s22  ;;  %s15265_s21 = scalar_lea.vmem %s15294_s5, %s8863_s7 }
 0x16a   : > { %2156 = vrot.lane.b32.xlu0 %v11508_v51, %s11071_s22  ;;  %2150 = vrot.lane.b32.xlu1 %v1170_v53, %s11071_s22 }
 0x16e   : > { %2152 = vrot.lane.b32.xlu0 %v11501_v44, %s11071_s22  ;;  %2146 = vrot.lane.b32.xlu1 %v1168_v62, %s11071_s22 }
 0x172   : > { %2148 = vrot.lane.b32.xlu0 %v1169_v63, %s11071_s22  ;;  %2142 = vrot.lane.b32.xlu1 %v11488_v7, %s11071_s22 }
 0x176   : > { %2144 = vrot.lane.b32.xlu0 %v1167_v0, %s11071_s22  ;;  %2120 = vrot.lane.b32.xlu1 %v11518_v1, %s11072_s23 }
 0x17a   : > { %2118 = vrot.lane.b32.xlu0 %v11492_v25, %s11072_s23  ;;  %2124 = vrot.lane.b32.xlu1 %v11521_v4, %s11072_s23 }
 0x17e   : > { %2122 = vrot.lane.b32.xlu0 %v11528_v12, %s11072_s23  ;;  %2128 = vrot.lane.b32.xlu1 %v11526_v11, %s11072_s23 }
 0x182   : > { %2126 = vrot.lane.b32.xlu0 %v11535_v19, %s11072_s23  ;;  %2132 = vrot.lane.b32.xlu1 %v11533_v14, %s11072_s23 }
 0x186   : > { %2130 = vrot.lane.b32.xlu0 %v11539_v24, %s11072_s23  ;;  %3096 = vrot.lane.b32.xlu1 %v1172_v60, %s11073_s24 }
 0x18a   : > { %3098 = vrot.lane.b32.xlu0 %v11508_v51, %s11073_s24  ;;  %3092 = vrot.lane.b32.xlu1 %v1170_v53, %s11073_s24 }
 0x18e   : > { %3094 = vrot.lane.b32.xlu0 %v11501_v44, %s11073_s24  ;;  %3088 = vrot.lane.b32.xlu1 %v1168_v62, %s11073_s24 }
 0x192   : > { %3090 = vrot.lane.b32.xlu0 %v1169_v63, %s11073_s24  ;;  %3084 = vrot.lane.b32.xlu1 %v11488_v7, %s11073_s24 }
 0x196   : > { %3086 = vrot.lane.b32.xlu0 %v1167_v0, %s11073_s24  ;;  %3062 = vrot.lane.b32.xlu1 %v11518_v1, %s11074_s25  ;;  %v1223_v1 = vsel %vm1206_vm2, %v11526_v11, 0 }
 0x19a   : > { %3060 = vrot.lane.b32.xlu0 %v11492_v25, %s11074_s25  ;;  %3066 = vrot.lane.b32.xlu1 %v11521_v4, %s11074_s25 }
 0x19e   : > { %3064 = vrot.lane.b32.xlu0 %v11528_v12, %s11074_s25  ;;  %3070 = vrot.lane.b32.xlu1 %v11526_v11, %s11074_s25  ;;  %v1226_v12 = vsel %vm1206_vm2, %v11539_v24, 0  ;;  %v11677_v11 = vand.u32 4294901760, %v1223_v1 }
 0x1a2   : > { %3068 = vrot.lane.b32.xlu0 %v11535_v19, %s11074_s25  ;;  %3074 = vrot.lane.b32.xlu1 %v11533_v14, %s11074_s25 }
 0x1a6   : > { %3072 = vrot.lane.b32.xlu0 %v11539_v24, %s11074_s25  ;;  %5160 = vrot.lane.b32.xlu1 %v11508_v51, %s11075_s26 }
 0x1aa   : > { %5158 = vrot.lane.b32.xlu0 %v1172_v60, %s11075_s26  ;;  %5154 = vrot.lane.b32.xlu1 %v1170_v53, %s11075_s26 }
 0x1ae   : > { %5156 = vrot.lane.b32.xlu0 %v11501_v44, %s11075_s26  ;;  %5148 = vrot.lane.b32.xlu1 %v1167_v0, %s11075_s26  ;;  %v11638_v44 = vand.u32 4294901760, %v1214_v6  ;;  %v11656_v0 = vsub.f32 %v1211_v43, %v11633_v32 }
 0x1b0   : > { %v11666_v19 = vsub.f32 %v1214_v6, %v11638_v44 }
 0x1b2   : > { %5152 = vrot.lane.b32.xlu0 %v1169_v63, %s11075_s26  ;;  %5146 = vrot.lane.b32.xlu1 %v11488_v7, %s11075_s26 }
 0x1b6   : > { %5150 = vrot.lane.b32.xlu0 %v1168_v62, %s11075_s26 }
 0x1ba   : > { %6078 = vrot.lane.b32.xlu0 %v11508_v51, %s11076_s27  ;;  %v1217_v51 = vsel %vm1206_vm2, %v11521_v4, 0  ;;  %v11661_v4 = vand.u32 4294901760, %v1220_v33 }
 0x1bb   : > { %v11653_v63 = vand.u32 4294901760, %v1217_v51 }
 0x1bd   : > { %v11680_v24 = vsub.f32 %v1217_v51, %v11653_v63 }
 0x1c8   : > { %v1201_v27 = vpop.permute.xlu1 %1200 }
 0x1c9   : > { %v1241_v36 = vsel %vm1206_vm2, %v1201_v27, 0 }
 0x1ca   : > { %v11559_v39 = vand.u32 4294901760, %v1241_v36 }
 0x1cc   : > { %v1205_v41 = vpop.permute.xlu0 %1204  ;;  %v1199_v42 = vpop.permute.xlu1 %1198  ;;  %v11566_v57 = vsub.f32 %v1241_v36, %v11559_v39 }
 0x1cd   : > { %v1245_v52 = vsel %vm1206_vm2, %v1205_v41, 0  ;;  %v1239_v58 = vsel %vm1206_vm2, %v1199_v42, 0 }
 0x1ce   : > { %v11563_v15 = vand.u32 4294901760, %v1245_v52  ;;  %v11571_v9 = vand.u32 4294901760, %v1239_v58  ;;  %v11582_v20 = vand.u32 4294901760, %v11566_v57 }
 0x1d0   : > { %v11569_v8 = vsub.f32 %v1245_v52, %v11563_v15  ;;  %9795 = vmatprep.subr.mxu0 %v11563_v15  ;;  %v1203_v10 = vpop.permute.xlu0 %1202  ;;  %v1195_v16 = vpop.permute.xlu1 %1194  ;;  %v11585_v21 = vsub.f32 %v1239_v58, %v11571_v9  ;;  %v1434_v48 = vsub.f32 %v11566_v57, %v11582_v20  ;;  %v1332_v52 = vand.u32 4294901760, %v11656_v0 }
 0x1d1   : > { %v1243_v13 = vsel %vm1206_vm2, %v1203_v10, 0  ;;  %9796 = vmatpush3.xpose.msra.mxu0 %v11563_v15  ;;  %v1235_v23 = vsel %vm1206_vm2, %v1195_v16, 0  ;;  %v1229_v58 = vsel %vm1206_vm2, %v11533_v14, 0  ;;  %v11687_v10 = vsub.f32 %v1220_v33, %v11661_v4 }
 0x1d2   : > { %v11576_v17 = vand.u32 4294901760, %v1243_v13  ;;  %v11579_v18 = vand.u32 4294901760, %v11569_v8  ;;  %v11602_v47 = vand.u32 4294901760, %v1235_v23  ;;  %v11612_v59 = vand.u32 4294901760, %v11585_v21 }
 0x1d3   : > { %v1435_v7 = vand.u32 4294901760, %v1434_v48  ;;  %v1342_v16 = vand.u32 4294901760, %v11666_v19  ;;  %v11701_v14 = vand.u32 4294901760, %v1229_v58  ;;  %v1352_v48 = vand.u32 4294901760, %v11680_v24 }
 0x1d4   : > { %v11588_v22 = vsub.f32 %v1243_v13, %v11576_v17  ;;  %9797 = vmatprep.subr.mxu0 %v11576_v17  ;;  %v1197_v28 = vpop.permute.xlu0 %1196  ;;  %v1420_v37 = vsub.f32 %v11569_v8, %v11579_v18  ;;  %v1191_v61 = vpop.permute.xlu1 %1190  ;;  %v11622_v5 = vsub.f32 %v1235_v23, %v11602_v47  ;;  %v1441_v25 = vsub.f32 %v11585_v21, %v11612_v59 }
 0x1d5   : > { %v1237_v30 = vsel %vm1206_vm2, %v1197_v28, 0  ;;  %9798 = vmatpush3.xpose.msra.mxu0 %v11576_v17  ;;  %v1231_v26 = vsel %vm1206_vm2, %v1191_v61, 0  ;;  %v11689_v13 = vand.u32 4294901760, %v1226_v12  ;;  %v1362_v61 = vand.u32 4294901760, %v11687_v10 }
 0x1d6   : > { %v11596_v34 = vand.u32 4294901760, %v1237_v30  ;;  %9799 = vmatprep.subr.mxu0 %v11559_v39  ;;  %v1421_v40 = vand.u32 4294901760, %v1420_v37  ;;  %v11600_v45 = vand.u32 4294901760, %v11588_v22  ;;  %v11642_v53 = vand.u32 4294901760, %v1231_v26 }
 0x1d7   : > { %v1442_v56 = vand.u32 4294901760, %v1441_v25  ;;  %v11650_v62 = vand.u32 4294901760, %v11622_v5  ;;  %v11719_v6 = vsub.f32 %v1229_v58, %v11701_v14  ;;  %v1363_v33 = vsub.f32 %v11687_v10, %v1362_v61 }
 0x1d8   : > { %v11607_v49 = vsub.f32 %v1237_v30, %v11596_v34  ;;  %9823 = vmatprep.subr.mxu1 %v1421_v40  ;;  %v1193_v55 = vpop.permute.xlu0 %1192  ;;  %v1427_v38 = vsub.f32 %v11588_v22, %v11600_v45  ;;  %v11669_v27 = vsub.f32 %v1231_v26, %v11642_v53  ;;  %v11699_v30 = vsub.f32 %v1223_v1, %v11677_v11 }
 0x1d9   : > { %v1233_v2 = vsel %vm1206_vm2, %v1193_v55, 0  ;;  %9800 = vmatpush3.xpose.msra.mxu0 %v11559_v39  ;;  %9824 = vmatpush3.xpose.msra.mxu1 %v1421_v40  ;;  %v1455_v41 = vsub.f32 %v11622_v5, %v11650_v62  ;;  %v1333_v40 = vsub.f32 %v11656_v0, %v1332_v52  ;;  %v11709_v55 = vsub.f32 %v1226_v12, %v11689_v13 }
 0x1da   : > { %9801 = vmatprep.subr.mxu0 %v11571_v9  ;;  %v1428_v3 = vand.u32 4294901760, %v1427_v38  ;;  %v11625_v29 = vand.u32 4294901760, %v1233_v2  ;;  %v11630_v31 = vand.u32 4294901760, %v11607_v49  ;;  %v11695_v37 = vand.u32 4294901760, %v11669_v27 }
 0x1db   : > { %v1456_v23 = vand.u32 4294901760, %v1455_v41  ;;  %v1343_v38 = vsub.f32 %v11666_v19, %v1342_v16  ;;  %v1334_v43 = vand.u32 4294901760, %v1333_v40  ;;  %v1372_v26 = vand.u32 4294901760, %v11699_v30 }
 0x1dc   : > { %9825 = vmatprep.subr.mxu1 %v1428_v3  ;;  %v11645_v54 = vsub.f32 %v1233_v2, %v11625_v29  ;;  %v1448_v60 = vsub.f32 %v11607_v49, %v11630_v31  ;;  %v1382_v51 = vand.u32 4294901760, %v11709_v55  ;;  %v1392_v12 = vand.u32 4294901760, %v11719_v6 }
 0x1dd   : > { %9802 = vmatpush3.xpose.msra.mxu0 %v11571_v9  ;;  %9826 = vmatpush3.xpose.msra.mxu1 %v1428_v3  ;;  %v1469_v3 = vsub.f32 %v11669_v27, %v11695_v37  ;;  %v1344_v25 = vand.u32 4294901760, %v1343_v38  ;;  %v1373_v1 = vsub.f32 %v11699_v30, %v1372_v26 }
 0x1de   : > { %9803 = vmatprep.subr.mxu0 %v11596_v34  ;;  %9827 = vmatprep.subr.mxu1 %v1435_v7  ;;  %v1449_v36 = vand.u32 4294901760, %v1448_v60  ;;  %v11674_v42 = vand.u32 4294901760, %v11645_v54  ;;  %v1383_v41 = vsub.f32 %v11709_v55, %v1382_v51  ;;  %v1393_v58 = vsub.f32 %v11719_v6, %v1392_v12 }
 0x1e0   : > { %v1462_v28 = vsub.f32 %v11645_v54, %v11674_v42 }
 0x1e1   : > { %9804 = vmatpush3.xpose.msra.mxu0 %v11596_v34  ;;  %9828 = vmatpush3.xpose.msra.mxu1 %v1435_v7  ;;  %v1353_v7 = vsub.f32 %v11680_v24, %v1352_v48 }
 0x1e2   : > { %9805 = vmatprep.subr.mxu0 %v11602_v47  ;;  %9829 = vmatprep.subr.mxu1 %v1442_v56  ;;  %v1463_v2 = vand.u32 4294901760, %v1462_v28 }
 0x1e3   : > { %v1354_v60 = vand.u32 4294901760, %v1353_v7 }
 0x1e5   : > { %9806 = vmatpush3.xpose.msra.mxu0 %v11602_v47  ;;  %9830 = vmatpush3.xpose.msra.mxu1 %v1442_v56  ;;  %v1470_v56 = vand.u32 4294901760, %v1469_v3 }
 0x1e6   : > { %9807 = vmatprep.subr.mxu0 %v11625_v29  ;;  %9831 = vmatprep.subr.mxu1 %v1449_v36 }
 0x1e9   : > { %9808 = vmatpush3.xpose.msra.mxu0 %v11625_v29  ;;  %9832 = vmatpush3.xpose.msra.mxu1 %v1449_v36  ;;  %v1364_v36 = vand.u32 4294901760, %v1363_v33 }
 0x1ea   : > { %9809 = vmatprep.subr.mxu0 %v11642_v53  ;;  %9833 = vmatprep.subr.mxu1 %v1456_v23 }
 0x1ed   : > { %9810 = vmatpush3.xpose.msra.mxu0 %v11642_v53  ;;  %9834 = vmatpush3.xpose.msra.mxu1 %v1456_v23  ;;  %v1384_v23 = vand.u32 4294901760, %v1383_v41 }
 0x1ee   : > { %9835 = vmatprep.subr.mxu1 %v1463_v2  ;;  %9851 = vmatprep.subr.mxu0 %v11569_v8 }
 0x1f0   : > { %9812 = vmatmul.mubr.f32.vlgmr.msra.gmra.mxu0 %v1334_v43 }
 0x1f1   : > { %9814 = vmatprep.mubr.f32.mxu0 %v1344_v25  ;;  %9836 = vmatpush3.xpose.msra.mxu1 %v1463_v2 }
 0x1f2   : > { %9852 = vmatpush3.xpose.msra.mxu0 %v11569_v8  ;;  %9837 = vmatprep.subr.mxu1 %v1470_v56  ;;  %v1374_v8 = vand.u32 4294901760, %v1373_v1 }
 0x1f3   : > { %9853 = vmatprep.subr.mxu0 %v11588_v22 }
 0x1f4   : > { %9815 = vmatmul.mubr.f32.gmra.mxu0 %v1354_v60 }
 0x1f5   : > { %9817 = vmatprep.mubr.f32.mxu0 %v1364_v36  ;;  %9838 = vmatpush3.xpose.msra.mxu1 %v1470_v56 }
 0x1f6   : > { %9854 = vmatpush3.xpose.msra.mxu0 %v11588_v22  ;;  %9879 = vmatprep.subr.mxu1 %v11563_v15  ;;  %v1394_v22 = vand.u32 4294901760, %v1393_v58 }
 0x1f7   : > { %9855 = vmatprep.subr.mxu0 %v11566_v57 }
 0x1f8   : > { %9818 = vmatmul.mubr.f32.gmra.mxu0 %v1374_v8  ;;  %9840 = vmatmul.mubr.f32.vlgmr.msra.gmra.mxu1 %v11633_v32 }
 0x1f9   : > { %9820 = vmatprep.mubr.f32.mxu0 %v1384_v23  ;;  %9842 = vmatprep.mubr.f32.mxu1 %v11638_v44 }
 0x1fa   : > { %9856 = vmatpush3.xpose.msra.mxu0 %v11566_v57  ;;  %9880 = vmatpush3.xpose.msra.mxu1 %v11563_v15 }
 0x1fb   : > { %9857 = vmatprep.subr.mxu0 %v11585_v21  ;;  %9881 = vmatprep.subr.mxu1 %v11576_v17 }
 0x1fc   : > { %9821 = vmatmul.mubr.f32.gmra.mxu0 %v1394_v22  ;;  %9843 = vmatmul.mubr.f32.gmra.mxu1 %v11653_v63 }
 0x1fd   : > { %9845 = vmatprep.mubr.f32.mxu1 %v11661_v4  ;;  %9867 = vmatprep.mubr.f32.mxu0 %v11504_v46  ;;  %v2157_v46 = vpop.permute.xlu0 %2156 }
 0x1fe   : > { %9858 = vmatpush3.xpose.msra.mxu0 %v11585_v21  ;;  %9882 = vmatpush3.xpose.msra.mxu1 %v11576_v17 }
 0x1ff   : > { %9859 = vmatprep.subr.mxu0 %v11607_v49  ;;  %9883 = vmatprep.subr.mxu1 %v11559_v39 }
 0x200   : > { %9846 = vmatmul.mubr.f32.gmra.mxu1 %v11677_v11 }
 0x201   : > { %9848 = vmatprep.mubr.f32.mxu1 %v11689_v13 }
 0x202   : > { %9860 = vmatpush3.xpose.msra.mxu0 %v11607_v49  ;;  %9884 = vmatpush3.xpose.msra.mxu1 %v11559_v39 }
 0x203   : > { %9861 = vmatprep.subr.mxu0 %v11622_v5  ;;  %9885 = vmatprep.subr.mxu1 %v11571_v9 }
 0x204   : > { %9849 = vmatmul.mubr.f32.gmra.mxu1 %v11701_v14 }
 0x205   : > { %9895 = vmatprep.mubr.f32.mxu1 %v1322_v50  ;;  %v2153_v50 = vpop.permute.xlu0 %2152 }
 0x206   : > { %9862 = vmatpush3.xpose.msra.mxu0 %v11622_v5  ;;  %9886 = vmatpush3.xpose.msra.mxu1 %v11571_v9 }
 0x207   : > { %9863 = vmatprep.subr.mxu0 %v11645_v54  ;;  %9887 = vmatprep.subr.mxu1 %v11596_v34 }
 0x209   : > { %v2149_v57 = vpop.permute.xlu0 %2148 }
 0x20a   : > { %9864 = vmatpush3.xpose.msra.mxu0 %v11645_v54  ;;  %9888 = vmatpush3.xpose.msra.mxu1 %v11596_v34 }
 0x20b   : > { %9865 = vmatprep.subr.mxu0 %v11669_v27  ;;  %9889 = vmatprep.subr.mxu1 %v11602_v47 }
 0x20e   : > { %9866 = vmatpush3.xpose.msra.mxu0 %v11669_v27  ;;  %9890 = vmatpush3.xpose.msra.mxu1 %v11602_v47 }
 0x20f   : > { %9891 = vmatprep.subr.mxu1 %v11625_v29  ;;  %9907 = vmatprep.subr.mxu0 %v11579_v18 }
 0x211   : > { %9868 = vmatmul.mubr.f32.vlgmr.msra.gmra.mxu0 %v11656_v0 }
 0x212   : > { %9870 = vmatprep.mubr.f32.mxu0 %v11666_v19  ;;  %9892 = vmatpush3.xpose.msra.mxu1 %v11625_v29 }
 0x213   : > { %9908 = vmatpush3.xpose.msra.mxu0 %v11579_v18  ;;  %9893 = vmatprep.subr.mxu1 %v11642_v53  ;;  %v2155_v18 = vpop.permute.xlu1 %2154 }
 0x214   : > { %9909 = vmatprep.subr.mxu0 %v11600_v45  ;;  %v2186_v49 = vsel %vm1206_vm2, %v2155_v18, 0 }
 0x215   : > { %9871 = vmatmul.mubr.f32.gmra.mxu0 %v11680_v24 }
 0x216   : > { %9873 = vmatprep.mubr.f32.mxu0 %v11687_v10  ;;  %9894 = vmatpush3.xpose.msra.mxu1 %v11642_v53  ;;  %v2180_v10 = vsel %vm1206_vm2, %v2149_v57, 0 }
 0x217   : > { %9910 = vmatpush3.xpose.msra.mxu0 %v11600_v45  ;;  %9935 = vmatprep.subr.mxu1 %v11563_v15  ;;  %v2151_v21 = vpop.permute.xlu1 %2150  ;;  %v11884_v40 = vand.u32 4294901760, %v2180_v10 }
 0x218   : > { %9911 = vmatprep.subr.mxu0 %v11582_v20  ;;  %v2182_v0 = vsel %vm1206_vm2, %v2151_v21, 0 }
 0x219   : > { %9874 = vmatmul.mubr.f32.gmra.mxu0 %v11699_v30  ;;  %9896 = vmatmul.mubr.f32.vlgmr.msra.gmra.mxu1 %v1332_v52  ;;  %v11906_v3 = vsub.f32 %v2180_v10, %v11884_v40 }
 0x21a   : > { %9876 = vmatprep.mubr.f32.mxu0 %v11709_v55  ;;  %9898 = vmatprep.mubr.f32.mxu1 %v1342_v16 }
 0x21b   : > { %9912 = vmatpush3.xpose.msra.mxu0 %v11582_v20  ;;  %9936 = vmatpush3.xpose.msra.mxu1 %v11563_v15  ;;  %v11811_v15 = vpop.permute.xlu0 %2144  ;;  %v2188_v20 = vsel %vm1206_vm2, %v2157_v46, 0  ;;  %v11930_v36 = vand.u32 4294901760, %v11906_v3 }
 0x21c   : > { %9913 = vmatprep.subr.mxu0 %v11612_v59  ;;  %9937 = vmatprep.subr.mxu1 %v11576_v17 }
 0x21d   : > { %9877 = vmatmul.mubr.f32.gmra.mxu0 %v11719_v6  ;;  %9899 = vmatmul.mubr.f32.gmra.mxu1 %v1352_v48 }
 0x21e   : > { %9901 = vmatprep.mubr.f32.mxu1 %v1362_v61  ;;  %9923 = vmatprep.mubr.f32.mxu0 %v11497_v35 }
 0x21f   : > { %9914 = vmatpush3.xpose.msra.mxu0 %v11612_v59  ;;  %9938 = vmatpush3.xpose.msra.mxu1 %v11576_v17  ;;  %v11824_v17 = vand.u32 4294901760, %v2188_v20  ;;  %v2119_v45 = vpop.permute.xlu0 %2118 }
 0x220   : > { %9915 = vmatprep.subr.mxu0 %v11630_v31  ;;  %9939 = vmatprep.subr.mxu1 %v11559_v39  ;;  %v2158_v5 = vsel %vm1206_vm2, %v2119_v45, 0 }
 0x221   : > { %9902 = vmatmul.mubr.f32.gmra.mxu1 %v1372_v26  ;;  %v11833_v59 = vsub.f32 %v2188_v20, %v11824_v17  ;;  %v2176_v26 = vsel %vm1206_vm2, %v11811_v15, 0 }
 0x222   : > { %9904 = vmatprep.mubr.f32.mxu1 %v1382_v51  ;;  %v11925_v60 = vand.u32 4294901760, %v2176_v26 }
 0x223   : > { %9916 = vmatpush3.xpose.msra.mxu0 %v11630_v31  ;;  %9940 = vmatpush3.xpose.msra.mxu1 %v11559_v39  ;;  %v2147_v39 = vpop.permute.xlu1 %2146  ;;  %v11836_v31 = vand.u32 4294901760, %v2186_v49  ;;  %v11846_v54 = vand.u32 4294901760, %v11833_v59  ;;  %v2123_v38 = vpop.permute.xlu0 %2122 }
 0x224   : > { %9917 = vmatprep.subr.mxu0 %v11650_v62  ;;  %9941 = vmatprep.subr.mxu1 %v11571_v9  ;;  %v2178_v30 = vsel %vm1206_vm2, %v2147_v39, 0  ;;  %v2162_v1 = vsel %vm1206_vm2, %v2123_v38, 0  ;;  %v11943_v22 = vsub.f32 %v2176_v26, %v11925_v60 }
 0x225   : > { %9905 = vmatmul.mubr.f32.gmra.mxu1 %v1392_v12  ;;  %v2363_v24 = vsub.f32 %v11833_v59, %v11846_v54  ;;  %v11898_v2 = vand.u32 4294901760, %v2178_v30  ;;  %v11939_v23 = vand.u32 4294901760, %v2162_v1 }
 0x226   : > { %9951 = vmatprep.mubr.f32.mxu1 %v11497_v35  ;;  %v2184_v35 = vsel %vm1206_vm2, %v2153_v50, 0  ;;  %v2391_v50 = vsub.f32 %v11906_v3, %v11930_v36 }
 0x227   : > { %9918 = vmatpush3.xpose.msra.mxu0 %v11650_v62  ;;  %9942 = vmatpush3.xpose.msra.mxu1 %v11571_v9  ;;  %v11843_v9 = vand.u32 4294901760, %v2158_v5  ;;  %v11849_v62 = vsub.f32 %v2186_v49, %v11836_v31  ;;  %v11852_v19 = vand.u32 4294901760, %v2184_v35  ;;  %v2143_v27 = vpop.permute.xlu1 %2142  ;;  %v11917_v25 = vsub.f32 %v2178_v30, %v11898_v2  ;;  %v2127_v51 = vpop.permute.xlu0 %2126 }
 0x228   : > { %9919 = vmatprep.subr.mxu0 %v11674_v42  ;;  %9943 = vmatprep.subr.mxu1 %v11596_v34  ;;  %v2174_v33 = vsel %vm1206_vm2, %v2143_v27, 0  ;;  %v2166_v46 = vsel %vm1206_vm2, %v2127_v51, 0  ;;  %v11963_v20 = vsub.f32 %v2162_v1, %v11939_v23 }
 0x229   : > { %v11867_v52 = vsub.f32 %v2184_v35, %v11852_v19  ;;  %v11936_v8 = vand.u32 4294901760, %v2174_v33  ;;  %v11950_v57 = vand.u32 4294901760, %v11917_v25  ;;  %v11966_v45 = vand.u32 4294901760, %v2166_v46 }
 0x22a   : > { %v2285_v30 = vand.u32 4294901760, %v11963_v20 }
 0x22b   : > { %9920 = vmatpush3.xpose.msra.mxu0 %v11674_v42  ;;  %9944 = vmatpush3.xpose.msra.mxu1 %v11596_v34  ;;  %v11859_v34 = vsub.f32 %v2158_v5, %v11843_v9  ;;  %v11861_v42 = vand.u32 4294901760, %v2182_v0  ;;  %v2121_v16 = vpop.permute.xlu1 %2120  ;;  %v11891_v55 = vand.u32 4294901760, %v11867_v52  ;;  %v2131_v18 = vpop.permute.xlu0 %2130  ;;  %v2392_v5 = vand.u32 4294901760, %v2391_v50 }
 0x22c   : > { %9921 = vmatprep.subr.mxu0 %v11695_v37  ;;  %9945 = vmatprep.subr.mxu1 %v11602_v47  ;;  %v2170_v39 = vsel %vm1206_vm2, %v2131_v18, 0  ;;  %v2398_v35 = vsub.f32 %v11917_v25, %v11950_v57  ;;  %v11985_v10 = vsub.f32 %v2166_v46, %v11966_v45 }
 0x22d   : > { %v2265_v28 = vand.u32 4294901760, %v11859_v34  ;;  %v2377_v7 = vsub.f32 %v11867_v52, %v11891_v55 }
 0x22f   : > { %9922 = vmatpush3.xpose.msra.mxu0 %v11695_v37  ;;  %9946 = vmatpush3.xpose.msra.mxu1 %v11602_v47  ;;  %v11872_v47 = vand.u32 4294901760, %v11849_v62  ;;  %v11880_v37 = vsub.f32 %v2182_v0, %v11861_v42  ;;  %v2266_v61 = vsub.f32 %v11859_v34, %v2265_v28  ;;  %v2125_v6 = vpop.permute.xlu1 %2124  ;;  %v2378_v12 = vand.u32 4294901760, %v2377_v7 }
 0x230   : > { %9947 = vmatprep.subr.mxu1 %v11625_v29  ;;  %9963 = vmatprep.subr.mxu0 %v11824_v17  ;;  %v2164_v58 = vsel %vm1206_vm2, %v2125_v6, 0  ;;  %v11974_v0 = vand.u32 4294901760, %v11943_v22 }
 0x231   : > { %v2370_v48 = vsub.f32 %v11849_v62, %v11872_v47  ;;  %v11956_v15 = vand.u32 4294901760, %v2164_v58 }
 0x232   : > { %9924 = vmatmul.mubr.f32.vlgmr.msra.gmra.mxu0 %v11633_v32  ;;  %v2405_v38 = vsub.f32 %v11943_v22, %v11974_v0 }
 0x233   : > { %9926 = vmatprep.mubr.f32.mxu0 %v11638_v44  ;;  %9948 = vmatpush3.xpose.msra.mxu1 %v11625_v29  ;;  %v2364_v29 = vand.u32 4294901760, %v2363_v24  ;;  %v2371_v43 = vand.u32 4294901760, %v2370_v48  ;;  %v11979_v24 = vsub.f32 %v2164_v58, %v11956_v15  ;;  %v2399_v48 = vand.u32 4294901760, %v2398_v35 }
 0x234   : > { %9964 = vmatpush3.xpose.msra.mxu0 %v11824_v17  ;;  %9949 = vmatprep.subr.mxu1 %v11642_v53  ;;  %v2406_v51 = vand.u32 4294901760, %v2405_v38 }
 0x235   : > { %9965 = vmatprep.subr.mxu0 %v11836_v31  ;;  %v2295_v26 = vand.u32 4294901760, %v11979_v24 }
 0x236   : > { %9927 = vmatmul.mubr.f32.gmra.mxu0 %v11653_v63 }
 0x237   : > { %9929 = vmatprep.mubr.f32.mxu0 %v11661_v4  ;;  %9950 = vmatpush3.xpose.msra.mxu1 %v11642_v53  ;;  %v11903_v53 = vand.u32 4294901760, %v11880_v37 }
 0x238   : > { %9966 = vmatpush3.xpose.msra.mxu0 %v11836_v31  ;;  %9991 = vmatprep.subr.mxu1 %v2364_v29 }
 0x239   : > { %9967 = vmatprep.subr.mxu0 %v11852_v19  ;;  %v2384_v56 = vsub.f32 %v11880_v37, %v11903_v53 }
 0x23a   : > { %9930 = vmatmul.mubr.f32.gmra.mxu0 %v11677_v11  ;;  %9952 = vmatmul.mubr.f32.vlgmr.msra.gmra.mxu1 %v11633_v32  ;;  %v2267_v32 = vand.u32 4294901760, %v2266_v61 }
 0x23b   : > { %9932 = vmatprep.mubr.f32.mxu0 %v11689_v13  ;;  %9954 = vmatprep.mubr.f32.mxu1 %v11638_v44  ;;  %v2160_v44 = vsel %vm1206_vm2, %v2121_v16, 0 }
 0x23c   : > { %9968 = vmatpush3.xpose.msra.mxu0 %v11852_v19  ;;  %9992 = vmatpush3.xpose.msra.mxu1 %v2364_v29  ;;  %v11933_v41 = vand.u32 4294901760, %v2160_v44  ;;  %v11988_v29 = vand.u32 4294901760, %v2170_v39 }
 0x23d   : > { %9969 = vmatprep.subr.mxu0 %v11861_v42  ;;  %9993 = vmatprep.subr.mxu1 %v2371_v43 }
 0x23e   : > { %9933 = vmatmul.mubr.f32.gmra.mxu0 %v11701_v14  ;;  %9955 = vmatmul.mubr.f32.gmra.mxu1 %v11653_v63  ;;  %v2129_v63 = vpop.permute.xlu1 %2128 }
 0x23f   : > { %9957 = vmatprep.mubr.f32.mxu1 %v11661_v4  ;;  %9979 = vmatprep.mubr.f32.mxu0 %v2267_v32  ;;  %v2385_v4 = vand.u32 4294901760, %v2384_v56  ;;  %v2168_v21 = vsel %vm1206_vm2, %v2129_v63, 0  ;;  %v12008_v32 = vsub.f32 %v2170_v39, %v11988_v29  ;;  %v2296_v63 = vsub.f32 %v11979_v24, %v2295_v26 }
 0x240   : > { %9970 = vmatpush3.xpose.msra.mxu0 %v11861_v42  ;;  %9994 = vmatpush3.xpose.msra.mxu1 %v2371_v43 }
 0x241   : > { %9971 = vmatprep.subr.mxu0 %v11884_v40  ;;  %9995 = vmatprep.subr.mxu1 %v2378_v12  ;;  %v2325_v50 = vand.u32 4294901760, %v12008_v32 }
 0x242   : > { %9958 = vmatmul.mubr.f32.gmra.mxu1 %v11677_v11  ;;  %v11954_v11 = vsub.f32 %v2160_v44, %v11933_v41  ;;  %v2133_v49 = vpop.permute.xlu1 %2132  ;;  %v2305_v44 = vand.u32 4294901760, %v11985_v10 }
 0x243   : > { %9960 = vmatprep.mubr.f32.mxu1 %v11689_v13  ;;  %v11960_v13 = vsub.f32 %v2174_v33, %v11936_v8  ;;  %v2172_v16 = vsel %vm1206_vm2, %v2133_v49, 0  ;;  %v2286_v33 = vsub.f32 %v11963_v20, %v2285_v30  ;;  %v2326_v35 = vsub.f32 %v12008_v32, %v2325_v50 }
 0x244   : > { %9972 = vmatpush3.xpose.msra.mxu0 %v11884_v40  ;;  %9996 = vmatpush3.xpose.msra.mxu1 %v2378_v12  ;;  %v2275_v27 = vand.u32 4294901760, %v11954_v11  ;;  %v12003_v7 = vand.u32 4294901760, %v2172_v16  ;;  %v2306_v46 = vsub.f32 %v11985_v10, %v2305_v44 }
 0x245   : > { %9973 = vmatprep.subr.mxu0 %v11898_v2  ;;  %9997 = vmatprep.subr.mxu1 %v2385_v4  ;;  %v11994_v61 = vand.u32 4294901760, %v11960_v13 }
 0x246   : > { %9961 = vmatmul.mubr.f32.gmra.mxu1 %v11701_v14  ;;  %v11981_v14 = vand.u32 4294901760, %v2168_v21  ;;  %v2276_v6 = vsub.f32 %v11954_v11, %v2275_v27  ;;  %v12018_v12 = vsub.f32 %v2172_v16, %v12003_v7 }
 0x247   : > { %10007 = vmatprep.mubr.f32.mxu1 %v11843_v9  ;;  %v2412_v56 = vsub.f32 %v11960_v13, %v11994_v61 }
 0x248   : > { %9974 = vmatpush3.xpose.msra.mxu0 %v11898_v2  ;;  %9998 = vmatpush3.xpose.msra.mxu1 %v2385_v4  ;;  %v12001_v43 = vsub.f32 %v2168_v21, %v11981_v14  ;;  %v2277_v1 = vand.u32 4294901760, %v2276_v6  ;;  %v2287_v4 = vand.u32 4294901760, %v2286_v33  ;;  %v2297_v21 = vand.u32 4294901760, %v2296_v63 }
 0x249   : > { %9975 = vmatprep.subr.mxu0 %v11925_v60  ;;  %9999 = vmatprep.subr.mxu1 %v2392_v5  ;;  %v2413_v18 = vand.u32 4294901760, %v2412_v56  ;;  %v2335_v39 = vand.u32 4294901760, %v12018_v12 }
 0x24a   : > { %v2315_v58 = vand.u32 4294901760, %v12001_v43 }
 0x24b   : > { %v2336_v16 = vsub.f32 %v12018_v12, %v2335_v39 }
 0x24c   : > { %9976 = vmatpush3.xpose.msra.mxu0 %v11925_v60  ;;  %10000 = vmatpush3.xpose.msra.mxu1 %v2392_v5  ;;  %v2316_v49 = vsub.f32 %v12001_v43, %v2315_v58  ;;  %v2307_v5 = vand.u32 4294901760, %v2306_v46 }
 0x24d   : > { %9977 = vmatprep.subr.mxu0 %v11936_v8  ;;  %10001 = vmatprep.subr.mxu1 %v2399_v48 }
 0x250   : > { %9978 = vmatpush3.xpose.msra.mxu0 %v11936_v8  ;;  %10002 = vmatpush3.xpose.msra.mxu1 %v2399_v48  ;;  %v2327_v48 = vand.u32 4294901760, %v2326_v35 }
 0x251   : > { %10003 = vmatprep.subr.mxu1 %v2406_v51  ;;  %10019 = vmatprep.subr.mxu0 %v11833_v59 }
 0x253   : > { %9980 = vmatmul.mubr.f32.vlgmr.msra.gmra.mxu0 %v2277_v1 }
 0x254   : > { %9982 = vmatprep.mubr.f32.mxu0 %v2287_v4  ;;  %10004 = vmatpush3.xpose.msra.mxu1 %v2406_v51 }
 0x255   : > { %10020 = vmatpush3.xpose.msra.mxu0 %v11833_v59  ;;  %10005 = vmatprep.subr.mxu1 %v2413_v18  ;;  %v2317_v59 = vand.u32 4294901760, %v2316_v49 }
 0x256   : > { %10021 = vmatprep.subr.mxu0 %v11849_v62 }
 0x257   : > { %9983 = vmatmul.mubr.f32.gmra.mxu0 %v2297_v21 }
 0x258   : > { %9985 = vmatprep.mubr.f32.mxu0 %v2307_v5  ;;  %10006 = vmatpush3.xpose.msra.mxu1 %v2413_v18 }
 0x259   : > { %10022 = vmatpush3.xpose.msra.mxu0 %v11849_v62  ;;  %10047 = vmatprep.subr.mxu1 %v11824_v17  ;;  %v2337_v62 = vand.u32 4294901760, %v2336_v16 }
 0x25a   : > { %10023 = vmatprep.subr.mxu0 %v11867_v52 }
 0x25b   : > { %9986 = vmatmul.mubr.f32.gmra.mxu0 %v2317_v59  ;;  %10008 = vmatmul.mubr.f32.vlgmr.msra.gmra.mxu1 %v11933_v41 }
 0x25c   : > { %9988 = vmatprep.mubr.f32.mxu0 %v2327_v48  ;;  %10010 = vmatprep.mubr.f32.mxu1 %v11939_v23 }
 0x25d   : > { %10024 = vmatpush3.xpose.msra.mxu0 %v11867_v52  ;;  %10048 = vmatpush3.xpose.msra.mxu1 %v11824_v17 }
 0x25e   : > { %10025 = vmatprep.subr.mxu0 %v11880_v37  ;;  %10049 = vmatprep.subr.mxu1 %v11836_v31 }
 0x25f   : > { %9989 = vmatmul.mubr.f32.gmra.mxu0 %v2337_v62  ;;  %10011 = vmatmul.mubr.f32.gmra.mxu1 %v11956_v15 }
 0x260   : > { %10013 = vmatprep.mubr.f32.mxu1 %v11966_v45  ;;  %10035 = vmatprep.mubr.f32.mxu0 %v11859_v34  ;;  %v3099_v34 = vpop.permute.xlu0 %3098 }
 0x261   : > { %10026 = vmatpush3.xpose.msra.mxu0 %v11880_v37  ;;  %10050 = vmatpush3.xpose.msra.mxu1 %v11836_v31 }
 0x262   : > { %10027 = vmatprep.subr.mxu0 %v11906_v3  ;;  %10051 = vmatprep.subr.mxu1 %v11852_v19 }
 0x263   : > { %10014 = vmatmul.mubr.f32.gmra.mxu1 %v11981_v14 }
 0x264   : > { %10016 = vmatprep.mubr.f32.mxu1 %v11988_v29  ;;  %v3095_v52 = vpop.permute.xlu0 %3094 }
 0x265   : > { %10028 = vmatpush3.xpose.msra.mxu0 %v11906_v3  ;;  %10052 = vmatpush3.xpose.msra.mxu1 %v11852_v19 }
 0x266   : > { %10029 = vmatprep.subr.mxu0 %v11917_v25  ;;  %10053 = vmatprep.subr.mxu1 %v11861_v42 }
 0x267   : > { %10017 = vmatmul.mubr.f32.gmra.mxu1 %v12003_v7 }
 0x268   : > { %10063 = vmatprep.mubr.f32.mxu1 %v2265_v28  ;;  %v3130_v28 = vsel %vm1206_vm2, %v3099_v34, 0 }
 0x269   : > { %10030 = vmatpush3.xpose.msra.mxu0 %v11917_v25  ;;  %10054 = vmatpush3.xpose.msra.mxu1 %v11861_v42 }
 0x26a   : > { %10031 = vmatprep.subr.mxu0 %v11943_v22  ;;  %10055 = vmatprep.subr.mxu1 %v11884_v40 }
 0x26d   : > { %10032 = vmatpush3.xpose.msra.mxu0 %v11943_v22  ;;  %10056 = vmatpush3.xpose.msra.mxu1 %v11884_v40 }
 0x26e   : > { %10033 = vmatprep.subr.mxu0 %v11960_v13  ;;  %10057 = vmatprep.subr.mxu1 %v11898_v2 }
 0x271   : > { %10034 = vmatpush3.xpose.msra.mxu0 %v11960_v13  ;;  %10058 = vmatpush3.xpose.msra.mxu1 %v11898_v2 }
 0x272   : > { %10059 = vmatprep.subr.mxu1 %v11925_v60  ;;  %10075 = vmatprep.subr.mxu0 %v11846_v54 }
 0x274   : > { %10036 = vmatmul.mubr.f32.vlgmr.msra.gmra.mxu0 %v11954_v11 }
 0x275   : > { %10038 = vmatprep.mubr.f32.mxu0 %v11963_v20  ;;  %10060 = vmatpush3.xpose.msra.mxu1 %v11925_v60 }
 0x276   : > { %10076 = vmatpush3.xpose.msra.mxu0 %v11846_v54  ;;  %10061 = vmatprep.subr.mxu1 %v11936_v8  ;;  %v3091_v54 = vpop.permute.xlu0 %3090 }
 0x277   : > { %10077 = vmatprep.subr.mxu0 %v11872_v47 }
 0x278   : > { %10039 = vmatmul.mubr.f32.gmra.mxu0 %v11979_v24 }
 0x279   : > { %10041 = vmatprep.mubr.f32.mxu0 %v11985_v10  ;;  %10062 = vmatpush3.xpose.msra.mxu1 %v11936_v8  ;;  %v3122_v10 = vsel %vm1206_vm2, %v3091_v54, 0 }
 0x27a   : > { %10078 = vmatpush3.xpose.msra.mxu0 %v11872_v47  ;;  %10103 = vmatprep.subr.mxu1 %v11824_v17  ;;  %v3097_v47 = vpop.permute.xlu1 %3096 }
 0x27b   : > { %10079 = vmatprep.subr.mxu0 %v11891_v55 }
 0x27c   : > { %10042 = vmatmul.mubr.f32.gmra.mxu0 %v12001_v43  ;;  %10064 = vmatmul.mubr.f32.vlgmr.msra.gmra.mxu1 %v2275_v27  ;;  %v12183_v43 = vand.u32 4294901760, %v3122_v10 }
 0x27d   : > { %10044 = vmatprep.mubr.f32.mxu0 %v12008_v32  ;;  %10066 = vmatprep.mubr.f32.mxu1 %v2285_v30 }
 0x27e   : > { %10080 = vmatpush3.xpose.msra.mxu0 %v11891_v55  ;;  %10104 = vmatpush3.xpose.msra.mxu1 %v11824_v17  ;;  %v12110_v17 = vpop.permute.xlu0 %3086  ;;  %v3093_v37 = vpop.permute.xlu1 %3092  ;;  %v12205_v56 = vsub.f32 %v3122_v10, %v12183_v43 }
 0x27f   : > { %10081 = vmatprep.subr.mxu0 %v11903_v53  ;;  %10105 = vmatprep.subr.mxu1 %v11836_v31  ;;  %v3124_v11 = vsel %vm1206_vm2, %v3093_v37, 0 }
 0x280   : > { %10045 = vmatmul.mubr.f32.gmra.mxu0 %v12018_v12  ;;  %10067 = vmatmul.mubr.f32.gmra.mxu1 %v2295_v26  ;;  %v12229_v5 = vand.u32 4294901760, %v12205_v56 }
 0x281   : > { %10069 = vmatprep.mubr.f32.mxu1 %v2305_v44  ;;  %10091 = vmatprep.mubr.f32.mxu0 %v11843_v9 }
 0x282   : > { %10082 = vmatpush3.xpose.msra.mxu0 %v11903_v53  ;;  %10106 = vmatpush3.xpose.msra.mxu1 %v11836_v31  ;;  %v12123_v31 = vand.u32 4294901760, %v3130_v28  ;;  %v3061_v55 = vpop.permute.xlu0 %3060  ;;  %v3128_v53 = vsel %vm1206_vm2, %v3097_v47, 0 }
 0x283   : > { %10083 = vmatprep.subr.mxu0 %v11930_v36  ;;  %10107 = vmatprep.subr.mxu1 %v11852_v19  ;;  %v3100_v25 = vsel %vm1206_vm2, %v3061_v55, 0 }
 0x284   : > { %10070 = vmatmul.mubr.f32.gmra.mxu1 %v2315_v58  ;;  %v12132_v3 = vsub.f32 %v3130_v28, %v12123_v31  ;;  %v3118_v58 = vsel %vm1206_vm2, %v12110_v17, 0 }
 0x285   : > { %10072 = vmatprep.mubr.f32.mxu1 %v2325_v50  ;;  %v12224_v21 = vand.u32 4294901760, %v3118_v58 }
 0x286   : > { %10084 = vmatpush3.xpose.msra.mxu0 %v11930_v36  ;;  %10108 = vmatpush3.xpose.msra.mxu1 %v11852_v19  ;;  %v3089_v19 = vpop.permute.xlu1 %3088  ;;  %v12135_v36 = vand.u32 4294901760, %v3128_v53  ;;  %v12145_v22 = vand.u32 4294901760, %v12132_v3  ;;  %v3065_v33 = vpop.permute.xlu0 %3064 }
 0x287   : > { %10085 = vmatprep.subr.mxu0 %v11950_v57  ;;  %10109 = vmatprep.subr.mxu1 %v11861_v42  ;;  %v3120_v6 = vsel %vm1206_vm2, %v3089_v19, 0  ;;  %v3104_v49 = vsel %vm1206_vm2, %v3065_v33, 0  ;;  %v12242_v62 = vsub.f32 %v3118_v58, %v12224_v21 }
 0x288   : > { %10073 = vmatmul.mubr.f32.gmra.mxu1 %v2335_v39  ;;  %v3305_v27 = vsub.f32 %v12132_v3, %v12145_v22  ;;  %v12197_v51 = vand.u32 4294901760, %v3120_v6  ;;  %v12238_v48 = vand.u32 4294901760, %v3104_v49 }
 0x289   : > { %10119 = vmatprep.mubr.f32.mxu1 %v11843_v9  ;;  %v3126_v9 = vsel %vm1206_vm2, %v3095_v52, 0  ;;  %v3333_v52 = vsub.f32 %v12205_v56, %v12229_v5 }
 0x28a   : > { %10086 = vmatpush3.xpose.msra.mxu0 %v11950_v57  ;;  %10110 = vmatpush3.xpose.msra.mxu1 %v11861_v42  ;;  %v12142_v42 = vand.u32 4294901760, %v3100_v25  ;;  %v12148_v57 = vsub.f32 %v3128_v53, %v12135_v36  ;;  %v12151_v13 = vand.u32 4294901760, %v3126_v9  ;;  %v3085_v20 = vpop.permute.xlu1 %3084  ;;  %v12216_v4 = vsub.f32 %v3120_v6, %v12197_v51  ;;  %v3069_v50 = vpop.permute.xlu0 %3068 }
 0x28b   : > { %10087 = vmatprep.subr.mxu0 %v11974_v0  ;;  %10111 = vmatprep.subr.mxu1 %v11884_v40  ;;  %v3116_v46 = vsel %vm1206_vm2, %v3085_v20, 0  ;;  %v3108_v34 = vsel %vm1206_vm2, %v3069_v50, 0  ;;  %v12262_v28 = vsub.f32 %v3104_v49, %v12238_v48 }
 0x28c   : > { %v12166_v24 = vsub.f32 %v3126_v9, %v12151_v13  ;;  %v12235_v59 = vand.u32 4294901760, %v3116_v46  ;;  %v12249_v54 = vand.u32 4294901760, %v12216_v4  ;;  %v12265_v55 = vand.u32 4294901760, %v3108_v34 }
 0x28d   : > { %v3227_v6 = vand.u32 4294901760, %v12262_v28 }
 0x28e   : > { %10088 = vmatpush3.xpose.msra.mxu0 %v11974_v0  ;;  %10112 = vmatpush3.xpose.msra.mxu1 %v11884_v40  ;;  %v12158_v40 = vsub.f32 %v3100_v25, %v12142_v42  ;;  %v12160_v0 = vand.u32 4294901760, %v3124_v11  ;;  %v3063_v30 = vpop.permute.xlu1 %3062  ;;  %v12190_v32 = vand.u32 4294901760, %v12166_v24  ;;  %v3073_v47 = vpop.permute.xlu0 %3072  ;;  %v3334_v25 = vand.u32 4294901760, %v3333_v52 }
 0x28f   : > { %10089 = vmatprep.subr.mxu0 %v11994_v61  ;;  %10113 = vmatprep.subr.mxu1 %v11898_v2  ;;  %v3112_v19 = vsel %vm1206_vm2, %v3073_v47, 0  ;;  %v3340_v9 = vsub.f32 %v12216_v4, %v12249_v54  ;;  %v12284_v10 = vsub.f32 %v3108_v34, %v12265_v55 }
 0x290   : > { %v3207_v38 = vand.u32 4294901760, %v12158_v40  ;;  %v3319_v63 = vsub.f32 %v12166_v24, %v12190_v32 }
 0x292   : > { %10090 = vmatpush3.xpose.msra.mxu0 %v11994_v61  ;;  %10114 = vmatpush3.xpose.msra.mxu1 %v11898_v2  ;;  %v12171_v2 = vand.u32 4294901760, %v12148_v57  ;;  %v12179_v61 = vsub.f32 %v3124_v11, %v12160_v0  ;;  %v3208_v44 = vsub.f32 %v12158_v40, %v3207_v38  ;;  %v3067_v1 = vpop.permute.xlu1 %3066  ;;  %v3320_v39 = vand.u32 4294901760, %v3319_v63 }
 0x293   : > { %10115 = vmatprep.subr.mxu1 %v11925_v60  ;;  %10131 = vmatprep.subr.mxu0 %v12123_v31  ;;  %v3106_v16 = vsel %vm1206_vm2, %v3067_v1, 0  ;;  %v12273_v11 = vand.u32 4294901760, %v12242_v62 }
 0x294   : > { %v3312_v26 = vsub.f32 %v12148_v57, %v12171_v2  ;;  %v12255_v17 = vand.u32 4294901760, %v3106_v16 }
 0x295   : > { %10092 = vmatmul.mubr.f32.vlgmr.msra.gmra.mxu0 %v11933_v41  ;;  %v3347_v33 = vsub.f32 %v12242_v62, %v12273_v11 }
 0x296   : > { %10094 = vmatprep.mubr.f32.mxu0 %v11939_v23  ;;  %10116 = vmatpush3.xpose.msra.mxu1 %v11925_v60  ;;  %v3306_v60 = vand.u32 4294901760, %v3305_v27  ;;  %v3313_v12 = vand.u32 4294901760, %v3312_v26  ;;  %v12278_v27 = vsub.f32 %v3106_v16, %v12255_v17  ;;  %v3341_v26 = vand.u32 4294901760, %v3340_v9 }
 0x297   : > { %10132 = vmatpush3.xpose.msra.mxu0 %v12123_v31  ;;  %10117 = vmatprep.subr.mxu1 %v11936_v8  ;;  %v3348_v50 = vand.u32 4294901760, %v3347_v33 }
 0x298   : > { %10133 = vmatprep.subr.mxu0 %v12135_v36  ;;  %v3237_v58 = vand.u32 4294901760, %v12278_v27 }
 0x299   : > { %10095 = vmatmul.mubr.f32.gmra.mxu0 %v11956_v15 }
 0x29a   : > { %10097 = vmatprep.mubr.f32.mxu0 %v11966_v45  ;;  %10118 = vmatpush3.xpose.msra.mxu1 %v11936_v8  ;;  %v12202_v8 = vand.u32 4294901760, %v12179_v61 }
 0x29b   : > { %10134 = vmatpush3.xpose.msra.mxu0 %v12135_v36  ;;  %10159 = vmatprep.subr.mxu1 %v3306_v60 }
 0x29c   : > { %10135 = vmatprep.subr.mxu0 %v12151_v13  ;;  %v3326_v18 = vsub.f32 %v12179_v61, %v12202_v8 }
 0x29d   : > { %10098 = vmatmul.mubr.f32.gmra.mxu0 %v11981_v14  ;;  %10120 = vmatmul.mubr.f32.vlgmr.msra.gmra.mxu1 %v11933_v41  ;;  %v3209_v41 = vand.u32 4294901760, %v3208_v44 }
 0x29e   : > { %10100 = vmatprep.mubr.f32.mxu0 %v11988_v29  ;;  %10122 = vmatprep.mubr.f32.mxu1 %v11939_v23  ;;  %v3102_v23 = vsel %vm1206_vm2, %v3063_v30, 0 }
 0x29f   : > { %10136 = vmatpush3.xpose.msra.mxu0 %v12151_v13  ;;  %10160 = vmatpush3.xpose.msra.mxu1 %v3306_v60  ;;  %v12232_v35 = vand.u32 4294901760, %v3102_v23  ;;  %v12287_v60 = vand.u32 4294901760, %v3112_v19 }
 0x2a0   : > { %10137 = vmatprep.subr.mxu0 %v12160_v0  ;;  %10161 = vmatprep.subr.mxu1 %v3313_v12 }
 0x2a1   : > { %10101 = vmatmul.mubr.f32.gmra.mxu0 %v12003_v7  ;;  %10123 = vmatmul.mubr.f32.gmra.mxu1 %v11956_v15  ;;  %v3071_v15 = vpop.permute.xlu1 %3070 }
 0x2a2   : > { %10125 = vmatprep.mubr.f32.mxu1 %v11966_v45  ;;  %10147 = vmatprep.mubr.f32.mxu0 %v3209_v41  ;;  %v3327_v45 = vand.u32 4294901760, %v3326_v18  ;;  %v3110_v37 = vsel %vm1206_vm2, %v3071_v15, 0  ;;  %v12307_v41 = vsub.f32 %v3112_v19, %v12287_v60  ;;  %v3238_v15 = vsub.f32 %v12278_v27, %v3237_v58 }
 0x2a3   : > { %10138 = vmatpush3.xpose.msra.mxu0 %v12160_v0  ;;  %10162 = vmatpush3.xpose.msra.mxu1 %v3313_v12 }
 0x2a4   : > { %10139 = vmatprep.subr.mxu0 %v12183_v43  ;;  %10163 = vmatprep.subr.mxu1 %v3320_v39  ;;  %v3267_v52 = vand.u32 4294901760, %v12307_v41 }
 0x2a5   : > { %10126 = vmatmul.mubr.f32.gmra.mxu1 %v11981_v14  ;;  %v12253_v14 = vsub.f32 %v3102_v23, %v12232_v35  ;;  %v3075_v53 = vpop.permute.xlu1 %3074  ;;  %v3247_v23 = vand.u32 4294901760, %v12284_v10 }
 0x2a6   : > { %10128 = vmatprep.mubr.f32.mxu1 %v11988_v29  ;;  %v12259_v29 = vsub.f32 %v3116_v46, %v12235_v59  ;;  %v3114_v30 = vsel %vm1206_vm2, %v3075_v53, 0  ;;  %v3228_v46 = vsub.f32 %v12262_v28, %v3227_v6  ;;  %v3239_v53 = vand.u32 4294901760, %v3238_v15 }
 0x2a7   : > { %10140 = vmatpush3.xpose.msra.mxu0 %v12183_v43  ;;  %10164 = vmatpush3.xpose.msra.mxu1 %v3320_v39  ;;  %v3217_v20 = vand.u32 4294901760, %v12253_v14  ;;  %v12302_v63 = vand.u32 4294901760, %v3114_v30  ;;  %v3248_v34 = vsub.f32 %v12284_v10, %v3247_v23 }
 0x2a8   : > { %10141 = vmatprep.subr.mxu0 %v12197_v51  ;;  %10165 = vmatprep.subr.mxu1 %v3327_v45  ;;  %v12293_v44 = vand.u32 4294901760, %v12259_v29 }
 0x2a9   : > { %10129 = vmatmul.mubr.f32.gmra.mxu1 %v12003_v7  ;;  %v12280_v7 = vand.u32 4294901760, %v3110_v37  ;;  %v3218_v1 = vsub.f32 %v12253_v14, %v3217_v20  ;;  %v12317_v39 = vsub.f32 %v3114_v30, %v12302_v63  ;;  %v3249_v9 = vand.u32 4294901760, %v3248_v34 }
 0x2aa   : > { %10175 = vmatprep.mubr.f32.mxu1 %v12142_v42  ;;  %v3354_v18 = vsub.f32 %v12259_v29, %v12293_v44  ;;  %v3268_v30 = vsub.f32 %v12307_v41, %v3267_v52 }
 0x2ab   : > { %10142 = vmatpush3.xpose.msra.mxu0 %v12197_v51  ;;  %10166 = vmatpush3.xpose.msra.mxu1 %v3327_v45  ;;  %v12300_v12 = vsub.f32 %v3110_v37, %v12280_v7  ;;  %v3219_v49 = vand.u32 4294901760, %v3218_v1  ;;  %v3229_v45 = vand.u32 4294901760, %v3228_v46 }
 0x2ac   : > { %10143 = vmatprep.subr.mxu0 %v12224_v21  ;;  %10167 = vmatprep.subr.mxu1 %v3334_v25  ;;  %v3355_v37 = vand.u32 4294901760, %v3354_v18  ;;  %v3269_v1 = vand.u32 4294901760, %v3268_v30 }
 0x2ad   : > { %v3257_v16 = vand.u32 4294901760, %v12300_v12 }
 0x2af   : > { %10144 = vmatpush3.xpose.msra.mxu0 %v12224_v21  ;;  %10168 = vmatpush3.xpose.msra.mxu1 %v3334_v25  ;;  %v3258_v19 = vsub.f32 %v12300_v12, %v3257_v16  ;;  %v3277_v25 = vand.u32 4294901760, %v12317_v39 }
 0x2b0   : > { %10145 = vmatprep.subr.mxu0 %v12235_v59  ;;  %10169 = vmatprep.subr.mxu1 %v3341_v26  ;;  %v12328_v47 = vpop.f32.mrf.mxu0 }
 0x2b1   : > { %v3278_v33 = vsub.f32 %v12317_v39, %v3277_v25 }
 0x2b3   : > { %10146 = vmatpush3.xpose.msra.mxu0 %v12235_v59  ;;  %10170 = vmatpush3.xpose.msra.mxu1 %v3341_v26  ;;  %v12339_v26 = vpop.f32.mrf.mxu0 }
 0x2b4   : > { %10171 = vmatprep.subr.mxu1 %v3348_v50  ;;  %10187 = vmatprep.subr.mxu0 %v12132_v3 }
 0x2b5   : > { %v12347_v46 = vpop.f32.mrf.mxu0 }
 0x2b6   : > { %10148 = vmatmul.mubr.f32.vlgmr.msra.gmra.mxu0 %v3219_v49 }
 0x2b7   : > { %10150 = vmatprep.mubr.f32.mxu0 %v3229_v45  ;;  %10172 = vmatpush3.xpose.msra.mxu1 %v3348_v50  ;;  %v12357_v18 = vpop.f32.mrf.mxu0 }
 0x2b8   : > { %10188 = vmatpush3.xpose.msra.mxu0 %v12132_v3  ;;  %10173 = vmatprep.subr.mxu1 %v3355_v37  ;;  %v3259_v3 = vand.u32 4294901760, %v3258_v19  ;;  %v12349_v50 = vpop.f32.mrf.mxu1 }
 0x2b9   : > { %10189 = vmatprep.subr.mxu0 %v12148_v57 }
 0x2ba   : > { %10151 = vmatmul.mubr.f32.gmra.mxu0 %v3239_v53  ;;  %v12359_v49 = vpop.f32.mrf.mxu1 }
 0x2bb   : > { %10153 = vmatprep.mubr.f32.mxu0 %v3249_v9  ;;  %10174 = vmatpush3.xpose.msra.mxu1 %v3355_v37 }
 0x2bc   : > { %10190 = vmatpush3.xpose.msra.mxu0 %v12148_v57  ;;  %10215 = vmatprep.subr.mxu1 %v12123_v31  ;;  %v3279_v57 = vand.u32 4294901760, %v3278_v33  ;;  %v12370_v15 = vpop.f32.mrf.mxu1 }
 0x2bd   : > { %10191 = vmatprep.subr.mxu0 %v12166_v24 }
 0x2be   : > { %10154 = vmatmul.mubr.f32.gmra.mxu0 %v3259_v3  ;;  %10176 = vmatmul.mubr.f32.vlgmr.msra.gmra.mxu1 %v12232_v35  ;;  %v12380_v45 = vpop.f32.mrf.mxu1  ;;  %v1526_v3 = vadd.f32 %v12370_v15, %v12347_v46 }
 0x2bf   : > { %10156 = vmatprep.mubr.f32.mxu0 %v3269_v1  ;;  %10178 = vmatprep.mubr.f32.mxu1 %v12238_v48 }
 0x2c0   : > { %10192 = vmatpush3.xpose.msra.mxu0 %v12166_v24  ;;  %10216 = vmatpush3.xpose.msra.mxu1 %v12123_v31  ;;  %v12368_v24 = vpop.f32.mrf.mxu0  ;;  %v12391_v34 = vpop.f32.mrf.mxu1 }
 0x2c1   : > { %10193 = vmatprep.subr.mxu0 %v12179_v61  ;;  %10217 = vmatprep.subr.mxu1 %v12135_v36 }
 0x2c2   : > { %10157 = vmatmul.mubr.f32.gmra.mxu0 %v3279_v57  ;;  %10179 = vmatmul.mubr.f32.gmra.mxu1 %v12255_v17 }
 0x2c3   : > { %10181 = vmatprep.mubr.f32.mxu1 %v12265_v55  ;;  %10203 = vmatprep.mubr.f32.mxu0 %v12158_v40 }
 0x2c4   : > { %10194 = vmatpush3.xpose.msra.mxu0 %v12179_v61  ;;  %10218 = vmatpush3.xpose.msra.mxu1 %v12135_v36  ;;  %v12378_v61 = vpop.f32.mrf.mxu0 }
 0x2c5   : > { %10195 = vmatprep.subr.mxu0 %v12205_v56  ;;  %10219 = vmatprep.subr.mxu1 %v12151_v13 }
 0x2c6   : > { %10182 = vmatmul.mubr.f32.gmra.mxu1 %v12280_v7 }
 0x2c7   : > { %10184 = vmatprep.mubr.f32.mxu1 %v12287_v60 }
 0x2c8   : > { %10196 = vmatpush3.xpose.msra.mxu0 %v12205_v56  ;;  %10220 = vmatpush3.xpose.msra.mxu1 %v12151_v13  ;;  %v12389_v56 = vpop.f32.mrf.mxu0 }
 0x2c9   : > { %10197 = vmatprep.subr.mxu0 %v12216_v4  ;;  %10221 = vmatprep.subr.mxu1 %v12160_v0 }
 0x2ca   : > { %10185 = vmatmul.mubr.f32.gmra.mxu1 %v12302_v63  ;;  %v12397_v40 = vpop.f32.mrf.mxu0 }
 0x2cb   : > { %10231 = vmatprep.mubr.f32.mxu1 %v3207_v38  ;;  %v12399_v38 = vpop.f32.mrf.mxu1 }
 0x2cc   : > { %10198 = vmatpush3.xpose.msra.mxu0 %v12216_v4  ;;  %10222 = vmatpush3.xpose.msra.mxu1 %v12160_v0 }
 0x2cd   : > { %10199 = vmatprep.subr.mxu0 %v12242_v62  ;;  %10223 = vmatprep.subr.mxu1 %v12183_v43 }
 0x2d0   : > { %10200 = vmatpush3.xpose.msra.mxu0 %v12242_v62  ;;  %10224 = vmatpush3.xpose.msra.mxu1 %v12183_v43  ;;  %v12407_v62 = vpop.f32.mrf.mxu1 }
 0x2d1   : > { %10201 = vmatprep.subr.mxu0 %v12259_v29  ;;  %10225 = vmatprep.subr.mxu1 %v12197_v51  ;;  %v12403_v4 = vpop.f32.mrf.mxu0 }
 0x2d3   : > { %v12412_v37 = vpop.f32.mrf.mxu0 }
 0x2d4   : > { %10202 = vmatpush3.xpose.msra.mxu0 %v12259_v29  ;;  %10226 = vmatpush3.xpose.msra.mxu1 %v12197_v51  ;;  %v12416_v29 = vpop.f32.mrf.mxu1 }
 0x2d5   : > { %10227 = vmatprep.subr.mxu1 %v12224_v21  ;;  %10243 = vmatprep.subr.mxu0 %v12145_v22  ;;  %v12420_v53 = vpop.f32.mrf.mxu0 }
 0x2d7   : > { %10204 = vmatmul.mubr.f32.vlgmr.msra.gmra.mxu0 %v12253_v14 }
 0x2d8   : > { %10206 = vmatprep.mubr.f32.mxu0 %v12262_v28  ;;  %10228 = vmatpush3.xpose.msra.mxu1 %v12224_v21 }
 0x2d9   : > { %10244 = vmatpush3.xpose.msra.mxu0 %v12145_v22  ;;  %10229 = vmatprep.subr.mxu1 %v12235_v59  ;;  %v12424_v19 = vpop.f32.mrf.mxu1  ;;  %v12432_v22 = vpop.f32.mrf.mxu0 }
 0x2da   : > { %10245 = vmatprep.subr.mxu0 %v12171_v2 }
 0x2db   : > { %10207 = vmatmul.mubr.f32.gmra.mxu0 %v12278_v27  ;;  %v12437_v9 = vpop.f32.mrf.mxu1 }
 0x2dc   : > { %10209 = vmatprep.mubr.f32.mxu0 %v12284_v10  ;;  %10230 = vmatpush3.xpose.msra.mxu1 %v12235_v59 }
 0x2dd   : > { %10246 = vmatpush3.xpose.msra.mxu0 %v12171_v2  ;;  %10271 = vmatprep.subr.mxu1 %v12123_v31  ;;  %v12446_v2 = vpop.f32.mrf.mxu0  ;;  %v12448_v14 = vpop.f32.mrf.mxu1 }
 0x2de   : > { %10247 = vmatprep.subr.mxu0 %v12190_v32 }
 0x2df   : > { %10210 = vmatmul.mubr.f32.gmra.mxu0 %v12300_v12  ;;  %10232 = vmatmul.mubr.f32.vlgmr.msra.gmra.mxu1 %v3217_v20  ;;  %v12461_v28 = vpop.f32.mrf.mxu1  ;;  %v5161_v20 = vpop.permute.xlu1 %5160 }
 0x2e0   : > { %10212 = vmatprep.mubr.f32.mxu0 %v12307_v41  ;;  %10234 = vmatprep.mubr.f32.mxu1 %v3227_v6 }
 0x2e1   : > { %10248 = vmatpush3.xpose.msra.mxu0 %v12190_v32  ;;  %10272 = vmatpush3.xpose.msra.mxu1 %v12123_v31  ;;  %v5159_v31 = vpop.permute.xlu0 %5158  ;;  %v12459_v32 = vpop.f32.mrf.mxu0 }
 0x2e2   : > { %10249 = vmatprep.subr.mxu0 %v12202_v8  ;;  %10273 = vmatprep.subr.mxu1 %v12135_v36  ;;  %v12475_v27 = vpop.f32.mrf.mxu1  ;;  %v12485_v6 = vand.u32 4294901760, %v5159_v31 }
 0x2e3   : > { %10213 = vmatmul.mubr.f32.gmra.mxu0 %v12317_v39  ;;  %10235 = vmatmul.mubr.f32.gmra.mxu1 %v3237_v58 }
 0x2e4   : > { %10237 = vmatprep.mubr.f32.mxu1 %v3247_v23  ;;  %10259 = vmatprep.mubr.f32.mxu0 %v12142_v42  ;;  %15380 = vst [vmem:[#allocation7_spill] sm:$0xff] %v12485_v6  ;;  %v12489_v58 = vpop.f32.mrf.mxu1  ;;  %v12498_v41 = vsub.f32 %v5159_v31, %v12485_v6  ;;  %v1538_v31 = vadd.f32 %v12391_v34, %v12368_v24 }
 0x2e5   : > { %10250 = vmatpush3.xpose.msra.mxu0 %v12202_v8  ;;  %10274 = vmatpush3.xpose.msra.mxu1 %v12135_v36  ;;  %v12471_v36 = vand.u32 4294901760, %v5161_v20  ;;  %v12473_v8 = vpop.f32.mrf.mxu0  ;;  %v5157_v10 = vpop.permute.xlu0 %5156  ;;  %v1532_v24 = vadd.f32 %v12399_v38, %v12378_v61 }
 0x2e6   : > { %10251 = vmatprep.subr.mxu0 %v12229_v5  ;;  %10275 = vmatprep.subr.mxu1 %v12151_v13  ;;  %15381 = vst [vmem:[#allocation8_spill] sm:$0xff] %v12498_v41  ;;  %v12502_v39 = vpop.f32.mrf.mxu1  ;;  %v12533_v46 = vand.u32 4294901760, %v12498_v41  ;;  %v1673_v34 = vadd.f32 %v12446_v2, %v1538_v31  ;;  %v1550_v2 = vadd.f32 %v12407_v62, %v12389_v56 }
 0x2e7   : > { %10238 = vmatmul.mubr.f32.gmra.mxu1 %v3257_v16  ;;  %15378 = vst [vmem:[#allocation5_spill] sm:$0xff] %v12471_v36  ;;  %v12487_v12 = vpop.f32.mrf.mxu0 }
 0x2e8   : > { %10240 = vmatprep.mubr.f32.mxu1 %v3267_v52  ;;  %v12527_v1 = vpop.f32.mrf.mxu1  ;;  %15386 = vst [vmem:[#allocation13_spill] sm:$0xff] %v12533_v46 }
 0x2e9   : > { %10252 = vmatpush3.xpose.msra.mxu0 %v12229_v5  ;;  %10276 = vmatpush3.xpose.msra.mxu1 %v12151_v13  ;;  %v5155_v13 = vpop.permute.xlu1 %5154  ;;  %v12483_v5 = vsub.f32 %v5161_v20, %v12471_v36 }
 0x2ea   : > { %10253 = vmatprep.subr.mxu0 %v12249_v54  ;;  %10277 = vmatprep.subr.mxu1 %v12160_v0  ;;  %v12500_v23 = vand.u32 4294901760, %v5155_v13 }
 0x2eb   : > { %10241 = vmatmul.mubr.f32.gmra.mxu1 %v3277_v25  ;;  %15379 = vst [vmem:[#allocation6_spill] sm:$0xff] %v12483_v5 }
 0x2ec   : > { %10287 = vmatprep.mubr.f32.mxu1 %v12142_v42  ;;  %15382 = vst [vmem:[#allocation9_spill] sm:$0xff] %v12500_v23 }
 0x2ed   : > { %10254 = vmatpush3.xpose.msra.mxu0 %v12249_v54  ;;  %10278 = vmatpush3.xpose.msra.mxu1 %v12160_v0  ;;  %v5153_v0 = vpop.permute.xlu0 %5152  ;;  %v1514_v54 = vadd.f32 %v12349_v50, %v12328_v47  ;;  %v12512_v47 = vand.u32 4294901760, %v5157_v10  ;;  %v12514_v25 = vpop.permute.xlu1 %5148 }
 0x2ee   : > { %10255 = vmatprep.subr.mxu0 %v12273_v11  ;;  %10279 = vmatprep.subr.mxu1 %v12183_v43 }
 0x2ef   : > { %v1645_v52 = vadd.f32 %v12403_v4, %v1514_v54  ;;  %15384 = vst [vmem:[#allocation11_spill] sm:$0xff] %v12512_v47  ;;  %v1659_v4 = vadd.f32 %v12420_v53, %v1526_v3 }
 0x2f1   : > { %10256 = vmatpush3.xpose.msra.mxu0 %v12273_v11  ;;  %10280 = vmatpush3.xpose.msra.mxu1 %v12183_v43  ;;  %v12505_v11 = vand.u32 4294901760, %v12483_v5  ;;  %v1508_v43 = vadd.f32 %v12359_v49, %v12339_v26  ;;  %v1776_v33 = vadd.f32 %v12424_v19, %v1645_v52  ;;  %v12536_v49 = vand.u32 4294901760, %v12514_v25  ;;  %v5151_v15 = vpop.permute.xlu0 %5150  ;;  %v5147_v52 = vpop.permute.xlu1 %5146 }
 0x2f2   : > { %10257 = vmatprep.subr.mxu0 %v12293_v44  ;;  %10281 = vmatprep.subr.mxu1 %v12197_v51  ;;  %v9925_v42 = vpop.f32.mrf.mxu0  ;;  %v12545_v19 = vand.u32 4294901760, %v5153_v0  ;;  %v12583_v62 = vand.u32 4294901760, %v5147_v52 }
 0x2f3   : > { %15383 = vst [vmem:[#allocation10_spill] sm:$0xff] %v12505_v11  ;;  %v1638_v26 = vadd.f32 %v12412_v37, %v1508_v43  ;;  %v5367_v57 = vsub.f32 %v12483_v5, %v12505_v11  ;;  %15387 = vst [vmem:[#allocation14_spill] sm:$0xff] %v12536_v49 }
 0x2f4   : > { %v1918_v16 = vpop.f32.mrf.mxu0  ;;  %15389 = vst [vmem:[#allocation16_spill] sm:$0xff] %v12545_v19  ;;  %v12567_v38 = vsub.f32 %v5153_v0, %v12545_v19  ;;  %15394 = vst [vmem:[#allocation21_spill] sm:$0xff] %v12583_v62 }
 0x2f5   : > { %10258 = vmatpush3.xpose.msra.mxu0 %v12293_v44  ;;  %10282 = vmatpush3.xpose.msra.mxu1 %v12197_v51  ;;  %v12523_v44 = vsub.f32 %v5155_v13, %v12500_v23  ;;  %v1520_v51 = vadd.f32 %v12380_v45, %v12357_v18  ;;  %v1768_v37 = vadd.f32 %v12437_v9, %v1638_v26  ;;  %v5368_v3 = vand.u32 4294901760, %v5367_v57 }
 0x2f6   : > { %10283 = vmatprep.subr.mxu1 %v12224_v21  ;;  %10299 = vmatprep.subr.mxu0 %v12471_v36  ;;  %v9928_v30 = vpop.f32.mrf.mxu0  ;;  %v1925_v18 = vadd.f32 %v9925_v42, %v1776_v33  ;;  %v12543_v45 = vsub.f32 %v5157_v10, %v12512_v47  ;;  %v1792_v13 = vadd.f32 %v12448_v14, %v1659_v4  ;;  %v12554_v42 = vand.u32 4294901760, %v5151_v15 }
 0x2f7   : > { %15385 = vst [vmem:[#allocation12_spill] sm:$0xff] %v12523_v44  ;;  %v1652_v9 = vadd.f32 %v12432_v22, %v1520_v51  ;;  %v5374_v22 = vsub.f32 %v12498_v41, %v12533_v46  ;;  %15391 = vst [vmem:[#allocation18_spill] sm:$0xff] %v12567_v38  ;;  %v1666_v26 = vadd.f32 %v12459_v32, %v1532_v24  ;;  %v12581_v56 = vand.u32 4294901760, %v12523_v44 }
 0x2f8   : > { %10260 = vmatmul.mubr.f32.vlgmr.msra.gmra.mxu0 %v12232_v35  ;;  %v1930_v50 = vpop.f32.mrf.mxu0  ;;  %15388 = vst [vmem:[#allocation15_spill] sm:$0xff] %v12543_v45  ;;  %15390 = vst [vmem:[#allocation17_spill] sm:$0xff] %v12554_v42  ;;  %v1808_v33 = vadd.f32 %v12475_v27, %v1673_v34  ;;  %v1544_v32 = vadd.f32 %v12416_v29, %v12397_v40  ;;  %v1687_v27 = vadd.f32 %v12473_v8, %v1550_v2 }
 0x2f9   : > { %10262 = vmatprep.mubr.f32.mxu0 %v12238_v48  ;;  %10284 = vmatpush3.xpose.msra.mxu1 %v12224_v21  ;;  %v1919_v21 = vadd.f32 %v1918_v16, %v1768_v37  ;;  %v1784_v14 = vadd.f32 %v12461_v28, %v1652_v9  ;;  %v1937_v16 = vadd.f32 %v9928_v30, %v1792_v13  ;;  %v12575_v30 = vand.u32 4294901760, %v12543_v45 }
 0x2fa   : > { %10300 = vmatpush3.msra.mxu0 %v12471_v36  ;;  %10285 = vmatprep.subr.mxu1 %v12235_v59  ;;  %v9931_v53 = vpop.f32.mrf.mxu0  ;;  %v9953_v20 = vpop.f32.mrf.mxu1  ;;  %15393 = vst [vmem:[#allocation20_spill] sm:$0xff] %v12581_v56  ;;  %v1800_v4 = vadd.f32 %v12489_v58, %v1666_v26  ;;  %v1680_v40 = vadd.f32 %v12487_v12, %v1544_v32  ;;  %v5375_v29 = vand.u32 4294901760, %v5374_v22  ;;  %v12610_v12 = vand.u32 4294901760, %v12567_v38 }
 0x2fb   : > { %10301 = vmatprep.subr.mxu0 %v12485_v6  ;;  %v2046_v10 = vadd.f32 %v9953_v20, %v1925_v18  ;;  %15392 = vst [vmem:[#allocation19_spill] sm:$0xff] %v12575_v30  ;;  %v1931_v51 = vadd.f32 %v1930_v50, %v1784_v14  ;;  %v1949_v37 = vadd.f32 %v9931_v53, %v1808_v33 }
 0x2fc   : > { %10302 = vmatpush3.msra.mxu0 %v12485_v6  ;;  %v1942_v54 = vpop.f32.mrf.mxu0  ;;  %v2039_v43 = vpop.f32.mrf.mxu1  ;;  %v12598_v18 = vsub.f32 %v12514_v25, %v12536_v49  ;;  %v5381_v8 = vsub.f32 %v12543_v45, %v12575_v30  ;;  %15397 = vst [vmem:[#allocation24_spill] sm:$0xff] %v12610_v12  ;;  %v12613_v53 = vsub.f32 %v5147_v52, %v12583_v62 }
 0x2fd   : > { %10263 = vmatmul.mubr.f32.gmra.mxu0 %v12255_v17  ;;  %10303 = vmatprep.subr.mxu0 %v12512_v47  ;;  %2087 = vst.msk [vmem:[#allocation3 + $0x8] sm:$0xff] %vm2085_vm3, %v2046_v10  ;;  %v2040_v61 = vadd.f32 %v2039_v43, %v1919_v21  ;;  %v1943_v31 = vadd.f32 %v1942_v54, %v1800_v4 }
 0x2fe   : > { %10265 = vmatprep.mubr.f32.mxu0 %v12265_v55  ;;  %10286 = vmatpush3.xpose.msra.mxu1 %v12235_v59  ;;  %v9956_v28 = vpop.f32.mrf.mxu1  ;;  %v12586_v59 = vsub.f32 %v5151_v15, %v12554_v42  ;;  %v9934_v50 = vpop.f32.mrf.mxu0  ;;  %15396 = vst [vmem:[#allocation23_spill] sm:$0xff] %v12598_v18  ;;  %15398 = vst [vmem:[#allocation25_spill] sm:$0xff] %v12613_v53  ;;  %v5382_v24 = vand.u32 4294901760, %v5381_v8  ;;  %v5395_v54 = vsub.f32 %v12567_v38, %v12610_v12 }
 0x2ff   : > { %10304 = vmatpush3.msra.mxu0 %v12512_v47  ;;  %10327 = vmatprep.subr.mxu1 %v5368_v3  ;;  %2086 = vst.msk [vmem:[#allocation3] sm:$0xff] %vm2085_vm3, %v2040_v61  ;;  %v2058_v0 = vadd.f32 %v9956_v28, %v1937_v16  ;;  %v12631_v22 = vand.u32 4294901760, %v12598_v18  ;;  %v12642_v61 = vand.u32 4294901760, %v12613_v53 }
 0x300   : > { %15395 = vst [vmem:[#allocation22_spill] sm:$0xff] %v12586_v59  ;;  %10305 = vmatprep.subr.mxu0 %v12500_v23  ;;  %v2051_v57 = vpop.f32.mrf.mxu1  ;;  %v1954_v20 = vpop.f32.mrf.mxu0  ;;  %v12622_v10 = vand.u32 4294901760, %v12586_v59 }
 0x301   : > { %10306 = vmatpush3.msra.mxu0 %v12500_v23  ;;  %10288 = vmatmul.mubr.f32.vlgmr.msra.gmra.mxu1 %v12232_v35  ;;  %2089 = vst.msk [vmem:[#allocation3 + $0x18] sm:$0xff] %vm2085_vm3, %v2058_v0  ;;  %v2052_v15 = vadd.f32 %v2051_v57, %v1931_v51  ;;  %v1824_v35 = vadd.f32 %v12502_v39, %v1687_v27  ;;  %15400 = vst [vmem:[#allocation27_spill] sm:$0xff] %v12631_v22 }
 0x302   : > { %10266 = vmatmul.mubr.f32.gmra.mxu0 %v12280_v7  ;;  %10307 = vmatprep.subr.mxu0 %v12545_v19  ;;  %v9959_v58 = vpop.f32.mrf.mxu1  ;;  %v5388_v39 = vsub.f32 %v12523_v44, %v12581_v56  ;;  %15399 = vst [vmem:[#allocation26_spill] sm:$0xff] %v12622_v10  ;;  %15401 = vst [vmem:[#allocation28_spill] sm:$0xff] %v12642_v61  ;;  %v5409_v26 = vsub.f32 %v12598_v18, %v12631_v22 }
 0x303   : > { %10268 = vmatprep.mubr.f32.mxu0 %v12287_v60  ;;  %10290 = vmatprep.mubr.f32.mxu1 %v12238_v48  ;;  %2088 = vst.msk [vmem:[#allocation3 + $0x10] sm:$0xff] %vm2085_vm3, %v2052_v15  ;;  %v2070_v25 = vadd.f32 %v9959_v58, %v1949_v37  ;;  %v1816_v48 = vadd.f32 %v12527_v1, %v1680_v40 }
 0x304   : > { %10308 = vmatpush3.msra.mxu0 %v12545_v19  ;;  %10328 = vmatpush3.msra.mxu1 %v5368_v3  ;;  %v2063_v9 = vpop.f32.mrf.mxu1  ;;  %v1961_v13 = vadd.f32 %v9934_v50, %v1824_v35  ;;  %v5389_v14 = vand.u32 4294901760, %v5388_v39  ;;  %v12639_v16 = vld [vmem:[#allocation3 + $0x8] sm:$0xff]  ;;  %v5416_v51 = vsub.f32 %v12613_v53, %v12642_v61  ;;  %v5410_v27 = vand.u32 4294901760, %v5409_v26 }
 0x305   : > { %10309 = vmatprep.subr.mxu0 %v12554_v42  ;;  %10329 = vmatprep.subr.mxu1 %v5375_v29  ;;  %2091 = vst.msk [vmem:[#allocation3 + $0x28] sm:$0xff] %vm2085_vm3, %v2070_v25  ;;  %v2064_v21 = vadd.f32 %v2063_v9, %v1943_v31  ;;  %v1955_v1 = vadd.f32 %v1954_v20, %v1816_v48  ;;  %v4005_v28 = vsel %vm2085_vm3, %v12639_v16, -inf  ;;  %v6054_v48 = vld [vmem:[#allocation2 + $0x30] sm:$0xff] }
 0x306   : > { %10310 = vmatpush3.msra.mxu0 %v12554_v42  ;;  %10330 = vmatpush3.msra.mxu1 %v5375_v29  ;;  %v9962_v34 = vpop.f32.mrf.mxu1  ;;  %v12645_v2 = vld [vmem:[#allocation3] sm:$0xff]  ;;  %v5417_v57 = vand.u32 4294901760, %v5416_v51 }
 0x307   : > { %10269 = vmatmul.mubr.f32.gmra.mxu0 %v12302_v63  ;;  %10291 = vmatmul.mubr.f32.gmra.mxu1 %v12255_v17  ;;  %2090 = vst.msk [vmem:[#allocation3 + $0x20] sm:$0xff] %vm2085_vm3, %v2064_v21  ;;  %v2082_v43 = vadd.f32 %v9962_v34, %v1961_v13  ;;  %v5402_v17 = vsub.f32 %v12586_v59, %v12622_v10  ;;  %v4002_v0 = vsel %vm2085_vm3, %v12645_v2, -inf }
 0x308   : > { %10311 = vmatprep.subr.mxu0 %v12536_v49  ;;  %10331 = vmatprep.subr.mxu1 %v5382_v24  ;;  %v2075_v52 = vpop.f32.mrf.mxu1  ;;  %v12662_v50 = vld [vmem:[#allocation3 + $0x18] sm:$0xff] }
 0x309   : > { %10293 = vmatprep.mubr.f32.mxu1 %v12265_v55  ;;  %10312 = vmatpush3.msra.mxu0 %v12536_v49  ;;  %2093 = vst.msk [vmem:[#allocation3 + $0x38] sm:$0xff] %vm2085_vm3, %v2082_v43  ;;  %v2076_v3 = vadd.f32 %v2075_v52, %v1955_v1  ;;  %v5396_v55 = vand.u32 4294901760, %v5395_v54  ;;  %v5403_v33 = vand.u32 4294901760, %v5402_v17 }
 0x30a   : > { %10332 = vmatpush3.msra.mxu1 %v5382_v24  ;;  %10313 = vmatprep.subr.mxu0 %v12583_v62  ;;  %v12671_v37 = vld [vmem:[#allocation3 + $0x10] sm:$0xff] }
 0x30b   : > { %10333 = vmatprep.subr.mxu1 %v5389_v14  ;;  %10314 = vmatpush3.msra.mxu0 %v12583_v62  ;;  %2092 = vst.msk [vmem:[#allocation3 + $0x30] sm:$0xff] %vm2085_vm3, %v2076_v3 }
 0x30c   : > { %10334 = vmatpush3.msra.mxu1 %v5389_v14  ;;  %10355 = vmatprep.subr.mxu0 %v12483_v5  ;;  %v12678_v40 = vld [vmem:[#allocation3 + $0x28] sm:$0xff] }
 0x30d   : > { %10294 = vmatmul.mubr.f32.gmra.mxu1 %v12280_v7  ;;  %10335 = vmatprep.subr.mxu1 %v5396_v55  ;;  %v4017_v8 = vsel %vm2085_vm3, %v12678_v40, -inf }
 0x30e   : > { %10296 = vmatprep.mubr.f32.mxu1 %v12287_v60  ;;  %10336 = vmatpush3.msra.mxu1 %v5396_v55  ;;  %v12660_v32 = vld [vmem:[#allocation3 + $0x20] sm:$0xff]  ;;  %v4011_v60 = vsel %vm2085_vm3, %v12662_v50, -inf }
 0x30f   : > { %10337 = vmatprep.subr.mxu1 %v5403_v33  ;;  %4006 = vmax.xlane.f32.xlu1 %v4005_v28  ;;  %v4014_v7 = vsel %vm2085_vm3, %v12660_v32, -inf }
 0x310   : > { %10338 = vmatpush3.msra.mxu1 %v5403_v33  ;;  %4003 = vmax.xlane.f32.xlu0 %v4002_v0  ;;  %v12682_v58 = vld [vmem:[#allocation3 + $0x38] sm:$0xff] }
 0x311   : > { %10297 = vmatmul.mubr.f32.gmra.mxu1 %v12302_v63  ;;  %10339 = vmatprep.subr.mxu1 %v5410_v27  ;;  %v4008_v63 = vsel %vm2085_vm3, %v12671_v37, -inf  ;;  %v4023_v31 = vsel %vm2085_vm3, %v12682_v58, -inf }
 0x312   : > { %10340 = vmatpush3.msra.mxu1 %v5410_v27  ;;  %v12667_v4 = vld [vmem:[#allocation3 + $0x30] sm:$0xff] }
 0x313   : > { %10341 = vmatprep.subr.mxu1 %v5417_v57  ;;  %4015 = vmax.xlane.f32.xlu1 %v4014_v7  ;;  %v4020_v15 = vsel %vm2085_vm3, %v12667_v4, -inf  ;;  %v9981_v29 = vpop.f32.mrf.mxu0 }
 0x314   : > { %10342 = vmatpush3.msra.mxu1 %v5417_v57  ;;  %4012 = vmax.xlane.f32.xlu0 %v4011_v60 }
 0x315   : > { %10383 = vmatprep.subr.mxu1 %v12471_v36  ;;  %v2269_v35 = vpop.f32.mrf.mxu0 }
 0x317   : > { %4021 = vmax.xlane.f32.xlu1 %v4020_v15  ;;  %v9984_v25 = vpop.f32.mrf.mxu0 }
 0x318   : > { %4009 = vmax.xlane.f32.xlu0 %v4008_v63 }
 0x319   : > { %v2289_v39 = vpop.f32.mrf.mxu0 }
 0x31b   : > { %v10009_v20 = vpop.f32.mrf.mxu1  ;;  %v9987_v13 = vpop.f32.mrf.mxu0 }
 0x31c   : > { %4018 = vmax.xlane.f32.xlu0 %v4017_v8 }
 0x31d   : > { %v2450_v9 = vpop.f32.mrf.mxu1  ;;  %v2309_v24 = vpop.f32.mrf.mxu0 }
 0x31e   : > { %v2451_v10 = vadd.f32 %v2450_v9, %v2269_v35 }
 0x31f   : > { %v10012_v21 = vpop.f32.mrf.mxu1  ;;  %v9990_v1 = vpop.f32.mrf.mxu0 }
 0x320   : > { %4024 = vmax.xlane.f32.xlu0 %v4023_v31  ;;  %v2469_v30 = vadd.f32 %v10012_v21, %v9984_v25 }
 0x321   : > { %v2462_v34 = vpop.f32.mrf.mxu1  ;;  %v2329_v43 = vpop.f32.mrf.mxu0 }
 0x322   : > { %v2463_v59 = vadd.f32 %v2462_v34, %v2289_v39 }
 0x323   : > { %v10015_v54 = vpop.f32.mrf.mxu1 }
 0x324   : > { %v2481_v49 = vadd.f32 %v10015_v54, %v9987_v13 }
 0x325   : > { %v2474_v52 = vpop.f32.mrf.mxu1 }
 0x326   : > { %v2475_v19 = vadd.f32 %v2474_v52, %v2309_v24 }
 0x327   : > { %v10018_v17 = vpop.f32.mrf.mxu1 }
 0x328   : > { %6076 = vrot.lane.b32.xlu1 %v6054_v48, %s11076_s27  ;;  %v2457_v48 = vadd.f32 %v10009_v20, %v9981_v29  ;;  %v2493_v39 = vadd.f32 %v10018_v17, %v9990_v1 }
 0x329   : > { %v2486_v55 = vpop.f32.mrf.mxu1 }
 0x334   : > { %v10037_v14 = vpop.f32.mrf.mxu0 }
 0x335   : > { %v2588_v12 = vadd.f32 %v10037_v14, %v2457_v48 }
 0x336   : > { %v2580_v3 = vpop.f32.mrf.mxu0 }
 0x337   : > { %v2581_v46 = vadd.f32 %v2580_v3, %v2451_v10 }
 0x338   : > { %v10040_v26 = vpop.f32.mrf.mxu0 }
 0x339   : > { %v2602_v38 = vadd.f32 %v10040_v26, %v2469_v30 }
 0x33a   : > { %v2594_v33 = vpop.f32.mrf.mxu0 }
 0x33b   : > { %v2595_v41 = vadd.f32 %v2594_v33, %v2463_v59 }
 0x33c   : > { %v10065_v28 = vpop.f32.mrf.mxu1  ;;  %v10043_v0 = vpop.f32.mrf.mxu0 }
 0x33d   : > { %v2719_v11 = vadd.f32 %v10065_v28, %v2588_v12  ;;  %v2616_v14 = vadd.f32 %v10043_v0, %v2481_v49 }
 0x33e   : > { %v2710_v51 = vpop.f32.mrf.mxu1  ;;  %v2608_v7 = vpop.f32.mrf.mxu0 }
 0x33f   : > { %v2711_v62 = vadd.f32 %v2710_v51, %v2581_v46  ;;  %v2609_v46 = vadd.f32 %v2608_v7, %v2475_v19 }
 0x340   : > { %v10068_v27 = vpop.f32.mrf.mxu1  ;;  %v10046_v60 = vpop.f32.mrf.mxu0 }
 0x341   : > { %v2735_v5 = vadd.f32 %v10068_v27, %v2602_v38  ;;  %v2487_v38 = vadd.f32 %v2486_v55, %v2329_v43 }
 0x342   : > { %v2726_v57 = vpop.f32.mrf.mxu1  ;;  %v2622_v63 = vpop.f32.mrf.mxu0 }
 0x343   : > { %v2727_v25 = vadd.f32 %v2726_v57, %v2595_v41  ;;  %v2623_v49 = vadd.f32 %v2622_v63, %v2487_v38 }
 0x344   : > { %v10071_v15 = vpop.f32.mrf.mxu1 }
 0x346   : > { %v2742_v8 = vpop.f32.mrf.mxu1 }
 0x348   : > { %v10074_v61 = vpop.f32.mrf.mxu1 }
 0x34a   : > { %v2758_v53 = vpop.f32.mrf.mxu1 }
 0x34b   : > { %v2759_v54 = vadd.f32 %v2758_v53, %v2623_v49 }
 0x355   : > { %v10093_v31 = vpop.f32.mrf.mxu0 }
 0x356   : > { %v2868_v44 = vadd.f32 %v10093_v31, %v2719_v11  ;;  %v2751_v11 = vadd.f32 %v10071_v15, %v2616_v14 }
 0x357   : > { %v2861_v22 = vpop.f32.mrf.mxu0 }
 0x358   : > { %v2862_v29 = vadd.f32 %v2861_v22, %v2711_v62  ;;  %v2743_v22 = vadd.f32 %v2742_v8, %v2609_v46 }
 0x359   : > { %v10096_v56 = vpop.f32.mrf.mxu0 }
 0x35a   : > { %v2880_v10 = vadd.f32 %v10096_v56, %v2735_v5 }
 0x35b   : > { %v2873_v18 = vpop.f32.mrf.mxu0 }
 0x35c   : > { %v2874_v13 = vadd.f32 %v2873_v18, %v2727_v25 }
 0x35d   : > { %v10099_v45 = vpop.f32.mrf.mxu0  ;;  %v10121_v42 = vpop.f32.mrf.mxu1 }
 0x35e   : > { %v2989_v20 = vadd.f32 %v10121_v42, %v2868_v44  ;;  %v2630_v42 = vadd.f32 %v10046_v60, %v2493_v39  ;;  %v2892_v21 = vadd.f32 %v10099_v45, %v2751_v11 }
 0x35f   : > { %v2885_v35 = vpop.f32.mrf.mxu0  ;;  %v2982_v9 = vpop.f32.mrf.mxu1 }
 0x360   : > { %3029 = vst.msk [vmem:[#allocation3 + $0x48] sm:$0xff] %vm2085_vm3, %v2989_v20  ;;  %v2983_v12 = vadd.f32 %v2982_v9, %v2862_v29  ;;  %v2767_v56 = vadd.f32 %v10074_v61, %v2630_v42  ;;  %v2886_v24 = vadd.f32 %v2885_v35, %v2743_v22 }
 0x361   : > { %v10124_v30 = vpop.f32.mrf.mxu1  ;;  %v10102_v62 = vpop.f32.mrf.mxu0 }
 0x362   : > { %3028 = vst.msk [vmem:[#allocation3 + $0x40] sm:$0xff] %vm2085_vm3, %v2983_v12  ;;  %v3001_v59 = vadd.f32 %v10124_v30, %v2880_v10  ;;  %v2904_v43 = vadd.f32 %v10102_v62, %v2767_v56 }
 0x363   : > { %v2994_v44 = vpop.f32.mrf.mxu1  ;;  %v2897_v18 = vpop.f32.mrf.mxu0 }
 0x364   : > { %3031 = vst.msk [vmem:[#allocation3 + $0x58] sm:$0xff] %vm2085_vm3, %v3001_v59  ;;  %v2995_v5 = vadd.f32 %v2994_v44, %v2874_v13  ;;  %v2898_v61 = vadd.f32 %v2897_v18, %v2759_v54  ;;  %v12751_v13 = vpop.permute.xlu0 %6078 }
 0x365   : > { %v10127_v41 = vpop.f32.mrf.mxu1  ;;  %15402 = vst [vmem:[#allocation29_spill] sm:$0xff] %v12751_v13 }
 0x366   : > { %3030 = vst.msk [vmem:[#allocation3 + $0x50] sm:$0xff] %vm2085_vm3, %v2995_v5  ;;  %v3013_v19 = vadd.f32 %v10127_v41, %v2892_v21 }
 0x367   : > { %v3006_v34 = vpop.f32.mrf.mxu1  ;;  %v12691_v1 = vld [vmem:[#allocation3 + $0x48] sm:$0xff] }
 0x368   : > { %3033 = vst.msk [vmem:[#allocation3 + $0x68] sm:$0xff] %vm2085_vm3, %v3013_v19  ;;  %v3007_v52 = vadd.f32 %v3006_v34, %v2886_v24  ;;  %v4029_v45 = vsel %vm2085_vm3, %v12691_v1, -inf }
 0x369   : > { %v10130_v17 = vpop.f32.mrf.mxu1  ;;  %4030 = vmax.xlane.f32.xlu0 %v4029_v45  ;;  %v12696_v3 = vld [vmem:[#allocation3 + $0x40] sm:$0xff] }
 0x36a   : > { %3032 = vst.msk [vmem:[#allocation3 + $0x60] sm:$0xff] %vm2085_vm3, %v3007_v52  ;;  %v3025_v55 = vadd.f32 %v10130_v17, %v2904_v43  ;;  %v4026_v26 = vsel %vm2085_vm3, %v12696_v3, -inf }
 0x36b   : > { %v3018_v28 = vpop.f32.mrf.mxu1  ;;  %4027 = vmax.xlane.f32.xlu1 %v4026_v26  ;;  %v12701_v53 = vld [vmem:[#allocation3 + $0x58] sm:$0xff] }
 0x36c   : > { %3035 = vst.msk [vmem:[#allocation3 + $0x78] sm:$0xff] %vm2085_vm3, %v3025_v55  ;;  %v3019_v33 = vadd.f32 %v3018_v28, %v2898_v61  ;;  %v4035_v51 = vsel %vm2085_vm3, %v12701_v53, -inf }
 0x36d   : > { %4036 = vmax.xlane.f32.xlu0 %v4035_v51  ;;  %v12706_v0 = vld [vmem:[#allocation3 + $0x50] sm:$0xff] }
 0x36e   : > { %3034 = vst.msk [vmem:[#allocation3 + $0x70] sm:$0xff] %vm2085_vm3, %v3019_v33  ;;  %v4032_v27 = vsel %vm2085_vm3, %v12706_v0, -inf }
 0x36f   : > { %4033 = vmax.xlane.f32.xlu1 %v4032_v27  ;;  %v12711_v7 = vld [vmem:[#allocation3 + $0x68] sm:$0xff] }
 0x370   : > { %v4041_v57 = vsel %vm2085_vm3, %v12711_v7, -inf }
 0x371   : > { %4042 = vmax.xlane.f32.xlu0 %v4041_v57  ;;  %v12715_v60 = vld [vmem:[#allocation3 + $0x60] sm:$0xff] }
 0x372   : > { %v4038_v15 = vsel %vm2085_vm3, %v12715_v60, -inf }
 0x373   : > { %4039 = vmax.xlane.f32.xlu1 %v4038_v15  ;;  %v12719_v63 = vld [vmem:[#allocation3 + $0x78] sm:$0xff] }
 0x374   : > { %v4047_v8 = vsel %vm2085_vm3, %v12719_v63, -inf }
 0x375   : > { %4048 = vmax.xlane.f32.xlu0 %v4047_v8  ;;  %v12723_v31 = vld [vmem:[#allocation3 + $0x70] sm:$0xff] }
 0x376   : > { %v4044_v48 = vsel %vm2085_vm3, %v12723_v31, -inf  ;;  %v12727_v29 = vpop.f32.mrf.mxu0 }
 0x377   : > { %4045 = vmax.xlane.f32.xlu1 %v4044_v48 }
 0x378   : > { %v12729_v20 = vpop.f32.mrf.mxu0 }
 0x37a   : > { %v12731_v35 = vpop.f32.mrf.mxu0 }
 0x37c   : > { %v12735_v14 = vpop.f32.mrf.mxu0 }
 0x37e   : > { %v12733_v9 = vpop.f32.mrf.mxu1  ;;  %v12739_v10 = vpop.f32.mrf.mxu0 }
 0x380   : > { %v12737_v25 = vpop.f32.mrf.mxu1  ;;  %v12743_v39 = vpop.f32.mrf.mxu0 }
 0x381   : > { %v3393_v23 = vadd.f32 %v12737_v25, %v12729_v20 }
 0x382   : > { %v12741_v12 = vpop.f32.mrf.mxu1  ;;  %v12747_v46 = vpop.f32.mrf.mxu0 }
 0x384   : > { %v12745_v30 = vpop.f32.mrf.mxu1  ;;  %v12753_v59 = vpop.f32.mrf.mxu0 }
 0x386   : > { %v12749_v11 = vpop.f32.mrf.mxu1 }
 0x388   : > { %v12755_v38 = vpop.f32.mrf.mxu1 }
 0x38a   : > { %v12773_v41 = vpop.f32.mrf.mxu1 }
 0x38c   : > { %v12788_v18 = vpop.f32.mrf.mxu1 }
 0x397   : > { %v10205_v42 = vpop.f32.mrf.mxu0 }
 0x398   : > { %v12757_v62 = vpop.xlane.xlu1 %4006 }
 0x399   : > { %15403 = vst [vmem:[#allocation30_spill] sm:$0xff] %v12757_v62  ;;  %vm4075_vm4 = vcmp.ge.f32.partialorder %v12639_v16, %v12757_v62  ;;  %v12761_v44 = vpop.xlane.xlu0 %4003  ;;  %v3522_v19 = vpop.f32.mrf.mxu0 }
 0x39a   : > { %15404 = vst [vmem:[#allocation31_spill] sm:$0xff] %v12761_v44  ;;  %vm4074_vm5 = vcmp.ge.f32.partialorder %v12645_v2, %v12761_v44  ;;  %v12766_v22 = vsel %vm4075_vm4, -inf, %v12639_v16  ;;  %v3523_v36 = vadd.f32 %v3522_v19, %v3393_v23 }
 0x39b   : > { %v4125_v21 = vsel %vm2085_vm3, %v12766_v22, -inf  ;;  %v12771_v5 = vsel %vm4074_vm5, -inf, %v12645_v2  ;;  %v10208_v54 = vpop.f32.mrf.mxu0 }
 0x39c   : > { %4126 = vmax.xlane.f32.xlu0 %v4125_v21  ;;  %v4122_v49 = vsel %vm2085_vm3, %v12771_v5, -inf  ;;  %v12779_v24 = vpop.xlane.xlu1 %4015 }
 0x39d   : > { %v12777_v56 = vpop.xlane.xlu0 %4012  ;;  %4123 = vmax.xlane.f32.xlu1 %v4122_v49  ;;  %15406 = vst [vmem:[#allocation33_spill] sm:$0xff] %v12779_v24  ;;  %vm4078_vm7 = vcmp.ge.f32.partialorder %v12660_v32, %v12779_v24  ;;  %v3536_v55 = vpop.f32.mrf.mxu0 }
 0x39e   : > { %15405 = vst [vmem:[#allocation32_spill] sm:$0xff] %v12777_v56  ;;  %vm4077_vm6 = vcmp.ge.f32.partialorder %v12662_v50, %v12777_v56  ;;  %v12806_v61 = vsel %vm4078_vm7, -inf, %v12660_v32 }
 0x39f   : > { %v12784_v16 = vsel %vm4077_vm6, -inf, %v12662_v50  ;;  %v10233_v43 = vpop.f32.mrf.mxu1  ;;  %v4134_v33 = vsel %vm2085_vm3, %v12806_v61, -inf  ;;  %v10211_v27 = vpop.f32.mrf.mxu0 }
 0x3a0   : > { %v4131_v2 = vsel %vm2085_vm3, %v12784_v16, -inf  ;;  %v12799_v50 = vpop.xlane.xlu1 %4021 }
 0x3a1   : > { %4132 = vmax.xlane.f32.xlu0 %v4131_v2  ;;  %v12790_v34 = vpop.xlane.xlu0 %4009  ;;  %15408 = vst [vmem:[#allocation35_spill] sm:$0xff] %v12799_v50  ;;  %vm4080_vm10 = vcmp.ge.f32.partialorder %v12667_v4, %v12799_v50  ;;  %v3550_v48 = vpop.f32.mrf.mxu0  ;;  %v3411_v50 = vadd.f32 %v12741_v12, %v12731_v35 }
 0x3a2   : > { %15407 = vst [vmem:[#allocation34_spill] sm:$0xff] %v12790_v34  ;;  %vm4076_vm8 = vcmp.ge.f32.partialorder %v12671_v37, %v12790_v34  ;;  %v12822_v51 = vsel %vm4080_vm10, -inf, %v12667_v4 }
 0x3a3   : > { %v12797_v52 = vsel %vm4076_vm8, -inf, %v12671_v37  ;;  %v3652_v37 = vpop.f32.mrf.mxu1  ;;  %v4140_v8 = vsel %vm2085_vm3, %v12822_v51, -inf  ;;  %v10214_v4 = vpop.f32.mrf.mxu0 }
 0x3a4   : > { %v4128_v45 = vsel %vm2085_vm3, %v12797_v52, -inf  ;;  %v3653_v24 = vadd.f32 %v3652_v37, %v3523_v36 }
 0x3a5   : > { %v12803_v17 = vpop.xlane.xlu0 %4018  ;;  %4129 = vmax.xlane.f32.xlu1 %v4128_v45  ;;  %v10236_v57 = vpop.f32.mrf.mxu1 }
 0x3a6   : > { %15409 = vst [vmem:[#allocation36_spill] sm:$0xff] %v12803_v17  ;;  %vm4079_vm9 = vcmp.ge.f32.partialorder %v12678_v40, %v12803_v17  ;;  %v3564_v2 = vpop.f32.mrf.mxu0 }
 0x3a7   : > { %v12813_v26 = vsel %vm4079_vm9, -inf, %v12678_v40  ;;  %v3668_v21 = vpop.f32.mrf.mxu1 }
 0x3a8   : > { %v4137_v28 = vsel %vm2085_vm3, %v12813_v26, -inf }
 0x3a9   : > { %4138 = vmax.xlane.f32.xlu0 %v4137_v28  ;;  %v12819_v32 = vpop.xlane.xlu0 %4024  ;;  %4135 = vmax.xlane.f32.xlu1 %v4134_v33  ;;  %v10239_v49 = vpop.f32.mrf.mxu1  ;;  %v3399_v33 = vadd.f32 %v12733_v9, %v12727_v29  ;;  %v3405_v29 = vadd.f32 %v12745_v30, %v12735_v14  ;;  %v3544_v9 = vadd.f32 %v10208_v54, %v3411_v50 }
 0x3aa   : > { %15410 = vst [vmem:[#allocation37_spill] sm:$0xff] %v12819_v32  ;;  %vm4081_vm11 = vcmp.ge.f32.partialorder %v12682_v58, %v12819_v32  ;;  %v3417_v14 = vadd.f32 %v12755_v38, %v12743_v39 }
 0x3ab   : > { %v12827_v40 = vsel %vm4081_vm11, -inf, %v12682_v58  ;;  %v3684_v45 = vpop.f32.mrf.mxu1  ;;  %v3530_v47 = vadd.f32 %v10205_v42, %v3399_v33  ;;  %v3537_v25 = vadd.f32 %v3536_v55, %v3405_v29  ;;  %v3677_v42 = vadd.f32 %v10236_v57, %v3544_v9 }
 0x3ac   : > { %v4143_v15 = vsel %vm2085_vm3, %v12827_v40, -inf }
 0x3ad   : > { %4144 = vmax.xlane.f32.xlu0 %v4143_v15  ;;  %4141 = vmax.xlane.f32.xlu1 %v4140_v8  ;;  %v10242_v13 = vpop.f32.mrf.mxu1  ;;  %v3661_v15 = vadd.f32 %v10233_v43, %v3530_v47  ;;  %v3423_v47 = vadd.f32 %v12749_v11, %v12739_v10  ;;  %v3669_v35 = vadd.f32 %v3668_v21, %v3537_v25 }
 0x3af   : > { %v3700_v8 = vpop.f32.mrf.mxu1  ;;  %v3558_v30 = vadd.f32 %v10211_v27, %v3423_v47 }
 0x3b1   : > { %v3693_v43 = vadd.f32 %v10239_v49, %v3558_v30 }
 0x3b8   : > { %v10261_v28 = vpop.f32.mrf.mxu0 }
 0x3b9   : > { %v3810_v17 = vadd.f32 %v10261_v28, %v3661_v15 }
 0x3ba   : > { %v3803_v58 = vpop.f32.mrf.mxu0 }
 0x3bb   : > { %v3804_v56 = vadd.f32 %v3803_v58, %v3653_v24 }
 0x3bd   : > { %v10264_v6 = vpop.f32.mrf.mxu0 }
 0x3be   : > { %v3822_v36 = vadd.f32 %v10264_v6, %v3677_v42  ;;  %v3429_v6 = vadd.f32 %v12788_v18, %v12753_v59 }
 0x3bf   : > { %v3815_v32 = vpop.f32.mrf.mxu0 }
 0x3c0   : > { %v3816_v24 = vadd.f32 %v3815_v32, %v3669_v35 }
 0x3c1   : > { %v10289_v34 = vpop.f32.mrf.mxu1 }
 0x3c2   : > { %v3931_v44 = vadd.f32 %v10289_v34, %v3810_v17  ;;  %v10267_v62 = vpop.f32.mrf.mxu0 }
 0x3c3   : > { %v3924_v20 = vpop.f32.mrf.mxu1  ;;  %v3834_v38 = vadd.f32 %v10267_v62, %v3693_v43 }
 0x3c4   : > { %3971 = vst.msk [vmem:[#allocation3 + $0x88] sm:$0xff] %vm2085_vm3, %v3931_v44  ;;  %v3925_v23 = vadd.f32 %v3924_v20, %v3804_v56  ;;  %v3827_v12 = vpop.f32.mrf.mxu0  ;;  %v3435_v44 = vadd.f32 %v12773_v41, %v12747_v46  ;;  %v3551_v56 = vadd.f32 %v3550_v48, %v3417_v14  ;;  %v3565_v46 = vadd.f32 %v3564_v2, %v3429_v6 }
 0x3c6   : > { %3970 = vst.msk [vmem:[#allocation3 + $0x80] sm:$0xff] %vm2085_vm3, %v3925_v23  ;;  %v3572_v17 = vadd.f32 %v10214_v4, %v3435_v44  ;;  %v3685_v39 = vadd.f32 %v3684_v45, %v3551_v56  ;;  %v3701_v62 = vadd.f32 %v3700_v8, %v3565_v46 }
 0x3c7   : > { %v10292_v19 = vpop.f32.mrf.mxu1  ;;  %v10270_v11 = vpop.f32.mrf.mxu0 }
 0x3c8   : > { %v3943_v34 = vadd.f32 %v10292_v19, %v3822_v36  ;;  %v3709_v32 = vadd.f32 %v10242_v13, %v3572_v17  ;;  %v3828_v27 = vadd.f32 %v3827_v12, %v3685_v39  ;;  %v12889_v36 = vpop.permute.xlu1 %6076 }
 0x3c9   : > { %v3936_v54 = vpop.f32.mrf.mxu1  ;;  %v3839_v18 = vpop.f32.mrf.mxu0 }
 0x3ca   : > { %3973 = vst.msk [vmem:[#allocation3 + $0x98] sm:$0xff] %vm2085_vm3, %v3943_v34  ;;  %v3937_v10 = vadd.f32 %v3936_v54, %v3816_v24  ;;  %v3846_v21 = vadd.f32 %v10270_v11, %v3709_v32  ;;  %v3840_v45 = vadd.f32 %v3839_v18, %v3701_v62 }
 0x3cb   : > { %v12852_v50 = vld [vmem:[#allocation3 + $0x88] sm:$0xff] }
 0x3cc   : > { %3972 = vst.msk [vmem:[#allocation3 + $0x90] sm:$0xff] %vm2085_vm3, %v3937_v10  ;;  %v4053_v55 = vsel %vm2085_vm3, %v12852_v50, -inf }
 0x3cd   : > { %v10295_v41 = vpop.f32.mrf.mxu1  ;;  %4054 = vmax.xlane.f32.xlu0 %v4053_v55  ;;  %v12857_v37 = vld [vmem:[#allocation3 + $0x80] sm:$0xff] }
 0x3ce   : > { %v3955_v57 = vadd.f32 %v10295_v41, %v3834_v38  ;;  %v4050_v59 = vsel %vm2085_vm3, %v12857_v37, -inf  ;;  %v6053_v41 = vld [vmem:[#allocation2 + $0x28] sm:$0xff] }
 0x3cf   : > { %v3948_v48 = vpop.f32.mrf.mxu1  ;;  %4051 = vmax.xlane.f32.xlu1 %v4050_v59 }
 0x3d0   : > { %3975 = vst.msk [vmem:[#allocation3 + $0xa8] sm:$0xff] %vm2085_vm3, %v3955_v57  ;;  %v3949_v4 = vadd.f32 %v3948_v48, %v3828_v27 }
 0x3d1   : > { %v10298_v49 = vpop.f32.mrf.mxu1  ;;  %v12862_v2 = vld [vmem:[#allocation3 + $0x98] sm:$0xff] }
 0x3d2   : > { %3974 = vst.msk [vmem:[#allocation3 + $0xa0] sm:$0xff] %vm2085_vm3, %v3949_v4  ;;  %v3967_v13 = vadd.f32 %v10298_v49, %v3846_v21  ;;  %v4059_v28 = vsel %vm2085_vm3, %v12862_v2, -inf }
 0x3d3   : > { %v3960_v33 = vpop.f32.mrf.mxu1  ;;  %4060 = vmax.xlane.f32.xlu0 %v4059_v28  ;;  %v12867_v58 = vld [vmem:[#allocation3 + $0x90] sm:$0xff] }
 0x3d4   : > { %3977 = vst.msk [vmem:[#allocation3 + $0xb8] sm:$0xff] %vm2085_vm3, %v3967_v13  ;;  %v3961_v15 = vadd.f32 %v3960_v33, %v3840_v45  ;;  %v4056_v8 = vsel %vm2085_vm3, %v12867_v58, -inf }
 0x3d5   : > { %4057 = vmax.xlane.f32.xlu1 %v4056_v8 }
 0x3d6   : > { %3976 = vst.msk [vmem:[#allocation3 + $0xb0] sm:$0xff] %vm2085_vm3, %v3961_v15 }
 0x3d7   : > { %v12873_v29 = vld [vmem:[#allocation3 + $0xa8] sm:$0xff] }
 0x3d8   : > { %v4065_v9 = vsel %vm2085_vm3, %v12873_v29, -inf }
 0x3d9   : > { %4066 = vmax.xlane.f32.xlu0 %v4065_v9  ;;  %v12877_v20 = vld [vmem:[#allocation3 + $0xa0] sm:$0xff] }
 0x3da   : > { %v4062_v25 = vsel %vm2085_vm3, %v12877_v20, -inf }
 0x3db   : > { %4063 = vmax.xlane.f32.xlu1 %v4062_v25  ;;  %v12881_v42 = vld [vmem:[#allocation3 + $0xb8] sm:$0xff] }
 0x3dc   : > { %v4071_v23 = vsel %vm2085_vm3, %v12881_v42, -inf }
 0x3dd   : > { %4072 = vmax.xlane.f32.xlu0 %v4071_v23  ;;  %v12885_v47 = vld [vmem:[#allocation3 + $0xb0] sm:$0xff] }
 0x3de   : > { %v4068_v35 = vsel %vm2085_vm3, %v12885_v47, -inf }
 0x3df   : > { %4069 = vmax.xlane.f32.xlu1 %v4068_v35 }
 0x3f2   : > { %v12891_v12 = vpop.xlane.xlu0 %4030 }
 0x3f3   : > { %vm4083_vm12 = vcmp.ge.f32.partialorder %v12691_v1, %v12891_v12 }
 0x3f4   : > { %v12895_v19 = vpop.xlane.xlu1 %4027  ;;  %v12898_v14 = vsel %vm4083_vm12, -inf, %v12691_v1 }
 0x3f5   : > { %vm4082_vm13 = vcmp.ge.f32.partialorder %v12696_v3, %v12895_v19  ;;  %v4149_v30 = vsel %vm2085_vm3, %v12898_v14, -inf }
 0x3f6   : > { %4150 = vmax.xlane.f32.xlu0 %v4149_v30  ;;  %v12904_v24 = vpop.xlane.xlu0 %4036  ;;  %v12907_v34 = vsel %vm4082_vm13, -inf, %v12696_v3 }
 0x3f7   : > { %vm4085_vm14 = vcmp.ge.f32.partialorder %v12701_v53, %v12904_v24  ;;  %v4146_v54 = vsel %vm2085_vm3, %v12907_v34, -inf }
 0x3f8   : > { %v12913_v1 = vpop.xlane.xlu1 %4033  ;;  %v12916_v44 = vsel %vm4085_vm14, -inf, %v12701_v53  ;;  %4147 = vmax.xlane.f32.xlu1 %v4146_v54 }
 0x3f9   : > { %vm4084_vm15 = vcmp.ge.f32.partialorder %v12706_v0, %v12913_v1  ;;  %v4155_v56 = vsel %vm2085_vm3, %v12916_v44, -inf }
 0x3fa   : > { %v12922_v3 = vpop.xlane.xlu0 %4042  ;;  %v12925_v43 = vsel %vm4084_vm15, -inf, %v12706_v0  ;;  %4156 = vmax.xlane.f32.xlu0 %v4155_v56 }
 0x3fb   : > { %vm4087_vm1 = vcmp.ge.f32.partialorder %v12711_v7, %v12922_v3  ;;  %v4152_v53 = vsel %vm2085_vm3, %v12925_v43, -inf }
 0x3fc   : > { %v12931_v10 = vpop.xlane.xlu1 %4039  ;;  %v12934_v6 = vsel %vm4087_vm1, -inf, %v12711_v7  ;;  %4153 = vmax.xlane.f32.xlu1 %v4152_v53 }
 0x3fd   : > { %vm4086_vm4 = vcmp.ge.f32.partialorder %v12715_v60, %v12931_v10  ;;  %v4161_v0 = vsel %vm2085_vm3, %v12934_v6, -inf }
 0x3fe   : > { %v12940_v11 = vpop.xlane.xlu0 %4048  ;;  %v12943_v17 = vsel %vm4086_vm4, -inf, %v12715_v60  ;;  %4162 = vmax.xlane.f32.xlu0 %v4161_v0 }
 0x3ff   : > { %vm4089_vm5 = vcmp.ge.f32.partialorder %v12719_v63, %v12940_v11  ;;  %v4158_v7 = vsel %vm2085_vm3, %v12943_v17, -inf }
 0x400   : > { %v12949_v39 = vpop.xlane.xlu1 %4045  ;;  %v12952_v38 = vsel %vm4089_vm5, -inf, %v12719_v63  ;;  %4159 = vmax.xlane.f32.xlu1 %v4158_v7  ;;  %v6052_v63 = vld [vmem:[#allocation2 + $0x20] sm:$0xff] }
 0x401   : > { %vm4088_vm6 = vcmp.ge.f32.partialorder %v12723_v31, %v12949_v39  ;;  %v4167_v60 = vsel %vm2085_vm3, %v12952_v38, -inf }
 0x402   : > { %v12959_v55 = vsel %vm4088_vm6, -inf, %v12723_v31  ;;  %4168 = vmax.xlane.f32.xlu0 %v4167_v60 }
 0x403   : > { %v4164_v46 = vsel %vm2085_vm3, %v12959_v55, -inf }
 0x404   : > { %4165 = vmax.xlane.f32.xlu1 %v4164_v46 }
 0x415   : > { %6074 = vrot.lane.b32.xlu1 %v6053_v41, %s11076_s27 }
 0x418   : > { %6072 = vrot.lane.b32.xlu0 %v6052_v63, %s11076_s27 }
 0x425   : > { %v4127_v32 = vpop.xlane.xlu0 %4126 }
 0x426   : > { %v4124_v27 = vpop.xlane.xlu1 %4123  ;;  %vm4195_vm7 = vcmp.ge.f32.partialorder %v12766_v22, %v4127_v32 }
 0x427   : > { %vm4194_vm8 = vcmp.ge.f32.partialorder %v12771_v5, %v4124_v27  ;;  %v12968_v18 = vsel %vm4195_vm7, -inf, %v12766_v22 }
 0x428   : > { %v12972_v62 = vsel %vm4194_vm8, -inf, %v12771_v5  ;;  %v4245_v21 = vsel %vm2085_vm3, %v12968_v18, -inf }
 0x429   : > { %v4242_v22 = vsel %vm2085_vm3, %v12972_v62, -inf }
 0x42a   : > { %v4133_v57 = vpop.xlane.xlu0 %4132 }
 0x42b   : > { %vm4197_vm9 = vcmp.ge.f32.partialorder %v12784_v16, %v4133_v57 }
 0x42c   : > { %v12978_v4 = vsel %vm4197_vm9, -inf, %v12784_v16 }
 0x42d   : > { %v4251_v5 = vsel %vm2085_vm3, %v12978_v4, -inf }
 0x42e   : > { %v4130_v59 = vpop.xlane.xlu1 %4129 }
 0x42f   : > { %vm4196_vm10 = vcmp.ge.f32.partialorder %v12797_v52, %v4130_v59 }
 0x430   : > { %v12984_v45 = vsel %vm4196_vm10, -inf, %v12797_v52 }
 0x431   : > { %v4248_v28 = vsel %vm2085_vm3, %v12984_v45, -inf }
 0x432   : > { %v4139_v31 = vpop.xlane.xlu0 %4138  ;;  %v4136_v48 = vpop.xlane.xlu1 %4135 }
 0x433   : > { %vm4199_vm11 = vcmp.ge.f32.partialorder %v12813_v26, %v4139_v31  ;;  %vm4198_vm12 = vcmp.ge.f32.partialorder %v12806_v61, %v4136_v48 }
 0x434   : > { %v12990_v13 = vsel %vm4199_vm11, -inf, %v12813_v26  ;;  %v12996_v33 = vsel %vm4198_vm12, -inf, %v12806_v61 }
 0x435   : > { %v4257_v52 = vsel %vm2085_vm3, %v12990_v13, -inf  ;;  %v4254_v26 = vsel %vm2085_vm3, %v12996_v33, -inf }
 0x436   : > { %v4145_v49 = vpop.xlane.xlu0 %4144  ;;  %v4142_v16 = vpop.xlane.xlu1 %4141 }
 0x437   : > { %4246 = vmax.xlane.f32.xlu0 %v4245_v21  ;;  %vm4201_vm13 = vcmp.ge.f32.partialorder %v12827_v40, %v4145_v49  ;;  %vm4200_vm14 = vcmp.ge.f32.partialorder %v12822_v51, %v4142_v16 }
 0x438   : > { %v13002_v15 = vsel %vm4201_vm13, -inf, %v12827_v40  ;;  %v13007_v8 = vsel %vm4200_vm14, -inf, %v12822_v51 }
 0x439   : > { %4243 = vmax.xlane.f32.xlu1 %v4242_v22  ;;  %v4263_v61 = vsel %vm2085_vm3, %v13002_v15, -inf  ;;  %v4260_v9 = vsel %vm2085_vm3, %v13007_v8, -inf }
 0x43b   : > { %4252 = vmax.xlane.f32.xlu0 %v4251_v5 }
 0x43d   : > { %4249 = vmax.xlane.f32.xlu1 %v4248_v28 }
 0x43f   : > { %4258 = vmax.xlane.f32.xlu0 %v4257_v52 }
 0x441   : > { %4255 = vmax.xlane.f32.xlu1 %v4254_v26 }
 0x443   : > { %4264 = vmax.xlane.f32.xlu0 %v4263_v61 }
 0x445   : > { %4261 = vmax.xlane.f32.xlu1 %v4260_v9 }
 0x456   : > { %v13013_v25 = vpop.xlane.xlu0 %4054 }
 0x457   : > { %vm4091_vm15 = vcmp.ge.f32.partialorder %v12852_v50, %v13013_v25 }
 0x458   : > { %v13017_v40 = vpop.xlane.xlu1 %4051  ;;  %v13020_v23 = vsel %vm4091_vm15, -inf, %v12852_v50 }
 0x459   : > { %15411 = vst [vmem:[#allocation38_spill] sm:$0xff] %v13017_v40  ;;  %vm4090_vm1 = vcmp.ge.f32.partialorder %v12857_v37, %v13017_v40  ;;  %v4173_v51 = vsel %vm2085_vm3, %v13020_v23, -inf }
 0x45a   : > { %4174 = vmax.xlane.f32.xlu0 %v4173_v51  ;;  %v13027_v35 = vsel %vm4090_vm1, -inf, %v12857_v37 }
 0x45b   : > { %v4170_v30 = vsel %vm2085_vm3, %v13027_v35, -inf }
 0x45c   : > { %v13031_v54 = vpop.xlane.xlu0 %4060  ;;  %4171 = vmax.xlane.f32.xlu1 %v4170_v30 }
 0x45d   : > { %15412 = vst [vmem:[#allocation39_spill] sm:$0xff] %v13031_v54  ;;  %vm4093_vm4 = vcmp.ge.f32.partialorder %v12862_v2, %v13031_v54  ;;  %v11053_v54 = vld [vmem:[#allocation2] sm:$0xff] }
 0x45e   : > { %v13035_v50 = vpop.xlane.xlu1 %4057  ;;  %v13038_v56 = vsel %vm4093_vm4, -inf, %v12862_v2 }
 0x45f   : > { %15413 = vst [vmem:[#allocation40_spill] sm:$0xff] %v13035_v50  ;;  %vm4092_vm5 = vcmp.ge.f32.partialorder %v12867_v58, %v13035_v50  ;;  %v4179_v37 = vsel %vm2085_vm3, %v13038_v56, -inf }
 0x460   : > { %4180 = vmax.xlane.f32.xlu0 %v4179_v37  ;;  %v13045_v53 = vsel %vm4092_vm5, -inf, %v12867_v58 }
 0x461   : > { %v4176_v0 = vsel %vm2085_vm3, %v13045_v53, -inf }
 0x462   : > { %v13049_v7 = vpop.xlane.xlu0 %4066  ;;  %4177 = vmax.xlane.f32.xlu1 %v4176_v0 }
 0x463   : > { %15414 = vst [vmem:[#allocation41_spill] sm:$0xff] %v13049_v7  ;;  %vm4095_vm6 = vcmp.ge.f32.partialorder %v12873_v29, %v13049_v7 }
 0x464   : > { %v13053_v2 = vpop.xlane.xlu1 %4063  ;;  %v13056_v60 = vsel %vm4095_vm6, -inf, %v12873_v29 }
 0x465   : > { %15415 = vst [vmem:[#allocation42_spill] sm:$0xff] %v13053_v2  ;;  %vm4094_vm7 = vcmp.ge.f32.partialorder %v12877_v20, %v13053_v2  ;;  %v4185_v58 = vsel %vm2085_vm3, %v13056_v60, -inf  ;;  %v15450_v2 = vld [vmem:[#allocation23_spill] sm:$0xff] }
 0x466   : > { %4186 = vmax.xlane.f32.xlu0 %v4185_v58  ;;  %v13062_v46 = vpop.xlane.xlu0 %4072  ;;  %v13065_v41 = vsel %vm4094_vm7, -inf, %v12877_v20 }
 0x467   : > { %15416 = vst [vmem:[#allocation43_spill] sm:$0xff] %v13062_v46  ;;  %vm4097_vm8 = vcmp.ge.f32.partialorder %v12881_v42, %v13062_v46  ;;  %v4182_v63 = vsel %vm2085_vm3, %v13065_v41, -inf }
 0x468   : > { %v13071_v29 = vpop.xlane.xlu1 %4069  ;;  %v13074_v32 = vsel %vm4097_vm8, -inf, %v12881_v42  ;;  %4183 = vmax.xlane.f32.xlu1 %v4182_v63 }
 0x469   : > { %15417 = vst [vmem:[#allocation44_spill] sm:$0xff] %v13071_v29  ;;  %vm4096_vm9 = vcmp.ge.f32.partialorder %v12885_v47, %v13071_v29  ;;  %v4191_v27 = vsel %vm2085_vm3, %v13074_v32, -inf }
 0x46a   : > { %v13081_v20 = vsel %vm4096_vm9, -inf, %v12885_v47  ;;  %4192 = vmax.xlane.f32.xlu0 %v4191_v27 }
 0x46b   : > { %v4188_v57 = vsel %vm2085_vm3, %v13081_v20, -inf }
 0x46c   : > { %4189 = vmax.xlane.f32.xlu1 %v4188_v57 }
 0x47f   : > { %v4151_v59 = vpop.xlane.xlu0 %4150 }
 0x480   : > { %vm4203_vm10 = vcmp.ge.f32.partialorder %v12898_v14, %v4151_v59 }
 0x481   : > { %v13087_v42 = vsel %vm4203_vm10, -inf, %v12898_v14  ;;  %v4148_v31 = vpop.xlane.xlu1 %4147 }
 0x482   : > { %v4269_v48 = vsel %vm2085_vm3, %v13087_v42, -inf  ;;  %vm4202_vm11 = vcmp.ge.f32.partialorder %v12907_v34, %v4148_v31 }
 0x483   : > { %4270 = vmax.xlane.f32.xlu0 %v4269_v48  ;;  %v13093_v47 = vsel %vm4202_vm11, -inf, %v12907_v34  ;;  %v4157_v21 = vpop.xlane.xlu0 %4156 }
 0x484   : > { %vm4205_vm12 = vcmp.ge.f32.partialorder %v12916_v44, %v4157_v21  ;;  %v4266_v22 = vsel %vm2085_vm3, %v13093_v47, -inf }
 0x485   : > { %v13099_v49 = vsel %vm4205_vm12, -inf, %v12916_v44  ;;  %4267 = vmax.xlane.f32.xlu1 %v4266_v22  ;;  %v4154_v14 = vpop.xlane.xlu1 %4153 }
 0x486   : > { %vm4204_vm13 = vcmp.ge.f32.partialorder %v12925_v43, %v4154_v14  ;;  %v4275_v5 = vsel %vm2085_vm3, %v13099_v49, -inf }
 0x487   : > { %v13105_v16 = vsel %vm4204_vm13, -inf, %v12925_v43  ;;  %4276 = vmax.xlane.f32.xlu0 %v4275_v5  ;;  %v4163_v34 = vpop.xlane.xlu0 %4162 }
 0x488   : > { %vm4207_vm14 = vcmp.ge.f32.partialorder %v12934_v6, %v4163_v34  ;;  %v4272_v28 = vsel %vm2085_vm3, %v13105_v16, -inf }
 0x489   : > { %v13111_v44 = vsel %vm4207_vm14, -inf, %v12934_v6  ;;  %4273 = vmax.xlane.f32.xlu1 %v4272_v28  ;;  %v4160_v52 = vpop.xlane.xlu1 %4159 }
 0x48a   : > { %vm4206_vm15 = vcmp.ge.f32.partialorder %v12943_v17, %v4160_v52  ;;  %v4281_v26 = vsel %vm2085_vm3, %v13111_v44, -inf }
 0x48b   : > { %v13117_v43 = vsel %vm4206_vm15, -inf, %v12943_v17  ;;  %4282 = vmax.xlane.f32.xlu0 %v4281_v26  ;;  %v4169_v61 = vpop.xlane.xlu0 %4168 }
 0x48c   : > { %vm4209_vm1 = vcmp.ge.f32.partialorder %v12952_v38, %v4169_v61  ;;  %v4278_v9 = vsel %vm2085_vm3, %v13117_v43, -inf }
 0x48d   : > { %v13123_v6 = vsel %vm4209_vm1, -inf, %v12952_v38  ;;  %4279 = vmax.xlane.f32.xlu1 %v4278_v9  ;;  %v4166_v51 = vpop.xlane.xlu1 %4165 }
 0x48e   : > { %vm4208_vm4 = vcmp.ge.f32.partialorder %v12959_v55, %v4166_v51  ;;  %v4287_v30 = vsel %vm2085_vm3, %v13123_v6, -inf }
 0x48f   : > { %v13129_v17 = vsel %vm4208_vm4, -inf, %v12959_v55  ;;  %4288 = vmax.xlane.f32.xlu0 %v4287_v30  ;;  %v13133_v0 = vpop.permute.xlu0 %6072 }
 0x490   : > { %v4284_v37 = vsel %vm2085_vm3, %v13129_v17, -inf }
 0x491   : > { %4285 = vmax.xlane.f32.xlu1 %v4284_v37  ;;  %v13135_v58 = vpop.permute.xlu1 %6074 }
 0x4c0   : > { %v4247_v38 = vpop.xlane.xlu0 %4246 }
 0x4c1   : > { %vm4315_vm5 = vcmp.ge.f32.partialorder %v12968_v18, %v4247_v38 }
 0x4c2   : > { %v13139_v63 = vsel %vm4315_vm5, -inf, %v12968_v18  ;;  %v4244_v27 = vpop.xlane.xlu1 %4243 }
 0x4c3   : > { %vm4314_vm6 = vcmp.ge.f32.partialorder %v12972_v62, %v4244_v27  ;;  %v4365_v55 = vsel %vm2085_vm3, %v13139_v63, -inf }
 0x4c4   : > { %v13145_v57 = vsel %vm4314_vm6, -inf, %v12972_v62  ;;  %4366 = vmax.xlane.f32.xlu0 %v4365_v55  ;;  %v4253_v59 = vpop.xlane.xlu0 %4252 }
 0x4c5   : > { %vm4317_vm7 = vcmp.ge.f32.partialorder %v12978_v4, %v4253_v59  ;;  %v4362_v31 = vsel %vm2085_vm3, %v13145_v57, -inf }
 0x4c6   : > { %v13151_v48 = vsel %vm4317_vm7, -inf, %v12978_v4  ;;  %4363 = vmax.xlane.f32.xlu1 %v4362_v31  ;;  %v4250_v18 = vpop.xlane.xlu1 %4249 }
 0x4c7   : > { %vm4316_vm8 = vcmp.ge.f32.partialorder %v12984_v45, %v4250_v18  ;;  %v4371_v21 = vsel %vm2085_vm3, %v13151_v48, -inf }
 0x4c8   : > { %v13157_v62 = vsel %vm4316_vm8, -inf, %v12984_v45  ;;  %4372 = vmax.xlane.f32.xlu0 %v4371_v21  ;;  %v4259_v22 = vpop.xlane.xlu0 %4258 }
 0x4c9   : > { %vm4319_vm9 = vcmp.ge.f32.partialorder %v12990_v13, %v4259_v22  ;;  %v4368_v14 = vsel %vm2085_vm3, %v13157_v62, -inf }
 0x4ca   : > { %v13163_v4 = vsel %vm4319_vm9, -inf, %v12990_v13  ;;  %4369 = vmax.xlane.f32.xlu1 %v4368_v14  ;;  %v4256_v5 = vpop.xlane.xlu1 %4255 }
 0x4cb   : > { %vm4318_vm10 = vcmp.ge.f32.partialorder %v12996_v33, %v4256_v5  ;;  %v4377_v34 = vsel %vm2085_vm3, %v13163_v4, -inf }
 0x4cc   : > { %v13169_v45 = vsel %vm4318_vm10, -inf, %v12996_v33  ;;  %4378 = vmax.xlane.f32.xlu0 %v4377_v34  ;;  %v4265_v28 = vpop.xlane.xlu0 %4264 }
 0x4cd   : > { %vm4321_vm11 = vcmp.ge.f32.partialorder %v13002_v15, %v4265_v28  ;;  %v4374_v52 = vsel %vm2085_vm3, %v13169_v45, -inf }
 0x4ce   : > { %v13175_v13 = vsel %vm4321_vm11, -inf, %v13002_v15  ;;  %4375 = vmax.xlane.f32.xlu1 %v4374_v52  ;;  %v4262_v26 = vpop.xlane.xlu1 %4261 }
 0x4cf   : > { %vm4320_vm12 = vcmp.ge.f32.partialorder %v13007_v8, %v4262_v26  ;;  %v4383_v61 = vsel %vm2085_vm3, %v13175_v13, -inf }
 0x4d0   : > { %v13181_v33 = vsel %vm4320_vm12, -inf, %v13007_v8  ;;  %4384 = vmax.xlane.f32.xlu0 %v4383_v61 }
 0x4d1   : > { %v4380_v9 = vsel %vm2085_vm3, %v13181_v33, -inf }
 0x4d2   : > { %4381 = vmax.xlane.f32.xlu1 %v4380_v9 }
 0x4e3   : > { %v4175_v51 = vpop.xlane.xlu0 %4174 }
 0x4e4   : > { %vm4211_vm13 = vcmp.ge.f32.partialorder %v13020_v23, %v4175_v51 }
 0x4e5   : > { %v13187_v15 = vsel %vm4211_vm13, -inf, %v13020_v23  ;;  %v4172_v30 = vpop.xlane.xlu1 %4171 }
 0x4e6   : > { %vm4210_vm14 = vcmp.ge.f32.partialorder %v13027_v35, %v4172_v30  ;;  %v4293_v37 = vsel %vm2085_vm3, %v13187_v15, -inf }
 0x4e7   : > { %v13193_v8 = vsel %vm4210_vm14, -inf, %v13027_v35  ;;  %4294 = vmax.xlane.f32.xlu0 %v4293_v37 }
 0x4e8   : > { %v4290_v38 = vsel %vm2085_vm3, %v13193_v8, -inf }
 0x4e9   : > { %v4181_v27 = vpop.xlane.xlu0 %4180  ;;  %4291 = vmax.xlane.f32.xlu1 %v4290_v38 }
 0x4ea   : > { %vm4213_vm15 = vcmp.ge.f32.partialorder %v13038_v56, %v4181_v27 }
 0x4eb   : > { %v13199_v23 = vsel %vm4213_vm15, -inf, %v13038_v56  ;;  %v4178_v55 = vpop.xlane.xlu1 %4177 }
 0x4ec   : > { %vm4212_vm1 = vcmp.ge.f32.partialorder %v13045_v53, %v4178_v55  ;;  %v4299_v59 = vsel %vm2085_vm3, %v13199_v23, -inf }
 0x4ed   : > { %v13205_v35 = vsel %vm4212_vm1, -inf, %v13045_v53  ;;  %4300 = vmax.xlane.f32.xlu0 %v4299_v59 }
 0x4ee   : > { %v4296_v31 = vsel %vm2085_vm3, %v13205_v35, -inf }
 0x4ef   : > { %v4187_v18 = vpop.xlane.xlu0 %4186  ;;  %4297 = vmax.xlane.f32.xlu1 %v4296_v31 }
 0x4f0   : > { %vm4215_vm4 = vcmp.ge.f32.partialorder %v13056_v60, %v4187_v18 }
 0x4f1   : > { %v13211_v56 = vsel %vm4215_vm4, -inf, %v13056_v60  ;;  %v4184_v21 = vpop.xlane.xlu1 %4183 }
 0x4f2   : > { %v4305_v22 = vsel %vm2085_vm3, %v13211_v56, -inf  ;;  %vm4214_vm5 = vcmp.ge.f32.partialorder %v13065_v41, %v4184_v21 }
 0x4f3   : > { %4306 = vmax.xlane.f32.xlu0 %v4305_v22  ;;  %v13217_v53 = vsel %vm4214_vm5, -inf, %v13065_v41  ;;  %v4193_v14 = vpop.xlane.xlu0 %4192 }
 0x4f4   : > { %vm4217_vm6 = vcmp.ge.f32.partialorder %v13074_v32, %v4193_v14  ;;  %v4302_v5 = vsel %vm2085_vm3, %v13217_v53, -inf }
 0x4f5   : > { %v13223_v34 = vsel %vm4217_vm6, -inf, %v13074_v32  ;;  %4303 = vmax.xlane.f32.xlu1 %v4302_v5  ;;  %v4190_v60 = vpop.xlane.xlu1 %4189 }
 0x4f6   : > { %vm4216_vm7 = vcmp.ge.f32.partialorder %v13081_v20, %v4190_v60  ;;  %v4311_v28 = vsel %vm2085_vm3, %v13223_v34, -inf  ;;  %v13281_v60 = vld [vmem:[#allocation2 + $0x18] sm:$0xff] }
 0x4f7   : > { %v13229_v52 = vsel %vm4216_vm7, -inf, %v13081_v20  ;;  %4312 = vmax.xlane.f32.xlu0 %v4311_v28 }
 0x4f8   : > { %v4308_v41 = vsel %vm2085_vm3, %v13229_v52, -inf }
 0x4f9   : > { %4309 = vmax.xlane.f32.xlu1 %v4308_v41 }
 0x50c   : > { %v4271_v26 = vpop.xlane.xlu0 %4270 }
 0x50d   : > { %vm4323_vm8 = vcmp.ge.f32.partialorder %v13087_v42, %v4271_v26 }
 0x50e   : > { %v13235_v32 = vsel %vm4323_vm8, -inf, %v13087_v42  ;;  %v4268_v61 = vpop.xlane.xlu1 %4267 }
 0x50f   : > { %v4389_v9 = vsel %vm2085_vm3, %v13235_v32, -inf  ;;  %vm4322_vm9 = vcmp.ge.f32.partialorder %v13093_v47, %v4268_v61 }
 0x510   : > { %4390 = vmax.xlane.f32.xlu0 %v4389_v9  ;;  %v13241_v20 = vsel %vm4322_vm9, -inf, %v13093_v47  ;;  %v4277_v51 = vpop.xlane.xlu0 %4276 }
 0x511   : > { %vm4325_vm10 = vcmp.ge.f32.partialorder %v13099_v49, %v4277_v51  ;;  %v4386_v30 = vsel %vm2085_vm3, %v13241_v20, -inf }
 0x512   : > { %v13247_v37 = vsel %vm4325_vm10, -inf, %v13099_v49  ;;  %4387 = vmax.xlane.f32.xlu1 %v4386_v30  ;;  %v4274_v42 = vpop.xlane.xlu1 %4273 }
 0x513   : > { %vm4324_vm11 = vcmp.ge.f32.partialorder %v13105_v16, %v4274_v42  ;;  %v4395_v38 = vsel %vm2085_vm3, %v13247_v37, -inf }
 0x514   : > { %v13253_v27 = vsel %vm4324_vm11, -inf, %v13105_v16  ;;  %4396 = vmax.xlane.f32.xlu0 %v4395_v38  ;;  %v4283_v47 = vpop.xlane.xlu0 %4282 }
 0x515   : > { %vm4327_vm12 = vcmp.ge.f32.partialorder %v13111_v44, %v4283_v47  ;;  %v4392_v55 = vsel %vm2085_vm3, %v13253_v27, -inf }
 0x516   : > { %v13259_v49 = vsel %vm4327_vm12, -inf, %v13111_v44  ;;  %4393 = vmax.xlane.f32.xlu1 %v4392_v55  ;;  %v4280_v59 = vpop.xlane.xlu1 %4279 }
 0x517   : > { %vm4326_vm13 = vcmp.ge.f32.partialorder %v13117_v43, %v4280_v59  ;;  %v4401_v31 = vsel %vm2085_vm3, %v13259_v49, -inf }
 0x518   : > { %v13265_v16 = vsel %vm4326_vm13, -inf, %v13117_v43  ;;  %4402 = vmax.xlane.f32.xlu0 %v4401_v31  ;;  %v4289_v18 = vpop.xlane.xlu0 %4288 }
 0x519   : > { %vm4329_vm14 = vcmp.ge.f32.partialorder %v13123_v6, %v4289_v18  ;;  %v4398_v21 = vsel %vm2085_vm3, %v13265_v16, -inf }
 0x51a   : > { %v13271_v44 = vsel %vm4329_vm14, -inf, %v13123_v6  ;;  %4399 = vmax.xlane.f32.xlu1 %v4398_v21  ;;  %v4286_v22 = vpop.xlane.xlu1 %4285 }
 0x51b   : > { %vm4328_vm15 = vcmp.ge.f32.partialorder %v13129_v17, %v4286_v22  ;;  %v4407_v14 = vsel %vm2085_vm3, %v13271_v44, -inf }
 0x51c   : > { %v13277_v43 = vsel %vm4328_vm15, -inf, %v13129_v17  ;;  %4408 = vmax.xlane.f32.xlu0 %v4407_v14 }
 0x51d   : > { %v4404_v5 = vsel %vm2085_vm3, %v13277_v43, -inf }
 0x51e   : > { %4405 = vmax.xlane.f32.xlu1 %v4404_v5 }
 0x52f   : > { %6070 = vrot.lane.b32.xlu1 %v13281_v60, %s11076_s27 }
 0x54d   : > { %v4367_v6 = vpop.xlane.xlu0 %4366 }
 0x54e   : > { %vm4435_vm1 = vcmp.ge.f32.partialorder %v13139_v63, %v4367_v6 }
 0x54f   : > { %v13287_v28 = vsel %vm4435_vm1, -inf, %v13139_v63  ;;  %v4364_v41 = vpop.xlane.xlu1 %4363 }
 0x550   : > { %vm4434_vm4 = vcmp.ge.f32.partialorder %v13145_v57, %v4364_v41  ;;  %v4485_v17 = vsel %vm2085_vm3, %v13287_v28, -inf }
 0x551   : > { %v13293_v26 = vsel %vm4434_vm4, -inf, %v13145_v57  ;;  %4486 = vmax.xlane.f32.xlu0 %v4485_v17  ;;  %v4373_v61 = vpop.xlane.xlu0 %4372 }
 0x552   : > { %vm4437_vm5 = vcmp.ge.f32.partialorder %v13151_v48, %v4373_v61  ;;  %v4482_v9 = vsel %vm2085_vm3, %v13293_v26, -inf }
 0x553   : > { %v13299_v51 = vsel %vm4437_vm5, -inf, %v13151_v48  ;;  %4483 = vmax.xlane.f32.xlu1 %v4482_v9  ;;  %v4370_v63 = vpop.xlane.xlu1 %4369 }
 0x554   : > { %vm4436_vm6 = vcmp.ge.f32.partialorder %v13157_v62, %v4370_v63  ;;  %v4491_v30 = vsel %vm2085_vm3, %v13299_v51, -inf }
 0x555   : > { %v13305_v57 = vsel %vm4436_vm6, -inf, %v13157_v62  ;;  %4492 = vmax.xlane.f32.xlu0 %v4491_v30  ;;  %v4379_v42 = vpop.xlane.xlu0 %4378 }
 0x556   : > { %vm4439_vm7 = vcmp.ge.f32.partialorder %v13163_v4, %v4379_v42  ;;  %v4488_v38 = vsel %vm2085_vm3, %v13305_v57, -inf }
 0x557   : > { %v13311_v48 = vsel %vm4439_vm7, -inf, %v13163_v4  ;;  %4489 = vmax.xlane.f32.xlu1 %v4488_v38  ;;  %v4376_v47 = vpop.xlane.xlu1 %4375 }
 0x558   : > { %vm4438_vm8 = vcmp.ge.f32.partialorder %v13169_v45, %v4376_v47  ;;  %v4497_v55 = vsel %vm2085_vm3, %v13311_v48, -inf }
 0x559   : > { %v13317_v62 = vsel %vm4438_vm8, -inf, %v13169_v45  ;;  %4498 = vmax.xlane.f32.xlu0 %v4497_v55  ;;  %v4385_v59 = vpop.xlane.xlu0 %4384 }
 0x55a   : > { %vm4441_vm9 = vcmp.ge.f32.partialorder %v13175_v13, %v4385_v59  ;;  %v4494_v31 = vsel %vm2085_vm3, %v13317_v62, -inf }
 0x55b   : > { %v13323_v4 = vsel %vm4441_vm9, -inf, %v13175_v13  ;;  %4495 = vmax.xlane.f32.xlu1 %v4494_v31  ;;  %v4382_v18 = vpop.xlane.xlu1 %4381 }
 0x55c   : > { %vm4440_vm10 = vcmp.ge.f32.partialorder %v13181_v33, %v4382_v18  ;;  %v4503_v21 = vsel %vm2085_vm3, %v13323_v4, -inf }
 0x55d   : > { %v13329_v45 = vsel %vm4440_vm10, -inf, %v13181_v33  ;;  %4504 = vmax.xlane.f32.xlu0 %v4503_v21 }
 0x55e   : > { %v4500_v22 = vsel %vm2085_vm3, %v13329_v45, -inf }
 0x55f   : > { %4501 = vmax.xlane.f32.xlu1 %v4500_v22 }
 0x570   : > { %v4295_v14 = vpop.xlane.xlu0 %4294 }
 0x571   : > { %vm4331_vm11 = vcmp.ge.f32.partialorder %v13187_v15, %v4295_v14 }
 0x572   : > { %v13335_v13 = vsel %vm4331_vm11, -inf, %v13187_v15  ;;  %v4292_v5 = vpop.xlane.xlu1 %4291 }
 0x573   : > { %vm4330_vm12 = vcmp.ge.f32.partialorder %v13193_v8, %v4292_v5  ;;  %v4413_v6 = vsel %vm2085_vm3, %v13335_v13, -inf }
 0x574   : > { %v13341_v33 = vsel %vm4330_vm12, -inf, %v13193_v8  ;;  %4414 = vmax.xlane.f32.xlu0 %v4413_v6 }
 0x575   : > { %v4410_v41 = vsel %vm2085_vm3, %v13341_v33, -inf }
 0x576   : > { %v4301_v17 = vpop.xlane.xlu0 %4300  ;;  %4411 = vmax.xlane.f32.xlu1 %v4410_v41 }
 0x577   : > { %vm4333_vm13 = vcmp.ge.f32.partialorder %v13199_v23, %v4301_v17 }
 0x578   : > { %v13347_v15 = vsel %vm4333_vm13, -inf, %v13199_v23  ;;  %v4298_v61 = vpop.xlane.xlu1 %4297 }
 0x579   : > { %vm4332_vm14 = vcmp.ge.f32.partialorder %v13205_v35, %v4298_v61  ;;  %v4419_v9 = vsel %vm2085_vm3, %v13347_v15, -inf }
 0x57a   : > { %v13353_v8 = vsel %vm4332_vm14, -inf, %v13205_v35  ;;  %4420 = vmax.xlane.f32.xlu0 %v4419_v9 }
 0x57b   : > { %v4416_v63 = vsel %vm2085_vm3, %v13353_v8, -inf }
 0x57c   : > { %v4307_v30 = vpop.xlane.xlu0 %4306  ;;  %4417 = vmax.xlane.f32.xlu1 %v4416_v63 }
 0x57d   : > { %vm4335_vm15 = vcmp.ge.f32.partialorder %v13211_v56, %v4307_v30 }
 0x57e   : > { %v13359_v23 = vsel %vm4335_vm15, -inf, %v13211_v56  ;;  %v4304_v42 = vpop.xlane.xlu1 %4303 }
 0x57f   : > { %v4425_v38 = vsel %vm2085_vm3, %v13359_v23, -inf  ;;  %vm4334_vm1 = vcmp.ge.f32.partialorder %v13217_v53, %v4304_v42 }
 0x580   : > { %4426 = vmax.xlane.f32.xlu0 %v4425_v38  ;;  %v13365_v35 = vsel %vm4334_vm1, -inf, %v13217_v53  ;;  %v4313_v47 = vpop.xlane.xlu0 %4312 }
 0x581   : > { %vm4337_vm4 = vcmp.ge.f32.partialorder %v13223_v34, %v4313_v47  ;;  %v4422_v55 = vsel %vm2085_vm3, %v13365_v35, -inf }
 0x582   : > { %v13371_v59 = vsel %vm4337_vm4, -inf, %v13223_v34  ;;  %4423 = vmax.xlane.f32.xlu1 %v4422_v55  ;;  %v4310_v56 = vpop.xlane.xlu1 %4309 }
 0x583   : > { %vm4336_vm5 = vcmp.ge.f32.partialorder %v13229_v52, %v4310_v56  ;;  %v4431_v31 = vsel %vm2085_vm3, %v13371_v59, -inf }
 0x584   : > { %v13377_v18 = vsel %vm4336_vm5, -inf, %v13229_v52  ;;  %4432 = vmax.xlane.f32.xlu0 %v4431_v31 }
 0x585   : > { %v4428_v53 = vsel %vm2085_vm3, %v13377_v18, -inf }
 0x586   : > { %4429 = vmax.xlane.f32.xlu1 %v4428_v53 }
 0x599   : > { %v4391_v21 = vpop.xlane.xlu0 %4390 }
 0x59a   : > { %vm4443_vm6 = vcmp.ge.f32.partialorder %v13235_v32, %v4391_v21 }
 0x59b   : > { %v13383_v34 = vsel %vm4443_vm6, -inf, %v13235_v32  ;;  %v4388_v22 = vpop.xlane.xlu1 %4387 }
 0x59c   : > { %v4509_v14 = vsel %vm2085_vm3, %v13383_v34, -inf  ;;  %vm4442_vm7 = vcmp.ge.f32.partialorder %v13241_v20, %v4388_v22 }
 0x59d   : > { %4510 = vmax.xlane.f32.xlu0 %v4509_v14  ;;  %v13389_v52 = vsel %vm4442_vm7, -inf, %v13241_v20  ;;  %v4397_v5 = vpop.xlane.xlu0 %4396 }
 0x59e   : > { %vm4445_vm8 = vcmp.ge.f32.partialorder %v13247_v37, %v4397_v5  ;;  %v4506_v6 = vsel %vm2085_vm3, %v13389_v52, -inf }
 0x59f   : > { %v13395_v41 = vsel %vm4445_vm8, -inf, %v13247_v37  ;;  %4507 = vmax.xlane.f32.xlu1 %v4506_v6  ;;  %v4394_v32 = vpop.xlane.xlu1 %4393 }
 0x5a0   : > { %vm4444_vm9 = vcmp.ge.f32.partialorder %v13253_v27, %v4394_v32  ;;  %v4515_v17 = vsel %vm2085_vm3, %v13395_v41, -inf }
 0x5a1   : > { %v13401_v61 = vsel %vm4444_vm9, -inf, %v13253_v27  ;;  %4516 = vmax.xlane.f32.xlu0 %v4515_v17  ;;  %v4403_v20 = vpop.xlane.xlu0 %4402 }
 0x5a2   : > { %vm4447_vm10 = vcmp.ge.f32.partialorder %v13259_v49, %v4403_v20  ;;  %v4512_v9 = vsel %vm2085_vm3, %v13401_v61, -inf }
 0x5a3   : > { %v13407_v37 = vsel %vm4447_vm10, -inf, %v13259_v49  ;;  %4513 = vmax.xlane.f32.xlu1 %v4512_v9  ;;  %v4400_v63 = vpop.xlane.xlu1 %4399 }
 0x5a4   : > { %vm4446_vm11 = vcmp.ge.f32.partialorder %v13265_v16, %v4400_v63  ;;  %v4521_v30 = vsel %vm2085_vm3, %v13407_v37, -inf }
 0x5a5   : > { %v13413_v27 = vsel %vm4446_vm11, -inf, %v13265_v16  ;;  %4522 = vmax.xlane.f32.xlu0 %v4521_v30  ;;  %v4409_v42 = vpop.xlane.xlu0 %4408 }
 0x5a6   : > { %vm4449_vm12 = vcmp.ge.f32.partialorder %v13271_v44, %v4409_v42  ;;  %v4518_v38 = vsel %vm2085_vm3, %v13413_v27, -inf }
 0x5a7   : > { %v13419_v49 = vsel %vm4449_vm12, -inf, %v13271_v44  ;;  %4519 = vmax.xlane.f32.xlu1 %v4518_v38  ;;  %v4406_v47 = vpop.xlane.xlu1 %4405 }
 0x5a8   : > { %vm4448_vm13 = vcmp.ge.f32.partialorder %v13277_v43, %v4406_v47  ;;  %v4527_v55 = vsel %vm2085_vm3, %v13419_v49, -inf }
 0x5a9   : > { %v13425_v16 = vsel %vm4448_vm13, -inf, %v13277_v43  ;;  %4528 = vmax.xlane.f32.xlu0 %v4527_v55 }
 0x5aa   : > { %v4524_v56 = vsel %vm2085_vm3, %v13425_v16, -inf }
 0x5ab   : > { %4525 = vmax.xlane.f32.xlu1 %v4524_v56  ;;  %v13429_v31 = vpop.permute.xlu1 %6070 }
 0x5da   : > { %v4487_v53 = vpop.xlane.xlu0 %4486 }
 0x5db   : > { %vm4555_vm14 = vcmp.ge.f32.partialorder %v13287_v28, %v4487_v53 }
 0x5dc   : > { %v13433_v44 = vsel %vm4555_vm14, -inf, %v13287_v28  ;;  %v4484_v21 = vpop.xlane.xlu1 %4483 }
 0x5dd   : > { %vm4554_vm15 = vcmp.ge.f32.partialorder %v13293_v26, %v4484_v21  ;;  %v4605_v43 = vsel %vm2085_vm3, %v13433_v44, -inf }
 0x5de   : > { %v13439_v22 = vsel %vm4554_vm15, -inf, %v13293_v26  ;;  %4606 = vmax.xlane.f32.xlu0 %v4605_v43  ;;  %v4493_v14 = vpop.xlane.xlu0 %4492 }
 0x5df   : > { %vm4557_vm1 = vcmp.ge.f32.partialorder %v13299_v51, %v4493_v14  ;;  %v4602_v5 = vsel %vm2085_vm3, %v13439_v22, -inf }
 0x5e0   : > { %v13445_v6 = vsel %vm4557_vm1, -inf, %v13299_v51  ;;  %4603 = vmax.xlane.f32.xlu1 %v4602_v5  ;;  %v4490_v28 = vpop.xlane.xlu1 %4489 }
 0x5e1   : > { %vm4556_vm4 = vcmp.ge.f32.partialorder %v13305_v57, %v4490_v28  ;;  %v4611_v32 = vsel %vm2085_vm3, %v13445_v6, -inf }
 0x5e2   : > { %v13451_v26 = vsel %vm4556_vm4, -inf, %v13305_v57  ;;  %4612 = vmax.xlane.f32.xlu0 %v4611_v32  ;;  %v4499_v17 = vpop.xlane.xlu0 %4498 }
 0x5e3   : > { %vm4559_vm5 = vcmp.ge.f32.partialorder %v13311_v48, %v4499_v17  ;;  %v4608_v20 = vsel %vm2085_vm3, %v13451_v26, -inf }
 0x5e4   : > { %v13457_v51 = vsel %vm4559_vm5, -inf, %v13311_v48  ;;  %4609 = vmax.xlane.f32.xlu1 %v4608_v20  ;;  %v4496_v9 = vpop.xlane.xlu1 %4495 }
 0x5e5   : > { %vm4558_vm6 = vcmp.ge.f32.partialorder %v13317_v62, %v4496_v9  ;;  %v4617_v63 = vsel %vm2085_vm3, %v13457_v51, -inf }
 0x5e6   : > { %v13463_v57 = vsel %vm4558_vm6, -inf, %v13317_v62  ;;  %4618 = vmax.xlane.f32.xlu0 %v4617_v63  ;;  %v4505_v30 = vpop.xlane.xlu0 %4504 }
 0x5e7   : > { %vm4561_vm7 = vcmp.ge.f32.partialorder %v13323_v4, %v4505_v30  ;;  %v4614_v42 = vsel %vm2085_vm3, %v13463_v57, -inf }
 0x5e8   : > { %v13469_v48 = vsel %vm4561_vm7, -inf, %v13323_v4  ;;  %4615 = vmax.xlane.f32.xlu1 %v4614_v42  ;;  %v4502_v38 = vpop.xlane.xlu1 %4501 }
 0x5e9   : > { %vm4560_vm8 = vcmp.ge.f32.partialorder %v13329_v45, %v4502_v38  ;;  %v4623_v47 = vsel %vm2085_vm3, %v13469_v48, -inf }
 0x5ea   : > { %v13475_v62 = vsel %vm4560_vm8, -inf, %v13329_v45  ;;  %4624 = vmax.xlane.f32.xlu0 %v4623_v47 }
 0x5eb   : > { %v4620_v55 = vsel %vm2085_vm3, %v13475_v62, -inf }
 0x5ec   : > { %4621 = vmax.xlane.f32.xlu1 %v4620_v55 }
 0x5fd   : > { %v4415_v56 = vpop.xlane.xlu0 %4414 }
 0x5fe   : > { %vm4451_vm9 = vcmp.ge.f32.partialorder %v13335_v13, %v4415_v56 }
 0x5ff   : > { %v13481_v4 = vsel %vm4451_vm9, -inf, %v13335_v13  ;;  %v4412_v53 = vpop.xlane.xlu1 %4411 }
 0x600   : > { %vm4450_vm10 = vcmp.ge.f32.partialorder %v13341_v33, %v4412_v53  ;;  %v4533_v21 = vsel %vm2085_vm3, %v13481_v4, -inf }
 0x601   : > { %v13487_v45 = vsel %vm4450_vm10, -inf, %v13341_v33  ;;  %4534 = vmax.xlane.f32.xlu0 %v4533_v21 }
 0x602   : > { %v4530_v43 = vsel %vm2085_vm3, %v13487_v45, -inf }
 0x603   : > { %v4421_v14 = vpop.xlane.xlu0 %4420  ;;  %4531 = vmax.xlane.f32.xlu1 %v4530_v43 }
 0x604   : > { %vm4453_vm11 = vcmp.ge.f32.partialorder %v13347_v15, %v4421_v14 }
 0x605   : > { %v13493_v13 = vsel %vm4453_vm11, -inf, %v13347_v15  ;;  %v4418_v5 = vpop.xlane.xlu1 %4417 }
 0x606   : > { %vm4452_vm12 = vcmp.ge.f32.partialorder %v13353_v8, %v4418_v5  ;;  %v4539_v28 = vsel %vm2085_vm3, %v13493_v13, -inf }
 0x607   : > { %v13499_v33 = vsel %vm4452_vm12, -inf, %v13353_v8  ;;  %4540 = vmax.xlane.f32.xlu0 %v4539_v28 }
 0x608   : > { %v4536_v32 = vsel %vm2085_vm3, %v13499_v33, -inf }
 0x609   : > { %v4427_v17 = vpop.xlane.xlu0 %4426  ;;  %4537 = vmax.xlane.f32.xlu1 %v4536_v32 }
 0x60a   : > { %vm4455_vm13 = vcmp.ge.f32.partialorder %v13359_v23, %v4427_v17 }
 0x60b   : > { %v13505_v15 = vsel %vm4455_vm13, -inf, %v13359_v23  ;;  %v4424_v20 = vpop.xlane.xlu1 %4423 }
 0x60c   : > { %v4545_v9 = vsel %vm2085_vm3, %v13505_v15, -inf  ;;  %vm4454_vm14 = vcmp.ge.f32.partialorder %v13365_v35, %v4424_v20 }
 0x60d   : > { %4546 = vmax.xlane.f32.xlu0 %v4545_v9  ;;  %v13511_v8 = vsel %vm4454_vm14, -inf, %v13365_v35  ;;  %v4433_v63 = vpop.xlane.xlu0 %4432 }
 0x60e   : > { %vm4457_vm15 = vcmp.ge.f32.partialorder %v13371_v59, %v4433_v63  ;;  %v4542_v30 = vsel %vm2085_vm3, %v13511_v8, -inf }
 0x60f   : > { %v13517_v42 = vsel %vm4457_vm15, -inf, %v13371_v59  ;;  %4543 = vmax.xlane.f32.xlu1 %v4542_v30  ;;  %v4430_v23 = vpop.xlane.xlu1 %4429 }
 0x610   : > { %vm4456_vm1 = vcmp.ge.f32.partialorder %v13377_v18, %v4430_v23  ;;  %v4551_v38 = vsel %vm2085_vm3, %v13517_v42, -inf }
 0x611   : > { %v13523_v47 = vsel %vm4456_vm1, -inf, %v13377_v18  ;;  %4552 = vmax.xlane.f32.xlu0 %v4551_v38 }
 0x612   : > { %v4548_v35 = vsel %vm2085_vm3, %v13523_v47, -inf }
 0x613   : > { %4549 = vmax.xlane.f32.xlu1 %v4548_v35  ;;  %v13575_v35 = vld [vmem:[#allocation2 + $0x10] sm:$0xff] }
 0x626   : > { %v4511_v55 = vpop.xlane.xlu0 %4510 }
 0x627   : > { %vm4563_vm4 = vcmp.ge.f32.partialorder %v13383_v34, %v4511_v55 }
 0x628   : > { %v13529_v59 = vsel %vm4563_vm4, -inf, %v13383_v34  ;;  %v4508_v56 = vpop.xlane.xlu1 %4507 }
 0x629   : > { %v4629_v53 = vsel %vm2085_vm3, %v13529_v59, -inf  ;;  %vm4562_vm5 = vcmp.ge.f32.partialorder %v13389_v52, %v4508_v56 }
 0x62a   : > { %4630 = vmax.xlane.f32.xlu0 %v4629_v53  ;;  %v13535_v18 = vsel %vm4562_vm5, -inf, %v13389_v52  ;;  %v4517_v21 = vpop.xlane.xlu0 %4516 }
 0x62b   : > { %vm4565_vm6 = vcmp.ge.f32.partialorder %v13395_v41, %v4517_v21  ;;  %v4626_v43 = vsel %vm2085_vm3, %v13535_v18, -inf }
 0x62c   : > { %v13541_v14 = vsel %vm4565_vm6, -inf, %v13395_v41  ;;  %4627 = vmax.xlane.f32.xlu1 %v4626_v43  ;;  %v4514_v34 = vpop.xlane.xlu1 %4513 }
 0x62d   : > { %vm4564_vm7 = vcmp.ge.f32.partialorder %v13401_v61, %v4514_v34  ;;  %v4635_v5 = vsel %vm2085_vm3, %v13541_v14, -inf }
 0x62e   : > { %v13547_v28 = vsel %vm4564_vm7, -inf, %v13401_v61  ;;  %4636 = vmax.xlane.f32.xlu0 %v4635_v5  ;;  %v4523_v52 = vpop.xlane.xlu0 %4522 }
 0x62f   : > { %vm4567_vm8 = vcmp.ge.f32.partialorder %v13407_v37, %v4523_v52  ;;  %v4632_v32 = vsel %vm2085_vm3, %v13547_v28, -inf }
 0x630   : > { %v13553_v41 = vsel %vm4567_vm8, -inf, %v13407_v37  ;;  %4633 = vmax.xlane.f32.xlu1 %v4632_v32  ;;  %v4520_v17 = vpop.xlane.xlu1 %4519 }
 0x631   : > { %vm4566_vm9 = vcmp.ge.f32.partialorder %v13413_v27, %v4520_v17  ;;  %v4641_v20 = vsel %vm2085_vm3, %v13553_v41, -inf }
 0x632   : > { %v13559_v61 = vsel %vm4566_vm9, -inf, %v13413_v27  ;;  %4642 = vmax.xlane.f32.xlu0 %v4641_v20  ;;  %v4529_v9 = vpop.xlane.xlu0 %4528 }
 0x633   : > { %vm4569_vm10 = vcmp.ge.f32.partialorder %v13419_v49, %v4529_v9  ;;  %v4638_v63 = vsel %vm2085_vm3, %v13559_v61, -inf }
 0x634   : > { %v13565_v37 = vsel %vm4569_vm10, -inf, %v13419_v49  ;;  %4639 = vmax.xlane.f32.xlu1 %v4638_v63  ;;  %v4526_v30 = vpop.xlane.xlu1 %4525  ;;  %v6049_v49 = vld [vmem:[#allocation2 + $0x8] sm:$0xff] }
 0x635   : > { %vm4568_vm11 = vcmp.ge.f32.partialorder %v13425_v16, %v4526_v30  ;;  %v4647_v23 = vsel %vm2085_vm3, %v13565_v37, -inf }
 0x636   : > { %v13571_v27 = vsel %vm4568_vm11, -inf, %v13425_v16  ;;  %4648 = vmax.xlane.f32.xlu0 %v4647_v23 }
 0x637   : > { %v4644_v38 = vsel %vm2085_vm3, %v13571_v27, -inf }
 0x638   : > { %4645 = vmax.xlane.f32.xlu1 %v4644_v38 }
 0x649   : > { %6068 = vrot.lane.b32.xlu1 %v13575_v35, %s11076_s27 }
 0x64c   : > { %6066 = vrot.lane.b32.xlu0 %v6049_v49, %s11076_s27 }
 0x667   : > { %v4607_v55 = vpop.xlane.xlu0 %4606 }
 0x668   : > { %vm4675_vm12 = vcmp.ge.f32.partialorder %v13433_v44, %v4607_v55 }
 0x669   : > { %v13582_v56 = vsel %vm4675_vm12, -inf, %v13433_v44  ;;  %v4604_v16 = vpop.xlane.xlu1 %4603 }
 0x66a   : > { %vm4674_vm13 = vcmp.ge.f32.partialorder %v13439_v22, %v4604_v16  ;;  %v4725_v53 = vsel %vm2085_vm3, %v13582_v56, -inf }
 0x66b   : > { %v13588_v21 = vsel %vm4674_vm13, -inf, %v13439_v22  ;;  %4726 = vmax.xlane.f32.xlu0 %v4725_v53  ;;  %v4613_v43 = vpop.xlane.xlu0 %4612 }
 0x66c   : > { %vm4677_vm14 = vcmp.ge.f32.partialorder %v13445_v6, %v4613_v43  ;;  %v4722_v34 = vsel %vm2085_vm3, %v13588_v21, -inf }
 0x66d   : > { %v13594_v5 = vsel %vm4677_vm14, -inf, %v13445_v6  ;;  %4723 = vmax.xlane.f32.xlu1 %v4722_v34  ;;  %v4610_v44 = vpop.xlane.xlu1 %4609 }
 0x66e   : > { %vm4676_vm15 = vcmp.ge.f32.partialorder %v13451_v26, %v4610_v44  ;;  %v4731_v52 = vsel %vm2085_vm3, %v13594_v5, -inf }
 0x66f   : > { %v13600_v22 = vsel %vm4676_vm15, -inf, %v13451_v26  ;;  %4732 = vmax.xlane.f32.xlu0 %v4731_v52  ;;  %v4619_v32 = vpop.xlane.xlu0 %4618 }
 0x670   : > { %vm4679_vm1 = vcmp.ge.f32.partialorder %v13457_v51, %v4619_v32  ;;  %v4728_v17 = vsel %vm2085_vm3, %v13600_v22, -inf }
 0x671   : > { %v13606_v6 = vsel %vm4679_vm1, -inf, %v13457_v51  ;;  %4729 = vmax.xlane.f32.xlu1 %v4728_v17  ;;  %v4616_v20 = vpop.xlane.xlu1 %4615 }
 0x672   : > { %vm4678_vm4 = vcmp.ge.f32.partialorder %v13463_v57, %v4616_v20  ;;  %v4737_v9 = vsel %vm2085_vm3, %v13606_v6, -inf }
 0x673   : > { %v13612_v26 = vsel %vm4678_vm4, -inf, %v13463_v57  ;;  %4738 = vmax.xlane.f32.xlu0 %v4737_v9  ;;  %v4625_v63 = vpop.xlane.xlu0 %4624 }
 0x674   : > { %vm4681_vm5 = vcmp.ge.f32.partialorder %v13469_v48, %v4625_v63  ;;  %v4734_v30 = vsel %vm2085_vm3, %v13612_v26, -inf }
 0x675   : > { %v13618_v51 = vsel %vm4681_vm5, -inf, %v13469_v48  ;;  %4735 = vmax.xlane.f32.xlu1 %v4734_v30  ;;  %v4622_v23 = vpop.xlane.xlu1 %4621 }
 0x676   : > { %vm4680_vm6 = vcmp.ge.f32.partialorder %v13475_v62, %v4622_v23  ;;  %v4743_v38 = vsel %vm2085_vm3, %v13618_v51, -inf }
 0x677   : > { %v13624_v57 = vsel %vm4680_vm6, -inf, %v13475_v62  ;;  %4744 = vmax.xlane.f32.xlu0 %v4743_v38 }
 0x678   : > { %v4740_v49 = vsel %vm2085_vm3, %v13624_v57, -inf }
 0x679   : > { %4741 = vmax.xlane.f32.xlu1 %v4740_v49 }
 0x68a   : > { %v4535_v55 = vpop.xlane.xlu0 %4534 }
 0x68b   : > { %vm4571_vm7 = vcmp.ge.f32.partialorder %v13481_v4, %v4535_v55 }
 0x68c   : > { %v13630_v48 = vsel %vm4571_vm7, -inf, %v13481_v4  ;;  %v4532_v16 = vpop.xlane.xlu1 %4531 }
 0x68d   : > { %vm4570_vm8 = vcmp.ge.f32.partialorder %v13487_v45, %v4532_v16  ;;  %v4653_v53 = vsel %vm2085_vm3, %v13630_v48, -inf }
 0x68e   : > { %v13636_v62 = vsel %vm4570_vm8, -inf, %v13487_v45  ;;  %4654 = vmax.xlane.f32.xlu0 %v4653_v53 }
 0x68f   : > { %v4650_v43 = vsel %vm2085_vm3, %v13636_v62, -inf }
 0x690   : > { %v4541_v34 = vpop.xlane.xlu0 %4540  ;;  %4651 = vmax.xlane.f32.xlu1 %v4650_v43 }
 0x691   : > { %vm4573_vm9 = vcmp.ge.f32.partialorder %v13493_v13, %v4541_v34 }
 0x692   : > { %v13642_v4 = vsel %vm4573_vm9, -inf, %v13493_v13  ;;  %v4538_v44 = vpop.xlane.xlu1 %4537 }
 0x693   : > { %vm4572_vm10 = vcmp.ge.f32.partialorder %v13499_v33, %v4538_v44  ;;  %v4659_v52 = vsel %vm2085_vm3, %v13642_v4, -inf }
 0x694   : > { %v13648_v45 = vsel %vm4572_vm10, -inf, %v13499_v33  ;;  %4660 = vmax.xlane.f32.xlu0 %v4659_v52 }
 0x695   : > { %v4656_v32 = vsel %vm2085_vm3, %v13648_v45, -inf }
 0x696   : > { %v4547_v17 = vpop.xlane.xlu0 %4546  ;;  %4657 = vmax.xlane.f32.xlu1 %v4656_v32 }
 0x697   : > { %vm4575_vm11 = vcmp.ge.f32.partialorder %v13505_v15, %v4547_v17 }
 0x698   : > { %v13654_v13 = vsel %vm4575_vm11, -inf, %v13505_v15  ;;  %v4544_v20 = vpop.xlane.xlu1 %4543 }
 0x699   : > { %v4665_v9 = vsel %vm2085_vm3, %v13654_v13, -inf  ;;  %vm4574_vm12 = vcmp.ge.f32.partialorder %v13511_v8, %v4544_v20 }
 0x69a   : > { %4666 = vmax.xlane.f32.xlu0 %v4665_v9  ;;  %v13660_v33 = vsel %vm4574_vm12, -inf, %v13511_v8  ;;  %v4553_v63 = vpop.xlane.xlu0 %4552 }
 0x69b   : > { %vm4577_vm13 = vcmp.ge.f32.partialorder %v13517_v42, %v4553_v63  ;;  %v4662_v30 = vsel %vm2085_vm3, %v13660_v33, -inf }
 0x69c   : > { %v13666_v23 = vsel %vm4577_vm13, -inf, %v13517_v42  ;;  %4663 = vmax.xlane.f32.xlu1 %v4662_v30  ;;  %v4550_v15 = vpop.xlane.xlu1 %4549 }
 0x69d   : > { %vm4576_vm14 = vcmp.ge.f32.partialorder %v13523_v47, %v4550_v15  ;;  %v4671_v38 = vsel %vm2085_vm3, %v13666_v23, -inf }
 0x69e   : > { %v13672_v49 = vsel %vm4576_vm14, -inf, %v13523_v47  ;;  %4672 = vmax.xlane.f32.xlu0 %v4671_v38 }
 0x69f   : > { %v4668_v8 = vsel %vm2085_vm3, %v13672_v49, -inf }
 0x6a0   : > { %4669 = vmax.xlane.f32.xlu1 %v4668_v8 }
 0x6b3   : > { %v4631_v55 = vpop.xlane.xlu0 %4630 }
 0x6b4   : > { %vm4683_vm15 = vcmp.ge.f32.partialorder %v13529_v59, %v4631_v55 }
 0x6b5   : > { %v13678_v42 = vsel %vm4683_vm15, -inf, %v13529_v59  ;;  %v4628_v16 = vpop.xlane.xlu1 %4627 }
 0x6b6   : > { %v4749_v53 = vsel %vm2085_vm3, %v13678_v42, -inf  ;;  %vm4682_vm1 = vcmp.ge.f32.partialorder %v13535_v18, %v4628_v16 }
 0x6b7   : > { %4750 = vmax.xlane.f32.xlu0 %v4749_v53  ;;  %v13684_v47 = vsel %vm4682_vm1, -inf, %v13535_v18  ;;  %v4637_v43 = vpop.xlane.xlu0 %4636 }
 0x6b8   : > { %vm4685_vm4 = vcmp.ge.f32.partialorder %v13541_v14, %v4637_v43  ;;  %v4746_v34 = vsel %vm2085_vm3, %v13684_v47, -inf }
 0x6b9   : > { %v13690_v44 = vsel %vm4685_vm4, -inf, %v13541_v14  ;;  %4747 = vmax.xlane.f32.xlu1 %v4746_v34  ;;  %v4634_v59 = vpop.xlane.xlu1 %4633 }
 0x6ba   : > { %vm4684_vm5 = vcmp.ge.f32.partialorder %v13547_v28, %v4634_v59  ;;  %v4755_v52 = vsel %vm2085_vm3, %v13690_v44, -inf }
 0x6bb   : > { %v13696_v32 = vsel %vm4684_vm5, -inf, %v13547_v28  ;;  %4756 = vmax.xlane.f32.xlu0 %v4755_v52  ;;  %v4643_v18 = vpop.xlane.xlu0 %4642 }
 0x6bc   : > { %vm4687_vm6 = vcmp.ge.f32.partialorder %v13553_v41, %v4643_v18  ;;  %v4752_v17 = vsel %vm2085_vm3, %v13696_v32, -inf }
 0x6bd   : > { %v13702_v14 = vsel %vm4687_vm6, -inf, %v13553_v41  ;;  %4753 = vmax.xlane.f32.xlu1 %v4752_v17  ;;  %v4640_v20 = vpop.xlane.xlu1 %4639 }
 0x6be   : > { %vm4686_vm7 = vcmp.ge.f32.partialorder %v13559_v61, %v4640_v20  ;;  %v4761_v9 = vsel %vm2085_vm3, %v13702_v14, -inf }
 0x6bf   : > { %v13708_v28 = vsel %vm4686_vm7, -inf, %v13559_v61  ;;  %4762 = vmax.xlane.f32.xlu0 %v4761_v9  ;;  %v4649_v63 = vpop.xlane.xlu0 %4648 }
 0x6c0   : > { %vm4689_vm8 = vcmp.ge.f32.partialorder %v13565_v37, %v4649_v63  ;;  %v4758_v30 = vsel %vm2085_vm3, %v13708_v28, -inf }
 0x6c1   : > { %v13714_v41 = vsel %vm4689_vm8, -inf, %v13565_v37  ;;  %4759 = vmax.xlane.f32.xlu1 %v4758_v30  ;;  %v4646_v15 = vpop.xlane.xlu1 %4645 }
 0x6c2   : > { %vm4688_vm9 = vcmp.ge.f32.partialorder %v13571_v27, %v4646_v15  ;;  %v4767_v38 = vsel %vm2085_vm3, %v13714_v41, -inf }
 0x6c3   : > { %v13720_v61 = vsel %vm4688_vm9, -inf, %v13571_v27  ;;  %4768 = vmax.xlane.f32.xlu0 %v4767_v38  ;;  %v13724_v55 = vpop.permute.xlu0 %6066 }
 0x6c4   : > { %v4764_v8 = vsel %vm2085_vm3, %v13720_v61, -inf }
 0x6c5   : > { %4765 = vmax.xlane.f32.xlu1 %v4764_v8  ;;  %v13726_v16 = vpop.permute.xlu1 %6068 }
 0x6f4   : > { %v4727_v37 = vpop.xlane.xlu0 %4726 }
 0x6f5   : > { %vm4795_vm10 = vcmp.ge.f32.partialorder %v13582_v56, %v4727_v37 }
 0x6f6   : > { %v4724_v53 = vpop.xlane.xlu1 %4723  ;;  %v4819_v43 = vsel %vm4795_vm10, -inf, %v13582_v56 }
 0x6f7   : > { %vm4794_vm11 = vcmp.ge.f32.partialorder %v13588_v21, %v4724_v53  ;;  %v4845_v27 = vsel %vm2085_vm3, %v4819_v43, -inf }
 0x6f8   : > { %v4818_v34 = vsel %vm4794_vm11, -inf, %v13588_v21  ;;  %4846 = vmax.xlane.f32.xlu0 %v4845_v27  ;;  %v4733_v59 = vpop.xlane.xlu0 %4732 }
 0x6f9   : > { %vm4797_vm12 = vcmp.ge.f32.partialorder %v13594_v5, %v4733_v59  ;;  %v4842_v52 = vsel %vm2085_vm3, %v4818_v34, -inf  ;;  %v7006_v34 = vld [vmem:[#allocation2 + $0x38] sm:$0xff]  ;;  %v7005_v59 = vld [vmem:[#allocation2 + $0x30] sm:$0xff] }
 0x6fa   : > { %4843 = vmax.xlane.f32.xlu1 %v4842_v52  ;;  %v4730_v18 = vpop.xlane.xlu1 %4729  ;;  %v4821_v17 = vsel %vm4797_vm12, -inf, %v13594_v5  ;;  %v6048_v52 = vld [vmem:[#allocation2] sm:$0xff] }
 0x6fb   : > { %vm4796_vm13 = vcmp.ge.f32.partialorder %v13600_v22, %v4730_v18  ;;  %v4851_v9 = vsel %vm2085_vm3, %v4821_v17, -inf  ;;  %v7003_v18 = vld [vmem:[#allocation2 + $0x20] sm:$0xff] }
 0x6fc   : > { %v4820_v56 = vsel %vm4796_vm13, -inf, %v13600_v22  ;;  %v4739_v20 = vpop.xlane.xlu0 %4738 }
 0x6fd   : > { %vm4799_vm14 = vcmp.ge.f32.partialorder %v13606_v6, %v4739_v20  ;;  %v4848_v21 = vsel %vm2085_vm3, %v4820_v56, -inf }
 0x6fe   : > { %4852 = vmax.xlane.f32.xlu1 %v4851_v9  ;;  %4849 = vmax.xlane.f32.xlu0 %v4848_v21  ;;  %v4736_v63 = vpop.xlane.xlu1 %4735  ;;  %v4823_v30 = vsel %vm4799_vm14, -inf, %v13606_v6 }
 0x6ff   : > { %vm4798_vm15 = vcmp.ge.f32.partialorder %v13612_v26, %v4736_v63  ;;  %v4857_v5 = vsel %vm2085_vm3, %v4823_v30, -inf }
 0x700   : > { %v4745_v15 = vpop.xlane.xlu0 %4744  ;;  %v4822_v38 = vsel %vm4798_vm15, -inf, %v13612_v26 }
 0x701   : > { %vm4801_vm1 = vcmp.ge.f32.partialorder %v13618_v51, %v4745_v15  ;;  %v4854_v37 = vsel %vm2085_vm3, %v4822_v38, -inf }
 0x702   : > { %4858 = vmax.xlane.f32.xlu0 %v4857_v5  ;;  %v4742_v22 = vpop.xlane.xlu1 %4741  ;;  %v4825_v6 = vsel %vm4801_vm1, -inf, %v13618_v51  ;;  %v7004_v51 = vld [vmem:[#allocation2 + $0x28] sm:$0xff] }
 0x703   : > { %vm4800_vm4 = vcmp.ge.f32.partialorder %v13624_v57, %v4742_v22  ;;  %v4863_v43 = vsel %vm2085_vm3, %v4825_v6, -inf }
 0x704   : > { %v4824_v8 = vsel %vm4800_vm4, -inf, %v13624_v57 }
 0x705   : > { %v4860_v53 = vsel %vm2085_vm3, %v4824_v8, -inf }
 0x706   : > { %4855 = vmax.xlane.f32.xlu0 %v4854_v37  ;;  %4861 = vmax.xlane.f32.xlu1 %v4860_v53 }
 0x70a   : > { %4864 = vmax.xlane.f32.xlu0 %v4863_v43 }
 0x717   : > { %v4655_v26 = vpop.xlane.xlu0 %4654 }
 0x718   : > { %vm4691_vm5 = vcmp.ge.f32.partialorder %v13630_v48, %v4655_v26 }
 0x719   : > { %v13754_v27 = vsel %vm4691_vm5, -inf, %v13630_v48  ;;  %v4652_v48 = vpop.xlane.xlu1 %4651 }
 0x71a   : > { %v4773_v57 = vsel %vm2085_vm3, %v13754_v27, -inf  ;;  %vm4690_vm6 = vcmp.ge.f32.partialorder %v13636_v62, %v4652_v48 }
 0x71b   : > { %4774 = vmax.xlane.f32.xlu1 %v4773_v57  ;;  %v13770_v8 = vsel %vm4690_vm6, -inf, %v13636_v62 }
 0x71c   : > { %v4770_v6 = vsel %vm2085_vm3, %v13770_v8, -inf }
 0x71d   : > { %v4661_v17 = vpop.xlane.xlu0 %4660 }
 0x71e   : > { %vm4693_vm8 = vcmp.ge.f32.partialorder %v13642_v4, %v4661_v17 }
 0x71f   : > { %v4658_v56 = vpop.xlane.xlu1 %4657  ;;  %v13779_v43 = vsel %vm4693_vm8, -inf, %v13642_v4 }
 0x720   : > { %7029 = vrot.lane.b32.xlu0 %v7006_v34, %s11077_s28  ;;  %vm4692_vm10 = vcmp.ge.f32.partialorder %v13648_v45, %v4658_v56  ;;  %v4779_v57 = vsel %vm2085_vm3, %v13779_v43, -inf }
 0x721   : > { %v13788_v34 = vsel %vm4692_vm10, -inf, %v13648_v45 }
 0x723   : > { %v4667_v20 = vpop.xlane.xlu0 %4666 }
 0x724   : > { %7027 = vrot.lane.b32.xlu0 %v7005_v59, %s11077_s28  ;;  %vm4695_vm12 = vcmp.ge.f32.partialorder %v13654_v13, %v4667_v20  ;;  %v4776_v59 = vsel %vm2085_vm3, %v13788_v34, -inf }
 0x725   : > { %v4664_v9 = vpop.xlane.xlu1 %4663 }
 0x726   : > { %vm4694_vm14 = vcmp.ge.f32.partialorder %v13660_v33, %v4664_v9  ;;  %v15418_v9 = vld [vmem:[#allocation30_spill] sm:$0xff] }
 0x727   : > { %v4673_v21 = vpop.xlane.xlu0 %4672 }
 0x728   : > { %7025 = vrot.lane.b32.xlu0 %v7004_v51, %s11077_s28  ;;  %v13797_v51 = vsel %vm4695_vm12, -inf, %v13654_v13  ;;  %vm4697_vm15 = vcmp.ge.f32.partialorder %v13666_v23, %v4673_v21 }
 0x729   : > { %v4670_v63 = vpop.xlane.xlu1 %4669 }
 0x72a   : > { %vm4696_vm1 = vcmp.ge.f32.partialorder %v13672_v49, %v4670_v63 }
 0x72b   : > { %v13817_v17 = vsel %vm4696_vm1, -inf, %v13672_v49  ;;  %v11037_v49 = vld [vmem:[#allocation3 + $0x8] sm:$0xff] }
 0x72c   : > { %6064 = vrot.lane.b32.xlu1 %v6048_v52, %s11076_s27  ;;  %7023 = vrot.lane.b32.xlu0 %v7003_v18, %s11077_s28  ;;  %v13805_v18 = vsel %vm4694_vm14, -inf, %v13660_v33  ;;  %v4788_v33 = vsel %vm2085_vm3, %v13817_v17, -inf  ;;  %v4939_v21 = vsub.f32 %v11037_v49, %v15418_v9 }
 0x72d   : > { %v4782_v13 = vsel %vm2085_vm3, %v13805_v18, -inf }
 0x730   : > { %7021 = vrot.lane.b32.xlu0 %v13281_v60, %s11077_s28 }
 0x740   : > { %v4751_v30 = vpop.xlane.xlu0 %4750 }
 0x741   : > { %vm4803_vm4 = vcmp.ge.f32.partialorder %v13678_v42, %v4751_v30 }
 0x742   : > { %v4748_v15 = vpop.xlane.xlu1 %4747  ;;  %v4827_v56 = vsel %vm4803_vm4, -inf, %v13678_v42 }
 0x743   : > { %vm4802_vm5 = vcmp.ge.f32.partialorder %v13684_v47, %v4748_v15  ;;  %v4964_v15 = vmul.f32 1.442695, %v4939_v21  ;;  %v13847_v21 = vld [vmem:[#allocation3 + $0x38] sm:$0xff] }
 0x744   : > { %v13765_v5 = vpop.xlane.xlu0 %4756  ;;  %v4826_v20 = vsel %vm4802_vm5, -inf, %v13684_v47  ;;  %v11039_v47 = vld [vmem:[#allocation3 + $0x18] sm:$0xff] }
 0x745   : > { %vm4805_vm6 = vcmp.ge.f32.partialorder %v13690_v44, %v13765_v5  ;;  %v4866_v30 = vsel %vm2085_vm3, %v4826_v20, -inf  ;;  %10941 = vpow2.f32 %v4964_v15 }
 0x746   : > { %v4754_v38 = vpop.xlane.xlu1 %4753  ;;  %v4829_v42 = vsel %vm4805_vm6, -inf, %v13690_v44 }
 0x747   : > { %vm4804_vm7 = vcmp.ge.f32.partialorder %v13696_v32, %v4754_v38  ;;  %v11038_v38 = vld [vmem:[#allocation3] sm:$0xff]  ;;  %v4875_v5 = vsel %vm2085_vm3, %v4829_v42, -inf }
 0x748   : > { %v4763_v22 = vpop.xlane.xlu0 %4762  ;;  %v4828_v60 = vsel %vm4804_vm7, -inf, %v13696_v32 }
 0x749   : > { %vm4807_vm9 = vcmp.ge.f32.partialorder %v13702_v14, %v4763_v22  ;;  %v4872_v53 = vsel %vm2085_vm3, %v4828_v60, -inf  ;;  %v15419_v22 = vld [vmem:[#allocation31_spill] sm:$0xff] }
 0x74a   : > { %v4760_v37 = vpop.xlane.xlu1 %4759  ;;  %v4831_v26 = vsel %vm4807_vm9, -inf, %v13702_v14  ;;  %v4938_v60 = vsub.f32 %v11038_v38, %v15419_v22 }
 0x74b   : > { %vm4806_vm11 = vcmp.ge.f32.partialorder %v13708_v28, %v4760_v37  ;;  %v4881_v32 = vsel %vm2085_vm3, %v4831_v26, -inf  ;;  %v15420_v37 = vld [vmem:[#allocation32_spill] sm:$0xff]  ;;  %v11040_v26 = vld [vmem:[#allocation3 + $0x10] sm:$0xff] }
 0x74c   : > { %v4769_v62 = vpop.xlane.xlu0 %4768  ;;  %v4830_v4 = vsel %vm4806_vm11, -inf, %v13708_v28  ;;  %v4785_v28 = vsel %vm2085_vm3, %v13797_v51, -inf }
 0x74d   : > { %vm4809_vm13 = vcmp.ge.f32.partialorder %v13714_v41, %v4769_v62  ;;  %v4878_v14 = vsel %vm2085_vm3, %v4830_v4, -inf  ;;  %v15421_v62 = vld [vmem:[#allocation34_spill] sm:$0xff] }
 0x74e   : > { %v4833_v52 = vsel %vm4809_vm13, -inf, %v13714_v41  ;;  %v13811_v41 = vsel %vm4697_vm15, -inf, %v13666_v23  ;;  %v4869_v23 = vsel %vm2085_vm3, %v4827_v56, -inf  ;;  %v4766_v63 = vpop.xlane.xlu1 %4765  ;;  %v15424_v56 = vld [vmem:[#allocation35_spill] sm:$0xff] }
 0x74f   : > { %4771 = vmax.xlane.f32.xlu0 %v4770_v6  ;;  %v4887_v45 = vsel %vm2085_vm3, %v4833_v52, -inf  ;;  %v4791_v48 = vsel %vm2085_vm3, %v13811_v41, -inf  ;;  %vm4808_vm7 = vcmp.ge.f32.partialorder %v13720_v61, %v4766_v63  ;;  %v4962_v6 = vmul.f32 1.442695, %v4938_v60  ;;  %v15422_v52 = vld [vmem:[#allocation36_spill] sm:$0xff]  ;;  %v15425_v63 = vld [vmem:[#allocation37_spill] sm:$0xff] }
 0x750   : > { %4873 = vmax.xlane.f32.xlu1 %v4872_v53  ;;  %v4941_v53 = vsub.f32 %v11039_v47, %v15420_v37 }
 0x751   : > { %10943 = vpow2.f32 %v4962_v6 }
 0x752   : > { %v4968_v4 = vmul.f32 1.442695, %v4941_v53  ;;  %v10942_v60 = vpop.eup %10941 }
 0x753   : > { %4780 = vmax.xlane.f32.xlu0 %v4779_v57  ;;  %v4832_v57 = vsel %vm4808_vm7, -inf, %v13720_v61  ;;  %v13843_v61 = vld [vmem:[#allocation3 + $0x30] sm:$0xff] }
 0x754   : > { %4882 = vmax.xlane.f32.xlu1 %v4881_v32  ;;  %v4940_v32 = vsub.f32 %v11040_v26, %v15421_v62  ;;  %v4884_v44 = vsel %vm2085_vm3, %v4832_v57, -inf  ;;  %10945 = vpow2.f32 %v4968_v4 }
 0x757   : > { %4777 = vmax.xlane.f32.xlu0 %v4776_v59  ;;  %v11041_v59 = vld [vmem:[#allocation3 + $0x28] sm:$0xff] }
 0x758   : > { %4879 = vmax.xlane.f32.xlu1 %v4878_v14  ;;  %v4966_v14 = vmul.f32 1.442695, %v4940_v32 }
 0x75a   : > { %10947 = vpow2.f32 %v4966_v14 }
 0x75b   : > { %4786 = vmax.xlane.f32.xlu0 %v4785_v28  ;;  %v13839_v28 = vld [vmem:[#allocation3 + $0x20] sm:$0xff] }
 0x75c   : > { %4888 = vmax.xlane.f32.xlu1 %v4887_v45  ;;  %v4943_v45 = vsub.f32 %v11041_v59, %v15422_v52 }
 0x75e   : > { %v10944_v53 = vpop.eup %10943 }
 0x75f   : > { %4783 = vmax.xlane.f32.xlu0 %v4782_v13  ;;  %v15423_v13 = vld [vmem:[#allocation33_spill] sm:$0xff] }
 0x761   : > { %v10946_v57 = vpop.eup %10945 }
 0x763   : > { %4792 = vmax.xlane.f32.xlu0 %v4791_v48  ;;  %v4942_v48 = vsub.f32 %v13839_v28, %v15423_v13 }
 0x765   : > { %v4970_v20 = vmul.f32 1.442695, %v4942_v48 }
 0x767   : > { %4789 = vmax.xlane.f32.xlu0 %v4788_v33  ;;  %v4972_v33 = vmul.f32 1.442695, %v4943_v45  ;;  %v10948_v52 = vpop.eup %10947 }
 0x769   : > { %10949 = vpow2.f32 %v4972_v33 }
 0x76a   : > { %10951 = vpow2.f32 %v4970_v20 }
 0x76b   : > { %4870 = vmax.xlane.f32.xlu0 %v4869_v23  ;;  %v4944_v23 = vsub.f32 %v13843_v61, %v15424_v56 }
 0x76d   : > { %v4974_v9 = vmul.f32 1.442695, %v4944_v23  ;;  %v15430_v23 = vld [vmem:[#allocation5_spill] sm:$0xff] }
 0x76f   : > { %4867 = vmax.xlane.f32.xlu0 %v4866_v30  ;;  %v4945_v30 = vsub.f32 %v13847_v21, %v15425_v63  ;;  %10953 = vpow2.f32 %v4974_v9 }
 0x771   : > { %v4976_v42 = vmul.f32 1.442695, %v4945_v30  ;;  %v15431_v30 = vld [vmem:[#allocation7_spill] sm:$0xff] }
 0x773   : > { %4876 = vmax.xlane.f32.xlu0 %v4875_v5  ;;  %10955 = vpow2.f32 %v4976_v42 }
 0x776   : > { %v10950_v63 = vpop.eup %10949 }
 0x777   : > { %4885 = vmax.xlane.f32.xlu0 %v4884_v44 }
 0x781   : > { %v4847_v22 = vpop.xlane.xlu0 %4846 }
 0x782   : > { %vm4915_vm8 = vcmp.ge.f32.partialorder %v11037_v49, %v4847_v22 }
 0x783   : > { %v13851_v15 = vsel %vm4915_vm8, %v10942_v60, 0.0  ;;  %v4844_v37 = vpop.xlane.xlu1 %4843 }
 0x784   : > { %15426 = vst [vmem:[#allocation30_spill] sm:$0xff] %v13851_v15  ;;  %v5174_v5 = vsel %vm2085_vm3, %v13851_v15, 0  ;;  %vm4914_vm9 = vcmp.ge.f32.partialorder %v11038_v38, %v4844_v37 }
 0x785   : > { %v13855_v6 = vand.u32 4294901760, %v5174_v5  ;;  %v13857_v62 = vsel %vm4914_vm9, %v10944_v53, 0.0  ;;  %v15433_v53 = vld [vmem:[#allocation11_spill] sm:$0xff] }
 0x786   : > { %15427 = vst [vmem:[#allocation31_spill] sm:$0xff] %v13857_v62  ;;  %v5171_v32 = vsel %vm2085_vm3, %v13857_v62, 0 }
 0x787   : > { %v13862_v49 = vsub.f32 %v5174_v5, %v13855_v6  ;;  %v13864_v4 = vand.u32 4294901760, %v5171_v32  ;;  %v4850_v44 = vpop.xlane.xlu0 %4849  ;;  %v4853_v14 = vpop.xlane.xlu1 %4852 }
 0x788   : > { %vm4916_vm10 = vcmp.ge.f32.partialorder %v11040_v26, %v4850_v44  ;;  %vm4917_vm11 = vcmp.ge.f32.partialorder %v11039_v47, %v4853_v14 }
 0x789   : > { %v15351_v38 = vand.u32 4294901760, %v13862_v49  ;;  %v13868_v45 = vsub.f32 %v5171_v32, %v13864_v4  ;;  %v13870_v13 = vsel %vm4916_vm10, %v10948_v52, 0.0  ;;  %v13872_v48 = vsel %vm4917_vm11, %v10946_v57, 0.0  ;;  %10343 = vmatprep.mubr.f32.mxu1 %v13864_v4  ;;  %v10952_v32 = vpop.eup %10951 }
 0x78a   : > { %15428 = vst [vmem:[#allocation32_spill] sm:$0xff] %v13870_v13  ;;  %15429 = vst [vmem:[#allocation34_spill] sm:$0xff] %v13872_v48  ;;  %v5177_v33 = vsel %vm2085_vm3, %v13870_v13, 0  ;;  %v5180_v56 = vsel %vm2085_vm3, %v13872_v48, 0  ;;  %10344 = vmatmul.mubr.f32.vlgmr.msra.gmra.mxu1 %v13855_v6  ;;  %v10954_v52 = vpop.eup %10953 }
 0x78b   : > { %v13880_v47 = vand.u32 4294901760, %v5177_v33  ;;  %v13882_v26 = vand.u32 4294901760, %v5180_v56  ;;  %10384 = vmatpush3.msra.mxu1 %v15430_v23  ;;  %v4859_v20 = vpop.xlane.xlu0 %4858  ;;  %v15352_v9 = vand.u32 4294901760, %v13868_v45  ;;  %v5280_v22 = vsub.f32 %v13862_v49, %v15351_v38  ;;  %v15435_v38 = vld [vmem:[#allocation9_spill] sm:$0xff] }
 0x78c   : > { %vm4919_vm12 = vcmp.ge.f32.partialorder %v11041_v59, %v4859_v20  ;;  %10385 = vmatprep.subr.mxu1 %v15431_v30  ;;  %v15448_v29 = vand.u32 4294901760, %v13868_v45 }
 0x78d   : > { %v13891_v60 = vsub.f32 %v5177_v33, %v13880_v47  ;;  %v13894_v42 = vsub.f32 %v5180_v56, %v13882_v26  ;;  %v13896_v37 = vsel %vm4919_vm12, %v10950_v63, 0.0  ;;  %10386 = vmatpush3.msra.mxu1 %v15431_v30  ;;  %7019 = vrot.lane.b32.xlu0 %v13575_v35, %s11077_s28  ;;  %v5270_v5 = vsub.f32 %v13868_v45, %v15352_v9 }
 0x78e   : > { %15432 = vst [vmem:[#allocation36_spill] sm:$0xff] %v13896_v37  ;;  %v5186_v59 = vsel %vm2085_vm3, %v13896_v37, 0  ;;  %10346 = vmatprep.mubr.f32.mxu1 %v13880_v47  ;;  %10387 = vmatprep.subr.mxu1 %v15433_v53  ;;  %v5281_v20 = vand.u32 4294901760, %v5280_v22  ;;  %v15441_v37 = vld [vmem:[#allocation8_spill] sm:$0xff] }
 0x78f   : > { %10347 = vmatmul.mubr.f32.gmra.mxu1 %v13882_v26  ;;  %v4856_v57 = vpop.xlane.xlu0 %4855  ;;  %v4862_v44 = vpop.xlane.xlu1 %4861  ;;  %v15354_v14 = vand.u32 4294901760, %v13891_v60  ;;  %v13911_v33 = vand.u32 4294901760, %v5186_v59  ;;  %v5271_v56 = vand.u32 4294901760, %v5270_v5 }
 0x790   : > { %10388 = vmatpush3.msra.mxu1 %v15433_v53  ;;  %vm4918_vm13 = vcmp.ge.f32.partialorder %v13839_v28, %v4856_v57  ;;  %vm4920_vm14 = vcmp.ge.f32.partialorder %v13843_v61, %v4862_v44  ;;  %v15437_v61 = vand.u32 4294901760, %v13894_v42  ;;  %v15438_v57 = vld [vmem:[#allocation16_spill] sm:$0xff] }
 0x791   : > { %v13916_v63 = vsel %vm4918_vm13, %v10952_v32, 0.0  ;;  %10389 = vmatprep.subr.mxu1 %v15435_v38  ;;  %v13919_v9 = vsel %vm4920_vm14, %v10954_v52, 0.0  ;;  %v5290_v35 = vsub.f32 %v13891_v60, %v15354_v14  ;;  %10315 = vmatprep.mubr.f32.mxu0 %v5271_v56  ;;  %v10956_v14 = vpop.eup %10955 }
 0x792   : > { %15434 = vst [vmem:[#allocation33_spill] sm:$0xff] %v13916_v63  ;;  %15436 = vst [vmem:[#allocation35_spill] sm:$0xff] %v13919_v9  ;;  %v5183_v13 = vsel %vm2085_vm3, %v13916_v63, 0  ;;  %v5189_v28 = vsel %vm2085_vm3, %v13919_v9, 0  ;;  %10390 = vmatpush3.msra.mxu1 %v15435_v38  ;;  %v5300_v22 = vsub.f32 %v13894_v42, %v15437_v61  ;;  %10316 = vmatmul.mubr.f32.vlgmr.msra.gmra.mxu0 %v5281_v20  ;;  %v15439_v9 = vld [vmem:[#allocation6_spill] sm:$0xff]  ;;  %v15442_v20 = vld [vmem:[#allocation17_spill] sm:$0xff] }
 0x793   : > { %v13932_v5 = vand.u32 4294901760, %v5183_v13  ;;  %v13934_v32 = vand.u32 4294901760, %v5189_v28  ;;  %10391 = vmatprep.subr.mxu1 %v15438_v57  ;;  %v4865_v44 = vpop.xlane.xlu0 %4864  ;;  %v5291_v52 = vand.u32 4294901760, %v5290_v35  ;;  %v13938_v63 = vsub.f32 %v5186_v59, %v13911_v33  ;;  %10356 = vmatpush3.msra.mxu0 %v15439_v9  ;;  %v15443_v59 = vld [vmem:[#allocation15_spill] sm:$0xff] }
 0x794   : > { %10392 = vmatpush3.msra.mxu1 %v15438_v57  ;;  %vm4921_vm15 = vcmp.ge.f32.partialorder %v13847_v21, %v4865_v44  ;;  %10357 = vmatprep.subr.mxu0 %v15441_v37  ;;  %v5301_v35 = vand.u32 4294901760, %v5300_v22 }
 0x795   : > { %v13944_v56 = vsub.f32 %v5183_v13, %v13932_v5  ;;  %v13946_v61 = vsel %vm4921_vm15, %v10956_v14, 0.0  ;;  %10393 = vmatprep.subr.mxu1 %v15442_v20  ;;  %v13951_v48 = vsub.f32 %v5189_v28, %v13934_v32  ;;  %10358 = vmatpush3.msra.mxu0 %v15441_v37  ;;  %v15444_v14 = vld [vmem:[#allocation14_spill] sm:$0xff]  ;;  %v5319_v28 = vand.u32 4294901760, %v13938_v63 }
 0x796   : > { %15440 = vst [vmem:[#allocation37_spill] sm:$0xff] %v13946_v61  ;;  %v5192_v9 = vsel %vm2085_vm3, %v13946_v61, 0  ;;  %10394 = vmatpush3.msra.mxu1 %v15442_v20  ;;  %10318 = vmatprep.mubr.f32.mxu0 %v5291_v52  ;;  %v15445_v52 = vld [vmem:[#allocation12_spill] sm:$0xff]  ;;  %v15446_v61 = vld [vmem:[#allocation21_spill] sm:$0xff] }
 0x797   : > { %v13957_v21 = vand.u32 4294901760, %v5192_v9  ;;  %10349 = vmatprep.mubr.f32.mxu1 %v13932_v5  ;;  %v5309_v13 = vand.u32 4294901760, %v13944_v56  ;;  %10359 = vmatprep.subr.mxu0 %v15443_v59  ;;  %v5329_v44 = vand.u32 4294901760, %v13951_v48 }
 0x798   : > { %10395 = vmatprep.subr.mxu1 %v15444_v14  ;;  %10319 = vmatmul.mubr.f32.gmra.mxu0 %v5301_v35  ;;  %v5320_v35 = vsub.f32 %v13938_v63, %v5319_v28 }
 0x799   : > { %v13965_v22 = vsub.f32 %v5192_v9, %v13957_v21  ;;  %10350 = vmatmul.mubr.f32.gmra.mxu1 %v13911_v33  ;;  %v5310_v37 = vsub.f32 %v13944_v56, %v5309_v13  ;;  %10360 = vmatpush3.msra.mxu0 %v15443_v59  ;;  %v15447_v59 = vld [vmem:[#allocation18_spill] sm:$0xff]  ;;  %v5330_v15 = vsub.f32 %v13951_v48, %v5329_v44 }
 0x79a   : > { %10396 = vmatpush3.msra.mxu1 %v15444_v14  ;;  %10352 = vmatprep.mubr.f32.mxu1 %v13934_v32 }
 0x79b   : > { %10361 = vmatprep.subr.mxu0 %v15445_v52  ;;  %10397 = vmatprep.subr.mxu1 %v15446_v61  ;;  %v5311_v9 = vand.u32 4294901760, %v5310_v37  ;;  %v15366_v62 = vand.u32 4294901760, %v13965_v22  ;;  %v15449_v37 = vld [vmem:[#allocation22_spill] sm:$0xff]  ;;  %v5331_v7 = vand.u32 4294901760, %v5330_v15  ;;  %v15454_v15 = vld [vmem:[#allocation29_spill] sm:$0xff] }
 0x79c   : > { %10362 = vmatpush3.msra.mxu0 %v15445_v52  ;;  %10398 = vmatpush3.msra.mxu1 %v15446_v61  ;;  %v5321_v52 = vand.u32 4294901760, %v5320_v35  ;;  %v15452_v35 = vld [vmem:[#allocation25_spill] sm:$0xff] }
 0x79d   : > { %10363 = vmatprep.subr.mxu0 %v15447_v59  ;;  %10439 = vmatprep.subr.mxu1 %v15430_v23  ;;  %v5340_v46 = vsub.f32 %v13965_v22, %v15366_v62  ;;  %v14002_v62 = vand.u32 4294901760, %v15454_v15 }
 0x79e   : > { %10353 = vmatmul.mubr.f32.gmra.mxu1 %v13957_v21  ;;  %10364 = vmatpush3.msra.mxu0 %v15447_v59  ;;  %v15451_v59 = vand.u32 4294901760, %v13862_v49 }
 0x79f   : > { %10399 = vmatprep.mubr.f32.mxu1 %v15448_v29  ;;  %10365 = vmatprep.subr.mxu0 %v15449_v37 }
 0x7a0   : > { %10321 = vmatprep.mubr.f32.mxu0 %v5311_v9  ;;  %10366 = vmatpush3.msra.mxu0 %v15449_v37  ;;  %v5341_v9 = vand.u32 4294901760, %v5340_v46  ;;  %v15453_v37 = vand.u32 4294901760, %v13891_v60  ;;  %v15456_v46 = vand.u32 4294901760, %v13894_v42 }
 0x7a1   : > { %10367 = vmatprep.subr.mxu0 %v15450_v2  ;;  %10322 = vmatmul.mubr.f32.gmra.mxu0 %v5321_v52 }
 0x7a2   : > { %10368 = vmatpush3.msra.mxu0 %v15450_v2  ;;  %10400 = vmatmul.mubr.f32.vlgmr.msra.gmra.mxu1 %v15451_v59  ;;  %v15460_v59 = vld [vmem:[#allocation20_spill] sm:$0xff] }
 0x7a3   : > { %10440 = vmatpush3.msra.mxu1 %v15430_v23  ;;  %10324 = vmatprep.mubr.f32.mxu0 %v5331_v7  ;;  %v15455_v7 = vld [vmem:[#allocation10_spill] sm:$0xff]  ;;  %v14018_v23 = vand.u32 4294901760, %v12889_v36 }
 0x7a4   : > { %v4775_v29 = vpop.xlane.xlu1 %4774  ;;  %10369 = vmatprep.subr.mxu0 %v15452_v35  ;;  %10402 = vmatprep.mubr.f32.mxu1 %v15453_v37 }
 0x7a5   : > { %vm4811_vm1 = vcmp.ge.f32.partialorder %v13754_v27, %v4775_v29  ;;  %10441 = vmatprep.subr.mxu1 %v15431_v30  ;;  %10370 = vmatpush3.msra.mxu0 %v15452_v35  ;;  %v14078_v29 = vand.u32 4294901760, %v13726_v16 }
 0x7a6   : > { %v4835_v52 = vsel %vm4811_vm1, -inf, %v13754_v27  ;;  %10442 = vmatpush3.msra.mxu1 %v15431_v30  ;;  %10411 = vmatprep.subr.mxu0 %v15455_v7  ;;  %v14015_v27 = vsub.f32 %v15454_v15, %v14002_v62  ;;  %v14023_v30 = vand.u32 4294901760, %v13135_v58 }
 0x7a7   : > { %10443 = vmatprep.subr.mxu1 %v15433_v53  ;;  %10325 = vmatmul.mubr.f32.gmra.mxu0 %v5341_v9  ;;  %v4893_v2 = vsel %vm2085_vm3, %v4835_v52, -inf }
 0x7a8   : > { %10403 = vmatmul.mubr.f32.gmra.mxu1 %v15456_v46  ;;  %10371 = vmatprep.mubr.f32.mxu0 %v13868_v45  ;;  %v14030_v45 = vsub.f32 %v12889_v36, %v14018_v23  ;;  %v14050_v36 = vand.u32 4294901760, %v13429_v31  ;;  %v6065_v37 = vpop.permute.xlu1 %6064 }
 0x7a9   : > { %10444 = vmatpush3.msra.mxu1 %v15433_v53  ;;  %10405 = vmatprep.mubr.f32.mxu1 %v5309_v13  ;;  %v14035_v53 = vand.u32 4294901760, %v14015_v27  ;;  %v15457_v13 = vld [vmem:[#allocation13_spill] sm:$0xff]  ;;  %v14113_v46 = vand.u32 4294901760, %v6065_v37 }
 0x7aa   : > { %10445 = vmatprep.subr.mxu1 %v15435_v38  ;;  %4894 = vmax.xlane.f32.xlu1 %v4893_v2  ;;  %v14111_v2 = vpop.permute.xlu0 %7029 }
 0x7ab   : > { %10446 = vmatpush3.msra.mxu1 %v15435_v38  ;;  %10372 = vmatmul.mubr.f32.vlgmr.msra.gmra.mxu0 %v13862_v49  ;;  %v14039_v38 = vand.u32 4294901760, %v13133_v0  ;;  %v14043_v49 = vsub.f32 %v13135_v58, %v14023_v30  ;;  %v14057_v58 = vand.u32 4294901760, %v14030_v45 }
 0x7ac   : > { %10447 = vmatprep.subr.mxu1 %v15438_v57  ;;  %10406 = vmatmul.mubr.f32.gmra.mxu1 %v5319_v28  ;;  %v15459_v28 = vand.u32 4294901760, %v13965_v22 }
 0x7ad   : > { %10412 = vmatpush3.msra.mxu0 %v15455_v7  ;;  %10448 = vmatpush3.msra.mxu1 %v15438_v57  ;;  %v6285_v57 = vsub.f32 %v14015_v27, %v14035_v53  ;;  %v15462_v7 = vld [vmem:[#allocation26_spill] sm:$0xff] }
 0x7ae   : > { %10374 = vmatprep.mubr.f32.mxu0 %v13891_v60  ;;  %10408 = vmatprep.mubr.f32.mxu1 %v5329_v44  ;;  %v15458_v60 = vld [vmem:[#allocation19_spill] sm:$0xff]  ;;  %v14069_v44 = vand.u32 4294901760, %v14043_v49 }
 0x7af   : > { %10413 = vmatprep.subr.mxu0 %v15457_v13  ;;  %10449 = vmatprep.subr.mxu1 %v15442_v20 }
 0x7b0   : > { %10414 = vmatpush3.msra.mxu0 %v15457_v13  ;;  %10450 = vmatpush3.msra.mxu1 %v15442_v20  ;;  %v14064_v20 = vsub.f32 %v13133_v0, %v14039_v38  ;;  %v6286_v0 = vand.u32 4294901760, %v6285_v57  ;;  %v6299_v9 = vsub.f32 %v14043_v49, %v14069_v44  ;;  %v14128_v57 = vsub.f32 %v6065_v37, %v14113_v46 }
 0x7b1   : > { %10415 = vmatprep.subr.mxu0 %v15458_v60  ;;  %10451 = vmatprep.subr.mxu1 %v15444_v14 }
 0x7b2   : > { %10375 = vmatmul.mubr.f32.gmra.mxu0 %v13894_v42  ;;  %10409 = vmatmul.mubr.f32.gmra.mxu1 %v15459_v28  ;;  %v14075_v42 = vsub.f32 %v13429_v31, %v14050_v36  ;;  %v15461_v31 = vld [vmem:[#allocation24_spill] sm:$0xff]  ;;  %v14093_v35 = vand.u32 4294901760, %v14064_v20 }
 0x7b3   : > { %10416 = vmatpush3.msra.mxu0 %v15458_v60  ;;  %10452 = vmatpush3.msra.mxu1 %v15444_v14  ;;  %v6292_v14 = vsub.f32 %v14030_v45, %v14057_v58 }
 0x7b4   : > { %10377 = vmatprep.mubr.f32.mxu0 %v13944_v56  ;;  %10417 = vmatprep.subr.mxu0 %v15460_v59  ;;  %v14087_v56 = vand.u32 4294901760, %v13724_v55  ;;  %v14103_v15 = vand.u32 4294901760, %v14075_v42  ;;  %v6306_v13 = vsub.f32 %v14064_v20, %v14093_v35 }
 0x7b5   : > { %10453 = vmatprep.subr.mxu1 %v15446_v61  ;;  %10455 = vmatprep.mubr.f32.mxu1 %v13864_v4  ;;  %v6293_v52 = vand.u32 4294901760, %v6292_v14  ;;  %v14136_v14 = vpop.permute.xlu0 %7027 }
 0x7b6   : > { %10418 = vmatpush3.msra.mxu0 %v15460_v59  ;;  %10454 = vmatpush3.msra.mxu1 %v15446_v61  ;;  %v14099_v61 = vsub.f32 %v13726_v16, %v14078_v29  ;;  %v6300_v16 = vand.u32 4294901760, %v6299_v9  ;;  %v6307_v28 = vand.u32 4294901760, %v6306_v13 }
 0x7b7   : > { %10419 = vmatprep.subr.mxu0 %v15461_v31  ;;  %10495 = vmatprep.subr.mxu1 %v6286_v0 }
 0x7b8   : > { %10378 = vmatmul.mubr.f32.gmra.mxu0 %v13938_v63  ;;  %10456 = vmatmul.mubr.f32.vlgmr.msra.gmra.mxu1 %v13855_v6  ;;  %v14109_v63 = vsub.f32 %v13724_v55, %v14087_v56  ;;  %v6313_v55 = vsub.f32 %v14075_v42, %v14103_v15  ;;  %v14123_v60 = vand.u32 4294901760, %v14099_v61 }
 0x7b9   : > { %10420 = vmatpush3.msra.mxu0 %v15461_v31  ;;  %10496 = vmatpush3.msra.mxu1 %v6286_v0  ;;  %v15464_v0 = vld [vmem:[#allocation28_spill] sm:$0xff] }
 0x7ba   : > { %10380 = vmatprep.mubr.f32.mxu0 %v13951_v48  ;;  %10421 = vmatprep.subr.mxu0 %v15462_v7  ;;  %v15463_v48 = vld [vmem:[#allocation27_spill] sm:$0xff]  ;;  %v14132_v59 = vand.u32 4294901760, %v14109_v63  ;;  %v6320_v31 = vsub.f32 %v14099_v61, %v14123_v60 }
 0x7bb   : > { %10458 = vmatprep.mubr.f32.mxu1 %v13880_v47  ;;  %10497 = vmatprep.subr.mxu1 %v6293_v52 }
 0x7bc   : > { %10422 = vmatpush3.msra.mxu0 %v15462_v7  ;;  %10498 = vmatpush3.msra.mxu1 %v6293_v52  ;;  %v6327_v9 = vsub.f32 %v14109_v63, %v14132_v59  ;;  %v6321_v37 = vand.u32 4294901760, %v6320_v31  ;;  %v14153_v52 = vpop.permute.xlu0 %7025 }
 0x7bd   : > { %10423 = vmatprep.subr.mxu0 %v15463_v48  ;;  %10499 = vmatprep.subr.mxu1 %v6300_v16 }
 0x7be   : > { %10381 = vmatmul.mubr.f32.gmra.mxu0 %v13965_v22  ;;  %10459 = vmatmul.mubr.f32.gmra.mxu1 %v13882_v26  ;;  %v6314_v22 = vand.u32 4294901760, %v6313_v55  ;;  %v6328_v7 = vand.u32 4294901760, %v6327_v9  ;;  %v14197_v9 = vld [vmem:[#allocation3 + $0x60] sm:$0xff] }
 0x7bf   : > { %10424 = vmatpush3.msra.mxu0 %v15463_v48  ;;  %10500 = vmatpush3.msra.mxu1 %v6300_v16 }
 0x7c0   : > { %10425 = vmatprep.subr.mxu0 %v15464_v0  ;;  %10427 = vmatprep.mubr.f32.mxu0 %v13864_v4  ;;  %v14146_v4 = vand.u32 4294901760, %v14128_v57 }
 0x7c1   : > { %10461 = vmatprep.mubr.f32.mxu1 %v13932_v5  ;;  %10501 = vmatprep.subr.mxu1 %v6307_v28 }
 0x7c2   : > { %10426 = vmatpush3.msra.mxu0 %v15464_v0  ;;  %10502 = vmatpush3.msra.mxu1 %v6307_v28  ;;  %v6334_v16 = vsub.f32 %v14128_v57, %v14146_v4 }
 0x7c3   : > { %10467 = vmatprep.subr.mxu0 %v14002_v62  ;;  %10503 = vmatprep.subr.mxu1 %v6314_v22 }
 0x7c4   : > { %10428 = vmatmul.mubr.f32.vlgmr.msra.gmra.mxu0 %v13855_v6  ;;  %10462 = vmatmul.mubr.f32.gmra.mxu1 %v13911_v33  ;;  %v6335_v6 = vand.u32 4294901760, %v6334_v16  ;;  %v14204_v16 = vld [vmem:[#allocation3 + $0x40] sm:$0xff] }
 0x7c5   : > { %10468 = vmatpush3.msra.mxu0 %v14002_v62  ;;  %10504 = vmatpush3.msra.mxu1 %v6314_v22  ;;  %v14193_v22 = vld [vmem:[#allocation3 + $0x48] sm:$0xff] }
 0x7c6   : > { %10430 = vmatprep.mubr.f32.mxu0 %v13880_v47  ;;  %10464 = vmatprep.mubr.f32.mxu1 %v13934_v32  ;;  %v14165_v47 = vpop.permute.xlu0 %7023 }
 0x7c7   : > { %10469 = vmatprep.subr.mxu0 %v14018_v23  ;;  %10505 = vmatprep.subr.mxu1 %v6321_v37 }
 0x7c8   : > { %10470 = vmatpush3.msra.mxu0 %v14018_v23  ;;  %10506 = vmatpush3.msra.mxu1 %v6321_v37 }
 0x7c9   : > { %10471 = vmatprep.subr.mxu0 %v14023_v30  ;;  %10507 = vmatprep.subr.mxu1 %v6328_v7 }
 0x7ca   : > { %10431 = vmatmul.mubr.f32.gmra.mxu0 %v13882_v26  ;;  %10465 = vmatmul.mubr.f32.gmra.mxu1 %v13957_v21  ;;  %v14175_v26 = vpop.permute.xlu0 %7021 }
 0x7cb   : > { %10472 = vmatpush3.msra.mxu0 %v14023_v30  ;;  %10508 = vmatpush3.msra.mxu1 %v6328_v7 }
 0x7cc   : > { %10433 = vmatprep.mubr.f32.mxu0 %v13932_v5  ;;  %10473 = vmatprep.subr.mxu0 %v14039_v38 }
 0x7cd   : > { %10509 = vmatprep.subr.mxu1 %v6335_v6  ;;  %10474 = vmatpush3.msra.mxu0 %v14039_v38 }
 0x7ce   : > { %10510 = vmatpush3.msra.mxu1 %v6335_v6  ;;  %10475 = vmatprep.subr.mxu0 %v14050_v36 }
 0x7cf   : > { %10551 = vmatprep.subr.mxu1 %v14002_v62  ;;  %10434 = vmatmul.mubr.f32.gmra.mxu0 %v13911_v33 }
 0x7d0   : > { %10476 = vmatpush3.msra.mxu0 %v14050_v36  ;;  %10436 = vmatprep.mubr.f32.mxu0 %v13934_v32  ;;  %v14185_v32 = vld [vmem:[#allocation3 + $0x50] sm:$0xff] }
 0x7d1   : > { %10477 = vmatprep.subr.mxu0 %v14078_v29  ;;  %v4948_v13 = vsub.f32 %v14185_v32, %v12913_v1  ;;  %v4950_v1 = vsub.f32 %v14197_v9, %v12931_v10 }
 0x7d2   : > { %10478 = vmatpush3.msra.mxu0 %v14078_v29 }
 0x7d3   : > { %10479 = vmatprep.subr.mxu0 %v14087_v56  ;;  %10437 = vmatmul.mubr.f32.gmra.mxu0 %v13957_v21  ;;  %v4982_v28 = vmul.f32 1.442695, %v4948_v13 }
 0x7d4   : > { %10480 = vmatpush3.msra.mxu0 %v14087_v56 }
 0x7d5   : > { %10481 = vmatprep.subr.mxu0 %v14113_v46  ;;  %10957 = vpow2.f32 %v4982_v28 }
 0x7d6   : > { %10482 = vmatpush3.msra.mxu0 %v14113_v46 }
 0x7d7   : > { %10523 = vmatprep.subr.mxu0 %v14015_v27 }
 0x7d8   : > { %v4772_v33 = vpop.xlane.xlu0 %4771 }
 0x7d9   : > { %vm4810_vm4 = vcmp.ge.f32.partialorder %v13770_v8, %v4772_v33  ;;  %v14208_v33 = vld [vmem:[#allocation3 + $0x68] sm:$0xff]  ;;  %v4874_v13 = vpop.xlane.xlu1 %4873 }
 0x7da   : > { %v4834_v5 = vsel %vm4810_vm4, -inf, %v13770_v8  ;;  %v4947_v8 = vsub.f32 %v14193_v22, %v12891_v12  ;;  %v4946_v12 = vsub.f32 %v14204_v16, %v12895_v19  ;;  %v4951_v10 = vsub.f32 %v14208_v33, %v12922_v3 }
 0x7db   : > { %v4890_v21 = vsel %vm2085_vm3, %v4834_v5, -inf  ;;  %v4986_v5 = vmul.f32 1.442695, %v4950_v1  ;;  %vm4924_vm10 = vcmp.ge.f32.partialorder %v14185_v32, %v4874_v13 }
 0x7dc   : > { %v4781_v48 = vpop.xlane.xlu0 %4780  ;;  %4891 = vmax.xlane.f32.xlu0 %v4890_v21  ;;  %v4980_v7 = vmul.f32 1.442695, %v4947_v8  ;;  %v14221_v8 = vld [vmem:[#allocation3 + $0x78] sm:$0xff] }
 0x7dd   : > { %vm4813_vm5 = vcmp.ge.f32.partialorder %v13779_v43, %v4781_v48  ;;  %v4978_v48 = vmul.f32 1.442695, %v4946_v12 }
 0x7de   : > { %v4837_v55 = vsel %vm4813_vm5, -inf, %v13779_v43  ;;  %10959 = vpow2.f32 %v4980_v7 }
 0x7df   : > { %v4899_v0 = vsel %vm2085_vm3, %v4837_v55, -inf  ;;  %v14215_v55 = vld [vmem:[#allocation3 + $0x58] sm:$0xff]  ;;  %10961 = vpow2.f32 %v4986_v5 }
 0x7e0   : > { %v4778_v31 = vpop.xlane.xlu0 %4777  ;;  %4900 = vmax.xlane.f32.xlu1 %v4899_v0  ;;  %v4949_v19 = vsub.f32 %v14215_v55, %v12904_v24  ;;  %v4988_v0 = vmul.f32 1.442695, %v4951_v10  ;;  %10963 = vpow2.f32 %v4978_v48 }
 0x7e1   : > { %vm4812_vm6 = vcmp.ge.f32.partialorder %v13788_v34, %v4778_v31  ;;  %v4883_v31 = vpop.xlane.xlu1 %4882 }
 0x7e2   : > { %v4836_v37 = vsel %vm4812_vm6, -inf, %v13788_v34  ;;  %10965 = vpow2.f32 %v4988_v0  ;;  %vm4927_vm14 = vcmp.ge.f32.partialorder %v14208_v33, %v4883_v31 }
 0x7e3   : > { %v4896_v43 = vsel %vm2085_vm3, %v4836_v37, -inf  ;;  %v4984_v37 = vmul.f32 1.442695, %v4949_v19 }
 0x7e4   : > { %v4787_v6 = vpop.xlane.xlu0 %4786  ;;  %4897 = vmax.xlane.f32.xlu1 %v4896_v43  ;;  %v14226_v43 = vld [vmem:[#allocation3 + $0x70] sm:$0xff] }
 0x7e5   : > { %vm4815_vm7 = vcmp.ge.f32.partialorder %v13797_v51, %v4787_v6  ;;  %v4952_v24 = vsub.f32 %v14226_v43, %v12949_v39  ;;  %v10958_v6 = vpop.eup %10957  ;;  %10967 = vpow2.f32 %v4984_v37  ;;  %v4880_v39 = vpop.xlane.xlu1 %4879 }
 0x7e6   : > { %v4839_v34 = vsel %vm4815_vm7, -inf, %v13797_v51  ;;  %v4953_v51 = vsub.f32 %v14221_v8, %v12940_v11  ;;  %vm4926_vm12 = vcmp.ge.f32.partialorder %v14197_v9, %v4880_v39 }
 0x7e7   : > { %v4905_v21 = vsel %vm2085_vm3, %v4839_v34, -inf  ;;  %v4990_v10 = vmul.f32 1.442695, %v4952_v24  ;;  %v14234_v34 = vsel %vm4924_vm10, %v10958_v6, 0.0 }
 0x7e8   : > { %v4784_v28 = vpop.xlane.xlu0 %4783  ;;  %4906 = vmax.xlane.f32.xlu1 %v4905_v21  ;;  %v4992_v11 = vmul.f32 1.442695, %v4953_v51  ;;  %v7000_v21 = vld [vmem:[#allocation2 + $0x8] sm:$0xff]  ;;  %v6095_v32 = vsel %vm2085_vm3, %v14234_v34, 0 }
 0x7e9   : > { %vm4814_vm8 = vcmp.ge.f32.partialorder %v13805_v18, %v4784_v28  ;;  %v4889_v31 = vpop.xlane.xlu1 %4888 }
 0x7ea   : > { %v4838_v3 = vsel %vm4814_vm8, -inf, %v13805_v18  ;;  %10969 = vpow2.f32 %v4992_v11  ;;  %vm4929_vm4 = vcmp.ge.f32.partialorder %v14221_v8, %v4889_v31 }
 0x7eb   : > { %v4902_v1 = vsel %vm2085_vm3, %v4838_v3, -inf  ;;  %10971 = vpow2.f32 %v4990_v10  ;;  %v10960_v19 = vpop.eup %10959 }
 0x7ec   : > { %v4793_v7 = vpop.xlane.xlu0 %4792  ;;  %4903 = vmax.xlane.f32.xlu1 %v4902_v1  ;;  %v10962_v28 = vpop.eup %10961 }
 0x7ed   : > { %vm4817_vm9 = vcmp.ge.f32.partialorder %v13811_v41, %v4793_v7  ;;  %v14248_v3 = vsel %vm4926_vm12, %v10962_v28, 0.0  ;;  %v10964_v37 = vpop.eup %10963 }
 0x7ee   : > { %v4841_v18 = vsel %vm4817_vm9, -inf, %v13811_v41 }
 0x7ef   : > { %v4911_v12 = vsel %vm2085_vm3, %v4841_v18, -inf  ;;  %v10966_v24 = vpop.eup %10965 }
 0x7f0   : > { %v4790_v5 = vpop.xlane.xlu0 %4789  ;;  %4912 = vmax.xlane.f32.xlu1 %v4911_v12  ;;  %v14266_v12 = vsel %vm4927_vm14, %v10966_v24, 0.0  ;;  %vm7941_vm14 = vcmask 195712  }
 0x7f1   : > { %vm4816_vm11 = vcmp.ge.f32.partialorder %v13817_v17, %v4790_v5 }
 0x7f2   : > { %v4840_v48 = vsel %vm4816_vm11, -inf, %v13817_v17  ;;  %7017 = vrot.lane.b32.xlu0 %v7000_v21, %s11077_s28  ;;  %v14246_v17 = vand.u32 4294901760, %v6095_v32  ;;  %v10968_v10 = vpop.eup %10967  ;;  %v6104_v21 = vsel %vm2085_vm3, %v14266_v12, 0 }
 0x7f3   : > { %v4908_v41 = vsel %vm2085_vm3, %v4840_v48, -inf }
 0x7f4   : > { %v4871_v13 = vpop.xlane.xlu0 %4870  ;;  %4909 = vmax.xlane.f32.xlu1 %v4908_v41  ;;  %v14264_v11 = vsub.f32 %v6095_v32, %v14246_v17 }
 0x7f5   : > { %vm4923_vm13 = vcmp.ge.f32.partialorder %v14193_v22, %v4871_v13  ;;  %v6101_v22 = vsel %vm2085_vm3, %v14248_v3, 0 }
 0x7f6   : > { %v14244_v0 = vsel %vm4923_vm13, %v10960_v19, 0.0  ;;  %v14272_v5 = vand.u32 4294901760, %v6101_v22  ;;  %v15465_v8 = vand.u32 4294901760, %v14264_v11 }
 0x7f7   : > { %v6092_v51 = vsel %vm2085_vm3, %v14244_v0, 0 }
 0x7f8   : > { %v14253_v1 = vand.u32 4294901760, %v6092_v51  ;;  %v4868_v9 = vpop.xlane.xlu0 %4867  ;;  %v14297_v24 = vsub.f32 %v6101_v22, %v14272_v5 }
 0x7f9   : > { %vm4922_vm15 = vcmp.ge.f32.partialorder %v14204_v16, %v4868_v9 }
 0x7fa   : > { %v14259_v7 = vsub.f32 %v6092_v51, %v14253_v1  ;;  %v14261_v18 = vsel %vm4922_vm15, %v10964_v37, 0.0  ;;  %v14294_v37 = vand.u32 4294901760, %v6104_v21 }
 0x7fb   : > { %v6089_v33 = vsel %vm2085_vm3, %v14261_v18, 0 }
 0x7fc   : > { %v14270_v6 = vand.u32 4294901760, %v6089_v33  ;;  %v4877_v16 = vpop.xlane.xlu0 %4876  ;;  %v15367_v39 = vand.u32 4294901760, %v14259_v7 }
 0x7fd   : > { %vm4925_vm1 = vcmp.ge.f32.partialorder %v14215_v55, %v4877_v16  ;;  %v10970_v55 = vpop.eup %10969 }
 0x7fe   : > { %v14279_v48 = vsub.f32 %v6089_v33, %v14270_v6  ;;  %v14281_v41 = vsel %vm4925_vm1, %v10968_v10, 0.0  ;;  %10511 = vmatprep.mubr.f32.mxu1 %v14270_v6  ;;  %v10972_v9 = vpop.eup %10971  ;;  %v6198_v33 = vsub.f32 %v14259_v7, %v15367_v39  ;;  %v14306_v16 = vsel %vm4929_vm4, %v10970_v55, 0.0 }
 0x7ff   : > { %v6098_v32 = vsel %vm2085_vm3, %v14281_v41, 0  ;;  %10512 = vmatmul.mubr.f32.vlgmr.msra.gmra.mxu1 %v14253_v1 }
 0x800   : > { %v14289_v19 = vand.u32 4294901760, %v6098_v32  ;;  %10552 = vmatpush3.msra.mxu1 %v14002_v62  ;;  %v4886_v28 = vpop.xlane.xlu0 %4885  ;;  %10514 = vmatprep.mubr.f32.mxu1 %v14246_v17  ;;  %v6187_v51 = vand.u32 4294901760, %v14279_v48  ;;  %v6199_v50 = vand.u32 4294901760, %v6198_v33 }
 0x801   : > { %vm4928_vm5 = vcmp.ge.f32.partialorder %v14226_v43, %v4886_v28  ;;  %10553 = vmatprep.subr.mxu1 %v14018_v23  ;;  %v6208_v43 = vsub.f32 %v14264_v11, %v15465_v8  ;;  %v14328_v28 = vsub.f32 %v6104_v21, %v14294_v37  ;;  %v6227_v8 = vand.u32 4294901760, %v14297_v24 }
 0x802   : > { %v14309_v10 = vsub.f32 %v6098_v32, %v14289_v19  ;;  %v14311_v13 = vsel %vm4928_vm5, %v10972_v9, 0.0  ;;  %10554 = vmatpush3.msra.mxu1 %v14018_v23  ;;  %v6188_v22 = vsub.f32 %v14279_v48, %v6187_v51  ;;  %v6110_v9 = vsel %vm2085_vm3, %v14306_v16, 0 }
 0x803   : > { %v6107_v39 = vsel %vm2085_vm3, %v14311_v13, 0  ;;  %10555 = vmatprep.subr.mxu1 %v14023_v30  ;;  %10515 = vmatmul.mubr.f32.gmra.mxu1 %v14289_v19  ;;  %v6209_v33 = vand.u32 4294901760, %v6208_v43  ;;  %v14343_v40 = vand.u32 4294901760, %v6110_v9 }
 0x804   : > { %v6217_v31 = vand.u32 4294901760, %v14309_v10  ;;  %v14323_v32 = vand.u32 4294901760, %v6107_v39  ;;  %10556 = vmatpush3.msra.mxu1 %v14023_v30  ;;  %10517 = vmatprep.mubr.f32.mxu1 %v14272_v5  ;;  %v6189_v55 = vand.u32 4294901760, %v6188_v22 }
 0x805   : > { %10557 = vmatprep.subr.mxu1 %v14039_v38  ;;  %7015 = vrot.lane.b32.xlu1 %v11053_v54, %s11077_s28  ;;  %v6237_v54 = vand.u32 4294901760, %v14328_v28 }
 0x806   : > { %10558 = vmatpush3.msra.mxu1 %v14039_v38  ;;  %10483 = vmatprep.mubr.f32.mxu0 %v6189_v55  ;;  %v6218_v22 = vsub.f32 %v14309_v10, %v6217_v31  ;;  %v14340_v21 = vsub.f32 %v6107_v39, %v14323_v32  ;;  %v6228_v39 = vsub.f32 %v14297_v24, %v6227_v8 }
 0x807   : > { %10559 = vmatprep.subr.mxu1 %v14050_v36  ;;  %10484 = vmatmul.mubr.f32.vlgmr.msra.gmra.mxu0 %v6199_v50 }
 0x808   : > { %10518 = vmatmul.mubr.f32.gmra.mxu1 %v14294_v37  ;;  %10524 = vmatpush3.msra.mxu0 %v14015_v27  ;;  %v6219_v55 = vand.u32 4294901760, %v6218_v22  ;;  %v6247_v50 = vand.u32 4294901760, %v14340_v21  ;;  %v14358_v27 = vsub.f32 %v6110_v9, %v14343_v40  ;;  %v6229_v43 = vand.u32 4294901760, %v6228_v39 }
 0x809   : > { %10560 = vmatpush3.msra.mxu1 %v14050_v36  ;;  %10486 = vmatprep.mubr.f32.mxu0 %v6209_v33  ;;  %v6238_v22 = vsub.f32 %v14328_v28, %v6237_v54  ;;  %v5058_v39 = vsel %vm2085_vm3, %v14261_v18, 0.0 }
 0x80a   : > { %10520 = vmatprep.mubr.f32.mxu1 %v14323_v32  ;;  %10525 = vmatprep.subr.mxu0 %v14030_v45  ;;  %v6257_v9 = vand.u32 4294901760, %v14358_v27 }
 0x80b   : > { %10561 = vmatprep.subr.mxu1 %v14078_v29  ;;  %10526 = vmatpush3.msra.mxu0 %v14030_v45  ;;  %v6248_v45 = vsub.f32 %v14340_v21, %v6247_v50  ;;  %v6239_v33 = vand.u32 4294901760, %v6238_v22 }
 0x80c   : > { %10562 = vmatpush3.msra.mxu1 %v14078_v29  ;;  %10527 = vmatprep.subr.mxu0 %v14043_v49 }
 0x80d   : > { %10563 = vmatprep.subr.mxu1 %v14087_v56  ;;  %10487 = vmatmul.mubr.f32.gmra.mxu0 %v6219_v55  ;;  %v15466_v55 = vand.u32 4294901760, %v14259_v7 }
 0x80e   : > { %10521 = vmatmul.mubr.f32.gmra.mxu1 %v14343_v40  ;;  %10528 = vmatpush3.msra.mxu0 %v14043_v49  ;;  %v6249_v49 = vand.u32 4294901760, %v6248_v45 }
 0x80f   : > { %10564 = vmatpush3.msra.mxu1 %v14087_v56  ;;  %10489 = vmatprep.mubr.f32.mxu0 %v6229_v43 }
 0x810   : > { %10529 = vmatprep.subr.mxu0 %v14064_v20  ;;  %10565 = vmatprep.subr.mxu1 %v14113_v46 }
 0x811   : > { %10567 = vmatprep.mubr.f32.mxu1 %v6187_v51  ;;  %10530 = vmatpush3.msra.mxu0 %v14064_v20  ;;  %v6258_v51 = vsub.f32 %v14358_v27, %v6257_v9  ;;  %v15467_v20 = vand.u32 4294901760, %v14264_v11 }
 0x812   : > { %10566 = vmatpush3.msra.mxu1 %v14113_v46  ;;  %10531 = vmatprep.subr.mxu0 %v14075_v42 }
 0x813   : > { %10607 = vmatprep.subr.mxu1 %v14002_v62  ;;  %10490 = vmatmul.mubr.f32.gmra.mxu0 %v6239_v33  ;;  %v11056_v33 = vld [vmem:[#allocation3 + $0x98] sm:$0xff] }
 0x814   : > { %10532 = vmatpush3.msra.mxu0 %v14075_v42  ;;  %10568 = vmatmul.mubr.f32.vlgmr.msra.gmra.mxu1 %v15466_v55  ;;  %v6259_v42 = vand.u32 4294901760, %v6258_v51 }
 0x815   : > { %10608 = vmatpush3.msra.mxu1 %v14002_v62  ;;  %10492 = vmatprep.mubr.f32.mxu0 %v6249_v49  ;;  %v14399_v62 = vand.u32 4294901760, %v14111_v2 }
 0x816   : > { %10533 = vmatprep.subr.mxu0 %v14099_v61  ;;  %10570 = vmatprep.mubr.f32.mxu1 %v15467_v20 }
 0x817   : > { %10609 = vmatprep.subr.mxu1 %v14018_v23  ;;  %5059 = vadd.xlane.f32.xlu0 %v5058_v39 }
 0x818   : > { %10534 = vmatpush3.msra.mxu0 %v14099_v61  ;;  %10610 = vmatpush3.msra.mxu1 %v14018_v23  ;;  %v5067_v23 = vsel %vm2085_vm3, %v14281_v41, 0.0  ;;  %v14413_v61 = vsub.f32 %v14111_v2, %v14399_v62  ;;  %v5064_v2 = vsel %vm2085_vm3, %v14234_v34, 0.0 }
 0x819   : > { %10535 = vmatprep.subr.mxu0 %v14109_v63  ;;  %10611 = vmatprep.subr.mxu1 %v14023_v30 }
 0x81a   : > { %10493 = vmatmul.mubr.f32.gmra.mxu0 %v6259_v42  ;;  %10571 = vmatmul.mubr.f32.gmra.mxu1 %v6217_v31  ;;  %v14571_v42 = vld [vmem:[#allocation3 + $0x90] sm:$0xff] }
 0x81b   : > { %10536 = vmatpush3.msra.mxu0 %v14109_v63  ;;  %10612 = vmatpush3.msra.mxu1 %v14023_v30  ;;  %v14416_v30 = vand.u32 4294901760, %v14136_v14  ;;  %v14423_v63 = vand.u32 4294901760, %v14153_v52 }
 0x81c   : > { %10537 = vmatprep.subr.mxu0 %v14128_v57  ;;  %10539 = vmatprep.mubr.f32.mxu0 %v14279_v48 }
 0x81d   : > { %10573 = vmatprep.mubr.f32.mxu1 %v6227_v8  ;;  %10613 = vmatprep.subr.mxu1 %v14039_v38 }
 0x81e   : > { %5068 = vadd.xlane.f32.xlu0 %v5067_v23  ;;  %10538 = vmatpush3.msra.mxu0 %v14128_v57  ;;  %v14440_v57 = vand.u32 4294901760, %v14413_v61  ;;  %v15470_v23 = vld [vmem:[#allocation40_spill] sm:$0xff] }
 0x81f   : > { %10614 = vmatpush3.msra.mxu1 %v14039_v38  ;;  %10579 = vmatprep.subr.mxu0 %v14035_v53  ;;  %v14432_v38 = vsub.f32 %v14136_v14, %v14416_v30  ;;  %v14452_v14 = vld [vmem:[#allocation3 + $0x88] sm:$0xff] }
 0x820   : > { %10615 = vmatprep.subr.mxu1 %v14050_v36  ;;  %10540 = vmatmul.mubr.f32.vlgmr.msra.gmra.mxu0 %v14259_v7  ;;  %v4955_v34 = vsub.f32 %v14452_v14, %v13013_v25  ;;  %v14459_v7 = vand.u32 4294901760, %v14175_v26 }
 0x821   : > { %10574 = vmatmul.mubr.f32.gmra.mxu1 %v6237_v54  ;;  %10580 = vmatpush3.msra.mxu0 %v14035_v53  ;;  %v14445_v53 = vsub.f32 %v14153_v52, %v14423_v63  ;;  %v7020_v52 = vpop.permute.xlu0 %7019 }
 0x822   : > { %10616 = vmatpush3.msra.mxu1 %v14050_v36  ;;  %10542 = vmatprep.mubr.f32.mxu0 %v14264_v11  ;;  %v14448_v36 = vand.u32 4294901760, %v14165_v47  ;;  %v4996_v11 = vmul.f32 1.442695, %v4955_v34 }
 0x823   : > { %10576 = vmatprep.mubr.f32.mxu1 %v6247_v50  ;;  %10581 = vmatprep.subr.mxu0 %v14057_v58  ;;  %v14478_v18 = vand.u32 4294901760, %v14445_v53  ;;  %v11055_v50 = vld [vmem:[#allocation3 + $0x80] sm:$0xff] }
 0x824   : > { %10617 = vmatprep.subr.mxu1 %v14078_v29  ;;  %5065 = vadd.xlane.f32.xlu0 %v5064_v2  ;;  %v14473_v25 = vsub.f32 %v14165_v47, %v14448_v36  ;;  %v14488_v47 = vand.u32 4294901760, %v7020_v52  ;;  %10973 = vpow2.f32 %v4996_v11  ;;  %v4956_v2 = vsub.f32 %v14571_v42, %v15470_v23 }
 0x825   : > { %10582 = vmatpush3.msra.mxu0 %v14057_v58  ;;  %10618 = vmatpush3.msra.mxu1 %v14078_v29  ;;  %v7236_v58 = vsub.f32 %v14413_v61, %v14440_v57  ;;  %v14467_v29 = vand.u32 4294901760, %v14432_v38 }
 0x826   : > { %10583 = vmatprep.subr.mxu0 %v14069_v44  ;;  %10619 = vmatprep.subr.mxu1 %v14087_v56  ;;  %v4998_v11 = vmul.f32 1.442695, %v4956_v2 }
 0x827   : > { %10543 = vmatmul.mubr.f32.gmra.mxu0 %v14309_v10  ;;  %10577 = vmatmul.mubr.f32.gmra.mxu1 %v6257_v9  ;;  %v7237_v48 = vand.u32 4294901760, %v7236_v58  ;;  %v7243_v41 = vsub.f32 %v14432_v38, %v14467_v29 }
 0x828   : > { %10584 = vmatpush3.msra.mxu0 %v14069_v44  ;;  %10620 = vmatpush3.msra.mxu1 %v14087_v56  ;;  %v5070_v44 = vsel %vm2085_vm3, %v14248_v3, 0.0  ;;  %v14486_v56 = vsub.f32 %v14175_v26, %v14459_v7  ;;  %v7250_v26 = vsub.f32 %v14445_v53, %v14478_v18  ;;  %v14499_v3 = vand.u32 4294901760, %v14473_v25 }
 0x829   : > { %10545 = vmatprep.mubr.f32.mxu0 %v14297_v24  ;;  %10585 = vmatprep.subr.mxu0 %v14093_v35 }
 0x82a   : > { %10621 = vmatprep.subr.mxu1 %v14113_v46  ;;  %10623 = vmatprep.mubr.f32.mxu1 %v14270_v6  ;;  %v14508_v24 = vand.u32 4294901760, %v14486_v56  ;;  %v7251_v10 = vand.u32 4294901760, %v7250_v26  ;;  %v7257_v31 = vsub.f32 %v14473_v25, %v14499_v3 }
 0x82b   : > { %5071 = vadd.xlane.f32.xlu0 %v5070_v44  ;;  %10586 = vmatpush3.msra.mxu0 %v14093_v35  ;;  %v14504_v35 = vsub.f32 %v7020_v52, %v14488_v47  ;;  %v14579_v44 = vld [vmem:[#allocation3 + $0xa8] sm:$0xff] }
 0x82c   : > { %10622 = vmatpush3.msra.mxu1 %v14113_v46  ;;  %10587 = vmatprep.subr.mxu0 %v14103_v15  ;;  %v7244_v46 = vand.u32 4294901760, %v7243_v41 }
 0x82d   : > { %10663 = vmatprep.subr.mxu1 %v7237_v48  ;;  %10546 = vmatmul.mubr.f32.gmra.mxu0 %v14328_v28  ;;  %v7264_v28 = vsub.f32 %v14486_v56, %v14508_v24  ;;  %v14521_v8 = vand.u32 4294901760, %v14504_v35 }
 0x82e   : > { %10588 = vmatpush3.msra.mxu0 %v14103_v15  ;;  %10624 = vmatmul.mubr.f32.vlgmr.msra.gmra.mxu1 %v14253_v1  ;;  %v5076_v15 = vsel %vm2085_vm3, %v14311_v13, 0.0  ;;  %v7258_v13 = vand.u32 4294901760, %v7257_v31  ;;  %v15472_v31 = vld [vmem:[#allocation42_spill] sm:$0xff] }
 0x82f   : > { %10664 = vmatpush3.msra.mxu1 %v7237_v48  ;;  %10548 = vmatprep.mubr.f32.mxu0 %v14340_v21  ;;  %v7271_v21 = vsub.f32 %v14504_v35, %v14521_v8  ;;  %v15471_v48 = vld [vmem:[#allocation41_spill] sm:$0xff] }
 0x830   : > { %10589 = vmatprep.subr.mxu0 %v14123_v60  ;;  %10626 = vmatprep.mubr.f32.mxu1 %v14246_v17  ;;  %v4959_v41 = vsub.f32 %v14579_v44, %v15471_v48 }
 0x831   : > { %10665 = vmatprep.subr.mxu1 %v7244_v46  ;;  %5077 = vadd.xlane.f32.xlu0 %v5076_v15 }
 0x832   : > { %10590 = vmatpush3.msra.mxu0 %v14123_v60  ;;  %10666 = vmatpush3.msra.mxu1 %v7244_v46  ;;  %v7265_v60 = vand.u32 4294901760, %v7264_v28  ;;  %v5004_v15 = vmul.f32 1.442695, %v4959_v41 }
 0x833   : > { %10591 = vmatprep.subr.mxu0 %v14132_v59  ;;  %10667 = vmatprep.subr.mxu1 %v7251_v10  ;;  %v4895_v54 = vpop.xlane.xlu1 %4894 }
 0x834   : > { %10549 = vmatmul.mubr.f32.gmra.mxu0 %v14358_v27  ;;  %10627 = vmatmul.mubr.f32.gmra.mxu1 %v14289_v19  ;;  %vm4931_vm6 = vcmp.ge.f32.partialorder %v14452_v14, %v4895_v54  ;;  %v15468_v27 = vld [vmem:[#allocation38_spill] sm:$0xff] }
 0x835   : > { %10592 = vmatpush3.msra.mxu0 %v14132_v59  ;;  %10668 = vmatpush3.msra.mxu1 %v7251_v10  ;;  %v7272_v59 = vand.u32 4294901760, %v7271_v21  ;;  %v4954_v43 = vsub.f32 %v11055_v50, %v15468_v27  ;;  %v14583_v10 = vld [vmem:[#allocation3 + $0xa0] sm:$0xff] }
 0x836   : > { %10593 = vmatprep.subr.mxu0 %v14146_v4  ;;  %10595 = vmatprep.mubr.f32.mxu0 %v14270_v6  ;;  %v10974_v6 = vpop.eup %10973  ;;  %v4958_v28 = vsub.f32 %v14583_v10, %v15472_v31 }
 0x837   : > { %10629 = vmatprep.mubr.f32.mxu1 %v14272_v5  ;;  %10669 = vmatprep.subr.mxu1 %v7258_v13 }
 0x838   : > { %10594 = vmatpush3.msra.mxu0 %v14146_v4  ;;  %10670 = vmatpush3.msra.mxu1 %v7258_v13  ;;  %v5061_v4 = vsel %vm2085_vm3, %v14244_v0, 0.0  ;;  %v5073_v0 = vsel %vm2085_vm3, %v14266_v12, 0.0 }
 0x839   : > { %10635 = vmatprep.subr.mxu0 %v14399_v62  ;;  %10671 = vmatprep.subr.mxu1 %v7265_v60 }
 0x83a   : > { %10596 = vmatmul.mubr.f32.vlgmr.msra.gmra.mxu0 %v14253_v1  ;;  %10630 = vmatmul.mubr.f32.gmra.mxu1 %v14294_v37  ;;  %v14542_v1 = vsel %vm4931_vm6, %v10974_v6, 0.0 }
 0x83b   : > { %10636 = vmatpush3.msra.mxu0 %v14399_v62  ;;  %10672 = vmatpush3.msra.mxu1 %v7265_v60 }
 0x83c   : > { %10598 = vmatprep.mubr.f32.mxu0 %v14246_v17  ;;  %10632 = vmatprep.mubr.f32.mxu1 %v14323_v32  ;;  %v5085_v17 = vsel %vm2085_vm3, %v14542_v1, 0.0 }
 0x83d   : > { %10637 = vmatprep.subr.mxu0 %v14416_v30  ;;  %10673 = vmatprep.subr.mxu1 %v7272_v59 }
 0x83e   : > { %5062 = vadd.xlane.f32.xlu1 %v5061_v4  ;;  %10638 = vmatpush3.msra.mxu0 %v14416_v30 }
 0x83f   : > { %10674 = vmatpush3.msra.mxu1 %v7272_v59  ;;  %10639 = vmatprep.subr.mxu0 %v14423_v63 }
 0x840   : > { %10599 = vmatmul.mubr.f32.gmra.mxu0 %v14289_v19  ;;  %10633 = vmatmul.mubr.f32.gmra.mxu1 %v14343_v40 }
 0x841   : > { %10640 = vmatpush3.msra.mxu0 %v14423_v63  ;;  %10601 = vmatprep.mubr.f32.mxu0 %v14272_v5  ;;  %v5079_v5 = vsel %vm2085_vm3, %v14306_v16, 0.0  ;;  %v15469_v16 = vld [vmem:[#allocation39_spill] sm:$0xff] }
 0x842   : > { %10641 = vmatprep.subr.mxu0 %v14448_v36  ;;  %5074 = vadd.xlane.f32.xlu1 %v5073_v0  ;;  %v4957_v49 = vsub.f32 %v11056_v33, %v15469_v16  ;;  %v5002_v0 = vmul.f32 1.442695, %v4958_v28 }
 0x843   : > { %10642 = vmatpush3.msra.mxu0 %v14448_v36  ;;  %5086 = vadd.xlane.f32.xlu0 %v5085_v17 }
 0x844   : > { %10643 = vmatprep.subr.mxu0 %v14459_v7  ;;  %10602 = vmatmul.mubr.f32.gmra.mxu0 %v14294_v37  ;;  %v5000_v39 = vmul.f32 1.442695, %v4957_v49 }
 0x845   : > { %10644 = vmatpush3.msra.mxu0 %v14459_v7  ;;  %10604 = vmatprep.mubr.f32.mxu0 %v14323_v32  ;;  %v4994_v32 = vmul.f32 1.442695, %v4954_v43 }
 0x846   : > { %10645 = vmatprep.subr.mxu0 %v14488_v47  ;;  %5080 = vadd.xlane.f32.xlu1 %v5079_v5  ;;  %v14591_v5 = vld [vmem:[#allocation3 + $0xb8] sm:$0xff] }
 0x847   : > { %10646 = vmatpush3.msra.mxu0 %v14488_v47  ;;  %10975 = vpow2.f32 %v4994_v32 }
 0x848   : > { %10605 = vmatmul.mubr.f32.gmra.mxu0 %v14343_v40  ;;  %10977 = vpow2.f32 %v5000_v39 }
 0x849   : > { %10979 = vpow2.f32 %v4998_v11 }
 0x84a   : > { %v10345_v12 = vpop.f32.mrf.mxu1  ;;  %10981 = vpow2.f32 %v5004_v15 }
 0x84b   : > { %10983 = vpow2.f32 %v5002_v0 }
 0x84c   : > { %v5454_v19 = vpop.f32.mrf.mxu1 }
 0x84f   : > { %v10348_v37 = vpop.f32.mrf.mxu1 }
 0x851   : > { %v5466_v51 = vpop.f32.mrf.mxu1 }
 0x852   : > { %v10317_v22 = vpop.f32.mrf.mxu0 }
 0x853   : > { %v14566_v45 = vadd.f32 %v10345_v12, %v10317_v22  ;;  %v15473_v12 = vld [vmem:[#allocation43_spill] sm:$0xff] }
 0x854   : > { %v5273_v9 = vpop.f32.mrf.mxu0  ;;  %v10976_v17 = vpop.eup %10975 }
 0x855   : > { %v14569_v55 = vadd.f32 %v5454_v19, %v5273_v9  ;;  %v4961_v19 = vsub.f32 %v14591_v5, %v15473_v12 }
 0x858   : > { %v10320_v20 = vpop.f32.mrf.mxu0 }
 0x859   : > { %v10351_v40 = vpop.f32.mrf.mxu1  ;;  %v14575_v14 = vadd.f32 %v10348_v37, %v10320_v20  ;;  %v14603_v20 = vld [vmem:[#allocation3 + $0xb0] sm:$0xff] }
 0x85a   : > { %v5293_v34 = vpop.f32.mrf.mxu0 }
 0x85b   : > { %v5478_v58 = vpop.f32.mrf.mxu1  ;;  %v14577_v52 = vadd.f32 %v5466_v51, %v5293_v34  ;;  %v5008_v51 = vmul.f32 1.442695, %v4961_v19  ;;  %v10978_v34 = vpop.eup %10977 }
 0x85c   : > { %v10980_v0 = vpop.eup %10979 }
 0x85d   : > { %10985 = vpow2.f32 %v5008_v51 }
 0x85e   : > { %v10354_v26 = vpop.f32.mrf.mxu1 }
 0x860   : > { %v5490_v46 = vpop.f32.mrf.mxu1 }
 0x861   : > { %v10323_v13 = vpop.f32.mrf.mxu0 }
 0x862   : > { %v14587_v60 = vadd.f32 %v10351_v40, %v10323_v13  ;;  %v10401_v21 = vpop.f32.mrf.mxu1  ;;  %v15475_v40 = vld [vmem:[#allocation44_spill] sm:$0xff] }
 0x863   : > { %v5313_v54 = vpop.f32.mrf.mxu0 }
 0x864   : > { %v14589_v59 = vadd.f32 %v5478_v58, %v5313_v54  ;;  %v5714_v6 = vpop.f32.mrf.mxu1 }
 0x865   : > { %v4892_v4 = vpop.xlane.xlu0 %4891 }
 0x866   : > { %vm4930_vm7 = vcmp.ge.f32.partialorder %v11055_v50, %v4892_v4  ;;  %v4960_v50 = vsub.f32 %v14603_v20, %v15475_v40 }
 0x867   : > { %v5026_v27 = vsel %vm4930_vm7, %v10976_v17, 0.0  ;;  %v10326_v43 = vpop.f32.mrf.mxu0 }
 0x868   : > { %v7040_v37 = vsel %vm2085_vm3, %v5026_v27, 0  ;;  %v5082_v22 = vsel %vm2085_vm3, %v5026_v27, 0.0  ;;  %v14597_v32 = vadd.f32 %v10354_v26, %v10326_v43  ;;  %v14599_v9 = vpop.f32.mrf.mxu1 }
 0x869   : > { %v14601_v16 = vand.u32 4294901760, %v7040_v37  ;;  %v7018_v49 = vpop.permute.xlu0 %7017  ;;  %5083 = vadd.xlane.f32.xlu0 %v5082_v22  ;;  %v5333_v39 = vpop.f32.mrf.mxu0 }
 0x86a   : > { %v14607_v23 = vand.u32 4294901760, %v7018_v49  ;;  %v4901_v2 = vpop.xlane.xlu1 %4900  ;;  %v14609_v58 = vadd.f32 %v5490_v46, %v5333_v39  ;;  %v5730_v11 = vpop.f32.mrf.mxu1 }
 0x86b   : > { %15474 = vst [vmem:[#allocation5_spill] sm:$0xff] %v14601_v16  ;;  %v14612_v48 = vsub.f32 %v7040_v37, %v14601_v16  ;;  %vm4933_vm8 = vcmp.ge.f32.partialorder %v11056_v33, %v4901_v2  ;;  %10679 = vmatprep.mubr.f32.mxu1 %v14601_v16  ;;  %v10373_v41 = vpop.f32.mrf.mxu0  ;;  %v5006_v33 = vmul.f32 1.442695, %v4960_v50  ;;  %v10982_v50 = vpop.eup %10981 }
 0x86c   : > { %v14616_v26 = vsub.f32 %v7018_v49, %v14607_v23  ;;  %v5029_v15 = vsel %vm4933_vm8, %v10978_v34, 0.0  ;;  %10647 = vmatprep.subr.mxu0 %v14607_v23  ;;  %v5592_v31 = vadd.f32 %v10373_v41, %v14566_v45  ;;  %v14620_v28 = vpop.f32.mrf.mxu1 }
 0x86d   : > { %10648 = vmatpush3.msra.mxu0 %v14607_v23  ;;  %v5091_v46 = vsel %vm2085_vm3, %v5029_v15, 0.0  ;;  %v15373_v13 = vand.u32 4294901760, %v14612_v48  ;;  %v5584_v54 = vpop.f32.mrf.mxu0  ;;  %10987 = vpow2.f32 %v5006_v33 }
 0x86e   : > { %5092 = vadd.xlane.f32.xlu1 %v5091_v46  ;;  %v4898_v4 = vpop.xlane.xlu1 %4897  ;;  %v14626_v17 = vand.u32 4294901760, %v14616_v26  ;;  %v5585_v12 = vadd.f32 %v5584_v54, %v14569_v55  ;;  %v14633_v19 = vadd.f32 %v10401_v21, %v5592_v31  ;;  %v5746_v27 = vpop.f32.mrf.mxu1  ;;  %v7043_v55 = vsel %vm2085_vm3, %v14542_v1, 0 }
 0x86f   : > { %vm4932_vm9 = vcmp.ge.f32.partialorder %v14571_v42, %v4898_v4  ;;  %v7139_v45 = vsub.f32 %v14612_v48, %v15373_v13  ;;  %v14647_v41 = vand.u32 4294901760, %v7043_v55  ;;  %v7049_v46 = vsel %vm2085_vm3, %v5029_v15, 0  ;;  %v10984_v54 = vpop.eup %10983 }
 0x870   : > { %v5028_v43 = vsel %vm4932_vm9, %v10980_v0, 0.0  ;;  %v7278_v37 = vsub.f32 %v14616_v26, %v14626_v17  ;;  %v14638_v51 = vadd.f32 %v5714_v6, %v5585_v12  ;;  %v14663_v15 = vand.u32 4294901760, %v7049_v46 }
 0x871   : > { %v5088_v22 = vsel %vm2085_vm3, %v5028_v43, 0.0  ;;  %v7140_v49 = vand.u32 4294901760, %v7139_v45  ;;  %v7046_v34 = vsel %vm2085_vm3, %v5028_v43, 0  ;;  %v14661_v43 = vsub.f32 %v7043_v55, %v14647_v41 }
 0x872   : > { %5089 = vadd.xlane.f32.xlu0 %v5088_v22  ;;  %v4907_v42 = vpop.xlane.xlu1 %4906  ;;  %v7279_v40 = vand.u32 4294901760, %v7278_v37  ;;  %v10376_v21 = vpop.f32.mrf.mxu0  ;;  %v14655_v4 = vand.u32 4294901760, %v7046_v34 }
 0x873   : > { %vm4935_vm10 = vcmp.ge.f32.partialorder %v14579_v44, %v4907_v42  ;;  %10651 = vmatprep.mubr.f32.mxu0 %v7140_v49  ;;  %v5606_v39 = vadd.f32 %v10376_v21, %v14575_v14  ;;  %v14644_v2 = vpop.f32.mrf.mxu1  ;;  %v10986_v42 = vpop.eup %10985 }
 0x874   : > { %v5031_v6 = vsel %vm4935_vm10, %v10982_v50, 0.0  ;;  %10675 = vmatprep.subr.mxu1 %v7279_v40  ;;  %v5598_v31 = vpop.f32.mrf.mxu0 }
 0x875   : > { %10676 = vmatpush3.msra.mxu1 %v7279_v40  ;;  %v5097_v1 = vsel %vm2085_vm3, %v5031_v6, 0.0  ;;  %v5599_v33 = vadd.f32 %v5598_v31, %v14577_v52  ;;  %v14653_v14 = vadd.f32 %v14599_v9, %v5606_v39  ;;  %v5762_v0 = vpop.f32.mrf.mxu1  ;;  %v7055_v21 = vsel %vm2085_vm3, %v5031_v6, 0 }
 0x876   : > { %5098 = vadd.xlane.f32.xlu1 %v5097_v1  ;;  %v4904_v44 = vpop.xlane.xlu1 %4903  ;;  %v14681_v1 = vsub.f32 %v7049_v46, %v14663_v15 }
 0x877   : > { %vm4934_vm11 = vcmp.ge.f32.partialorder %v14583_v10, %v4904_v44  ;;  %v14658_v45 = vadd.f32 %v5730_v11, %v5599_v33  ;;  %v14669_v10 = vsub.f32 %v7046_v34, %v14655_v4 }
 0x878   : > { %v5030_v12 = vsel %vm4934_vm11, %v10984_v54, 0.0  ;;  %v10379_v52 = vpop.f32.mrf.mxu0  ;;  %v10457_v55 = vpop.f32.mrf.mxu1  ;;  %v14686_v54 = vand.u32 4294901760, %v7055_v21 }
 0x879   : > { %v7052_v37 = vsel %vm2085_vm3, %v5030_v12, 0  ;;  %v5094_v9 = vsel %vm2085_vm3, %v5030_v12, 0.0  ;;  %v5620_v22 = vadd.f32 %v10379_v52, %v14587_v60  ;;  %v15372_v60 = vand.u32 4294901760, %v14661_v43 }
 0x87a   : > { %5095 = vadd.xlane.f32.xlu0 %v5094_v9  ;;  %v4913_v49 = vpop.xlane.xlu1 %4912  ;;  %v5612_v11 = vpop.f32.mrf.mxu0  ;;  %v14671_v40 = vand.u32 4294901760, %v7052_v37  ;;  %v15476_v9 = vld [vmem:[#allocation30_spill] sm:$0xff] }
 0x87b   : > { %vm4937_vm12 = vcmp.ge.f32.partialorder %v14591_v5, %v4913_v49  ;;  %v5613_v50 = vadd.f32 %v5612_v11, %v14589_v59  ;;  %v14677_v31 = vadd.f32 %v14620_v28, %v5620_v22  ;;  %v10988_v5 = vpop.eup %10987  ;;  %v15371_v28 = vand.u32 4294901760, %v14669_v10  ;;  %v5986_v12 = vpop.f32.mrf.mxu1 }
 0x87c   : > { %v5033_v39 = vsel %vm4937_vm12, %v10986_v42, 0.0  ;;  %v14689_v6 = vsub.f32 %v7052_v37, %v14671_v40  ;;  %v5037_v22 = vsel %vm2085_vm3, %v15476_v9, 0.0  ;;  %v15377_v49 = vand.u32 4294901760, %v14681_v1 }
 0x87d   : > { %v5103_v34 = vsel %vm2085_vm3, %v5033_v39, 0.0  ;;  %v14684_v44 = vadd.f32 %v5746_v27, %v5613_v50  ;;  %v7149_v27 = vsub.f32 %v14661_v43, %v15372_v60  ;;  %v7061_v50 = vsel %vm2085_vm3, %v5033_v39, 0 }
 0x87e   : > { %5104 = vadd.xlane.f32.xlu1 %v5103_v34  ;;  %v4910_v33 = vpop.xlane.xlu1 %4909  ;;  %v10382_v59 = vpop.f32.mrf.mxu0 }
 0x87f   : > { %vm4936_vm13 = vcmp.ge.f32.partialorder %v14603_v20, %v4910_v33  ;;  %v5634_v46 = vadd.f32 %v10382_v59, %v14597_v32  ;;  %v10460_v39 = vpop.f32.mrf.mxu1  ;;  %v7150_v13 = vand.u32 4294901760, %v7149_v27 }
 0x880   : > { %v5032_v52 = vsel %vm4936_vm13, %v10988_v5, 0.0  ;;  %v5626_v42 = vpop.f32.mrf.mxu0  ;;  %v14710_v5 = vsub.f32 %v7055_v21, %v14686_v54 }
 0x881   : > { %v7058_v37 = vsel %vm2085_vm3, %v5032_v52, 0  ;;  %v5100_v20 = vsel %vm2085_vm3, %v5032_v52, 0.0  ;;  %v5627_v11 = vadd.f32 %v5626_v42, %v14609_v58  ;;  %v14707_v33 = vadd.f32 %v14644_v2, %v5634_v46 }
 0x882   : > { %v14704_v32 = vand.u32 4294901760, %v7058_v37  ;;  %5038 = vadd.xlane.f32.xlu1 %v5037_v22  ;;  %5101 = vadd.xlane.f32.xlu0 %v5100_v20  ;;  %v7016_v34 = vpop.permute.xlu1 %7015  ;;  %v7159_v52 = vsub.f32 %v14669_v10, %v15371_v28  ;;  %v15376_v58 = vand.u32 4294901760, %v14689_v6  ;;  %v15477_v22 = vld [vmem:[#allocation31_spill] sm:$0xff]  ;;  %v14722_v2 = vand.u32 4294901760, %v7061_v50  ;;  %v15478_v28 = vld [vmem:[#allocation34_spill] sm:$0xff] }
 0x883   : > { %v14712_v59 = vand.u32 4294901760, %v7016_v34  ;;  %v14718_v9 = vadd.f32 %v5762_v0, %v5627_v11  ;;  %v5034_v42 = vsel %vm2085_vm3, %v15477_v22, 0.0  ;;  %v5043_v60 = vsel %vm2085_vm3, %v15478_v28, 0.0 }
 0x884   : > { %v10429_v20 = vpop.f32.mrf.mxu0  ;;  %v14725_v21 = vsub.f32 %v7058_v37, %v14704_v32  ;;  %v7169_v11 = vsub.f32 %v14681_v1, %v15377_v49  ;;  %v7188_v37 = vand.u32 4294901760, %v14710_v5  ;;  %v7179_v16 = vsub.f32 %v14689_v6, %v15376_v58 }
 0x885   : > { %v14728_v46 = vsub.f32 %v7016_v34, %v14712_v59  ;;  %10649 = vmatprep.subr.mxu0 %v14712_v59  ;;  %v5872_v0 = vadd.f32 %v10429_v20, %v14633_v19  ;;  %v7160_v34 = vand.u32 4294901760, %v7159_v52  ;;  %v5998_v19 = vpop.f32.mrf.mxu1  ;;  %v15479_v52 = vld [vmem:[#allocation36_spill] sm:$0xff] }
 0x886   : > { %5044 = vadd.xlane.f32.xlu1 %v5043_v60  ;;  %5035 = vadd.xlane.f32.xlu0 %v5034_v42  ;;  %v5865_v22 = vpop.f32.mrf.mxu0  ;;  %v14750_v42 = vsub.f32 %v7061_v50, %v14722_v2  ;;  %v5049_v20 = vsel %vm2085_vm3, %v15479_v52, 0.0  ;;  %v7170_v50 = vand.u32 4294901760, %v7169_v11  ;;  %v7189_v52 = vsub.f32 %v14710_v5, %v7188_v37 }
 0x887   : > { %10650 = vmatpush3.msra.mxu0 %v14712_v59  ;;  %v14743_v28 = vand.u32 4294901760, %v14728_v46  ;;  %v14745_v60 = vadd.f32 %v10457_v55, %v5872_v0  ;;  %v5866_v27 = vadd.f32 %v5865_v22, %v14638_v51  ;;  %v7198_v55 = vand.u32 4294901760, %v14725_v21  ;;  %v10463_v49 = vpop.f32.mrf.mxu1 }
 0x888   : > { %10652 = vmatmul.mubr.f32.vlgmr.msra.gmra.mxu0 %v7150_v13  ;;  %10691 = vmatprep.subr.mxu0 %v14413_v61  ;;  %v15480_v13 = vld [vmem:[#allocation32_spill] sm:$0xff] }
 0x889   : > { %10654 = vmatprep.mubr.f32.mxu0 %v7160_v34  ;;  %10692 = vmatpush3.msra.mxu0 %v14413_v61  ;;  %v7285_v58 = vsub.f32 %v14728_v46, %v14743_v28  ;;  %v14758_v0 = vadd.f32 %v5986_v12, %v5866_v27  ;;  %v5040_v51 = vsel %vm2085_vm3, %v15480_v13, 0.0  ;;  %v7180_v61 = vand.u32 4294901760, %v7179_v16  ;;  %v15482_v13 = vld [vmem:[#allocation33_spill] sm:$0xff] }
 0x88a   : > { %10693 = vmatprep.subr.mxu0 %v14432_v38  ;;  %5050 = vadd.xlane.f32.xlu1 %v5049_v20  ;;  %v10432_v22 = vpop.f32.mrf.mxu0  ;;  %v7208_v27 = vand.u32 4294901760, %v14750_v42 }
 0x88b   : > { %5041 = vadd.xlane.f32.xlu0 %v5040_v51  ;;  %10694 = vmatpush3.msra.mxu0 %v14432_v38  ;;  %v7286_v34 = vand.u32 4294901760, %v7285_v58  ;;  %v5884_v12 = vadd.f32 %v10432_v22, %v14653_v14  ;;  %v7199_v38 = vsub.f32 %v14725_v21, %v7198_v55  ;;  %v15481_v14 = vld [vmem:[#allocation37_spill] sm:$0xff]  ;;  %v5046_v51 = vsel %vm2085_vm3, %v15482_v13, 0.0 }
 0x88c   : > { %10655 = vmatmul.mubr.f32.gmra.mxu0 %v7170_v50  ;;  %10695 = vmatprep.subr.mxu0 %v14445_v53  ;;  %v5877_v20 = vpop.f32.mrf.mxu0  ;;  %v5055_v11 = vsel %vm2085_vm3, %v15481_v14, 0.0  ;;  %v6010_v50 = vpop.f32.mrf.mxu1 }
 0x88d   : > { %10657 = vmatprep.mubr.f32.mxu0 %v7180_v61  ;;  %10696 = vmatpush3.msra.mxu0 %v14445_v53  ;;  %v14774_v16 = vadd.f32 %v10460_v39, %v5884_v12  ;;  %v5878_v58 = vadd.f32 %v5877_v20, %v14658_v45  ;;  %v7190_v53 = vand.u32 4294901760, %v7189_v52  ;;  %v7200_v39 = vand.u32 4294901760, %v7199_v38 }
 0x88e   : > { %10677 = vmatprep.subr.mxu1 %v7286_v34  ;;  %10697 = vmatprep.subr.mxu0 %v14473_v25  ;;  %v7209_v12 = vsub.f32 %v14750_v42, %v7208_v27 }
 0x88f   : > { %5056 = vadd.xlane.f32.xlu1 %v5055_v11  ;;  %5047 = vadd.xlane.f32.xlu0 %v5046_v51  ;;  %v14782_v22 = vadd.f32 %v5998_v19, %v5878_v58  ;;  %v10435_v61 = vpop.f32.mrf.mxu0 }
 0x890   : > { %10678 = vmatpush3.msra.mxu1 %v7286_v34  ;;  %10698 = vmatpush3.msra.mxu0 %v14473_v25  ;;  %v5896_v45 = vadd.f32 %v10435_v61, %v14677_v31  ;;  %v10466_v25 = vpop.f32.mrf.mxu1  ;;  %v7210_v58 = vand.u32 4294901760, %v7209_v12 }
 0x891   : > { %10658 = vmatmul.mubr.f32.gmra.mxu0 %v7190_v53  ;;  %10680 = vmatmul.mubr.f32.vlgmr.msra.gmra.mxu1 %v14647_v41  ;;  %v5889_v20 = vpop.f32.mrf.mxu0 }
 0x892   : > { %10699 = vmatprep.subr.mxu0 %v14486_v56  ;;  %10719 = vmatprep.subr.mxu1 %v14399_v62  ;;  %v14792_v19 = vadd.f32 %v10463_v49, %v5896_v45  ;;  %v5890_v34 = vadd.f32 %v5889_v20, %v14684_v44  ;;  %v15483_v49 = vld [vmem:[#allocation35_spill] sm:$0xff] }
 0x893   : > { %10660 = vmatprep.mubr.f32.mxu0 %v7200_v39  ;;  %10682 = vmatprep.mubr.f32.mxu1 %v14655_v4  ;;  %v10438_v31 = vpop.f32.mrf.mxu0  ;;  %v5052_v44 = vsel %vm2085_vm3, %v15483_v49, 0.0  ;;  %vm7964_vm3 = vcmask 195584  }
 0x894   : > { %10700 = vmatpush3.msra.mxu0 %v14486_v56  ;;  %10720 = vmatpush3.msra.mxu1 %v14399_v62  ;;  %v14798_v52 = vadd.f32 %v6010_v50, %v5890_v34  ;;  %v5908_v38 = vadd.f32 %v10438_v31, %v14707_v33  ;;  %v6022_v33 = vpop.f32.mrf.mxu1 }
 0x895   : > { %10701 = vmatprep.subr.mxu0 %v14504_v35  ;;  %10721 = vmatprep.subr.mxu1 %v14416_v30  ;;  %v5901_v14 = vpop.f32.mrf.mxu0 }
 0x896   : > { %5053 = vadd.xlane.f32.xlu0 %v5052_v44  ;;  %10702 = vmatpush3.msra.mxu0 %v14504_v35  ;;  %v14806_v11 = vadd.f32 %v10466_v25, %v5908_v38  ;;  %v5902_v56 = vadd.f32 %v5901_v14, %v14718_v9  ;;  %v15488_v35 = vand.u32 4294901760, %v14689_v6 }
 0x897   : > { %10722 = vmatpush3.msra.mxu1 %v14416_v30  ;;  %10661 = vmatmul.mubr.f32.gmra.mxu0 %v7210_v58 }
 0x898   : > { %10683 = vmatmul.mubr.f32.gmra.mxu1 %v14663_v15  ;;  %10703 = vmatprep.subr.mxu0 %v14616_v26  ;;  %v14812_v13 = vadd.f32 %v6022_v33, %v5902_v56 }
 0x899   : > { %10723 = vmatprep.subr.mxu1 %v14423_v63  ;;  %10685 = vmatprep.mubr.f32.mxu1 %v14671_v40 }
 0x89a   : > { %10704 = vmatpush3.msra.mxu0 %v14616_v26  ;;  %10707 = vmatprep.mubr.f32.mxu0 %v14612_v48 }
 0x89b   : > { %10724 = vmatpush3.msra.mxu1 %v14423_v63  ;;  %10705 = vmatprep.subr.mxu0 %v14728_v46 }
 0x89c   : > { %10725 = vmatprep.subr.mxu1 %v14448_v36  ;;  %10706 = vmatpush3.msra.mxu0 %v14728_v46 }
 0x89d   : > { %10726 = vmatpush3.msra.mxu1 %v14448_v36  ;;  %10708 = vmatmul.mubr.f32.vlgmr.msra.gmra.mxu0 %v14661_v43 }
 0x89e   : > { %10686 = vmatmul.mubr.f32.gmra.mxu1 %v14686_v54  ;;  %10727 = vmatprep.subr.mxu1 %v14459_v7 }
 0x89f   : > { %10747 = vmatprep.subr.mxu0 %v14440_v57  ;;  %10688 = vmatprep.mubr.f32.mxu1 %v14704_v32 }
 0x8a0   : > { %10710 = vmatprep.mubr.f32.mxu0 %v14669_v10  ;;  %10728 = vmatpush3.msra.mxu1 %v14459_v7 }
 0x8a1   : > { %10748 = vmatpush3.msra.mxu0 %v14440_v57  ;;  %10729 = vmatprep.subr.mxu1 %v14488_v47  ;;  %v15484_v57 = vand.u32 4294901760, %v14612_v48 }
 0x8a2   : > { %10749 = vmatprep.subr.mxu0 %v14467_v29  ;;  %10730 = vmatpush3.msra.mxu1 %v14488_v47 }
 0x8a3   : > { %10750 = vmatpush3.msra.mxu0 %v14467_v29  ;;  %10689 = vmatmul.mubr.f32.gmra.mxu1 %v14722_v2  ;;  %v15485_v29 = vand.u32 4294901760, %v14661_v43 }
 0x8a4   : > { %10711 = vmatmul.mubr.f32.gmra.mxu0 %v14681_v1  ;;  %10731 = vmatprep.subr.mxu1 %v14607_v23 }
 0x8a5   : > { %10751 = vmatprep.subr.mxu0 %v14478_v18  ;;  %10713 = vmatprep.mubr.f32.mxu0 %v14689_v6 }
 0x8a6   : > { %10732 = vmatpush3.msra.mxu1 %v14607_v23  ;;  %10735 = vmatprep.mubr.f32.mxu1 %v15484_v57 }
 0x8a7   : > { %10752 = vmatpush3.msra.mxu0 %v14478_v18  ;;  %10733 = vmatprep.subr.mxu1 %v14712_v59  ;;  %v15486_v18 = vand.u32 4294901760, %v14669_v10 }
 0x8a8   : > { %10753 = vmatprep.subr.mxu0 %v14499_v3  ;;  %10734 = vmatpush3.msra.mxu1 %v14712_v59 }
 0x8a9   : > { %10754 = vmatpush3.msra.mxu0 %v14499_v3  ;;  %10736 = vmatmul.mubr.f32.vlgmr.msra.gmra.mxu1 %v15485_v29  ;;  %v15487_v3 = vand.u32 4294901760, %v14681_v1 }
 0x8aa   : > { %10714 = vmatmul.mubr.f32.gmra.mxu0 %v14710_v5  ;;  %10755 = vmatprep.subr.mxu0 %v14508_v24 }
 0x8ab   : > { %10775 = vmatprep.subr.mxu1 %v14399_v62  ;;  %10716 = vmatprep.mubr.f32.mxu0 %v14725_v21 }
 0x8ac   : > { %10738 = vmatprep.mubr.f32.mxu1 %v15486_v18  ;;  %10756 = vmatpush3.msra.mxu0 %v14508_v24 }
 0x8ad   : > { %10776 = vmatpush3.msra.mxu1 %v14399_v62  ;;  %10757 = vmatprep.subr.mxu0 %v14521_v8  ;;  %v15489_v62 = vld [vmem:[#allocation5_spill] sm:$0xff] }
 0x8ae   : > { %10777 = vmatprep.subr.mxu1 %v14416_v30  ;;  %10758 = vmatpush3.msra.mxu0 %v14521_v8 }
 0x8af   : > { %10778 = vmatpush3.msra.mxu1 %v14416_v30  ;;  %10717 = vmatmul.mubr.f32.gmra.mxu0 %v14750_v42 }
 0x8b0   : > { %10739 = vmatmul.mubr.f32.gmra.mxu1 %v15487_v3  ;;  %10759 = vmatprep.subr.mxu0 %v14626_v17 }
 0x8b1   : > { %10779 = vmatprep.subr.mxu1 %v14423_v63  ;;  %10741 = vmatprep.mubr.f32.mxu1 %v15488_v35 }
 0x8b2   : > { %10760 = vmatpush3.msra.mxu0 %v14626_v17  ;;  %10763 = vmatprep.mubr.f32.mxu0 %v15489_v62 }
 0x8b3   : > { %10780 = vmatpush3.msra.mxu1 %v14423_v63  ;;  %10761 = vmatprep.subr.mxu0 %v14743_v28 }
 0x8b4   : > { %10781 = vmatprep.subr.mxu1 %v14448_v36  ;;  %10762 = vmatpush3.msra.mxu0 %v14743_v28 }
 0x8b5   : > { %10782 = vmatpush3.msra.mxu1 %v14448_v36  ;;  %10764 = vmatmul.mubr.f32.vlgmr.msra.gmra.mxu0 %v14647_v41 }
 0x8b6   : > { %10742 = vmatmul.mubr.f32.gmra.mxu1 %v7188_v37  ;;  %10783 = vmatprep.subr.mxu1 %v14459_v7 }
 0x8b7   : > { %10744 = vmatprep.mubr.f32.mxu1 %v7198_v55  ;;  %10766 = vmatprep.mubr.f32.mxu0 %v14655_v4 }
 0x8b8   : > { %10784 = vmatpush3.msra.mxu1 %v14459_v7 }
 0x8b9   : > { %10785 = vmatprep.subr.mxu1 %v14488_v47  ;;  %10767 = vmatmul.mubr.f32.gmra.mxu0 %v14663_v15 }
 0x8ba   : > { %10786 = vmatpush3.msra.mxu1 %v14488_v47  ;;  %10769 = vmatprep.mubr.f32.mxu0 %v14671_v40 }
 0x8bb   : > { %10745 = vmatmul.mubr.f32.gmra.mxu1 %v7208_v27  ;;  %10787 = vmatprep.subr.mxu1 %v14607_v23 }
 0x8bc   : > { %10788 = vmatpush3.msra.mxu1 %v14607_v23  ;;  %10791 = vmatprep.mubr.f32.mxu1 %v15489_v62 }
 0x8bd   : > { %10789 = vmatprep.subr.mxu1 %v14712_v59  ;;  %10770 = vmatmul.mubr.f32.gmra.mxu0 %v14686_v54 }
 0x8be   : > { %10790 = vmatpush3.msra.mxu1 %v14712_v59  ;;  %10772 = vmatprep.mubr.f32.mxu0 %v14704_v32 }
 0x8bf   : > { %10792 = vmatmul.mubr.f32.vlgmr.msra.gmra.mxu1 %v14647_v41  ;;  %v10513_v30 = vpop.f32.mrf.mxu1 }
 0x8c0   : > { %10794 = vmatprep.mubr.f32.mxu1 %v14655_v4 }
 0x8c1   : > { %10773 = vmatmul.mubr.f32.gmra.mxu0 %v14722_v2  ;;  %v6372_v63 = vpop.f32.mrf.mxu1 }
 0x8c3   : > { %10795 = vmatmul.mubr.f32.gmra.mxu1 %v14663_v15  ;;  %v10516_v36 = vpop.f32.mrf.mxu1 }
 0x8c4   : > { %10797 = vmatprep.mubr.f32.mxu1 %v14671_v40 }
 0x8c5   : > { %v6384_v7 = vpop.f32.mrf.mxu1 }
 0x8c7   : > { %10798 = vmatmul.mubr.f32.gmra.mxu1 %v14686_v54  ;;  %v10485_v47 = vpop.f32.mrf.mxu0  ;;  %v5063_v51 = vpop.xlane.xlu1 %5062 }
 0x8c8   : > { %10800 = vmatprep.mubr.f32.mxu1 %v14704_v32  ;;  %v10519_v24 = vpop.f32.mrf.mxu1  ;;  %v5060_v32 = vpop.xlane.xlu0 %5059  ;;  %10989 = vrcp.f32 %v5063_v51  ;;  %v6379_v45 = vadd.f32 %v10513_v30, %v10485_v47 }
 0x8c9   : > { %v6191_v8 = vpop.f32.mrf.mxu0  ;;  %10991 = vrcp.f32 %v5060_v32 }
 0x8ca   : > { %v14904_v23 = vpop.f32.mrf.mxu1  ;;  %v6373_v34 = vadd.f32 %v6372_v63, %v6191_v8 }
 0x8cb   : > { %10801 = vmatmul.mubr.f32.gmra.mxu1 %v14722_v2  ;;  %v5075_v20 = vpop.xlane.xlu1 %5074 }
 0x8cc   : > { %v5069_v21 = vpop.xlane.xlu0 %5068 }
 0x8cd   : > { %v10488_v48 = vpop.f32.mrf.mxu0  ;;  %10993 = vrcp.f32 %v5069_v21 }
 0x8ce   : > { %v14907_v26 = vpop.f32.mrf.mxu1  ;;  %v6391_v58 = vadd.f32 %v10516_v36, %v10488_v48 }
 0x8cf   : > { %v6211_v17 = vpop.f32.mrf.mxu0  ;;  %v5081_v57 = vpop.xlane.xlu1 %5080 }
 0x8d0   : > { %v14909_v41 = vpop.f32.mrf.mxu1  ;;  %v5066_v42 = vpop.xlane.xlu0 %5065  ;;  %v6385_v29 = vadd.f32 %v6384_v7, %v6211_v17 }
 0x8d1   : > { %10995 = vrcp.f32 %v5066_v42 }
 0x8d2   : > { %10997 = vrcp.f32 %v5075_v20 }
 0x8d3   : > { %v10491_v4 = vpop.f32.mrf.mxu0 }
 0x8d4   : > { %v10569_v43 = vpop.f32.mrf.mxu1  ;;  %v5072_v61 = vpop.xlane.xlu0 %5071  ;;  %v6403_v63 = vadd.f32 %v10519_v24, %v10491_v4 }
 0x8d5   : > { %v6231_v15 = vpop.f32.mrf.mxu0  ;;  %10999 = vrcp.f32 %v5072_v61 }
 0x8d6   : > { %v6632_v10 = vpop.f32.mrf.mxu1  ;;  %11001 = vrcp.f32 %v5081_v57  ;;  %v6397_v36 = vadd.f32 %v14904_v23, %v6231_v15 }
 0x8d8   : > { %v5078_v38 = vpop.xlane.xlu0 %5077 }
 0x8d9   : > { %11003 = vrcp.f32 %v5078_v38 }
 0x8da   : > { %v14911_v40 = vpop.f32.mrf.mxu0  ;;  %v10572_v1 = vpop.f32.mrf.mxu1 }
 0x8db   : > { %v6415_v4 = vadd.f32 %v14907_v26, %v14911_v40 }
 0x8dc   : > { %v14913_v54 = vpop.f32.mrf.mxu0  ;;  %v14915_v6 = vpop.f32.mrf.mxu1 }
 0x8dd   : > { %v14925_v33 = vpop.xlane.xlu0 %5086  ;;  %v6409_v15 = vadd.f32 %v14909_v41, %v14913_v54 }
 0x8e0   : > { %v10541_v5 = vpop.f32.mrf.mxu0 }
 0x8e1   : > { %v14917_v59 = vpop.f32.mrf.mxu1  ;;  %v6510_v25 = vadd.f32 %v10541_v5, %v6379_v45  ;;  %v10990_v5 = vpop.eup %10989 }
 0x8e2   : > { %v6502_v9 = vpop.f32.mrf.mxu0  ;;  %v10992_v17 = vpop.eup %10991 }
 0x8e3   : > { %v14919_v2 = vpop.f32.mrf.mxu1  ;;  %v6503_v49 = vadd.f32 %v6502_v9, %v6373_v34  ;;  %v6641_v14 = vadd.f32 %v10569_v43, %v6510_v25  ;;  %v10994_v40 = vpop.eup %10993 }
 0x8e5   : > { %v6633_v35 = vadd.f32 %v6632_v10, %v6503_v49 }
 0x8e7   : > { %v10544_v46 = vpop.f32.mrf.mxu0  ;;  %v14921_v37 = vpop.f32.mrf.mxu1 }
 0x8e8   : > { %v6524_v18 = vadd.f32 %v10544_v46, %v6391_v58 }
 0x8e9   : > { %v6516_v28 = vpop.f32.mrf.mxu0  ;;  %v14923_v55 = vpop.f32.mrf.mxu1 }
 0x8ea   : > { %v6517_v47 = vadd.f32 %v6516_v28, %v6385_v29  ;;  %v6657_v21 = vadd.f32 %v10572_v1, %v6524_v18 }
 0x8ec   : > { %v6649_v23 = vadd.f32 %v14915_v6, %v6517_v47 }
 0x8ed   : > { %v10547_v27 = vpop.f32.mrf.mxu0 }
 0x8ee   : > { %v10625_v53 = vpop.f32.mrf.mxu1  ;;  %v6538_v48 = vadd.f32 %v10547_v27, %v6403_v63 }
 0x8ef   : > { %v6530_v50 = vpop.f32.mrf.mxu0 }
 0x8f0   : > { %v6904_v39 = vpop.f32.mrf.mxu1  ;;  %v6531_v10 = vadd.f32 %v6530_v50, %v6397_v36  ;;  %v6673_v50 = vadd.f32 %v14917_v59, %v6538_v48 }
 0x8f2   : > { %v14928_v42 = vpop.xlane.xlu0 %5083  ;;  %v6665_v20 = vadd.f32 %v14919_v2, %v6531_v10  ;;  %v246_v10 = vld [vmem:[%s15292_s3 + $0x18] sm:$0xff] }
 0x8f4   : > { %v10550_v12 = vpop.f32.mrf.mxu0  ;;  %v10628_v44 = vpop.f32.mrf.mxu1 }
 0x8f5   : > { %v6552_v27 = vadd.f32 %v10550_v12, %v6415_v4  ;;  %v10996_v12 = vpop.eup %10995 }
 0x8f6   : > { %v6544_v31 = vpop.f32.mrf.mxu0  ;;  %v6916_v62 = vpop.f32.mrf.mxu1 }
 0x8f7   : > { %v14930_v7 = vpop.xlane.xlu1 %5092  ;;  %v6545_v34 = vadd.f32 %v6544_v31, %v6409_v15  ;;  %v10998_v49 = vpop.eup %10997 }
 0x8f8   : > { %v11000_v31 = vpop.eup %10999 }
 0x8f9   : > { %v11002_v63 = vpop.eup %11001 }
 0x8fa   : > { %v10597_v56 = vpop.f32.mrf.mxu0  ;;  %v10631_v46 = vpop.f32.mrf.mxu1 }
 0x8fb   : > { %v6790_v3 = vadd.f32 %v10597_v56, %v6641_v14  ;;  %v14940_v45 = vpop.xlane.xlu0 %5089  ;;  %v6689_v14 = vadd.f32 %v14921_v37, %v6552_v27  ;;  %v11004_v48 = vpop.eup %11003 }
 0x8fc   : > { %v6783_v30 = vpop.f32.mrf.mxu0  ;;  %v6928_v6 = vpop.f32.mrf.mxu1 }
 0x8fd   : > { %v6911_v8 = vadd.f32 %v10625_v53, %v6790_v3  ;;  %v6784_v32 = vadd.f32 %v6783_v30, %v6633_v35 }
 0x8ff   : > { %v6951_v43 = vmul.f32 %v10990_v5, %v6911_v8  ;;  %v6905_v9 = vadd.f32 %v6904_v39, %v6784_v32  ;;  %v14942_v26 = vpop.xlane.xlu1 %5098 }
 0x900   : > { %v10600_v24 = vpop.f32.mrf.mxu0  ;;  %v10634_v29 = vpop.f32.mrf.mxu1 }
 0x901   : > { %v6950_v28 = vmul.f32 %v10992_v17, %v6905_v9  ;;  %v6802_v51 = vadd.f32 %v10600_v24, %v6657_v21  ;;  %6968 = vrot.lane.b32.xlu1 %v6951_v43, %s11078_s29  ;;  %v7999_v24 = vsel %vm7964_vm3, %v246_v10, 0  ;;  %v245_v10 = vld [vmem:[%s15292_s3 + $0x10] sm:$0xff] }
 0x902   : > { %v6795_v1 = vpop.f32.mrf.mxu0  ;;  %v6940_v36 = vpop.f32.mrf.mxu1 }
 0x903   : > { %v6923_v53 = vadd.f32 %v10628_v44, %v6802_v51  ;;  %v6796_v61 = vadd.f32 %v6795_v1, %v6649_v23  ;;  %6966 = vrot.lane.b32.xlu0 %v6950_v28, %s11078_s29  ;;  %v14947_v56 = vpop.xlane.xlu0 %5095  ;;  %v14963_v28 = vand.u32 4294901760, %v7999_v24 }
 0x904   : > { %v10603_v39 = vpop.f32.mrf.mxu0 }
 0x905   : > { %v6953_v25 = vmul.f32 %v10994_v40, %v6923_v53  ;;  %v6917_v41 = vadd.f32 %v6916_v62, %v6796_v61  ;;  %v6814_v54 = vadd.f32 %v10603_v39, %v6673_v50  ;;  %v6681_v62 = vadd.f32 %v14923_v55, %v6545_v34  ;;  %10803 = vmatprep.subr.mxu0 %v14963_v28 }
 0x906   : > { %v6807_v38 = vpop.f32.mrf.mxu0  ;;  %v14966_v51 = vsub.f32 %v7999_v24, %v14963_v28  ;;  %10804 = vmatpush3.xpose.msra.mxu0 %v14963_v28  ;;  %v7996_v24 = vsel %vm7964_vm3, %v245_v10, 0 }
 0x907   : > { %v6952_v44 = vmul.f32 %v10996_v12, %v6917_v41  ;;  %v6935_v59 = vadd.f32 %v10631_v46, %v6814_v54  ;;  %v6808_v58 = vadd.f32 %v6807_v38, %v6665_v20  ;;  %6972 = vrot.lane.b32.xlu0 %v6953_v25, %s11078_s29  ;;  %v14949_v57 = vpop.xlane.xlu1 %5104 }
 0x908   : > { %v10606_v2 = vpop.f32.mrf.mxu0  ;;  %v14971_v1 = vand.u32 4294901760, %v14966_v51 }
 0x909   : > { %v6955_v18 = vmul.f32 %v10998_v49, %v6935_v59  ;;  %v6929_v3 = vadd.f32 %v6928_v6, %v6808_v58  ;;  %v6826_v35 = vadd.f32 %v10606_v2, %v6689_v14  ;;  %6970 = vrot.lane.b32.xlu1 %v6952_v44, %s11078_s29 }
 0x90a   : > { %v6819_v30 = vpop.f32.mrf.mxu0  ;;  %v8178_v53 = vsub.f32 %v14966_v51, %v14971_v1 }
 0x90b   : > { %v6954_v47 = vmul.f32 %v11000_v31, %v6929_v3  ;;  %v6947_v37 = vadd.f32 %v10634_v29, %v6826_v35  ;;  %v6820_v8 = vadd.f32 %v6819_v30, %v6681_v62  ;;  %6976 = vrot.lane.b32.xlu0 %v6955_v18, %s11078_s29  ;;  %v14954_v32 = vpop.xlane.xlu0 %5101  ;;  %v5039_v5 = vpop.xlane.xlu1 %5038 }
 0x90c   : > { %11005 = vrcp.f32 %v5039_v5  ;;  %v8179_v50 = vand.u32 4294901760, %v8178_v53 }
 0x90d   : > { %v6957_v43 = vmul.f32 %v11002_v63, %v6947_v37  ;;  %v6941_v9 = vadd.f32 %v6940_v36, %v6820_v8  ;;  %6974 = vrot.lane.b32.xlu1 %v6954_v47, %s11078_s29 }
 0x90e   : > { %10823 = vmatprep.subr.mxu1 %v8179_v50 }
 0x90f   : > { %v6956_v21 = vmul.f32 %v11004_v48, %v6941_v9  ;;  %6980 = vrot.lane.b32.xlu0 %v6957_v43, %s11078_s29  ;;  %v5036_v55 = vpop.xlane.xlu0 %5035  ;;  %v5045_v17 = vpop.xlane.xlu1 %5044  ;;  %10824 = vmatpush3.xpose.msra.mxu1 %v8179_v50 }
 0x910   : > { %11007 = vrcp.f32 %v5036_v55 }
 0x911   : > { %6978 = vrot.lane.b32.xlu1 %v6956_v21, %s11078_s29  ;;  %11009 = vrcp.f32 %v5045_v17 }
 0x913   : > { %v5051_v46 = vpop.xlane.xlu1 %5050 }
 0x914   : > { %v5042_v4 = vpop.xlane.xlu0 %5041  ;;  %11011 = vrcp.f32 %v5051_v46 }
 0x915   : > { %11013 = vrcp.f32 %v5042_v4  ;;  %v15031_v4 = vand.u32 4294901760, %v7996_v24 }
 0x917   : > { %v15038_v53 = vsub.f32 %v7996_v24, %v15031_v4  ;;  %10805 = vmatprep.subr.mxu0 %v15031_v4 }
 0x918   : > { %v5048_v23 = vpop.xlane.xlu0 %5047  ;;  %v5057_v15 = vpop.xlane.xlu1 %5056  ;;  %10806 = vmatpush3.xpose.msra.mxu0 %v15031_v4 }
 0x919   : > { %11015 = vrcp.f32 %v5048_v23  ;;  %v11006_v27 = vpop.eup %11005 }
 0x91a   : > { %11017 = vrcp.f32 %v5057_v15  ;;  %v6033_v61 = vmul.f32 %v11006_v27, %v14745_v60 }
 0x91c   : > { %6041 = vst.msk [vmem:[#allocation4 + $0x8] sm:$0xff] %vm1206_vm2, %v6033_v61  ;;  %v244_v61 = vld [vmem:[%s15292_s3 + $0x8] sm:$0xff] }
 0x91d   : > { %v11008_v40 = vpop.eup %11007  ;;  %v7993_v50 = vsel %vm7964_vm3, %v244_v61, 0 }
 0x91e   : > { %v11010_v6 = vpop.eup %11009  ;;  %v6032_v39 = vmul.f32 %v11008_v40, %v14758_v0 }
 0x91f   : > { %v5054_v20 = vpop.xlane.xlu0 %5053  ;;  %v6035_v34 = vmul.f32 %v11010_v6, %v14774_v16  ;;  %v15050_v6 = vand.u32 4294901760, %v15038_v53 }
 0x920   : > { %11019 = vrcp.f32 %v5054_v20  ;;  %6040 = vst.msk [vmem:[#allocation4] sm:$0xff] %vm1206_vm2, %v6032_v39  ;;  %v15052_v39 = vand.u32 4294901760, %v7993_v50 }
 0x921   : > { %v11012_v25 = vpop.eup %11011  ;;  %6043 = vst.msk [vmem:[#allocation4 + $0x18] sm:$0xff] %vm1206_vm2, %v6035_v34  ;;  %11021 = vrcp.f32 %v14925_v33 }
 0x922   : > { %v11014_v41 = vpop.eup %11013  ;;  %v6037_v60 = vmul.f32 %v11012_v25, %v14792_v19  ;;  %11023 = vrcp.f32 %v14928_v42  ;;  %10807 = vmatprep.subr.mxu0 %v15052_v39 }
 0x923   : > { %v6034_v54 = vmul.f32 %v11014_v41, %v14782_v22  ;;  %11025 = vrcp.f32 %v14930_v7  ;;  %v15059_v7 = vsub.f32 %v7993_v50, %v15052_v39  ;;  %10808 = vmatpush3.xpose.msra.mxu0 %v15052_v39 }
 0x924   : > { %6045 = vst.msk [vmem:[#allocation4 + $0x28] sm:$0xff] %vm1206_vm2, %v6037_v60  ;;  %11027 = vrcp.f32 %v14940_v45  ;;  %v8185_v60 = vsub.f32 %v15038_v53, %v15050_v6 }
 0x925   : > { %6042 = vst.msk [vmem:[#allocation4 + $0x10] sm:$0xff] %vm1206_vm2, %v6034_v54  ;;  %v243_v54 = vld [vmem:[%s15292_s3] sm:$0xff]  ;;  %11029 = vrcp.f32 %v14942_v26 }
 0x926   : > { %v11016_v0 = vpop.eup %11015  ;;  %11031 = vrcp.f32 %v14947_v56 }
 0x927   : > { %v11018_v12 = vpop.eup %11017  ;;  %v6036_v16 = vmul.f32 %v11016_v0, %v14798_v52  ;;  %11033 = vrcp.f32 %v14949_v57 }
 0x928   : > { %v6039_v38 = vmul.f32 %v11018_v12, %v14806_v11  ;;  %11035 = vrcp.f32 %v14954_v32 }
 0x929   : > { %6044 = vst.msk [vmem:[#allocation4 + $0x20] sm:$0xff] %vm1206_vm2, %v6036_v16 }
 0x92a   : > { %6047 = vst.msk [vmem:[#allocation4 + $0x38] sm:$0xff] %vm1206_vm2, %v6039_v38  ;;  %v7990_v38 = vsel %vm7964_vm3, %v243_v54, 0 }
 0x92d   : > { %v11020_v49 = vpop.eup %11019 }
 0x92e   : > { %v6038_v44 = vmul.f32 %v11020_v49, %v14812_v13 }
 0x930   : > { %6046 = vst.msk [vmem:[#allocation4 + $0x30] sm:$0xff] %vm1206_vm2, %v6038_v44  ;;  %vm6990_vm2 = vcmask 130112  }
 0x948   : > { %v10653_v22 = vpop.f32.mrf.mxu0 }
 0x94a   : > { %v7142_v19 = vpop.f32.mrf.mxu0 }
 0x94c   : > { %v10656_v59 = vpop.f32.mrf.mxu0 }
 0x94e   : > { %v14991_v58 = vpop.f32.mrf.mxu0 }
 0x951   : > { %v14993_v14 = vpop.f32.mrf.mxu0  ;;  %v10681_v29 = vpop.f32.mrf.mxu1 }
 0x952   : > { %v7330_v42 = vadd.f32 %v10681_v29, %v10653_v22  ;;  %v8186_v22 = vand.u32 4294901760, %v8185_v60  ;;  %v15074_v29 = vand.u32 4294901760, %v7990_v38 }
 0x953   : > { %v14995_v52 = vpop.f32.mrf.mxu0  ;;  %v7323_v11 = vpop.f32.mrf.mxu1 }
 0x954   : > { %v7324_v20 = vadd.f32 %v7323_v11, %v7142_v19  ;;  %v15072_v19 = vand.u32 4294901760, %v15059_v7  ;;  %10825 = vmatprep.subr.mxu1 %v8186_v22  ;;  %10809 = vmatprep.subr.mxu0 %v15074_v29 }
 0x955   : > { %10826 = vmatpush3.xpose.msra.mxu1 %v8186_v22  ;;  %10810 = vmatpush3.xpose.msra.mxu0 %v15074_v29 }
 0x956   : > { %v8192_v10 = vsub.f32 %v15059_v7, %v15072_v19  ;;  %10843 = vmatprep.subr.mxu0 %v14966_v51 }
 0x957   : > { %v14997_v2 = vpop.f32.mrf.mxu0 }
 0x958   : > { %v10684_v31 = vpop.f32.mrf.mxu1  ;;  %v8193_v61 = vand.u32 4294901760, %v8192_v10 }
 0x959   : > { %v14999_v18 = vpop.f32.mrf.mxu0  ;;  %v7342_v0 = vadd.f32 %v10684_v31, %v10656_v59 }
 0x95a   : > { %v15001_v3 = vpop.f32.mrf.mxu1  ;;  %10827 = vmatprep.subr.mxu1 %v8193_v61 }
 0x95b   : > { %v7336_v26 = vadd.f32 %v15001_v3, %v14991_v58  ;;  %10828 = vmatpush3.xpose.msra.mxu1 %v8193_v61 }
 0x95d   : > { %v10709_v13 = vpop.f32.mrf.mxu0 }
 0x95e   : > { %v15003_v35 = vpop.f32.mrf.mxu1  ;;  %v7461_v41 = vadd.f32 %v10709_v13, %v7330_v42 }
 0x95f   : > { %v7453_v30 = vpop.f32.mrf.mxu0  ;;  %v7354_v58 = vadd.f32 %v15003_v35, %v14993_v14  ;;  %v11022_v14 = vpop.eup %11021 }
 0x960   : > { %v15005_v62 = vpop.f32.mrf.mxu1  ;;  %v7454_v12 = vadd.f32 %v7453_v30, %v7324_v20  ;;  %v11024_v60 = vpop.eup %11023 }
 0x961   : > { %v7348_v35 = vadd.f32 %v15005_v62, %v14995_v52 }
 0x963   : > { %v15007_v63 = vpop.f32.mrf.mxu1 }
 0x964   : > { %v10712_v47 = vpop.f32.mrf.mxu0  ;;  %v7366_v32 = vadd.f32 %v15007_v63, %v14997_v2 }
 0x965   : > { %v15009_v37 = vpop.f32.mrf.mxu1  ;;  %v7475_v59 = vadd.f32 %v10712_v47, %v7342_v0 }
 0x966   : > { %v15011_v8 = vpop.f32.mrf.mxu0  ;;  %v7360_v2 = vadd.f32 %v15009_v37, %v14999_v18 }
 0x967   : > { %v7468_v56 = vadd.f32 %v15011_v8, %v7336_v26 }
 0x969   : > { %v10737_v5 = vpop.f32.mrf.mxu1 }
 0x96a   : > { %v15013_v36 = vpop.f32.mrf.mxu0  ;;  %v7592_v49 = vadd.f32 %v10737_v5, %v7461_v41 }
 0x96b   : > { %v7583_v43 = vpop.f32.mrf.mxu1  ;;  %v7489_v8 = vadd.f32 %v15013_v36, %v7354_v58 }
 0x96c   : > { %v15015_v48 = vpop.f32.mrf.mxu0  ;;  %v7584_v11 = vadd.f32 %v7583_v43, %v7454_v12 }
 0x96d   : > { %v7482_v52 = vadd.f32 %v15015_v48, %v7348_v35 }
 0x96f   : > { %v15017_v9 = vpop.f32.mrf.mxu0 }
 0x970   : > { %v15019_v21 = vpop.f32.mrf.mxu1  ;;  %v7503_v63 = vadd.f32 %v15017_v9, %v7366_v32 }
 0x971   : > { %v15021_v55 = vpop.f32.mrf.mxu0  ;;  %v7608_v3 = vadd.f32 %v15019_v21, %v7475_v59 }
 0x972   : > { %v15023_v17 = vpop.f32.mrf.mxu1  ;;  %v7496_v59 = vadd.f32 %v15021_v55, %v7360_v2 }
 0x973   : > { %v6969_v46 = vpop.permute.xlu1 %6968  ;;  %v7600_v21 = vadd.f32 %v15023_v17, %v7468_v56 }
 0x974   : > { %6992 = vst.msk [vmem:[#allocation4 + $0x8] sm:$0xff] %vm6990_vm2, %v6969_v46  ;;  %v15085_v46 = vsub.f32 %v7990_v38, %v15074_v29 }
 0x975   : > { %v6967_v23 = vpop.permute.xlu0 %6966  ;;  %v10765_v15 = vpop.f32.mrf.mxu0 }
 0x976   : > { %6991 = vst.msk [vmem:[#allocation4] sm:$0xff] %vm6990_vm2, %v6967_v23  ;;  %v15035_v27 = vpop.f32.mrf.mxu1  ;;  %v7741_v30 = vadd.f32 %v10765_v15, %v7592_v49  ;;  %v15096_v57 = vand.u32 4294901760, %v15085_v46 }
 0x977   : > { %v7734_v33 = vpop.f32.mrf.mxu0  ;;  %v7624_v62 = vadd.f32 %v15035_v27, %v7489_v8 }
 0x978   : > { %v15047_v40 = vpop.f32.mrf.mxu1  ;;  %v7735_v24 = vadd.f32 %v7734_v33, %v7584_v11  ;;  %v8199_v41 = vsub.f32 %v15085_v46, %v15096_v57 }
 0x979   : > { %v6973_v34 = vpop.permute.xlu0 %6972  ;;  %v10768_v25 = vpop.f32.mrf.mxu0  ;;  %v7616_v48 = vadd.f32 %v15047_v40, %v7482_v52 }
 0x97a   : > { %6994 = vst.msk [vmem:[#allocation4 + $0x18] sm:$0xff] %vm6990_vm2, %v6973_v34  ;;  %v7753_v42 = vadd.f32 %v10768_v25, %v7608_v3  ;;  %v8200_v12 = vand.u32 4294901760, %v8199_v41 }
 0x97b   : > { %v6971_v45 = vpop.permute.xlu1 %6970  ;;  %v15066_v16 = vpop.f32.mrf.mxu1 }
 0x97c   : > { %6993 = vst.msk [vmem:[#allocation4 + $0x10] sm:$0xff] %vm6990_vm2, %v6971_v45  ;;  %v7746_v44 = vpop.f32.mrf.mxu0  ;;  %v11026_v45 = vpop.eup %11025  ;;  %10829 = vmatprep.subr.mxu1 %v8200_v12  ;;  %v7640_v11 = vadd.f32 %v15066_v16, %v7503_v63 }
 0x97d   : > { %v6977_v31 = vpop.permute.xlu0 %6976  ;;  %v15078_v13 = vpop.f32.mrf.mxu1  ;;  %v7747_v25 = vadd.f32 %v7746_v44, %v7600_v21  ;;  %10830 = vmatpush3.xpose.msra.mxu1 %v8200_v12 }
 0x97e   : > { %6996 = vst.msk [vmem:[#allocation4 + $0x28] sm:$0xff] %vm6990_vm2, %v6977_v31  ;;  %v10771_v5 = vpop.f32.mrf.mxu0  ;;  %v11028_v26 = vpop.eup %11027  ;;  %10863 = vmatprep.subr.mxu1 %v14963_v28  ;;  %v7632_v10 = vadd.f32 %v15078_v13, %v7496_v59 }
 0x97f   : > { %v6975_v47 = vpop.permute.xlu1 %6974  ;;  %v10793_v43 = vpop.f32.mrf.mxu1  ;;  %v7765_v49 = vadd.f32 %v10771_v5, %v7624_v62 }
 0x980   : > { %6995 = vst.msk [vmem:[#allocation4 + $0x20] sm:$0xff] %vm6990_vm2, %v6975_v47  ;;  %v7862_v23 = vadd.f32 %v10793_v43, %v7741_v30  ;;  %v7758_v15 = vpop.f32.mrf.mxu0  ;;  %v11030_v18 = vpop.eup %11029 }
 0x981   : > { %v6981_v33 = vpop.permute.xlu0 %6980  ;;  %v7855_v50 = vpop.f32.mrf.mxu1  ;;  %v7759_v37 = vadd.f32 %v7758_v15, %v7616_v48 }
 0x982   : > { %v7902_v20 = vmul.f32 %v11022_v14, %v7862_v23  ;;  %6998 = vst.msk [vmem:[#allocation4 + $0x38] sm:$0xff] %vm6990_vm2, %v6981_v33  ;;  %v7856_v34 = vadd.f32 %v7855_v50, %v7735_v24  ;;  %v10774_v27 = vpop.f32.mrf.mxu0  ;;  %v11032_v55 = vpop.eup %11031 }
 0x983   : > { %v6979_v36 = vpop.permute.xlu1 %6978  ;;  %v10796_v17 = vpop.f32.mrf.mxu1  ;;  %v7777_v58 = vadd.f32 %v10774_v27, %v7640_v11 }
 0x984   : > { %6997 = vst.msk [vmem:[#allocation4 + $0x30] sm:$0xff] %vm6990_vm2, %v6979_v36  ;;  %v7901_v54 = vmul.f32 %v11024_v60, %v7856_v34  ;;  %v7874_v0 = vadd.f32 %v10796_v17, %v7753_v42  ;;  %7919 = vrot.lane.b32.xlu0 %v7902_v20, %s11079_s14  ;;  %v7770_v40 = vpop.f32.mrf.mxu0  ;;  %v11034_v47 = vpop.eup %11033 }
 0x985   : > { %v7867_v38 = vpop.f32.mrf.mxu1  ;;  %v7771_v43 = vadd.f32 %v7770_v40, %v7632_v10  ;;  %v11036_v61 = vpop.eup %11035 }
 0x986   : > { %v7904_v44 = vmul.f32 %v11026_v45, %v7874_v0  ;;  %v7868_v22 = vadd.f32 %v7867_v38, %v7747_v25  ;;  %7917 = vrot.lane.b32.xlu1 %v7901_v54, %s11079_s14 }
 0x987   : > { %v10799_v31 = vpop.f32.mrf.mxu1 }
 0x988   : > { %v7903_v9 = vmul.f32 %v11028_v26, %v7868_v22  ;;  %v7886_v30 = vadd.f32 %v10799_v31, %v7765_v49  ;;  %7923 = vrot.lane.b32.xlu0 %v7904_v44, %s11079_s14 }
 0x989   : > { %v7879_v5 = vpop.f32.mrf.mxu1 }
 0x98a   : > { %v7906_v56 = vmul.f32 %v11030_v18, %v7886_v30  ;;  %v7880_v3 = vadd.f32 %v7879_v5, %v7759_v37  ;;  %7921 = vrot.lane.b32.xlu1 %v7903_v9, %s11079_s14 }
 0x98b   : > { %v10802_v16 = vpop.f32.mrf.mxu1 }
 0x98c   : > { %v7905_v24 = vmul.f32 %v11032_v55, %v7880_v3  ;;  %v7898_v23 = vadd.f32 %v10802_v16, %v7777_v58  ;;  %7927 = vrot.lane.b32.xlu0 %v7906_v56, %s11079_s14 }
 0x98d   : > { %v7891_v15 = vpop.f32.mrf.mxu1 }
 0x98e   : > { %v7908_v14 = vmul.f32 %v11034_v47, %v7898_v23  ;;  %v7892_v35 = vadd.f32 %v7891_v15, %v7771_v43  ;;  %7925 = vrot.lane.b32.xlu1 %v7905_v24, %s11079_s14 }
 0x990   : > { %v7907_v13 = vmul.f32 %v11036_v61, %v7892_v35  ;;  %7931 = vrot.lane.b32.xlu0 %v7908_v14, %s11079_s14 }
 0x992   : > { %7929 = vrot.lane.b32.xlu1 %v7907_v13, %s11079_s14 }
 0x9f6   : > { %v7920_v8 = vpop.permute.xlu0 %7919 }
 0x9f7   : > { %7943 = vst.msk [vmem:[#allocation4 + $0x8] sm:$0xff] %vm7941_vm14, %v7920_v8 }
 0x9f8   : > { %v7918_v21 = vpop.permute.xlu1 %7917 }
 0x9f9   : > { %7942 = vst.msk [vmem:[#allocation4] sm:$0xff] %vm7941_vm14, %v7918_v21 }
 0x9fa   : > { %v7924_v33 = vpop.permute.xlu0 %7923 }
 0x9fb   : > { %7945 = vst.msk [vmem:[#allocation4 + $0x18] sm:$0xff] %vm7941_vm14, %v7924_v33 }
 0x9fc   : > { %v7922_v50 = vpop.permute.xlu1 %7921 }
 0x9fd   : > { %7944 = vst.msk [vmem:[#allocation4 + $0x10] sm:$0xff] %vm7941_vm14, %v7922_v50 }
 0x9fe   : > { %v7928_v42 = vpop.permute.xlu0 %7927  ;;  %v7951_v20 = vld [vmem:[#allocation4 + $0x8] sm:$0xff] }
 0x9ff   : > { %7947 = vst.msk [vmem:[#allocation4 + $0x28] sm:$0xff] %vm7941_vm14, %v7928_v42  ;;  %v7969_v34 = vsel %vm7964_vm3, %v7951_v20, 0 }
 0xa00   : > { %v7926_v41 = vpop.permute.xlu1 %7925  ;;  %v7950_v60 = vld [vmem:[#allocation4] sm:$0xff]  ;;  %v15134_v32 = vand.u32 4294901760, %v7969_v34 }
 0xa01   : > { %7946 = vst.msk [vmem:[#allocation4 + $0x20] sm:$0xff] %vm7941_vm14, %v7926_v41  ;;  %v7966_v52 = vsel %vm7964_vm3, %v7950_v60, 0 }
 0xa02   : > { %v7932_v62 = vpop.permute.xlu0 %7931  ;;  %v15138_v36 = vand.u32 4294901760, %v7966_v52  ;;  %v15141_v17 = vsub.f32 %v7969_v34, %v15134_v32  ;;  %v7953_v25 = vld [vmem:[#allocation4 + $0x18] sm:$0xff] }
 0xa03   : > { %7949 = vst.msk [vmem:[#allocation4 + $0x38] sm:$0xff] %vm7941_vm14, %v7932_v62  ;;  %v7975_v54 = vsel %vm7964_vm3, %v7953_v25, 0 }
 0xa04   : > { %10831 = vmatprep.mubr.f32.mxu1 %v15138_v36  ;;  %v7930_v0 = vpop.permute.xlu1 %7929  ;;  %v7952_v12 = vld [vmem:[#allocation4 + $0x10] sm:$0xff]  ;;  %v15146_v45 = vand.u32 4294901760, %v7975_v54  ;;  %v15149_v2 = vsub.f32 %v7966_v52, %v15138_v36  ;;  %v8082_v63 = vand.u32 4294901760, %v15141_v17 }
 0xa05   : > { %7948 = vst.msk [vmem:[#allocation4 + $0x30] sm:$0xff] %vm7941_vm14, %v7930_v0  ;;  %10832 = vmatmul.mubr.f32.vlgmr.msra.gmra.mxu1 %v15134_v32  ;;  %v7972_v48 = vsel %vm7964_vm3, %v7952_v12, 0 }
 0xa06   : > { %10864 = vmatpush3.xpose.msra.mxu1 %v14963_v28  ;;  %v15156_v27 = vand.u32 4294901760, %v7972_v48  ;;  %v15159_v38 = vsub.f32 %v7975_v54, %v15146_v45  ;;  %v8072_v49 = vand.u32 4294901760, %v15149_v2  ;;  %v7955_v44 = vld [vmem:[#allocation4 + $0x28] sm:$0xff]  ;;  %v8083_v22 = vsub.f32 %v15141_v17, %v8082_v63 }
 0xa07   : > { %10865 = vmatprep.subr.mxu1 %v15031_v4  ;;  %v7981_v26 = vsel %vm7964_vm3, %v7955_v44, 0 }
 0xa08   : > { %10834 = vmatprep.mubr.f32.mxu1 %v15156_v27  ;;  %v8073_v59 = vsub.f32 %v15149_v2, %v8072_v49  ;;  %v7954_v11 = vld [vmem:[#allocation4 + $0x20] sm:$0xff]  ;;  %v15169_v31 = vand.u32 4294901760, %v7981_v26  ;;  %v15172_v18 = vsub.f32 %v7972_v48, %v15156_v27  ;;  %v8102_v9 = vand.u32 4294901760, %v15159_v38 }
 0xa09   : > { %10835 = vmatmul.mubr.f32.gmra.mxu1 %v15146_v45  ;;  %v7978_v37 = vsel %vm7964_vm3, %v7954_v11, 0  ;;  %v8084_v56 = vand.u32 4294901760, %v8083_v22 }
 0xa0a   : > { %10866 = vmatpush3.xpose.msra.mxu1 %v15031_v4  ;;  %v8074_v30 = vand.u32 4294901760, %v8073_v59  ;;  %v15178_v40 = vand.u32 4294901760, %v7978_v37  ;;  %v15181_v5 = vsub.f32 %v7981_v26, %v15169_v31  ;;  %v8092_v10 = vand.u32 4294901760, %v15172_v18  ;;  %v7957_v58 = vld [vmem:[#allocation4 + $0x38] sm:$0xff] }
 0xa0b   : > { %10867 = vmatprep.subr.mxu1 %v15052_v39  ;;  %v8103_v3 = vsub.f32 %v15159_v38, %v8102_v9  ;;  %v7987_v55 = vsel %vm7964_vm3, %v7957_v58, 0 }
 0xa0c   : > { %10811 = vmatprep.mubr.f32.mxu0 %v8074_v30  ;;  %10837 = vmatprep.mubr.f32.mxu1 %v15178_v40  ;;  %v8093_v16 = vsub.f32 %v15172_v18, %v8092_v10  ;;  %v7956_v47 = vld [vmem:[#allocation4 + $0x30] sm:$0xff]  ;;  %v15189_v43 = vand.u32 4294901760, %v7987_v55  ;;  %v8111_v24 = vsub.f32 %v7978_v37, %v15178_v40  ;;  %v8122_v23 = vand.u32 4294901760, %v15181_v5 }
 0xa0d   : > { %10812 = vmatmul.mubr.f32.vlgmr.msra.gmra.mxu0 %v8084_v56  ;;  %10838 = vmatmul.mubr.f32.gmra.mxu1 %v15169_v31  ;;  %v7984_v15 = vsel %vm7964_vm3, %v7956_v47, 0  ;;  %v8104_v8 = vand.u32 4294901760, %v8103_v3 }
 0xa0e   : > { %10844 = vmatpush3.xpose.msra.mxu0 %v14966_v51  ;;  %10868 = vmatpush3.xpose.msra.mxu1 %v15052_v39  ;;  %v8094_v61 = vand.u32 4294901760, %v8093_v16  ;;  %v15197_v14 = vand.u32 4294901760, %v7984_v15  ;;  %v8141_v35 = vsub.f32 %v7987_v55, %v15189_v43  ;;  %v8112_v13 = vand.u32 4294901760, %v8111_v24 }
 0xa0f   : > { %10845 = vmatprep.subr.mxu0 %v15038_v53  ;;  %10869 = vmatprep.subr.mxu1 %v15074_v29  ;;  %v8123_v21 = vsub.f32 %v15181_v5, %v8122_v23 }
 0xa10   : > { %10814 = vmatprep.mubr.f32.mxu0 %v8094_v61  ;;  %10840 = vmatprep.mubr.f32.mxu1 %v15197_v14  ;;  %v8113_v33 = vsub.f32 %v8111_v24, %v8112_v13  ;;  %v8131_v51 = vsub.f32 %v7984_v15, %v15197_v14  ;;  %v8142_v50 = vand.u32 4294901760, %v8141_v35 }
 0xa11   : > { %10815 = vmatmul.mubr.f32.gmra.mxu0 %v8104_v8  ;;  %10841 = vmatmul.mubr.f32.gmra.mxu1 %v15189_v43  ;;  %v8124_v34 = vand.u32 4294901760, %v8123_v21 }
 0xa12   : > { %10846 = vmatpush3.xpose.msra.mxu0 %v15038_v53  ;;  %10870 = vmatpush3.xpose.msra.mxu1 %v15074_v29  ;;  %v8114_v42 = vand.u32 4294901760, %v8113_v33  ;;  %v8132_v20 = vand.u32 4294901760, %v8131_v51  ;;  %v8143_v41 = vsub.f32 %v8141_v35, %v8142_v50 }
 0xa13   : > { %10871 = vmatprep.mubr.f32.mxu1 %v8072_v49  ;;  %10847 = vmatprep.subr.mxu0 %v15059_v7  ;;  %v8860_v49 = vld [vmem:[%s15293_s4] ss:$0 sm:$0xff] }
 0xa14   : > { %10817 = vmatprep.mubr.f32.mxu0 %v8114_v42  ;;  %10903 = vmatprep.subr.mxu1 %v14963_v28  ;;  %v8133_v60 = vsub.f32 %v8131_v51, %v8132_v20  ;;  %v8144_v52 = vand.u32 4294901760, %v8143_v41 }
 0xa15   : > { %10818 = vmatmul.mubr.f32.gmra.mxu0 %v8124_v34  ;;  %10872 = vmatmul.mubr.f32.vlgmr.msra.gmra.mxu1 %v8082_v63 }
 0xa16   : > { %10848 = vmatpush3.xpose.msra.mxu0 %v15059_v7  ;;  %10874 = vmatprep.mubr.f32.mxu1 %v8092_v10  ;;  %v8134_v53 = vand.u32 4294901760, %v8133_v60 }
 0xa17   : > { %10904 = vmatpush3.xpose.msra.mxu1 %v14963_v28  ;;  %10849 = vmatprep.subr.mxu0 %v15085_v46 }
 0xa18   : > { %10820 = vmatprep.mubr.f32.mxu0 %v8134_v53  ;;  %10905 = vmatprep.subr.mxu1 %v15031_v4 }
 0xa19   : > { %10821 = vmatmul.mubr.f32.gmra.mxu0 %v8144_v52  ;;  %10875 = vmatmul.mubr.f32.gmra.mxu1 %v8102_v9 }
 0xa1a   : > { %10850 = vmatpush3.xpose.msra.mxu0 %v15085_v46  ;;  %10851 = vmatprep.mubr.f32.mxu0 %v15149_v2 }
 0xa1b   : > { %10877 = vmatprep.mubr.f32.mxu1 %v8112_v13  ;;  %10906 = vmatpush3.xpose.msra.mxu1 %v15031_v4 }
 0xa1c   : > { %10883 = vmatprep.subr.mxu0 %v14971_v1  ;;  %10907 = vmatprep.subr.mxu1 %v15052_v39 }
 0xa1d   : > { %10852 = vmatmul.mubr.f32.vlgmr.msra.gmra.mxu0 %v15141_v17  ;;  %10878 = vmatmul.mubr.f32.gmra.mxu1 %v8122_v23 }
 0xa1e   : > { %10854 = vmatprep.mubr.f32.mxu0 %v15172_v18  ;;  %10880 = vmatprep.mubr.f32.mxu1 %v8132_v20 }
 0xa1f   : > { %10884 = vmatpush3.xpose.msra.mxu0 %v14971_v1  ;;  %10908 = vmatpush3.xpose.msra.mxu1 %v15052_v39 }
 0xa20   : > { %10885 = vmatprep.subr.mxu0 %v15050_v6  ;;  %10909 = vmatprep.subr.mxu1 %v15074_v29 }
 0xa21   : > { %10855 = vmatmul.mubr.f32.gmra.mxu0 %v15159_v38  ;;  %10881 = vmatmul.mubr.f32.gmra.mxu1 %v8142_v50 }
 0xa22   : > { %10857 = vmatprep.mubr.f32.mxu0 %v8111_v24  ;;  %10911 = vmatprep.mubr.f32.mxu1 %v15138_v36 }
 0xa23   : > { %10886 = vmatpush3.xpose.msra.mxu0 %v15050_v6  ;;  %10910 = vmatpush3.xpose.msra.mxu1 %v15074_v29 }
 0xa24   : > { %10887 = vmatprep.subr.mxu0 %v15072_v19 }
 0xa25   : > { %10858 = vmatmul.mubr.f32.gmra.mxu0 %v15181_v5 }
 0xa26   : > { %10912 = vmatmul.mubr.f32.vlgmr.msra.gmra.mxu1 %v15134_v32  ;;  %10860 = vmatprep.mubr.f32.mxu0 %v8131_v51 }
 0xa27   : > { %10888 = vmatpush3.xpose.msra.mxu0 %v15072_v19  ;;  %10914 = vmatprep.mubr.f32.mxu1 %v15156_v27 }
 0xa28   : > { %10889 = vmatprep.subr.mxu0 %v15096_v57 }
 0xa29   : > { %10861 = vmatmul.mubr.f32.gmra.mxu0 %v8141_v35 }
 0xa2a   : > { %10915 = vmatmul.mubr.f32.gmra.mxu1 %v15146_v45  ;;  %10891 = vmatprep.mubr.f32.mxu0 %v15138_v36 }
 0xa2b   : > { %10890 = vmatpush3.xpose.msra.mxu0 %v15096_v57  ;;  %10917 = vmatprep.mubr.f32.mxu1 %v15178_v40 }
 0xa2e   : > { %10892 = vmatmul.mubr.f32.vlgmr.msra.gmra.mxu0 %v15134_v32  ;;  %10918 = vmatmul.mubr.f32.gmra.mxu1 %v15169_v31 }
 0xa2f   : > { %10894 = vmatprep.mubr.f32.mxu0 %v15156_v27  ;;  %10920 = vmatprep.mubr.f32.mxu1 %v15197_v14 }
 0xa32   : > { %10895 = vmatmul.mubr.f32.gmra.mxu0 %v15146_v45  ;;  %10921 = vmatmul.mubr.f32.gmra.mxu1 %v15189_v43 }
 0xa33   : > { %10897 = vmatprep.mubr.f32.mxu0 %v15178_v40 }
 0xa36   : > { %10898 = vmatmul.mubr.f32.gmra.mxu0 %v15169_v31 }
 0xa37   : > { %10900 = vmatprep.mubr.f32.mxu0 %v15197_v14 }
 0xa3a   : > { %10901 = vmatmul.mubr.f32.gmra.mxu0 %v15189_v43 }
 0xac5   : > { %v10833_v28 = vpop.f32.mrf.mxu1 }
 0xac7   : > { %v8237_v1 = vpop.f32.mrf.mxu1 }
 0xac9   : > { %v10836_v4 = vpop.f32.mrf.mxu1 }
 0xacb   : > { %v8249_v6 = vpop.f32.mrf.mxu1 }
 0xacd   : > { %v10813_v39 = vpop.f32.mrf.mxu0  ;;  %v10839_v7 = vpop.f32.mrf.mxu1 }
 0xace   : > { %v8087_v26 = vadd.f32 %v10813_v39, %v8860_v49 }
 0xacf   : > { %v8076_v19 = vpop.f32.mrf.mxu0  ;;  %v8261_v29 = vpop.f32.mrf.mxu1 }
 0xad0   : > { %v8077_v31 = vadd.f32 %v8860_v49, %v8076_v19  ;;  %v8244_v30 = vadd.f32 %v10833_v28, %v8087_v26 }
 0xad1   : > { %v10816_v46 = vpop.f32.mrf.mxu0  ;;  %v10842_v57 = vpop.f32.mrf.mxu1 }
 0xad2   : > { %v8107_v9 = vadd.f32 %v10816_v46, %v8860_v49  ;;  %v8238_v56 = vadd.f32 %v8237_v1, %v8077_v31 }
 0xad3   : > { %v8096_v32 = vpop.f32.mrf.mxu0  ;;  %v8273_v62 = vpop.f32.mrf.mxu1 }
 0xad4   : > { %v8097_v10 = vadd.f32 %v8860_v49, %v8096_v32  ;;  %v8256_v43 = vadd.f32 %v10836_v4, %v8107_v9 }
 0xad5   : > { %v10819_v36 = vpop.f32.mrf.mxu0  ;;  %v10873_v17 = vpop.f32.mrf.mxu1 }
 0xad6   : > { %v8127_v16 = vadd.f32 %v10819_v36, %v8860_v49  ;;  %v8250_v61 = vadd.f32 %v8249_v6, %v8097_v10 }
 0xad7   : > { %v8116_v25 = vpop.f32.mrf.mxu0  ;;  %v8485_v54 = vpop.f32.mrf.mxu1 }
 0xad8   : > { %v8117_v23 = vadd.f32 %v8860_v49, %v8116_v25  ;;  %v8268_v33 = vadd.f32 %v10839_v7, %v8127_v16 }
 0xad9   : > { %v10822_v0 = vpop.f32.mrf.mxu0  ;;  %v10876_v12 = vpop.f32.mrf.mxu1 }
 0xada   : > { %v8147_v35 = vadd.f32 %v10822_v0, %v8860_v49  ;;  %v8262_v20 = vadd.f32 %v8261_v29, %v8117_v23 }
 0xadb   : > { %v8136_v45 = vpop.f32.mrf.mxu0  ;;  %v8501_v2 = vpop.f32.mrf.mxu1 }
 0xadc   : > { %v8137_v42 = vadd.f32 %v8860_v49, %v8136_v45  ;;  %v8280_v28 = vadd.f32 %v10842_v57, %v8147_v35 }
 0xadd   : > { %v10853_v63 = vpop.f32.mrf.mxu0  ;;  %v10879_v48 = vpop.f32.mrf.mxu1 }
 0xade   : > { %v8367_v58 = vadd.f32 %v10853_v63, %v8244_v30  ;;  %v8274_v29 = vadd.f32 %v8273_v62, %v8137_v42 }
 0xadf   : > { %v8359_v27 = vpop.f32.mrf.mxu0  ;;  %v15251_v38 = vpop.f32.mrf.mxu1 }
 0xae0   : > { %v8360_v47 = vadd.f32 %v8359_v27, %v8238_v56  ;;  %v8494_v14 = vadd.f32 %v10873_v17, %v8367_v58 }
 0xae1   : > { %v10856_v44 = vpop.f32.mrf.mxu0  ;;  %v15256_v22 = vpop.f32.mrf.mxu1 }
 0xae2   : > { %v8381_v15 = vadd.f32 %v10856_v44, %v8256_v43  ;;  %v8486_v50 = vadd.f32 %v8485_v54, %v8360_v47 }
 0xae3   : > { %v8373_v59 = vpop.f32.mrf.mxu0  ;;  %v15258_v11 = vpop.f32.mrf.mxu1 }
 0xae4   : > { %v8374_v21 = vadd.f32 %v8373_v59, %v8250_v61  ;;  %v8510_v52 = vadd.f32 %v10876_v12, %v8381_v15 }
 0xae5   : > { %v10859_v18 = vpop.f32.mrf.mxu0 }
 0xae6   : > { %v10913_v37 = vpop.f32.mrf.mxu1  ;;  %v8395_v41 = vadd.f32 %v10859_v18, %v8268_v33  ;;  %v8502_v19 = vadd.f32 %v8501_v2, %v8374_v21 }
 0xae7   : > { %v8387_v40 = vpop.f32.mrf.mxu0 }
 0xae8   : > { %v8741_v5 = vpop.f32.mrf.mxu1  ;;  %v8388_v6 = vadd.f32 %v8387_v40, %v8262_v20  ;;  %v8526_v25 = vadd.f32 %v10879_v48, %v8395_v41 }
 0xae9   : > { %v10862_v3 = vpop.f32.mrf.mxu0 }
 0xaea   : > { %v10916_v55 = vpop.f32.mrf.mxu1  ;;  %v8409_v32 = vadd.f32 %v10862_v3, %v8280_v28  ;;  %v8518_v2 = vadd.f32 %v15251_v38, %v8388_v6 }
 0xaeb   : > { %v8401_v24 = vpop.f32.mrf.mxu0 }
 0xaec   : > { %v8753_v13 = vpop.f32.mrf.mxu1  ;;  %v8402_v0 = vadd.f32 %v8401_v24, %v8274_v29  ;;  %v8542_v49 = vadd.f32 %v15256_v22, %v8409_v32 }
 0xaee   : > { %v10893_v8 = vpop.f32.mrf.mxu0  ;;  %v10919_v1 = vpop.f32.mrf.mxu1  ;;  %v8534_v31 = vadd.f32 %v15258_v11, %v8402_v0 }
 0xaef   : > { %v8631_v51 = vadd.f32 %v10893_v8, %v8494_v14 }
 0xaf0   : > { %v8624_v34 = vpop.f32.mrf.mxu0  ;;  %v8765_v57 = vpop.f32.mrf.mxu1 }
 0xaf1   : > { %v8748_v60 = vadd.f32 %v10913_v37, %v8631_v51  ;;  %v8625_v53 = vadd.f32 %v8624_v34, %v8486_v50 }
 0xaf2   : > { %v10896_v4 = vpop.f32.mrf.mxu0  ;;  %v10922_v48 = vpop.f32.mrf.mxu1 }
 0xaf3   : > { %8788 = vst.msk [vmem:[%s15265_s21 + $0x8] sm:$0xff] %vm254_vm0, %v8748_v60  ;;  %v8742_v39 = vadd.f32 %v8741_v5, %v8625_v53  ;;  %v8643_v7 = vadd.f32 %v10896_v4, %v8510_v52 }
 0xaf4   : > { %v8636_v46 = vpop.f32.mrf.mxu0  ;;  %v8777_v9 = vpop.f32.mrf.mxu1 }
 0xaf5   : > { %8787 = vst.msk [vmem:[%s15265_s21] sm:$0xff] %vm254_vm0, %v8742_v39  ;;  %v8760_v36 = vadd.f32 %v10916_v55, %v8643_v7  ;;  %v8637_v17 = vadd.f32 %v8636_v46, %v8502_v19 }
 0xaf6   : > { %v10899_v54 = vpop.f32.mrf.mxu0 }
 0xaf7   : > { %8790 = vst.msk [vmem:[%s15265_s21 + $0x18] sm:$0xff] %vm254_vm0, %v8760_v36  ;;  %v8754_v12 = vadd.f32 %v8753_v13, %v8637_v17  ;;  %v8655_v45 = vadd.f32 %v10899_v54, %v8526_v25 }
 0xaf8   : > { %v8648_v63 = vpop.f32.mrf.mxu0 }
 0xaf9   : > { %8789 = vst.msk [vmem:[%s15265_s21 + $0x10] sm:$0xff] %vm254_vm0, %v8754_v12  ;;  %v8772_v62 = vadd.f32 %v10919_v1, %v8655_v45  ;;  %v8649_v27 = vadd.f32 %v8648_v63, %v8518_v2 }
 0xafa   : > { %v10902_v44 = vpop.f32.mrf.mxu0 }
 0xafb   : > { %8792 = vst.msk [vmem:[%s15265_s21 + $0x28] sm:$0xff] %vm254_vm0, %v8772_v62  ;;  %v8766_v26 = vadd.f32 %v8765_v57, %v8649_v27  ;;  %v8667_v59 = vadd.f32 %v10902_v44, %v8542_v49 }
 0xafc   : > { %v8660_v18 = vpop.f32.mrf.mxu0 }
 0xafd   : > { %8791 = vst.msk [vmem:[%s15265_s21 + $0x20] sm:$0xff] %vm254_vm0, %v8766_v26  ;;  %v8784_v38 = vadd.f32 %v10922_v48, %v8667_v59  ;;  %v8661_v37 = vadd.f32 %v8660_v18, %v8534_v31 }
 0xaff   : > { %8794 = vst.msk [vmem:[%s15265_s21 + $0x38] sm:$0xff] %vm254_vm0, %v8784_v38  ;;  %v8778_v30 = vadd.f32 %v8777_v9, %v8661_v37 }
 0xb01   : > { %8793 = vst.msk [vmem:[%s15265_s21 + $0x30] sm:$0xff] %vm254_vm0, %v8778_v30 }
 0xb02 PF: > { %s15_s18 = sadd.s32 1, %s11068_s18  }
 0xb03   : > { %p12_p4 = scmp.ge.s32.totalorder %s15_s18, 4  }
 0xb05   :  { %14 = sbr.rel (!%p12_p4) target bundleno = 1 (0x1), region = 70 }

</bundles_post_ra>
